<compile_context>
chip_gen: v7x
topology: tpu7x:2x2x1
jax: 0.10.0
libtpu: 0.0.40
codegen_flags: <defaults>
</compile_context>

<pallas_src>
import functools

import jax
import jax.numpy as jnp
from jax import lax
from jax.experimental import pallas as pl
from jax.experimental.pallas import tpu as pltpu


# ----------------------------------------------------------------------------
# Wrapper-side weight re-packing (tiny, traced once under jit)
# ----------------------------------------------------------------------------
def _band_weights(w_hwio, W):
    """(3,3,Cin,Cout) HWIO conv weights -> 3 band matrices (3, W*Cin, W*Cout).

    B_dy[w_in*Cin + ci, w_out*Cout + co] = w[dy, dx, ci, co] with
    w_in = w_out + dx - 1, and taps falling outside [0, W) dropped (SAME pad).
    """
    KH, KW, Cin, Cout = w_hwio.shape
    bands = []
    for dy in range(KH):
        B = jnp.zeros((W, Cin, W, Cout), w_hwio.dtype)
        for dx in range(KW):
            sel = jnp.eye(W, k=1 - dx, dtype=w_hwio.dtype)      # (w_in, w_out)
            B = B + sel[:, None, :, None] * w_hwio[dy, dx][None, :, None, :]
        bands.append(B.reshape(W * Cin, W * Cout))
    return jnp.stack(bands)                                      # (3, WCin, WCout)


def _channel_mix_matrix(W, Cout, dtype=jnp.float32):
    """(W*Cout, W*Cout) 0/1 matrix, P[i, j] = 1 iff channel(i) == channel(j)."""
    return jnp.tile(jnp.eye(Cout, dtype=dtype), (W, W))


# ----------------------------------------------------------------------------
# Fused two-layer kernel: (conv3x3 same + bias + BN(batch stats) + ReLU) x 2
# Whole batch per grid step; everything lane-packed as (rows, W*C).
# ----------------------------------------------------------------------------
def _convblock_kernel(inv_cnt,                       # static (bound via partial)
                      x_ref, kb1_ref, kb2_ref, p_ref,
                      b1_ref, g1_ref, be1_ref, b2_ref, g2_ref, be2_ref,
                      o_ref, xp1_ref, xp2_ref):
    # x_ref  : (N, H, W*Cin)            packed input rows
    # kb*_ref: (3, W*Cin_l, W*Cout)     band weight matrices (matmul dtype)
    # p_ref  : (W*Cout, W*Cout)         channel-mixing 0/1 matrix (f32)
    # b*/g*/be*_ref : (1, W*Cout)       bias/gamma/beta pre-broadcast per column
    # o_ref  : (N, H, W*Cout)
    # xp*_ref: (N, H+2, W*Cin_l)        H-padded VMEM scratch (matmul dtype)
    N, H, _ = x_ref.shape
    Lout = o_ref.shape[-1]
    M = N * H
    Pm = p_ref[...]                                   # (Lout, Lout) f32

    def fused_layer(x_rows, xp_ref, kb_ref, bias_p, gamma_p, beta_p):
        Lp = xp_ref.shape[-1]
        # --- SAME padding in H only (W handled by the band weights): zero the
        #     1-row halo, then one lane-aligned interior store. ---
        zrow = jnp.zeros((N, 1, Lp), xp_ref.dtype)
        xp_ref[:, 0:1, :] = zrow
        xp_ref[:, H + 1:H + 2, :] = zrow
        xp_ref[:, 1:H + 1, :] = x_rows.astype(xp_ref.dtype)

        # --- conv: 3 lane-dense band matmuls, f32 accumulation ---
        acc = jnp.zeros((M, Lout), jnp.float32)
        for dy in range(3):                            # static unroll
            rows = xp_ref[:, dy:dy + H, :].reshape(M, Lp)
            acc = acc + jnp.dot(rows, kb_ref[dy],
                                preferred_element_type=jnp.float32)
        acc = acc + bias_p                             # conv bias (broadcast)

        # --- BatchNorm (exact batch stats, f32, two-pass variance) + ReLU ---
        # Per-channel sums via the channel-mixing matmul (MXU) + sublane sum;
        # results are already replicated per packed column -> no reshapes.
        mean_p = jnp.sum(jnp.dot(acc, Pm, preferred_element_type=jnp.float32),
                         axis=0, keepdims=True) * inv_cnt          # (1, Lout)
        centered = acc - mean_p                        # consumed only by var
        var_p = jnp.sum(jnp.dot(centered * centered, Pm,
                                preferred_element_type=jnp.float32),
                        axis=0, keepdims=True) * inv_cnt           # (1, Lout)
        scale_p = gamma_p * lax.rsqrt(var_p + 1e-5)
        shift_p = beta_p - mean_p * scale_p
        return jnp.maximum(acc * scale_p + shift_p, 0.0)           # (M, Lout)

    y1 = fused_layer(x_ref[...], xp1_ref, kb1_ref,
                     b1_ref[...], g1_ref[...], be1_ref[...])
    y2 = fused_layer(y1.reshape(N, H, Lout), xp2_ref, kb2_ref,
                     b2_ref[...], g2_ref[...], be2_ref[...])

    o_ref[...] = y2.reshape(N, H, Lout).astype(o_ref.dtype)        # lane-dense


# ----------------------------------------------------------------------------
# ConvBlock forward (NCHW in/out to match the torch module)
# ----------------------------------------------------------------------------
@functools.partial(jax.jit, static_argnames=("matmul_dtype",))
def conv_block_forward(x_nchw, params, matmul_dtype=jnp.float32):
    N, Cin, H, W = x_nchw.shape
    Cout = params["w1"].shape[-1]
    Lin, Lout = W * Cin, W * Cout

    # NCHW -> NHWC transpose is left to XLA at the torch-interface boundary
    # (keep NHWC end-to-end in a larger model); the packing reshape is free.
    x_p = jnp.transpose(x_nchw, (0, 2, 3, 1)).reshape(N, H, Lin)

    kb1 = _band_weights(params["w1"], W).astype(matmul_dtype)
    kb2 = _band_weights(params["w2"], W).astype(matmul_dtype)
    Pmix = _channel_mix_matrix(W, Cout)
    colbc = lambda v: jnp.tile(v.astype(jnp.float32), W).reshape(1, Lout)

    out_p = pl.pallas_call(
        functools.partial(_convblock_kernel, 1.0 / float(N * H * W)),
        out_shape=jax.ShapeDtypeStruct((N, H, Lout), jnp.float32),
        grid_spec=pltpu.PrefetchScalarGridSpec(
            num_scalar_prefetch=0,
            grid=(1,),
            in_specs=[
                pl.BlockSpec((N, H, Lin), lambda i: (0, 0, 0)),
                pl.BlockSpec((3, Lin, Lout), lambda i: (0, 0, 0)),
                pl.BlockSpec((3, Lout, Lout), lambda i: (0, 0, 0)),
                pl.BlockSpec((Lout, Lout), lambda i: (0, 0)),
            ] + [pl.BlockSpec((1, Lout), lambda i: (0, 0))] * 6,
            out_specs=pl.BlockSpec((N, H, Lout), lambda i: (0, 0, 0)),
            scratch_shapes=[
                pltpu.VMEM((N, H + 2, Lin), matmul_dtype),
                pltpu.VMEM((N, H + 2, Lout), matmul_dtype),
            ],
        ),
        compiler_params=pltpu.CompilerParams(
            dimension_semantics=("arbitrary",)),
    )(x_p, kb1, kb2, Pmix,
      colbc(params["b1"]), colbc(params["g1"]), colbc(params["be1"]),
      colbc(params["b2"]), colbc(params["g2"]), colbc(params["be2"]))

    # packed (N, H, W*Cout) -> NHWC (free reshape) -> NCHW
    return jnp.transpose(out_p.reshape(N, H, W, Cout), (0, 3, 1, 2))


# ----------------------------------------------------------------------------
# Pure-JAX reference (training-mode BN, matches torch ConvBlock.forward)
# ----------------------------------------------------------------------------
def reference_forward(x_nchw, params):
    def conv(x, w, b):  # x NHWC, w HWIO
        y = lax.conv_general_dilated(
            x, w, window_strides=(1, 1), padding="SAME",
            dimension_numbers=("NHWC", "HWIO", "NHWC"))
        return y + b.reshape(1, 1, 1, -1)

    def bn_relu(x, g, be):
        mean = jnp.mean(x, axis=(0, 1, 2), keepdims=True)
        var = jnp.mean((x - mean) ** 2, axis=(0, 1, 2), keepdims=True)
        y = (x - mean) * lax.rsqrt(var + 1e-5) * g.reshape(1, 1, 1, -1) \
            + be.reshape(1, 1, 1, -1)
        return jnp.maximum(y, 0.0)

    x = jnp.transpose(x_nchw, (0, 2, 3, 1))
    x = bn_relu(conv(x, params["w1"], params["b1"]), params["g1"], params["be1"])
    x = bn_relu(conv(x, params["w2"], params["b2"]), params["g2"], params["be2"])
    return jnp.transpose(x, (0, 3, 1, 2))


if __name__ == "__main__":
    N, Cin, Cout, H, W = 2, 4, 8, 16, 16

    key = jax.random.PRNGKey(0)
    k_x, k_w1, k_b1, k_w2, k_b2 = jax.random.split(key, 5)

    x = jax.random.normal(k_x, (N, Cin, H, W), dtype=jnp.float32)   # NCHW

    params = {
        "w1": jax.random.normal(k_w1, (3, 3, Cin, Cout), jnp.float32) * 0.1,
        "b1": jax.random.normal(k_b1, (Cout,), jnp.float32) * 0.1,
        "g1": jnp.ones((Cout,), jnp.float32),
        "be1": jnp.zeros((Cout,), jnp.float32),
        "w2": jax.random.normal(k_w2, (3, 3, Cout, Cout), jnp.float32) * 0.1,
        "b2": jax.random.normal(k_b2, (Cout,), jnp.float32) * 0.1,
        "g2": jnp.ones((Cout,), jnp.float32),
        "be2": jnp.zeros((Cout,), jnp.float32),
    }

    ref = reference_forward(x, params)

    # f32 MXU path: strict check against the f32 reference.
    out = jax.block_until_ready(conv_block_forward(x, params))
    assert out.shape == (N, Cout, H, W)
    assert jnp.allclose(out, ref, rtol=1e-4, atol=1e-4), "mismatch vs reference"

    # bf16 MXU operands (production dtype on v6e/v7x); BN stats stay f32.
    out_bf16 = jax.block_until_ready(
        conv_block_forward(x, params, matmul_dtype=jnp.bfloat16))
    assert float(jnp.max(jnp.abs(out_bf16 - ref))) < 0.3, "bf16 path diverged"

    print("KERNEL_OK")
</pallas_src>

<mosaic_0001>
module attributes {stable_mosaic.version = 11 : i64} {
  func.func @_convblock_kernel(%arg0: i32, %arg1: memref<2x16x64xf32, #tpu.memory_space<vmem>>, %arg2: memref<3x64x128xf32, #tpu.memory_space<vmem>>, %arg3: memref<3x128x128xf32, #tpu.memory_space<vmem>>, %arg4: memref<128x128xf32, #tpu.memory_space<vmem>>, %arg5: memref<1x128xf32, #tpu.memory_space<vmem>>, %arg6: memref<1x128xf32, #tpu.memory_space<vmem>>, %arg7: memref<1x128xf32, #tpu.memory_space<vmem>>, %arg8: memref<1x128xf32, #tpu.memory_space<vmem>>, %arg9: memref<1x128xf32, #tpu.memory_space<vmem>>, %arg10: memref<1x128xf32, #tpu.memory_space<vmem>>, %arg11: memref<2x16x128xf32, #tpu.memory_space<vmem>>, %arg12: memref<2x18x64xf32, #tpu.memory_space<vmem>>, %arg13: memref<2x18x128xf32, #tpu.memory_space<vmem>>) attributes {dimension_semantics = [#tpu.dimension_semantics<arbitrary>], iteration_bounds = array<i64: 1>, scalar_prefetch = 0 : i64, scratch_operands = 2 : i64, tpu.core_type = #tpu.core_type<tc>, window_params = [{pipeline_mode = #tpu.pipeline_mode<synchronous>, transform_indices = @transform_0, window_bounds = array<i64: 2, 16, 64>}, {pipeline_mode = #tpu.pipeline_mode<synchronous>, transform_indices = @transform_1, window_bounds = array<i64: 3, 64, 128>}, {pipeline_mode = #tpu.pipeline_mode<synchronous>, transform_indices = @transform_2, window_bounds = array<i64: 3, 128, 128>}, {pipeline_mode = #tpu.pipeline_mode<synchronous>, transform_indices = @transform_3, window_bounds = array<i64: 128, 128>}, {pipeline_mode = #tpu.pipeline_mode<synchronous>, transform_indices = @transform_4, window_bounds = array<i64: 1, 128>}, {pipeline_mode = #tpu.pipeline_mode<synchronous>, transform_indices = @transform_5, window_bounds = array<i64: 1, 128>}, {pipeline_mode = #tpu.pipeline_mode<synchronous>, transform_indices = @transform_6, window_bounds = array<i64: 1, 128>}, {pipeline_mode = #tpu.pipeline_mode<synchronous>, transform_indices = @transform_7, window_bounds = array<i64: 1, 128>}, {pipeline_mode = #tpu.pipeline_mode<synchronous>, transform_indices = @transform_8, window_bounds = array<i64: 1, 128>}, {pipeline_mode = #tpu.pipeline_mode<synchronous>, transform_indices = @transform_9, window_bounds = array<i64: 1, 128>}, {pipeline_mode = #tpu.pipeline_mode<synchronous>, transform_indices = @transform_10, window_bounds = array<i64: 2, 16, 128>}]} {
    %c0 = arith.constant 0 : index
    %c0_0 = arith.constant 0 : index
    %0 = vector.load %arg4[%c0, %c0_0] : memref<128x128xf32, #tpu.memory_space<vmem>>, vector<128x128xf32>
    %c0_1 = arith.constant 0 : index
    %c0_2 = arith.constant 0 : index
    %c0_3 = arith.constant 0 : index
    %1 = vector.load %arg1[%c0_1, %c0_2, %c0_3] : memref<2x16x64xf32, #tpu.memory_space<vmem>>, vector<2x16x64xf32>
    %c0_4 = arith.constant 0 : index
    %c0_5 = arith.constant 0 : index
    %2 = vector.load %arg5[%c0_4, %c0_5] : memref<1x128xf32, #tpu.memory_space<vmem>>, vector<1x128xf32>
    %c0_6 = arith.constant 0 : index
    %c0_7 = arith.constant 0 : index
    %3 = vector.load %arg6[%c0_6, %c0_7] : memref<1x128xf32, #tpu.memory_space<vmem>>, vector<1x128xf32>
    %c0_8 = arith.constant 0 : index
    %c0_9 = arith.constant 0 : index
    %4 = vector.load %arg7[%c0_8, %c0_9] : memref<1x128xf32, #tpu.memory_space<vmem>>, vector<1x128xf32>
    %cst = arith.constant 0.000000e+00 : f32
    %5 = vector.broadcast %cst : f32 to vector<2x1x64xf32>
    %c0_10 = arith.constant 0 : index
    %c0_11 = arith.constant 0 : index
    %c0_12 = arith.constant 0 : index
    %6 = vector.load %arg12[%c0_10, %c0_11, %c0_12] : memref<2x18x64xf32, #tpu.memory_space<vmem>>, vector<2x1x64xf32>
    tpu.vector_store %arg12[%c0_10, %c0_11, %c0_12], %5 {strides = array<i32>} : memref<2x18x64xf32, #tpu.memory_space<vmem>>, vector<2x1x64xf32>,
    %c0_13 = arith.constant 0 : index
    %c17 = arith.constant 17 : index
    %c0_14 = arith.constant 0 : index
    %7 = vector.load %arg12[%c0_13, %c17, %c0_14] : memref<2x18x64xf32, #tpu.memory_space<vmem>>, vector<2x1x64xf32>
    tpu.vector_store %arg12[%c0_13, %c17, %c0_14], %5 {strides = array<i32>} : memref<2x18x64xf32, #tpu.memory_space<vmem>>, vector<2x1x64xf32>,
    %c0_15 = arith.constant 0 : index
    %c1 = arith.constant 1 : index
    %c0_16 = arith.constant 0 : index
    %8 = vector.load %arg12[%c0_15, %c1, %c0_16] : memref<2x18x64xf32, #tpu.memory_space<vmem>>, vector<2x16x64xf32>
    tpu.vector_store %arg12[%c0_15, %c1, %c0_16], %1 {strides = array<i32>} : memref<2x18x64xf32, #tpu.memory_space<vmem>>, vector<2x16x64xf32>,
    %cst_17 = arith.constant 0.000000e+00 : f32
    %9 = vector.broadcast %cst_17 : f32 to vector<32x128xf32>
    %c0_18 = arith.constant 0 : index
    %c0_19 = arith.constant 0 : index
    %c0_20 = arith.constant 0 : index
    %10 = vector.load %arg12[%c0_18, %c0_19, %c0_20] : memref<2x18x64xf32, #tpu.memory_space<vmem>>, vector<2x16x64xf32>
    %11 = vector.shape_cast %10 : vector<2x16x64xf32> to vector<32x64xf32>
    %c0_21 = arith.constant 0 : index
    %c0_22 = arith.constant 0 : index
    %c0_23 = arith.constant 0 : index
    %12 = vector.load %arg2[%c0_21, %c0_22, %c0_23] : memref<3x64x128xf32, #tpu.memory_space<vmem>>, vector<1x64x128xf32>
    %13 = vector.shape_cast %12 : vector<1x64x128xf32> to vector<64x128xf32>
    %cst_24 = arith.constant dense<0.000000e+00> : vector<32x128xf32>
    %14 = tpu.matmul %11, %13, %cst_24 {dimension_numbers = #tpu.dot_dimension_numbers<[1], [0], [0], [1], [0, 0, 1, 1], [], []>} : vector<32x64xf32>, vector<64x128xf32>, vector<32x128xf32> -> vector<32x128xf32>
    %15 = arith.addf %9, %14 : vector<32x128xf32>
    %c0_25 = arith.constant 0 : index
    %c1_26 = arith.constant 1 : index
    %c0_27 = arith.constant 0 : index
    %16 = vector.load %arg12[%c0_25, %c1_26, %c0_27] : memref<2x18x64xf32, #tpu.memory_space<vmem>>, vector<2x16x64xf32>
    %17 = vector.shape_cast %16 : vector<2x16x64xf32> to vector<32x64xf32>
    %c1_28 = arith.constant 1 : index
    %c0_29 = arith.constant 0 : index
    %c0_30 = arith.constant 0 : index
    %18 = vector.load %arg2[%c1_28, %c0_29, %c0_30] : memref<3x64x128xf32, #tpu.memory_space<vmem>>, vector<1x64x128xf32>
    %19 = vector.shape_cast %18 : vector<1x64x128xf32> to vector<64x128xf32>
    %cst_31 = arith.constant dense<0.000000e+00> : vector<32x128xf32>
    %20 = tpu.matmul %17, %19, %cst_31 {dimension_numbers = #tpu.dot_dimension_numbers<[1], [0], [0], [1], [0, 0, 1, 1], [], []>} : vector<32x64xf32>, vector<64x128xf32>, vector<32x128xf32> -> vector<32x128xf32>
    %21 = arith.addf %15, %20 : vector<32x128xf32>
    %c0_32 = arith.constant 0 : index
    %c2 = arith.constant 2 : index
    %c0_33 = arith.constant 0 : index
    %22 = vector.load %arg12[%c0_32, %c2, %c0_33] : memref<2x18x64xf32, #tpu.memory_space<vmem>>, vector<2x16x64xf32>
    %23 = vector.shape_cast %22 : vector<2x16x64xf32> to vector<32x64xf32>
    %c2_34 = arith.constant 2 : index
    %c0_35 = arith.constant 0 : index
    %c0_36 = arith.constant 0 : index
    %24 = vector.load %arg2[%c2_34, %c0_35, %c0_36] : memref<3x64x128xf32, #tpu.memory_space<vmem>>, vector<1x64x128xf32>
    %25 = vector.shape_cast %24 : vector<1x64x128xf32> to vector<64x128xf32>
    %cst_37 = arith.constant dense<0.000000e+00> : vector<32x128xf32>
    %26 = tpu.matmul %23, %25, %cst_37 {dimension_numbers = #tpu.dot_dimension_numbers<[1], [0], [0], [1], [0, 0, 1, 1], [], []>} : vector<32x64xf32>, vector<64x128xf32>, vector<32x128xf32> -> vector<32x128xf32>
    %27 = arith.addf %21, %26 : vector<32x128xf32>
    %28 = vector.broadcast %2 : vector<1x128xf32> to vector<32x128xf32>
    %29 = arith.addf %27, %28 : vector<32x128xf32>
    %cst_38 = arith.constant dense<0.000000e+00> : vector<32x128xf32>
    %30 = tpu.matmul %29, %0, %cst_38 {dimension_numbers = #tpu.dot_dimension_numbers<[1], [0], [0], [1], [0, 0, 1, 1], [], []>} : vector<32x128xf32>, vector<128x128xf32>, vector<32x128xf32> -> vector<32x128xf32>
    %cst_39 = arith.constant dense<0.000000e+00> : vector<128xf32>
    %31 = vector.multi_reduction <add>, %30, %cst_39 [0] : vector<32x128xf32> to vector<128xf32>
    %32 = vector.shape_cast %31 : vector<128xf32> to vector<1x128xf32>
    %cst_40 = arith.constant 0.001953125 : f32
    %33 = vector.broadcast %cst_40 : f32 to vector<1x128xf32>
    %34 = arith.mulf %32, %33 : vector<1x128xf32>
    %35 = vector.broadcast %34 : vector<1x128xf32> to vector<32x128xf32>
    %36 = arith.subf %29, %35 : vector<32x128xf32>
    %37 = arith.mulf %36, %36 : vector<32x128xf32>
    %cst_41 = arith.constant dense<0.000000e+00> : vector<32x128xf32>
    %38 = tpu.matmul %37, %0, %cst_41 {dimension_numbers = #tpu.dot_dimension_numbers<[1], [0], [0], [1], [0, 0, 1, 1], [], []>} : vector<32x128xf32>, vector<128x128xf32>, vector<32x128xf32> -> vector<32x128xf32>
    %cst_42 = arith.constant dense<0.000000e+00> : vector<128xf32>
    %39 = vector.multi_reduction <add>, %38, %cst_42 [0] : vector<32x128xf32> to vector<128xf32>
    %40 = vector.shape_cast %39 : vector<128xf32> to vector<1x128xf32>
    %cst_43 = arith.constant 0.001953125 : f32
    %41 = vector.broadcast %cst_43 : f32 to vector<1x128xf32>
    %42 = arith.mulf %40, %41 : vector<1x128xf32>
    %cst_44 = arith.constant 9.99999974E-6 : f32
    %43 = vector.broadcast %cst_44 : f32 to vector<1x128xf32>
    %44 = arith.addf %42, %43 : vector<1x128xf32>
    %45 = math.rsqrt %44 : vector<1x128xf32>
    %46 = arith.mulf %3, %45 : vector<1x128xf32>
    %47 = arith.mulf %34, %46 : vector<1x128xf32>
    %48 = arith.subf %4, %47 : vector<1x128xf32>
    %49 = vector.broadcast %46 : vector<1x128xf32> to vector<32x128xf32>
    %50 = arith.mulf %29, %49 : vector<32x128xf32>
    %51 = vector.broadcast %48 : vector<1x128xf32> to vector<32x128xf32>
    %52 = arith.addf %50, %51 : vector<32x128xf32>
    %cst_45 = arith.constant 0.000000e+00 : f32
    %53 = vector.broadcast %cst_45 : f32 to vector<32x128xf32>
    %54 = arith.maximumf %52, %53 : vector<32x128xf32>
    %55 = vector.shape_cast %54 : vector<32x128xf32> to vector<2x16x128xf32>
    %c0_46 = arith.constant 0 : index
    %c0_47 = arith.constant 0 : index
    %56 = vector.load %arg8[%c0_46, %c0_47] : memref<1x128xf32, #tpu.memory_space<vmem>>, vector<1x128xf32>
    %c0_48 = arith.constant 0 : index
    %c0_49 = arith.constant 0 : index
    %57 = vector.load %arg9[%c0_48, %c0_49] : memref<1x128xf32, #tpu.memory_space<vmem>>, vector<1x128xf32>
    %c0_50 = arith.constant 0 : index
    %c0_51 = arith.constant 0 : index
    %58 = vector.load %arg10[%c0_50, %c0_51] : memref<1x128xf32, #tpu.memory_space<vmem>>, vector<1x128xf32>
    %cst_52 = arith.constant 0.000000e+00 : f32
    %59 = vector.broadcast %cst_52 : f32 to vector<2x1x128xf32>
    %c0_53 = arith.constant 0 : index
    %c0_54 = arith.constant 0 : index
    %c0_55 = arith.constant 0 : index
    %60 = vector.load %arg13[%c0_53, %c0_54, %c0_55] : memref<2x18x128xf32, #tpu.memory_space<vmem>>, vector<2x1x128xf32>
    tpu.vector_store %arg13[%c0_53, %c0_54, %c0_55], %59 {strides = array<i32>} : memref<2x18x128xf32, #tpu.memory_space<vmem>>, vector<2x1x128xf32>,
    %c0_56 = arith.constant 0 : index
    %c17_57 = arith.constant 17 : index
    %c0_58 = arith.constant 0 : index
    %61 = vector.load %arg13[%c0_56, %c17_57, %c0_58] : memref<2x18x128xf32, #tpu.memory_space<vmem>>, vector<2x1x128xf32>
    tpu.vector_store %arg13[%c0_56, %c17_57, %c0_58], %59 {strides = array<i32>} : memref<2x18x128xf32, #tpu.memory_space<vmem>>, vector<2x1x128xf32>,
    %c0_59 = arith.constant 0 : index
    %c1_60 = arith.constant 1 : index
    %c0_61 = arith.constant 0 : index
    %62 = vector.load %arg13[%c0_59, %c1_60, %c0_61] : memref<2x18x128xf32, #tpu.memory_space<vmem>>, vector<2x16x128xf32>
    tpu.vector_store %arg13[%c0_59, %c1_60, %c0_61], %55 {strides = array<i32>} : memref<2x18x128xf32, #tpu.memory_space<vmem>>, vector<2x16x128xf32>,
    %cst_62 = arith.constant 0.000000e+00 : f32
    %63 = vector.broadcast %cst_62 : f32 to vector<32x128xf32>
    %c0_63 = arith.constant 0 : index
    %c0_64 = arith.constant 0 : index
    %c0_65 = arith.constant 0 : index
    %64 = vector.load %arg13[%c0_63, %c0_64, %c0_65] : memref<2x18x128xf32, #tpu.memory_space<vmem>>, vector<2x16x128xf32>
    %65 = vector.shape_cast %64 : vector<2x16x128xf32> to vector<32x128xf32>
    %c0_66 = arith.constant 0 : index
    %c0_67 = arith.constant 0 : index
    %c0_68 = arith.constant 0 : index
    %66 = vector.load %arg3[%c0_66, %c0_67, %c0_68] : memref<3x128x128xf32, #tpu.memory_space<vmem>>, vector<1x128x128xf32>
    %67 = vector.shape_cast %66 : vector<1x128x128xf32> to vector<128x128xf32>
    %cst_69 = arith.constant dense<0.000000e+00> : vector<32x128xf32>
    %68 = tpu.matmul %65, %67, %cst_69 {dimension_numbers = #tpu.dot_dimension_numbers<[1], [0], [0], [1], [0, 0, 1, 1], [], []>} : vector<32x128xf32>, vector<128x128xf32>, vector<32x128xf32> -> vector<32x128xf32>
    %69 = arith.addf %63, %68 : vector<32x128xf32>
    %c0_70 = arith.constant 0 : index
    %c1_71 = arith.constant 1 : index
    %c0_72 = arith.constant 0 : index
    %70 = vector.load %arg13[%c0_70, %c1_71, %c0_72] : memref<2x18x128xf32, #tpu.memory_space<vmem>>, vector<2x16x128xf32>
    %71 = vector.shape_cast %70 : vector<2x16x128xf32> to vector<32x128xf32>
    %c1_73 = arith.constant 1 : index
    %c0_74 = arith.constant 0 : index
    %c0_75 = arith.constant 0 : index
    %72 = vector.load %arg3[%c1_73, %c0_74, %c0_75] : memref<3x128x128xf32, #tpu.memory_space<vmem>>, vector<1x128x128xf32>
    %73 = vector.shape_cast %72 : vector<1x128x128xf32> to vector<128x128xf32>
    %cst_76 = arith.constant dense<0.000000e+00> : vector<32x128xf32>
    %74 = tpu.matmul %71, %73, %cst_76 {dimension_numbers = #tpu.dot_dimension_numbers<[1], [0], [0], [1], [0, 0, 1, 1], [], []>} : vector<32x128xf32>, vector<128x128xf32>, vector<32x128xf32> -> vector<32x128xf32>
    %75 = arith.addf %69, %74 : vector<32x128xf32>
    %c0_77 = arith.constant 0 : index
    %c2_78 = arith.constant 2 : index
    %c0_79 = arith.constant 0 : index
    %76 = vector.load %arg13[%c0_77, %c2_78, %c0_79] : memref<2x18x128xf32, #tpu.memory_space<vmem>>, vector<2x16x128xf32>
    %77 = vector.shape_cast %76 : vector<2x16x128xf32> to vector<32x128xf32>
    %c2_80 = arith.constant 2 : index
    %c0_81 = arith.constant 0 : index
    %c0_82 = arith.constant 0 : index
    %78 = vector.load %arg3[%c2_80, %c0_81, %c0_82] : memref<3x128x128xf32, #tpu.memory_space<vmem>>, vector<1x128x128xf32>
    %79 = vector.shape_cast %78 : vector<1x128x128xf32> to vector<128x128xf32>
    %cst_83 = arith.constant dense<0.000000e+00> : vector<32x128xf32>
    %80 = tpu.matmul %77, %79, %cst_83 {dimension_numbers = #tpu.dot_dimension_numbers<[1], [0], [0], [1], [0, 0, 1, 1], [], []>} : vector<32x128xf32>, vector<128x128xf32>, vector<32x128xf32> -> vector<32x128xf32>
    %81 = arith.addf %75, %80 : vector<32x128xf32>
    %82 = vector.broadcast %56 : vector<1x128xf32> to vector<32x128xf32>
    %83 = arith.addf %81, %82 : vector<32x128xf32>
    %cst_84 = arith.constant dense<0.000000e+00> : vector<32x128xf32>
    %84 = tpu.matmul %83, %0, %cst_84 {dimension_numbers = #tpu.dot_dimension_numbers<[1], [0], [0], [1], [0, 0, 1, 1], [], []>} : vector<32x128xf32>, vector<128x128xf32>, vector<32x128xf32> -> vector<32x128xf32>
    %cst_85 = arith.constant dense<0.000000e+00> : vector<128xf32>
    %85 = vector.multi_reduction <add>, %84, %cst_85 [0] : vector<32x128xf32> to vector<128xf32>
    %86 = vector.shape_cast %85 : vector<128xf32> to vector<1x128xf32>
    %cst_86 = arith.constant 0.001953125 : f32
    %87 = vector.broadcast %cst_86 : f32 to vector<1x128xf32>
    %88 = arith.mulf %86, %87 : vector<1x128xf32>
    %89 = vector.broadcast %88 : vector<1x128xf32> to vector<32x128xf32>
    %90 = arith.subf %83, %89 : vector<32x128xf32>
    %91 = arith.mulf %90, %90 : vector<32x128xf32>
    %cst_87 = arith.constant dense<0.000000e+00> : vector<32x128xf32>
    %92 = tpu.matmul %91, %0, %cst_87 {dimension_numbers = #tpu.dot_dimension_numbers<[1], [0], [0], [1], [0, 0, 1, 1], [], []>} : vector<32x128xf32>, vector<128x128xf32>, vector<32x128xf32> -> vector<32x128xf32>
    %cst_88 = arith.constant dense<0.000000e+00> : vector<128xf32>
    %93 = vector.multi_reduction <add>, %92, %cst_88 [0] : vector<32x128xf32> to vector<128xf32>
    %94 = vector.shape_cast %93 : vector<128xf32> to vector<1x128xf32>
    %cst_89 = arith.constant 0.001953125 : f32
    %95 = vector.broadcast %cst_89 : f32 to vector<1x128xf32>
    %96 = arith.mulf %94, %95 : vector<1x128xf32>
    %cst_90 = arith.constant 9.99999974E-6 : f32
    %97 = vector.broadcast %cst_90 : f32 to vector<1x128xf32>
    %98 = arith.addf %96, %97 : vector<1x128xf32>
    %99 = math.rsqrt %98 : vector<1x128xf32>
    %100 = arith.mulf %57, %99 : vector<1x128xf32>
    %101 = arith.mulf %88, %100 : vector<1x128xf32>
    %102 = arith.subf %58, %101 : vector<1x128xf32>
    %103 = vector.broadcast %100 : vector<1x128xf32> to vector<32x128xf32>
    %104 = arith.mulf %83, %103 : vector<32x128xf32>
    %105 = vector.broadcast %102 : vector<1x128xf32> to vector<32x128xf32>
    %106 = arith.addf %104, %105 : vector<32x128xf32>
    %cst_91 = arith.constant 0.000000e+00 : f32
    %107 = vector.broadcast %cst_91 : f32 to vector<32x128xf32>
    %108 = arith.maximumf %106, %107 : vector<32x128xf32>
    %109 = vector.shape_cast %108 : vector<32x128xf32> to vector<2x16x128xf32>
    %c0_92 = arith.constant 0 : index
    %c0_93 = arith.constant 0 : index
    %c0_94 = arith.constant 0 : index
    %110 = vector.load %arg11[%c0_92, %c0_93, %c0_94] : memref<2x16x128xf32, #tpu.memory_space<vmem>>, vector<2x16x128xf32>
    tpu.vector_store %arg11[%c0_92, %c0_93, %c0_94], %109 {strides = array<i32>} : memref<2x16x128xf32, #tpu.memory_space<vmem>>, vector<2x16x128xf32>,
    return
  }
  func.func @transform_0(%arg0: i32) -> (i32, i32, i32) {
    %c0_i32 = arith.constant 0 : i32
    %c0_i32_0 = arith.constant 0 : i32
    %c0_i32_1 = arith.constant 0 : i32
    %c0_i32_2 = arith.constant 0 : i32
    return %c0_i32, %c0_i32_0, %c0_i32_1 : i32, i32, i32
  }
  func.func @transform_1(%arg0: i32) -> (i32, i32, i32) {
    %c0_i32 = arith.constant 0 : i32
    %c0_i32_0 = arith.constant 0 : i32
    %c0_i32_1 = arith.constant 0 : i32
    %c0_i32_2 = arith.constant 0 : i32
    return %c0_i32, %c0_i32_0, %c0_i32_1 : i32, i32, i32
  }
  func.func @transform_2(%arg0: i32) -> (i32, i32, i32) {
    %c0_i32 = arith.constant 0 : i32
    %c0_i32_0 = arith.constant 0 : i32
    %c0_i32_1 = arith.constant 0 : i32
    %c0_i32_2 = arith.constant 0 : i32
    return %c0_i32, %c0_i32_0, %c0_i32_1 : i32, i32, i32
  }
  func.func @transform_3(%arg0: i32) -> (i32, i32) {
    %c0_i32 = arith.constant 0 : i32
    %c0_i32_0 = arith.constant 0 : i32
    %c0_i32_1 = arith.constant 0 : i32
    return %c0_i32, %c0_i32_0 : i32, i32
  }
  func.func @transform_4(%arg0: i32) -> (i32, i32) {
    %c0_i32 = arith.constant 0 : i32
    %c0_i32_0 = arith.constant 0 : i32
    %c0_i32_1 = arith.constant 0 : i32
    return %c0_i32, %c0_i32_0 : i32, i32
  }
  func.func @transform_5(%arg0: i32) -> (i32, i32) {
    %c0_i32 = arith.constant 0 : i32
    %c0_i32_0 = arith.constant 0 : i32
    %c0_i32_1 = arith.constant 0 : i32
    return %c0_i32, %c0_i32_0 : i32, i32
  }
  func.func @transform_6(%arg0: i32) -> (i32, i32) {
    %c0_i32 = arith.constant 0 : i32
    %c0_i32_0 = arith.constant 0 : i32
    %c0_i32_1 = arith.constant 0 : i32
    return %c0_i32, %c0_i32_0 : i32, i32
  }
  func.func @transform_7(%arg0: i32) -> (i32, i32) {
    %c0_i32 = arith.constant 0 : i32
    %c0_i32_0 = arith.constant 0 : i32
    %c0_i32_1 = arith.constant 0 : i32
    return %c0_i32, %c0_i32_0 : i32, i32
  }
  func.func @transform_8(%arg0: i32) -> (i32, i32) {
    %c0_i32 = arith.constant 0 : i32
    %c0_i32_0 = arith.constant 0 : i32
    %c0_i32_1 = arith.constant 0 : i32
    return %c0_i32, %c0_i32_0 : i32, i32
  }
  func.func @transform_9(%arg0: i32) -> (i32, i32) {
    %c0_i32 = arith.constant 0 : i32
    %c0_i32_0 = arith.constant 0 : i32
    %c0_i32_1 = arith.constant 0 : i32
    return %c0_i32, %c0_i32_0 : i32, i32
  }
  func.func @transform_10(%arg0: i32) -> (i32, i32, i32) {
    %c0_i32 = arith.constant 0 : i32
    %c0_i32_0 = arith.constant 0 : i32
    %c0_i32_1 = arith.constant 0 : i32
    %c0_i32_2 = arith.constant 0 : i32
    return %c0_i32, %c0_i32_0, %c0_i32_1 : i32, i32, i32
  }
}

</mosaic_0001>

<bundles_post_ra>
// kernel: tile.38
= control target key start
LH: loop header
LB: loop body
LE: loop exit
PB: predicated region body
PF: predicated region fallthrough
CT: control target
= control target key end

     0   :  { %s1866_s0 = inlined_call_operand.vmem [shape: f32[8,8], index: 0, kind: input, shape index: {}]   ;;  %s1867_s1 = inlined_call_operand.vmem [shape: f32[16,8,16,8], index: 1, kind: output, shape index: {}]  }
   0x1   :  { %v805_v0 = vld [vmem:[%s1866_s0] ss:$0 sm:$0xff]  ;;  %v810_v1 = vld [vmem:[%s1866_s0 + $0x1] ss:$0 sm:$0xff]  ;;  %v815_v2 = vld [vmem:[%s1866_s0 + $0x2] ss:$0 sm:$0xff] }
   0x2   :  { %5 = vst [vmem:[%s1867_s1] sm:$0xff] %v805_v0  ;;  %530 = vst [vmem:[%s1867_s1 + $0x80] sm:$0xff] %v805_v0  ;;  %v1012_v3 = vld [vmem:[%s1866_s0 + $0x3] ss:$0 sm:$0xff]  ;;  %v1017_v4 = vld [vmem:[%s1866_s0 + $0x4] ss:$0 sm:$0xff] }
   0x3   :  { %531 = vst [vmem:[%s1867_s1 + $0x100] sm:$0xff] %v805_v0  ;;  %532 = vst [vmem:[%s1867_s1 + $0x180] sm:$0xff] %v805_v0  ;;  %v1022_v5 = vld [vmem:[%s1866_s0 + $0x5] ss:$0 sm:$0xff]  ;;  %v1411_v6 = vld [vmem:[%s1866_s0 + $0x6] ss:$0 sm:$0xff] }
   0x4   :  { %533 = vst [vmem:[%s1867_s1 + $0x200] sm:$0xff] %v805_v0  ;;  %534 = vst [vmem:[%s1867_s1 + $0x280] sm:$0xff] %v805_v0  ;;  %v1416_v7 = vld [vmem:[%s1866_s0 + $0x7] ss:$0 sm:$0xff] }
   0x5   :  { %535 = vst [vmem:[%s1867_s1 + $0x300] sm:$0xff] %v805_v0  ;;  %536 = vst [vmem:[%s1867_s1 + $0x380] sm:$0xff] %v805_v0 }
   0x6   :  { %537 = vst [vmem:[%s1867_s1 + $0x400] sm:$0xff] %v805_v0  ;;  %538 = vst [vmem:[%s1867_s1 + $0x480] sm:$0xff] %v805_v0 }
   0x7   :  { %539 = vst [vmem:[%s1867_s1 + $0x500] sm:$0xff] %v805_v0  ;;  %540 = vst [vmem:[%s1867_s1 + $0x580] sm:$0xff] %v805_v0 }
   0x8   :  { %541 = vst [vmem:[%s1867_s1 + $0x600] sm:$0xff] %v805_v0  ;;  %542 = vst [vmem:[%s1867_s1 + $0x680] sm:$0xff] %v805_v0 }
   0x9   :  { %543 = vst [vmem:[%s1867_s1 + $0x700] sm:$0xff] %v805_v0  ;;  %544 = vst [vmem:[%s1867_s1 + $0x780] sm:$0xff] %v805_v0 }
   0xa   :  { %546 = vst [vmem:[%s1867_s1 + $0x10] sm:$0xff] %v810_v1  ;;  %547 = vst [vmem:[%s1867_s1 + $0x90] sm:$0xff] %v810_v1 }
   0xb   :  { %548 = vst [vmem:[%s1867_s1 + $0x110] sm:$0xff] %v810_v1  ;;  %549 = vst [vmem:[%s1867_s1 + $0x190] sm:$0xff] %v810_v1 }
   0xc   :  { %550 = vst [vmem:[%s1867_s1 + $0x210] sm:$0xff] %v810_v1  ;;  %551 = vst [vmem:[%s1867_s1 + $0x290] sm:$0xff] %v810_v1 }
   0xd   :  { %552 = vst [vmem:[%s1867_s1 + $0x310] sm:$0xff] %v810_v1  ;;  %553 = vst [vmem:[%s1867_s1 + $0x390] sm:$0xff] %v810_v1 }
   0xe   :  { %554 = vst [vmem:[%s1867_s1 + $0x410] sm:$0xff] %v810_v1  ;;  %555 = vst [vmem:[%s1867_s1 + $0x490] sm:$0xff] %v810_v1 }
   0xf   :  { %556 = vst [vmem:[%s1867_s1 + $0x510] sm:$0xff] %v810_v1  ;;  %557 = vst [vmem:[%s1867_s1 + $0x590] sm:$0xff] %v810_v1 }
  0x10   :  { %558 = vst [vmem:[%s1867_s1 + $0x610] sm:$0xff] %v810_v1  ;;  %559 = vst [vmem:[%s1867_s1 + $0x690] sm:$0xff] %v810_v1 }
  0x11   :  { %560 = vst [vmem:[%s1867_s1 + $0x710] sm:$0xff] %v810_v1  ;;  %561 = vst [vmem:[%s1867_s1 + $0x790] sm:$0xff] %v810_v1 }
  0x12   :  { %563 = vst [vmem:[%s1867_s1 + $0x20] sm:$0xff] %v815_v2  ;;  %564 = vst [vmem:[%s1867_s1 + $0xa0] sm:$0xff] %v815_v2 }
  0x13   :  { %565 = vst [vmem:[%s1867_s1 + $0x120] sm:$0xff] %v815_v2  ;;  %566 = vst [vmem:[%s1867_s1 + $0x1a0] sm:$0xff] %v815_v2 }
  0x14   :  { %567 = vst [vmem:[%s1867_s1 + $0x220] sm:$0xff] %v815_v2  ;;  %568 = vst [vmem:[%s1867_s1 + $0x2a0] sm:$0xff] %v815_v2 }
  0x15   :  { %569 = vst [vmem:[%s1867_s1 + $0x320] sm:$0xff] %v815_v2  ;;  %570 = vst [vmem:[%s1867_s1 + $0x3a0] sm:$0xff] %v815_v2 }
  0x16   :  { %571 = vst [vmem:[%s1867_s1 + $0x420] sm:$0xff] %v815_v2  ;;  %572 = vst [vmem:[%s1867_s1 + $0x4a0] sm:$0xff] %v815_v2 }
  0x17   :  { %573 = vst [vmem:[%s1867_s1 + $0x520] sm:$0xff] %v815_v2  ;;  %574 = vst [vmem:[%s1867_s1 + $0x5a0] sm:$0xff] %v815_v2 }
  0x18   :  { %575 = vst [vmem:[%s1867_s1 + $0x620] sm:$0xff] %v815_v2  ;;  %576 = vst [vmem:[%s1867_s1 + $0x6a0] sm:$0xff] %v815_v2 }
  0x19   :  { %577 = vst [vmem:[%s1867_s1 + $0x720] sm:$0xff] %v815_v2  ;;  %578 = vst [vmem:[%s1867_s1 + $0x7a0] sm:$0xff] %v815_v2 }
  0x1a   :  { %664 = vst [vmem:[%s1867_s1 + $0x8] sm:$0xff] %v805_v0  ;;  %665 = vst [vmem:[%s1867_s1 + $0x88] sm:$0xff] %v805_v0 }
  0x1b   :  { %666 = vst [vmem:[%s1867_s1 + $0x108] sm:$0xff] %v805_v0  ;;  %667 = vst [vmem:[%s1867_s1 + $0x188] sm:$0xff] %v805_v0 }
  0x1c   :  { %668 = vst [vmem:[%s1867_s1 + $0x208] sm:$0xff] %v805_v0  ;;  %669 = vst [vmem:[%s1867_s1 + $0x288] sm:$0xff] %v805_v0 }
  0x1d   :  { %670 = vst [vmem:[%s1867_s1 + $0x308] sm:$0xff] %v805_v0  ;;  %671 = vst [vmem:[%s1867_s1 + $0x388] sm:$0xff] %v805_v0 }
  0x1e   :  { %672 = vst [vmem:[%s1867_s1 + $0x408] sm:$0xff] %v805_v0  ;;  %673 = vst [vmem:[%s1867_s1 + $0x488] sm:$0xff] %v805_v0 }
  0x1f   :  { %674 = vst [vmem:[%s1867_s1 + $0x508] sm:$0xff] %v805_v0  ;;  %675 = vst [vmem:[%s1867_s1 + $0x588] sm:$0xff] %v805_v0 }
  0x20   :  { %676 = vst [vmem:[%s1867_s1 + $0x608] sm:$0xff] %v805_v0  ;;  %677 = vst [vmem:[%s1867_s1 + $0x688] sm:$0xff] %v805_v0 }
  0x21   :  { %678 = vst [vmem:[%s1867_s1 + $0x708] sm:$0xff] %v805_v0  ;;  %679 = vst [vmem:[%s1867_s1 + $0x788] sm:$0xff] %v805_v0 }
  0x22   :  { %680 = vst [vmem:[%s1867_s1 + $0x18] sm:$0xff] %v810_v1  ;;  %681 = vst [vmem:[%s1867_s1 + $0x98] sm:$0xff] %v810_v1 }
  0x23   :  { %682 = vst [vmem:[%s1867_s1 + $0x118] sm:$0xff] %v810_v1  ;;  %683 = vst [vmem:[%s1867_s1 + $0x198] sm:$0xff] %v810_v1 }
  0x24   :  { %684 = vst [vmem:[%s1867_s1 + $0x218] sm:$0xff] %v810_v1  ;;  %685 = vst [vmem:[%s1867_s1 + $0x298] sm:$0xff] %v810_v1 }
  0x25   :  { %686 = vst [vmem:[%s1867_s1 + $0x318] sm:$0xff] %v810_v1  ;;  %687 = vst [vmem:[%s1867_s1 + $0x398] sm:$0xff] %v810_v1 }
  0x26   :  { %688 = vst [vmem:[%s1867_s1 + $0x418] sm:$0xff] %v810_v1  ;;  %689 = vst [vmem:[%s1867_s1 + $0x498] sm:$0xff] %v810_v1 }
  0x27   :  { %690 = vst [vmem:[%s1867_s1 + $0x518] sm:$0xff] %v810_v1  ;;  %691 = vst [vmem:[%s1867_s1 + $0x598] sm:$0xff] %v810_v1 }
  0x28   :  { %692 = vst [vmem:[%s1867_s1 + $0x618] sm:$0xff] %v810_v1  ;;  %693 = vst [vmem:[%s1867_s1 + $0x698] sm:$0xff] %v810_v1 }
  0x29   :  { %694 = vst [vmem:[%s1867_s1 + $0x718] sm:$0xff] %v810_v1  ;;  %695 = vst [vmem:[%s1867_s1 + $0x798] sm:$0xff] %v810_v1 }
  0x2a   :  { %696 = vst [vmem:[%s1867_s1 + $0x28] sm:$0xff] %v815_v2  ;;  %697 = vst [vmem:[%s1867_s1 + $0xa8] sm:$0xff] %v815_v2 }
  0x2b   :  { %698 = vst [vmem:[%s1867_s1 + $0x128] sm:$0xff] %v815_v2  ;;  %699 = vst [vmem:[%s1867_s1 + $0x1a8] sm:$0xff] %v815_v2 }
  0x2c   :  { %700 = vst [vmem:[%s1867_s1 + $0x228] sm:$0xff] %v815_v2  ;;  %701 = vst [vmem:[%s1867_s1 + $0x2a8] sm:$0xff] %v815_v2 }
  0x2d   :  { %702 = vst [vmem:[%s1867_s1 + $0x328] sm:$0xff] %v815_v2  ;;  %703 = vst [vmem:[%s1867_s1 + $0x3a8] sm:$0xff] %v815_v2 }
  0x2e   :  { %704 = vst [vmem:[%s1867_s1 + $0x428] sm:$0xff] %v815_v2  ;;  %705 = vst [vmem:[%s1867_s1 + $0x4a8] sm:$0xff] %v815_v2 }
  0x2f   :  { %706 = vst [vmem:[%s1867_s1 + $0x528] sm:$0xff] %v815_v2  ;;  %707 = vst [vmem:[%s1867_s1 + $0x5a8] sm:$0xff] %v815_v2 }
  0x30   :  { %708 = vst [vmem:[%s1867_s1 + $0x628] sm:$0xff] %v815_v2  ;;  %709 = vst [vmem:[%s1867_s1 + $0x6a8] sm:$0xff] %v815_v2 }
  0x31   :  { %710 = vst [vmem:[%s1867_s1 + $0x728] sm:$0xff] %v815_v2  ;;  %711 = vst [vmem:[%s1867_s1 + $0x7a8] sm:$0xff] %v815_v2 }
  0x32   :  { %580 = vst [vmem:[%s1867_s1 + $0x30] sm:$0xff] %v1012_v3  ;;  %581 = vst [vmem:[%s1867_s1 + $0xb0] sm:$0xff] %v1012_v3 }
  0x33   :  { %582 = vst [vmem:[%s1867_s1 + $0x130] sm:$0xff] %v1012_v3  ;;  %583 = vst [vmem:[%s1867_s1 + $0x1b0] sm:$0xff] %v1012_v3 }
  0x34   :  { %584 = vst [vmem:[%s1867_s1 + $0x230] sm:$0xff] %v1012_v3  ;;  %585 = vst [vmem:[%s1867_s1 + $0x2b0] sm:$0xff] %v1012_v3 }
  0x35   :  { %586 = vst [vmem:[%s1867_s1 + $0x330] sm:$0xff] %v1012_v3  ;;  %587 = vst [vmem:[%s1867_s1 + $0x3b0] sm:$0xff] %v1012_v3 }
  0x36   :  { %588 = vst [vmem:[%s1867_s1 + $0x430] sm:$0xff] %v1012_v3  ;;  %589 = vst [vmem:[%s1867_s1 + $0x4b0] sm:$0xff] %v1012_v3 }
  0x37   :  { %590 = vst [vmem:[%s1867_s1 + $0x530] sm:$0xff] %v1012_v3  ;;  %591 = vst [vmem:[%s1867_s1 + $0x5b0] sm:$0xff] %v1012_v3 }
  0x38   :  { %592 = vst [vmem:[%s1867_s1 + $0x630] sm:$0xff] %v1012_v3  ;;  %593 = vst [vmem:[%s1867_s1 + $0x6b0] sm:$0xff] %v1012_v3 }
  0x39   :  { %594 = vst [vmem:[%s1867_s1 + $0x730] sm:$0xff] %v1012_v3  ;;  %595 = vst [vmem:[%s1867_s1 + $0x7b0] sm:$0xff] %v1012_v3 }
  0x3a   :  { %597 = vst [vmem:[%s1867_s1 + $0x40] sm:$0xff] %v1017_v4  ;;  %598 = vst [vmem:[%s1867_s1 + $0xc0] sm:$0xff] %v1017_v4 }
  0x3b   :  { %599 = vst [vmem:[%s1867_s1 + $0x140] sm:$0xff] %v1017_v4  ;;  %600 = vst [vmem:[%s1867_s1 + $0x1c0] sm:$0xff] %v1017_v4 }
  0x3c   :  { %601 = vst [vmem:[%s1867_s1 + $0x240] sm:$0xff] %v1017_v4  ;;  %602 = vst [vmem:[%s1867_s1 + $0x2c0] sm:$0xff] %v1017_v4 }
  0x3d   :  { %603 = vst [vmem:[%s1867_s1 + $0x340] sm:$0xff] %v1017_v4  ;;  %604 = vst [vmem:[%s1867_s1 + $0x3c0] sm:$0xff] %v1017_v4 }
  0x3e   :  { %605 = vst [vmem:[%s1867_s1 + $0x440] sm:$0xff] %v1017_v4  ;;  %606 = vst [vmem:[%s1867_s1 + $0x4c0] sm:$0xff] %v1017_v4 }
  0x3f   :  { %607 = vst [vmem:[%s1867_s1 + $0x540] sm:$0xff] %v1017_v4  ;;  %608 = vst [vmem:[%s1867_s1 + $0x5c0] sm:$0xff] %v1017_v4 }
  0x40   :  { %609 = vst [vmem:[%s1867_s1 + $0x640] sm:$0xff] %v1017_v4  ;;  %610 = vst [vmem:[%s1867_s1 + $0x6c0] sm:$0xff] %v1017_v4 }
  0x41   :  { %611 = vst [vmem:[%s1867_s1 + $0x740] sm:$0xff] %v1017_v4  ;;  %612 = vst [vmem:[%s1867_s1 + $0x7c0] sm:$0xff] %v1017_v4 }
  0x42   :  { %614 = vst [vmem:[%s1867_s1 + $0x50] sm:$0xff] %v1022_v5  ;;  %615 = vst [vmem:[%s1867_s1 + $0xd0] sm:$0xff] %v1022_v5 }
  0x43   :  { %616 = vst [vmem:[%s1867_s1 + $0x150] sm:$0xff] %v1022_v5  ;;  %617 = vst [vmem:[%s1867_s1 + $0x1d0] sm:$0xff] %v1022_v5 }
  0x44   :  { %618 = vst [vmem:[%s1867_s1 + $0x250] sm:$0xff] %v1022_v5  ;;  %619 = vst [vmem:[%s1867_s1 + $0x2d0] sm:$0xff] %v1022_v5 }
  0x45   :  { %620 = vst [vmem:[%s1867_s1 + $0x350] sm:$0xff] %v1022_v5  ;;  %621 = vst [vmem:[%s1867_s1 + $0x3d0] sm:$0xff] %v1022_v5 }
  0x46   :  { %622 = vst [vmem:[%s1867_s1 + $0x450] sm:$0xff] %v1022_v5  ;;  %623 = vst [vmem:[%s1867_s1 + $0x4d0] sm:$0xff] %v1022_v5 }
  0x47   :  { %624 = vst [vmem:[%s1867_s1 + $0x550] sm:$0xff] %v1022_v5  ;;  %625 = vst [vmem:[%s1867_s1 + $0x5d0] sm:$0xff] %v1022_v5 }
  0x48   :  { %626 = vst [vmem:[%s1867_s1 + $0x650] sm:$0xff] %v1022_v5  ;;  %627 = vst [vmem:[%s1867_s1 + $0x6d0] sm:$0xff] %v1022_v5 }
  0x49   :  { %628 = vst [vmem:[%s1867_s1 + $0x750] sm:$0xff] %v1022_v5  ;;  %629 = vst [vmem:[%s1867_s1 + $0x7d0] sm:$0xff] %v1022_v5 }
  0x4a   :  { %712 = vst [vmem:[%s1867_s1 + $0x38] sm:$0xff] %v1012_v3  ;;  %713 = vst [vmem:[%s1867_s1 + $0xb8] sm:$0xff] %v1012_v3 }
  0x4b   :  { %714 = vst [vmem:[%s1867_s1 + $0x138] sm:$0xff] %v1012_v3  ;;  %715 = vst [vmem:[%s1867_s1 + $0x1b8] sm:$0xff] %v1012_v3 }
  0x4c   :  { %716 = vst [vmem:[%s1867_s1 + $0x238] sm:$0xff] %v1012_v3  ;;  %717 = vst [vmem:[%s1867_s1 + $0x2b8] sm:$0xff] %v1012_v3 }
  0x4d   :  { %718 = vst [vmem:[%s1867_s1 + $0x338] sm:$0xff] %v1012_v3  ;;  %719 = vst [vmem:[%s1867_s1 + $0x3b8] sm:$0xff] %v1012_v3 }
  0x4e   :  { %720 = vst [vmem:[%s1867_s1 + $0x438] sm:$0xff] %v1012_v3  ;;  %721 = vst [vmem:[%s1867_s1 + $0x4b8] sm:$0xff] %v1012_v3 }
  0x4f   :  { %722 = vst [vmem:[%s1867_s1 + $0x538] sm:$0xff] %v1012_v3  ;;  %723 = vst [vmem:[%s1867_s1 + $0x5b8] sm:$0xff] %v1012_v3 }
  0x50   :  { %724 = vst [vmem:[%s1867_s1 + $0x638] sm:$0xff] %v1012_v3  ;;  %725 = vst [vmem:[%s1867_s1 + $0x6b8] sm:$0xff] %v1012_v3 }
  0x51   :  { %726 = vst [vmem:[%s1867_s1 + $0x738] sm:$0xff] %v1012_v3  ;;  %727 = vst [vmem:[%s1867_s1 + $0x7b8] sm:$0xff] %v1012_v3 }
  0x52   :  { %728 = vst [vmem:[%s1867_s1 + $0x48] sm:$0xff] %v1017_v4  ;;  %729 = vst [vmem:[%s1867_s1 + $0xc8] sm:$0xff] %v1017_v4 }
  0x53   :  { %730 = vst [vmem:[%s1867_s1 + $0x148] sm:$0xff] %v1017_v4  ;;  %731 = vst [vmem:[%s1867_s1 + $0x1c8] sm:$0xff] %v1017_v4 }
  0x54   :  { %732 = vst [vmem:[%s1867_s1 + $0x248] sm:$0xff] %v1017_v4  ;;  %733 = vst [vmem:[%s1867_s1 + $0x2c8] sm:$0xff] %v1017_v4 }
  0x55   :  { %734 = vst [vmem:[%s1867_s1 + $0x348] sm:$0xff] %v1017_v4  ;;  %735 = vst [vmem:[%s1867_s1 + $0x3c8] sm:$0xff] %v1017_v4 }
  0x56   :  { %736 = vst [vmem:[%s1867_s1 + $0x448] sm:$0xff] %v1017_v4  ;;  %737 = vst [vmem:[%s1867_s1 + $0x4c8] sm:$0xff] %v1017_v4 }
  0x57   :  { %738 = vst [vmem:[%s1867_s1 + $0x548] sm:$0xff] %v1017_v4  ;;  %739 = vst [vmem:[%s1867_s1 + $0x5c8] sm:$0xff] %v1017_v4 }
  0x58   :  { %740 = vst [vmem:[%s1867_s1 + $0x648] sm:$0xff] %v1017_v4  ;;  %741 = vst [vmem:[%s1867_s1 + $0x6c8] sm:$0xff] %v1017_v4 }
  0x59   :  { %742 = vst [vmem:[%s1867_s1 + $0x748] sm:$0xff] %v1017_v4  ;;  %743 = vst [vmem:[%s1867_s1 + $0x7c8] sm:$0xff] %v1017_v4 }
  0x5a   :  { %744 = vst [vmem:[%s1867_s1 + $0x58] sm:$0xff] %v1022_v5  ;;  %745 = vst [vmem:[%s1867_s1 + $0xd8] sm:$0xff] %v1022_v5 }
  0x5b   :  { %746 = vst [vmem:[%s1867_s1 + $0x158] sm:$0xff] %v1022_v5  ;;  %747 = vst [vmem:[%s1867_s1 + $0x1d8] sm:$0xff] %v1022_v5 }
  0x5c   :  { %748 = vst [vmem:[%s1867_s1 + $0x258] sm:$0xff] %v1022_v5  ;;  %749 = vst [vmem:[%s1867_s1 + $0x2d8] sm:$0xff] %v1022_v5 }
  0x5d   :  { %750 = vst [vmem:[%s1867_s1 + $0x358] sm:$0xff] %v1022_v5  ;;  %751 = vst [vmem:[%s1867_s1 + $0x3d8] sm:$0xff] %v1022_v5 }
  0x5e   :  { %752 = vst [vmem:[%s1867_s1 + $0x458] sm:$0xff] %v1022_v5  ;;  %753 = vst [vmem:[%s1867_s1 + $0x4d8] sm:$0xff] %v1022_v5 }
  0x5f   :  { %754 = vst [vmem:[%s1867_s1 + $0x558] sm:$0xff] %v1022_v5  ;;  %755 = vst [vmem:[%s1867_s1 + $0x5d8] sm:$0xff] %v1022_v5 }
  0x60   :  { %756 = vst [vmem:[%s1867_s1 + $0x658] sm:$0xff] %v1022_v5  ;;  %757 = vst [vmem:[%s1867_s1 + $0x6d8] sm:$0xff] %v1022_v5 }
  0x61   :  { %758 = vst [vmem:[%s1867_s1 + $0x758] sm:$0xff] %v1022_v5  ;;  %759 = vst [vmem:[%s1867_s1 + $0x7d8] sm:$0xff] %v1022_v5 }
  0x62   :  { %631 = vst [vmem:[%s1867_s1 + $0x60] sm:$0xff] %v1411_v6  ;;  %632 = vst [vmem:[%s1867_s1 + $0xe0] sm:$0xff] %v1411_v6 }
  0x63   :  { %633 = vst [vmem:[%s1867_s1 + $0x160] sm:$0xff] %v1411_v6  ;;  %634 = vst [vmem:[%s1867_s1 + $0x1e0] sm:$0xff] %v1411_v6 }
  0x64   :  { %635 = vst [vmem:[%s1867_s1 + $0x260] sm:$0xff] %v1411_v6  ;;  %636 = vst [vmem:[%s1867_s1 + $0x2e0] sm:$0xff] %v1411_v6 }
  0x65   :  { %637 = vst [vmem:[%s1867_s1 + $0x360] sm:$0xff] %v1411_v6  ;;  %638 = vst [vmem:[%s1867_s1 + $0x3e0] sm:$0xff] %v1411_v6 }
  0x66   :  { %639 = vst [vmem:[%s1867_s1 + $0x460] sm:$0xff] %v1411_v6  ;;  %640 = vst [vmem:[%s1867_s1 + $0x4e0] sm:$0xff] %v1411_v6 }
  0x67   :  { %641 = vst [vmem:[%s1867_s1 + $0x560] sm:$0xff] %v1411_v6  ;;  %642 = vst [vmem:[%s1867_s1 + $0x5e0] sm:$0xff] %v1411_v6 }
  0x68   :  { %643 = vst [vmem:[%s1867_s1 + $0x660] sm:$0xff] %v1411_v6  ;;  %644 = vst [vmem:[%s1867_s1 + $0x6e0] sm:$0xff] %v1411_v6 }
  0x69   :  { %645 = vst [vmem:[%s1867_s1 + $0x760] sm:$0xff] %v1411_v6  ;;  %646 = vst [vmem:[%s1867_s1 + $0x7e0] sm:$0xff] %v1411_v6 }
  0x6a   :  { %648 = vst [vmem:[%s1867_s1 + $0x70] sm:$0xff] %v1416_v7  ;;  %649 = vst [vmem:[%s1867_s1 + $0xf0] sm:$0xff] %v1416_v7 }
  0x6b   :  { %650 = vst [vmem:[%s1867_s1 + $0x170] sm:$0xff] %v1416_v7  ;;  %651 = vst [vmem:[%s1867_s1 + $0x1f0] sm:$0xff] %v1416_v7 }
  0x6c   :  { %652 = vst [vmem:[%s1867_s1 + $0x270] sm:$0xff] %v1416_v7  ;;  %653 = vst [vmem:[%s1867_s1 + $0x2f0] sm:$0xff] %v1416_v7 }
  0x6d   :  { %654 = vst [vmem:[%s1867_s1 + $0x370] sm:$0xff] %v1416_v7  ;;  %655 = vst [vmem:[%s1867_s1 + $0x3f0] sm:$0xff] %v1416_v7 }
  0x6e   :  { %656 = vst [vmem:[%s1867_s1 + $0x470] sm:$0xff] %v1416_v7  ;;  %657 = vst [vmem:[%s1867_s1 + $0x4f0] sm:$0xff] %v1416_v7 }
  0x6f   :  { %658 = vst [vmem:[%s1867_s1 + $0x570] sm:$0xff] %v1416_v7  ;;  %659 = vst [vmem:[%s1867_s1 + $0x5f0] sm:$0xff] %v1416_v7 }
  0x70   :  { %660 = vst [vmem:[%s1867_s1 + $0x670] sm:$0xff] %v1416_v7  ;;  %661 = vst [vmem:[%s1867_s1 + $0x6f0] sm:$0xff] %v1416_v7 }
  0x71   :  { %662 = vst [vmem:[%s1867_s1 + $0x770] sm:$0xff] %v1416_v7  ;;  %663 = vst [vmem:[%s1867_s1 + $0x7f0] sm:$0xff] %v1416_v7 }
  0x72   :  { %760 = vst [vmem:[%s1867_s1 + $0x68] sm:$0xff] %v1411_v6  ;;  %761 = vst [vmem:[%s1867_s1 + $0xe8] sm:$0xff] %v1411_v6 }
  0x73   :  { %762 = vst [vmem:[%s1867_s1 + $0x168] sm:$0xff] %v1411_v6  ;;  %763 = vst [vmem:[%s1867_s1 + $0x1e8] sm:$0xff] %v1411_v6 }
  0x74   :  { %764 = vst [vmem:[%s1867_s1 + $0x268] sm:$0xff] %v1411_v6  ;;  %765 = vst [vmem:[%s1867_s1 + $0x2e8] sm:$0xff] %v1411_v6 }
  0x75   :  { %766 = vst [vmem:[%s1867_s1 + $0x368] sm:$0xff] %v1411_v6  ;;  %767 = vst [vmem:[%s1867_s1 + $0x3e8] sm:$0xff] %v1411_v6 }
  0x76   :  { %768 = vst [vmem:[%s1867_s1 + $0x468] sm:$0xff] %v1411_v6  ;;  %769 = vst [vmem:[%s1867_s1 + $0x4e8] sm:$0xff] %v1411_v6 }
  0x77   :  { %770 = vst [vmem:[%s1867_s1 + $0x568] sm:$0xff] %v1411_v6  ;;  %771 = vst [vmem:[%s1867_s1 + $0x5e8] sm:$0xff] %v1411_v6 }
  0x78   :  { %772 = vst [vmem:[%s1867_s1 + $0x668] sm:$0xff] %v1411_v6  ;;  %773 = vst [vmem:[%s1867_s1 + $0x6e8] sm:$0xff] %v1411_v6 }
  0x79   :  { %774 = vst [vmem:[%s1867_s1 + $0x768] sm:$0xff] %v1411_v6  ;;  %775 = vst [vmem:[%s1867_s1 + $0x7e8] sm:$0xff] %v1411_v6 }
  0x7a   :  { %776 = vst [vmem:[%s1867_s1 + $0x78] sm:$0xff] %v1416_v7  ;;  %777 = vst [vmem:[%s1867_s1 + $0xf8] sm:$0xff] %v1416_v7 }
  0x7b   :  { %778 = vst [vmem:[%s1867_s1 + $0x178] sm:$0xff] %v1416_v7  ;;  %779 = vst [vmem:[%s1867_s1 + $0x1f8] sm:$0xff] %v1416_v7 }
  0x7c   :  { %780 = vst [vmem:[%s1867_s1 + $0x278] sm:$0xff] %v1416_v7  ;;  %781 = vst [vmem:[%s1867_s1 + $0x2f8] sm:$0xff] %v1416_v7 }
  0x7d   :  { %782 = vst [vmem:[%s1867_s1 + $0x378] sm:$0xff] %v1416_v7  ;;  %783 = vst [vmem:[%s1867_s1 + $0x3f8] sm:$0xff] %v1416_v7 }
  0x7e   :  { %784 = vst [vmem:[%s1867_s1 + $0x478] sm:$0xff] %v1416_v7  ;;  %785 = vst [vmem:[%s1867_s1 + $0x4f8] sm:$0xff] %v1416_v7 }
  0x7f   :  { %786 = vst [vmem:[%s1867_s1 + $0x578] sm:$0xff] %v1416_v7  ;;  %787 = vst [vmem:[%s1867_s1 + $0x5f8] sm:$0xff] %v1416_v7 }
  0x80   :  { %788 = vst [vmem:[%s1867_s1 + $0x678] sm:$0xff] %v1416_v7  ;;  %789 = vst [vmem:[%s1867_s1 + $0x6f8] sm:$0xff] %v1416_v7 }
  0x81   :  { %790 = vst [vmem:[%s1867_s1 + $0x778] sm:$0xff] %v1416_v7  ;;  %791 = vst [vmem:[%s1867_s1 + $0x7f8] sm:$0xff] %v1416_v7 }

// kernel: tile.39
= control target key start
LH: loop header
LB: loop body
LE: loop exit
PB: predicated region body
PF: predicated region fallthrough
CT: control target
= control target key end

     0   :  { %vm6_vm0 = vcmask 1043458   ;;  %s379_s6 = smov 3  ;;  %vm10_vm1 = vcmask 1045508   ;;  %vm14_vm2 = vcmask 1047558   ;;  %s382_s9 = smov 12  ;;  %vm16_vm3 = vcmask 64512   ;;  %s12308_s0 = inlined_call_operand.vmem [shape: f32[16,8,16,8], index: 0, kind: input, shape index: {}]   ;;  %s12309_s1 = inlined_call_operand.vmem [shape: f32[128,128], index: 1, kind: output, shape index: {}]  }
   0x1   :  { %v5922_v0 = vld [vmem:[%s12308_s0 + $0x40f] ss:$16 sm:%s379_s6]   ;;  %s387_s10 = smov 48  ;;  %s392_s15 = smov 192  ;;  %vm353_vm4 = vcmask 1048512   ;;  %vm720_vm5 = vcmask 982912  }
   0x2   :  { %v5923_v1 = vld [vmem:[%s12308_s0 + $0x40f] ss:$16 sm:%s382_s9]   ;;  %s334_s16 = smov 3  ;;  %s337_s21 = smov 12  ;;  %vm1087_vm6 = vcmask 917312   ;;  %vm1454_vm7 = vcmask 851712  }
   0x3   :  { %v5924_v2 = vld [vmem:[%s12308_s0 + $0x40f] ss:$16 sm:%s387_s10]   ;;  %v385_v3 = vsel %vm6_vm0, %v5923_v1, %v5922_v0  ;;  %s342_s22 = smov 48  ;;  %s347_s27 = smov 192  ;;  %vm1821_vm8 = vcmask 786112   ;;  %vm2188_vm9 = vcmask 720512  }
   0x4   :  { %v5925_v4 = vld [vmem:[%s12308_s0 + $0x40f] ss:$16 sm:%s392_s15]   ;;  %v390_v6 = vsel %vm10_vm1, %v5924_v2, %v385_v3  ;;  %s402_s28 = smov 3  ;;  %s405_s4 = smov 12  ;;  %vm2555_vm10 = vcmask 654912   ;;  %vm2922_vm11 = vcmask 589312  }
   0x5   :  { %v5913_v5 = vld [vmem:[%s12308_s0 + $0xf] ss:$16 sm:%s334_s16]   ;;  %v395_v9 = vsel %vm14_vm2, %v5925_v4, %v390_v6  ;;  %s410_s5 = smov 48  ;;  %s7113_s6 = smov 120   ;;  %vm3289_vm12 = vcmask 523712   ;;  %vm3656_vm13 = vcmask 458112  }
   0x6   :  { %v5914_v7 = vld [vmem:[%s12308_s0 + $0xf] ss:$16 sm:%s337_s21]   ;;  %396 = vrot.lane.b32.xlu1 %v395_v9, %s7113_s6  ;;  %s415_s9 = smov 192  ;;  %s356_s10 = smov 3  ;;  %vm4023_vm14 = vcmask 392512   ;;  %vm4390_vm15 = vcmask 326912  }
   0x7   :  { %v5915_v8 = vld [vmem:[%s12308_s0 + $0xf] ss:$16 sm:%s342_s22]   ;;  %v340_v10 = vsel %vm6_vm0, %v5914_v7, %v5913_v5  ;;  %s359_s15 = smov 12  ;;  %s364_s16 = smov 48 }
   0x8   :  { %v5916_v11 = vld [vmem:[%s12308_s0 + $0xf] ss:$16 sm:%s347_s27]   ;;  %v345_v13 = vsel %vm10_vm1, %v5915_v8, %v340_v10  ;;  %s369_s19 = smov 192  ;;  %s448_s20 = smov 3 }
   0x9   :  { %v5927_v12 = vld [vmem:[%s12308_s0 + $0x60f] ss:$16 sm:%s402_s28]   ;;  %v350_v15 = vsel %vm14_vm2, %v5916_v11, %v345_v13  ;;  %s451_s25 = smov 12  ;;  %s456_s26 = smov 48 }
   0xa   :  { %v5928_v14 = vld [vmem:[%s12308_s0 + $0x60f] ss:$16 sm:%s405_s4]   ;;  %351 = vrot.lane.b32.xlu0 %v350_v15, %s7113_s6  ;;  %s461_s29 = smov 192  ;;  %s425_s30 = smov 3 }
   0xb   :  { %v408_v16 = vsel %vm6_vm0, %v5928_v14, %v5927_v12  ;;  %v5929_v17 = vld [vmem:[%s12308_s0 + $0x60f] ss:$16 sm:%s410_s5]   ;;  %s428_s7 = smov 12  ;;  %s433_s8 = smov 48 }
   0xc   :  { %v5930_v18 = vld [vmem:[%s12308_s0 + $0x60f] ss:$16 sm:%s415_s9]   ;;  %v413_v19 = vsel %vm10_vm1, %v5929_v17, %v408_v16  ;;  %s438_s13 = smov 192  ;;  %s497_s17 = smov 12 }
   0xd   :  { %v5917_v20 = vld [vmem:[%s12308_s0 + $0x20f] ss:$16 sm:%s356_s10]   ;;  %v418_v21 = vsel %vm14_vm2, %v5930_v18, %v413_v19  ;;  %s502_s22 = smov 48  ;;  %s507_s23 = smov 192 }
   0xe   :  { %v5918_v22 = vld [vmem:[%s12308_s0 + $0x20f] ss:$16 sm:%s359_s15]   ;;  %419 = vrot.lane.b32.xlu1 %v418_v21, %s7113_s6  ;;  %s474_s2 = smov 12  ;;  %s479_s3 = smov 48 }
   0xf   :  { %v5919_v23 = vld [vmem:[%s12308_s0 + $0x20f] ss:$16 sm:%s364_s16]   ;;  %v362_v24 = vsel %vm6_vm0, %v5918_v22, %v5917_v20  ;;  %s494_s16 = smov 3  ;;  %s484_s9 = smov 192 }
  0x10   :  { %v5920_v25 = vld [vmem:[%s12308_s0 + $0x20f] ss:$16 sm:%s369_s19]   ;;  %v367_v26 = vsel %vm10_vm1, %v5919_v23, %v362_v24  ;;  %s540_s12 = smov 3  ;;  %s548_s18 = smov 48 }
  0x11   :  { %v5937_v27 = vld [vmem:[%s12308_s0 + $0x28f] ss:$16 sm:%s448_s20]   ;;  %v372_v29 = vsel %vm14_vm2, %v5920_v25, %v367_v26  ;;  %s553_s19 = smov 192  ;;  %s520_s27 = smov 12 }
  0x12   :  { %v5938_v28 = vld [vmem:[%s12308_s0 + $0x28f] ss:$16 sm:%s451_s25]   ;;  %373 = vrot.lane.b32.xlu0 %v372_v29, %s7113_s6  ;;  %s525_s28 = smov 48  ;;  %s530_s4 = smov 192 }
  0x13   :  { %v454_v30 = vsel %vm6_vm0, %v5938_v28, %v5937_v27  ;;  %v5939_v31 = vld [vmem:[%s12308_s0 + $0x28f] ss:$16 sm:%s456_s26]   ;;  %s471_s26 = smov 3  ;;  %s594_s14 = smov 48 }
  0x14   :  { %v5940_v32 = vld [vmem:[%s12308_s0 + $0x28f] ss:$16 sm:%s461_s29]   ;;  %v459_v33 = vsel %vm10_vm1, %v5939_v31, %v454_v30  ;;  %s599_s15 = smov 192  ;;  %s571_s24 = smov 48 }
  0x15   :  { %v5932_v34 = vld [vmem:[%s12308_s0 + $0x8f] ss:$16 sm:%s425_s30]   ;;  %v464_v35 = vsel %vm14_vm2, %v5940_v32, %v459_v33  ;;  %s576_s29 = smov 192  ;;  %s640_s10 = smov 48 }
  0x16   :  { %v5933_v36 = vld [vmem:[%s12308_s0 + $0x8f] ss:$16 sm:%s428_s7]   ;;  %465 = vrot.lane.b32.xlu1 %v464_v35, %s7113_s6  ;;  %s645_s11 = smov 192  ;;  %s617_s20 = smov 48 }
  0x17   :  { %v5934_v37 = vld [vmem:[%s12308_s0 + $0x8f] ss:$16 sm:%s433_s8]   ;;  %v431_v38 = vsel %vm6_vm0, %v5933_v36, %v5932_v34  ;;  %s586_s8 = smov 3  ;;  %s622_s25 = smov 192 }
  0x18   :  { %v5935_v39 = vld [vmem:[%s12308_s0 + $0x8f] ss:$16 sm:%s438_s13]   ;;  %v436_v40 = vsel %vm10_vm1, %v5934_v37, %v431_v38  ;;  %s543_s13 = smov 12  ;;  %s686_s5 = smov 48 }
  0x19   :  { %v5947_v41 = vld [vmem:[%s12308_s0 + $0x68f] ss:$16 sm:%s494_s16]   ;;  %v441_v43 = vsel %vm14_vm2, %v5935_v39, %v436_v40  ;;  %s691_s7 = smov 192  ;;  %s663_s16 = smov 48 }
  0x1a   :  { %v5948_v42 = vld [vmem:[%s12308_s0 + $0x68f] ss:$16 sm:%s497_s17]   ;;  %442 = vrot.lane.b32.xlu0 %v441_v43, %s7113_s6  ;;  %s668_s21 = smov 192  ;;  %s731_s30 = smov 48 }
  0x1b   :  { %v500_v44 = vsel %vm6_vm0, %v5948_v42, %v5947_v41  ;;  %v5949_v45 = vld [vmem:[%s12308_s0 + $0x68f] ss:$16 sm:%s502_s22]   ;;  %s517_s22 = smov 3  ;;  %s714_s17 = smov 192 }
  0x1c   :  { %v5950_v46 = vld [vmem:[%s12308_s0 + $0x68f] ss:$16 sm:%s507_s23]   ;;  %v505_v47 = vsel %vm10_vm1, %v5949_v45, %v500_v44  ;;  %s566_s23 = smov 12 }
  0x1d   :  { %v5942_v48 = vld [vmem:[%s12308_s0 + $0x48f] ss:$16 sm:%s471_s26]   ;;  %v510_v49 = vsel %vm14_vm2, %v5950_v46, %v505_v47  ;;  %s782_s26 = smov 192 }
  0x1e   :  { %v5943_v50 = vld [vmem:[%s12308_s0 + $0x48f] ss:$16 sm:%s474_s2]   ;;  %511 = vrot.lane.b32.xlu1 %v510_v49, %s7113_s6  ;;  %s736_s2 = smov 192 }
  0x1f   :  { %v5944_v51 = vld [vmem:[%s12308_s0 + $0x48f] ss:$16 sm:%s479_s3]   ;;  %v477_v52 = vsel %vm6_vm0, %v5943_v50, %v5942_v48  ;;  %s632_s3 = smov 3 }
  0x20   :  { %v5945_v53 = vld [vmem:[%s12308_s0 + $0x48f] ss:$16 sm:%s484_s9]   ;;  %v482_v54 = vsel %vm10_vm1, %v5944_v51, %v477_v52  ;;  %s589_s9 = smov 12  ;;  %v5998_v51 = vld [vmem:[%s12308_s0 + $0x20e] ss:$16 sm:%s731_s30]   ;;  %s746_s30 = smov 3 }
  0x21   :  { %v5957_v55 = vld [vmem:[%s12308_s0 + $0x30f] ss:$16 sm:%s540_s12]   ;;  %v487_v57 = vsel %vm14_vm2, %v5945_v53, %v482_v54  ;;  %s709_s12 = smov 48  ;;  %v5999_v52 = vld [vmem:[%s12308_s0 + $0x20e] ss:$16 sm:%s736_s2]   ;;  %s795_s2 = smov 12 }
  0x22   :  { %v5958_v56 = vld [vmem:[%s12308_s0 + $0x30f] ss:$16 sm:%s543_s13]   ;;  %488 = vrot.lane.b32.xlu0 %v487_v57, %s7113_s6  ;;  %s759_s13 = smov 192 }
  0x23   :  { %v546_v58 = vsel %vm6_vm0, %v5958_v56, %v5957_v55  ;;  %v5959_v59 = vld [vmem:[%s12308_s0 + $0x30f] ss:$16 sm:%s548_s18]   ;;  %s563_s18 = smov 3  ;;  %v5994_v57 = vld [vmem:[%s12308_s0 + $0xe] ss:$16 sm:%s709_s12]   ;;  %s861_s12 = smov 3 }
  0x24   :  { %v5960_v60 = vld [vmem:[%s12308_s0 + $0x30f] ss:$16 sm:%s553_s19]   ;;  %v551_v61 = vsel %vm10_vm1, %v5959_v59, %v546_v58  ;;  %s612_s19 = smov 12  ;;  %v5995_v59 = vld [vmem:[%s12308_s0 + $0xe] ss:$16 sm:%s714_s17]   ;;  %s818_s17 = smov 12 }
  0x25   :  { %v5952_v62 = vld [vmem:[%s12308_s0 + $0x10f] ss:$16 sm:%s517_s22]   ;;  %v556_v63 = vsel %vm14_vm2, %v5960_v60, %v551_v61  ;;  %s828_s22 = smov 192 }
  0x26   :  { %v5953_v0 = vld [vmem:[%s12308_s0 + $0x10f] ss:$16 sm:%s520_s27]   ;;  %557 = vrot.lane.b32.xlu1 %v556_v63, %s7113_s6  ;;  %s7114_s27 = smov 112  }
  0x27   :  { %v5954_v1 = vld [vmem:[%s12308_s0 + $0x10f] ss:$16 sm:%s525_s28]   ;;  %v523_v2 = vsel %vm6_vm0, %v5953_v0, %v5952_v62  ;;  %s678_s28 = smov 3 }
  0x28   :  { %v5955_v3 = vld [vmem:[%s12308_s0 + $0x10f] ss:$16 sm:%s530_s4]   ;;  %v528_v4 = vsel %vm10_vm1, %v5954_v1, %v523_v2  ;;  %s635_s4 = smov 12  ;;  %v6009_v2 = vld [vmem:[%s12308_s0 + $0x60e] ss:$16 sm:%s782_s26]   ;;  %s841_s26 = smov 12 }
  0x29   :  { %v5967_v5 = vld [vmem:[%s12308_s0 + $0x70f] ss:$16 sm:%s586_s8]   ;;  %v533_v7 = vsel %vm14_vm2, %v5955_v3, %v528_v4  ;;  %s754_s8 = smov 48  ;;  %v6001_v4 = vld [vmem:[%s12308_s0 + $0x40e] ss:$16 sm:%s746_s30]   ;;  %s1053_s30 = smov 48 }
  0x2a   :  { %v5968_v6 = vld [vmem:[%s12308_s0 + $0x70f] ss:$16 sm:%s589_s9]   ;;  %534 = vrot.lane.b32.xlu0 %v533_v7, %s7113_s6  ;;  %s805_s9 = smov 192 }
  0x2b   :  { %v592_v8 = vsel %vm6_vm0, %v5968_v6, %v5967_v5  ;;  %v5969_v9 = vld [vmem:[%s12308_s0 + $0x70f] ss:$16 sm:%s594_s14]   ;;  %s609_s14 = smov 3  ;;  %v6003_v7 = vld [vmem:[%s12308_s0 + $0x40e] ss:$16 sm:%s754_s8]   ;;  %s907_s8 = smov 3 }
  0x2c   :  { %v5970_v10 = vld [vmem:[%s12308_s0 + $0x70f] ss:$16 sm:%s599_s15]   ;;  %v597_v11 = vsel %vm10_vm1, %v5969_v9, %v592_v8  ;;  %s658_s15 = smov 12  ;;  %v6004_v9 = vld [vmem:[%s12308_s0 + $0x40e] ss:$16 sm:%s759_s13]   ;;  %s864_s13 = smov 12 }
  0x2d   :  { %v5962_v12 = vld [vmem:[%s12308_s0 + $0x50f] ss:$16 sm:%s563_s18]   ;;  %v602_v13 = vsel %vm14_vm2, %v5970_v10, %v597_v11  ;;  %s874_s18 = smov 192 }
  0x2e   :  { %v5963_v14 = vld [vmem:[%s12308_s0 + $0x50f] ss:$16 sm:%s566_s23]   ;;  %603 = vrot.lane.b32.xlu1 %v602_v13, %s7113_s6  ;;  %s892_s23 = smov 48 }
  0x2f   :  { %v5964_v15 = vld [vmem:[%s12308_s0 + $0x50f] ss:$16 sm:%s571_s24]   ;;  %v569_v16 = vsel %vm6_vm0, %v5963_v14, %v5962_v12  ;;  %s723_s24 = smov 3  ;;  %v6017_v12 = vld [vmem:[%s12308_s0 + $0x28e] ss:$16 sm:%s818_s17]   ;;  %s1035_s17 = smov 192 }
  0x30   :  { %v5965_v17 = vld [vmem:[%s12308_s0 + $0x50f] ss:$16 sm:%s576_s29]   ;;  %v574_v18 = vsel %vm10_vm1, %v5964_v15, %v569_v16  ;;  %s681_s29 = smov 12  ;;  %v5996_v47 = vld [vmem:[%s12308_s0 + $0x20e] ss:$16 sm:%s723_s24]   ;;  %s943_s24 = smov 192 }
  0x31   :  { %v5977_v19 = vld [vmem:[%s12308_s0 + $0x38f] ss:$16 sm:%s632_s3]   ;;  %v579_v21 = vsel %vm14_vm2, %v5965_v17, %v574_v18  ;;  %s800_s3 = smov 48  ;;  %v6019_v16 = vld [vmem:[%s12308_s0 + $0x28e] ss:$16 sm:%s828_s22]   ;;  %s887_s22 = smov 12 }
  0x32   :  { %v5978_v20 = vld [vmem:[%s12308_s0 + $0x38f] ss:$16 sm:%s635_s4]   ;;  %580 = vrot.lane.b32.xlu0 %v579_v21, %s7113_s6  ;;  %s851_s4 = smov 192 }
  0x33   :  { %v638_v22 = vsel %vm6_vm0, %v5978_v20, %v5977_v19  ;;  %v5979_v23 = vld [vmem:[%s12308_s0 + $0x38f] ss:$16 sm:%s640_s10]   ;;  %s655_s10 = smov 3  ;;  %v6012_v20 = vld [vmem:[%s12308_s0 + $0x8e] ss:$16 sm:%s795_s2]   ;;  %s1058_s2 = smov 192 }
  0x34   :  { %v5980_v24 = vld [vmem:[%s12308_s0 + $0x38f] ss:$16 sm:%s645_s11]   ;;  %v643_v25 = vsel %vm10_vm1, %v5979_v23, %v638_v22  ;;  %s704_s11 = smov 12  ;;  %v6013_v21 = vld [vmem:[%s12308_s0 + $0x8e] ss:$16 sm:%s800_s3]   ;;  %s953_s3 = smov 3 }
  0x35   :  { %v5972_v26 = vld [vmem:[%s12308_s0 + $0x18f] ss:$16 sm:%s609_s14]   ;;  %v648_v27 = vsel %vm14_vm2, %v5980_v24, %v643_v25  ;;  %v5993_v56 = vld [vmem:[%s12308_s0 + $0xe] ss:$16 sm:%s704_s11]   ;;  %s915_s14 = smov 48  ;;  %s966_s11 = smov 192 }
  0x36   :  { %v5973_v28 = vld [vmem:[%s12308_s0 + $0x18f] ss:$16 sm:%s612_s19]   ;;  %649 = vrot.lane.b32.xlu1 %v648_v27, %s7113_s6  ;;  %s769_s19 = smov 3 }
  0x37   :  { %v5974_v29 = vld [vmem:[%s12308_s0 + $0x18f] ss:$16 sm:%s617_s20]   ;;  %v615_v30 = vsel %vm6_vm0, %v5973_v28, %v5972_v26  ;;  %s772_s20 = smov 12  ;;  %v6006_v61 = vld [vmem:[%s12308_s0 + $0x60e] ss:$16 sm:%s769_s19]   ;;  %s938_s19 = smov 48 }
  0x38   :  { %v5975_v31 = vld [vmem:[%s12308_s0 + $0x18f] ss:$16 sm:%s622_s25]   ;;  %v620_v32 = vsel %vm10_vm1, %v5974_v29, %v615_v30  ;;  %s726_s25 = smov 12  ;;  %v6007_v62 = vld [vmem:[%s12308_s0 + $0x60e] ss:$16 sm:%s772_s20]   ;;  %s989_s20 = smov 192 }
  0x39   :  { %v5987_v33 = vld [vmem:[%s12308_s0 + $0x78f] ss:$16 sm:%s678_s28]   ;;  %v625_v35 = vsel %vm14_vm2, %v5975_v31, %v620_v32  ;;  %v5997_v48 = vld [vmem:[%s12308_s0 + $0x20e] ss:$16 sm:%s726_s25]   ;;  %s777_s25 = smov 48  ;;  %v775_v0 = vsel %vm6_vm0, %v6007_v62, %v6006_v61  ;;  %s846_s28 = smov 48 }
  0x3a   :  { %v5988_v34 = vld [vmem:[%s12308_s0 + $0x78f] ss:$16 sm:%s681_s29]   ;;  %626 = vrot.lane.b32.xlu0 %v625_v35, %s7113_s6  ;;  %v729_v50 = vsel %vm6_vm0, %v5997_v48, %v5996_v47  ;;  %s897_s29 = smov 192 }
  0x3b   :  { %v684_v36 = vsel %vm6_vm0, %v5988_v34, %v5987_v33  ;;  %v5989_v37 = vld [vmem:[%s12308_s0 + $0x78f] ss:$16 sm:%s686_s5]   ;;  %s701_s5 = smov 3  ;;  %v734_v53 = vsel %vm10_vm1, %v5998_v51, %v729_v50  ;;  %v6008_v1 = vld [vmem:[%s12308_s0 + $0x60e] ss:$16 sm:%s777_s25]   ;;  %s792_s25 = smov 3 }
  0x3c   :  { %v5990_v38 = vld [vmem:[%s12308_s0 + $0x78f] ss:$16 sm:%s691_s7]   ;;  %v689_v39 = vsel %vm10_vm1, %v5989_v37, %v684_v36  ;;  %v5992_v54 = vld [vmem:[%s12308_s0 + $0xe] ss:$16 sm:%s701_s5]   ;;  %v739_v55 = vsel %vm14_vm2, %v5999_v52, %v734_v53  ;;  %s749_s7 = smov 12  ;;  %v780_v3 = vsel %vm10_vm1, %v6008_v1, %v775_v0  ;;  %s1007_s5 = smov 48 }
  0x3d   :  { %v5982_v40 = vld [vmem:[%s12308_s0 + $0x58f] ss:$16 sm:%s655_s10]   ;;  %v694_v41 = vsel %vm14_vm2, %v5990_v38, %v689_v39  ;;  %v707_v58 = vsel %vm6_vm0, %v5993_v56, %v5992_v54  ;;  %v785_v5 = vsel %vm14_vm2, %v6009_v2, %v780_v3  ;;  %v6002_v6 = vld [vmem:[%s12308_s0 + $0x40e] ss:$16 sm:%s749_s7]   ;;  %s961_s10 = smov 48  ;;  %s1012_s7 = smov 192 }
  0x3e   :  { %v5983_v42 = vld [vmem:[%s12308_s0 + $0x58f] ss:$16 sm:%s658_s15]   ;;  %695 = vrot.lane.b32.xlu1 %v694_v41, %s7113_s6  ;;  %v712_v60 = vsel %vm10_vm1, %v5994_v57, %v707_v58  ;;  %v752_v8 = vsel %vm6_vm0, %v6002_v6, %v6001_v4  ;;  %s920_s15 = smov 192 }
  0x3f   :  { %v5984_v43 = vld [vmem:[%s12308_s0 + $0x58f] ss:$16 sm:%s663_s16]   ;;  %v661_v44 = vsel %vm6_vm0, %v5983_v42, %v5982_v40  ;;  %v717_v63 = vsel %vm14_vm2, %v5995_v59, %v712_v60  ;;  %s815_s16 = smov 3  ;;  %v757_v10 = vsel %vm10_vm1, %v6003_v7, %v752_v8  ;;  %v6011_v18 = vld [vmem:[%s12308_s0 + $0x8e] ss:$16 sm:%s792_s25]   ;;  %s1098_s25 = smov 48 }
  0x40   :  { %v5985_v45 = vld [vmem:[%s12308_s0 + $0x58f] ss:$16 sm:%s668_s21]   ;;  %v666_v46 = vsel %vm10_vm1, %v5984_v43, %v661_v44  ;;  %s823_s21 = smov 48  ;;  %v6016_v11 = vld [vmem:[%s12308_s0 + $0x28e] ss:$16 sm:%s815_s16]   ;;  %v762_v13 = vsel %vm14_vm2, %v6004_v9, %v757_v10  ;;  %v798_v22 = vsel %vm6_vm0, %v6012_v20, %v6011_v18  ;;  %s984_s16 = smov 48 }
  0x41   :  { %v671_v49 = vsel %vm14_vm2, %v5985_v45, %v666_v46  ;;  %v821_v14 = vsel %vm6_vm0, %v6017_v12, %v6016_v11  ;;  %v6018_v15 = vld [vmem:[%s12308_s0 + $0x28e] ss:$16 sm:%s823_s21]   ;;  %s838_s21 = smov 3  ;;  %v803_v24 = vsel %vm10_vm1, %v6013_v21, %v798_v22 }
  0x42   :  { %672 = vrot.lane.b32.xlu0 %v671_v49, %s7113_s6  ;;  %740 = vrot.lane.b32.xlu1 %v739_v55, %s7114_s27  ;;  %v826_v17 = vsel %vm10_vm1, %v6018_v15, %v821_v14  ;;  %s869_s6 = smov 48  ;;  %v6014_v23 = vld [vmem:[%s12308_s0 + $0x8e] ss:$16 sm:%s805_s9]   ;;  %s910_s9 = smov 12 }
  0x43   :  { %v831_v19 = vsel %vm14_vm2, %v6019_v16, %v826_v17  ;;  %v6026_v25 = vld [vmem:[%s12308_s0 + $0x68e] ss:$16 sm:%s861_s12]   ;;  %v808_v27 = vsel %vm14_vm2, %v6014_v23, %v803_v24  ;;  %s1030_s12 = smov 48 }
  0x44   :  { %v6027_v26 = vld [vmem:[%s12308_s0 + $0x68e] ss:$16 sm:%s864_s13]   ;;  %s1081_s13 = smov 192 }
  0x45   :  { %v867_v28 = vsel %vm6_vm0, %v6027_v26, %v6026_v25  ;;  %v6028_v29 = vld [vmem:[%s12308_s0 + $0x68e] ss:$16 sm:%s869_s6]   ;;  %s884_s6 = smov 3 }
  0x46   :  { %718 = vrot.lane.b32.xlu0 %v717_v63, %s7114_s27  ;;  %786 = vrot.lane.b32.xlu1 %v785_v5, %s7114_s27  ;;  %v6029_v30 = vld [vmem:[%s12308_s0 + $0x68e] ss:$16 sm:%s874_s18]   ;;  %v872_v31 = vsel %vm10_vm1, %v6028_v29, %v867_v28  ;;  %s933_s18 = smov 12 }
  0x47   :  { %v6021_v32 = vld [vmem:[%s12308_s0 + $0x48e] ss:$16 sm:%s838_s21]   ;;  %v877_v33 = vsel %vm14_vm2, %v6029_v30, %v872_v31  ;;  %s1149_s21 = smov 192 }
  0x48   :  { %v6022_v34 = vld [vmem:[%s12308_s0 + $0x48e] ss:$16 sm:%s841_s26]   ;;  %s1103_s26 = smov 192 }
  0x49   :  { %v6023_v35 = vld [vmem:[%s12308_s0 + $0x48e] ss:$16 sm:%s846_s28]   ;;  %v844_v36 = vsel %vm6_vm0, %v6022_v34, %v6021_v32  ;;  %s999_s28 = smov 3 }
  0x4a   :  { %763 = vrot.lane.b32.xlu0 %v762_v13, %s7114_s27  ;;  %832 = vrot.lane.b32.xlu1 %v831_v19, %s7114_s27  ;;  %v6024_v37 = vld [vmem:[%s12308_s0 + $0x48e] ss:$16 sm:%s851_s4]   ;;  %v849_v38 = vsel %vm10_vm1, %v6023_v35, %v844_v36  ;;  %s956_s4 = smov 12 }
  0x4b   :  { %v6036_v39 = vld [vmem:[%s12308_s0 + $0x30e] ss:$16 sm:%s907_s8]   ;;  %v854_v41 = vsel %vm14_vm2, %v6024_v37, %v849_v38  ;;  %s1076_s8 = smov 48  ;;  %v6077_v35 = vld [vmem:[%s12308_s0 + $0x20d] ss:$16 sm:%s1098_s25]   ;;  %s1113_s25 = smov 3 }
  0x4c   :  { %v6037_v40 = vld [vmem:[%s12308_s0 + $0x30e] ss:$16 sm:%s910_s9]   ;;  %v6078_v36 = vld [vmem:[%s12308_s0 + $0x20d] ss:$16 sm:%s1103_s26]   ;;  %s1126_s9 = smov 192  ;;  %s1162_s26 = smov 12 }
  0x4d   :  { %v913_v42 = vsel %vm6_vm0, %v6037_v40, %v6036_v39  ;;  %v6038_v43 = vld [vmem:[%s12308_s0 + $0x30e] ss:$16 sm:%s915_s14]   ;;  %s930_s14 = smov 3 }
  0x4e   :  { %809 = vrot.lane.b32.xlu0 %v808_v27, %s7114_s27  ;;  %878 = vrot.lane.b32.xlu1 %v877_v33, %s7114_s27  ;;  %v6039_v44 = vld [vmem:[%s12308_s0 + $0x30e] ss:$16 sm:%s920_s15]   ;;  %v918_v45 = vsel %vm10_vm1, %v6038_v43, %v913_v42  ;;  %s979_s15 = smov 12 }
  0x4f   :  { %v6031_v46 = vld [vmem:[%s12308_s0 + $0x10e] ss:$16 sm:%s884_s6]   ;;  %v923_v47 = vsel %vm14_vm2, %v6039_v44, %v918_v45  ;;  %v6074_v43 = vld [vmem:[%s12308_s0 + $0xd] ss:$16 sm:%s1081_s13]   ;;  %s1185_s13 = smov 12  ;;  %s1195_s6 = smov 192 }
  0x50   :  { %v6032_v48 = vld [vmem:[%s12308_s0 + $0x10e] ss:$16 sm:%s887_s22]   ;;  %s7115_s22 = smov 104  }
  0x51   :  { %v6033_v49 = vld [vmem:[%s12308_s0 + $0x10e] ss:$16 sm:%s892_s23]   ;;  %v890_v50 = vsel %vm6_vm0, %v6032_v48, %v6031_v46  ;;  %s1045_s23 = smov 3 }
  0x52   :  { %855 = vrot.lane.b32.xlu0 %v854_v41, %s7114_s27  ;;  %924 = vrot.lane.b32.xlu1 %v923_v47, %s7114_s27  ;;  %v6034_v51 = vld [vmem:[%s12308_s0 + $0x10e] ss:$16 sm:%s897_s29]   ;;  %v895_v52 = vsel %vm10_vm1, %v6033_v49, %v890_v50  ;;  %s1002_s29 = smov 12 }
  0x53   :  { %v6046_v53 = vld [vmem:[%s12308_s0 + $0x70e] ss:$16 sm:%s953_s3]   ;;  %v900_v55 = vsel %vm14_vm2, %v6034_v51, %v895_v52  ;;  %v6073_v41 = vld [vmem:[%s12308_s0 + $0xd] ss:$16 sm:%s1076_s8]   ;;  %s1121_s3 = smov 48  ;;  %s1228_s8 = smov 3 }
  0x54   :  { %v6047_v54 = vld [vmem:[%s12308_s0 + $0x70e] ss:$16 sm:%s956_s4]   ;;  %v6088_v50 = vld [vmem:[%s12308_s0 + $0x60d] ss:$16 sm:%s1149_s21]   ;;  %s1172_s4 = smov 192  ;;  %s1208_s21 = smov 12 }
  0x55   :  { %v959_v56 = vsel %vm6_vm0, %v6047_v54, %v6046_v53  ;;  %v6048_v57 = vld [vmem:[%s12308_s0 + $0x70e] ss:$16 sm:%s961_s10]   ;;  %s976_s10 = smov 3  ;;  %v6080_v52 = vld [vmem:[%s12308_s0 + $0x40d] ss:$16 sm:%s1113_s25]   ;;  %s1420_s25 = smov 48 }
  0x56   :  { %v6049_v58 = vld [vmem:[%s12308_s0 + $0x70e] ss:$16 sm:%s966_s11]   ;;  %901 = vrot.lane.b32.xlu0 %v900_v55, %s7114_s27  ;;  %v964_v59 = vsel %vm10_vm1, %v6048_v57, %v959_v56  ;;  %s1025_s11 = smov 12 }
  0x57   :  { %v6041_v60 = vld [vmem:[%s12308_s0 + $0x50e] ss:$16 sm:%s930_s14]   ;;  %v969_v61 = vsel %vm14_vm2, %v6049_v58, %v964_v59  ;;  %v6082_v55 = vld [vmem:[%s12308_s0 + $0x40d] ss:$16 sm:%s1121_s3]   ;;  %s1241_s14 = smov 192  ;;  %s1274_s3 = smov 3 }
  0x58   :  { %v6042_v62 = vld [vmem:[%s12308_s0 + $0x50e] ss:$16 sm:%s933_s18]   ;;  %970 = vrot.lane.b32.xlu1 %v969_v61, %s7114_s27  ;;  %s1259_s18 = smov 48 }
  0x59   :  { %v6043_v63 = vld [vmem:[%s12308_s0 + $0x50e] ss:$16 sm:%s938_s19]   ;;  %v936_v0 = vsel %vm6_vm0, %v6042_v62, %v6041_v60  ;;  %s1090_s19 = smov 3  ;;  %v6083_v57 = vld [vmem:[%s12308_s0 + $0x40d] ss:$16 sm:%s1126_s9]   ;;  %s1231_s9 = smov 12 }
  0x5a   :  { %v6044_v1 = vld [vmem:[%s12308_s0 + $0x50e] ss:$16 sm:%s943_s24]   ;;  %v941_v2 = vsel %vm10_vm1, %v6043_v63, %v936_v0  ;;  %s1048_s24 = smov 12  ;;  %v6075_v31 = vld [vmem:[%s12308_s0 + $0x20d] ss:$16 sm:%s1090_s19]   ;;  %s1310_s19 = smov 192 }
  0x5b   :  { %v6056_v3 = vld [vmem:[%s12308_s0 + $0x38e] ss:$16 sm:%s999_s28]   ;;  %v946_v5 = vsel %vm14_vm2, %v6044_v1, %v941_v2  ;;  %v6096_v60 = vld [vmem:[%s12308_s0 + $0x28d] ss:$16 sm:%s1185_s13]   ;;  %s1167_s28 = smov 48  ;;  %s1402_s13 = smov 192 }
  0x5c   :  { %v6057_v4 = vld [vmem:[%s12308_s0 + $0x38e] ss:$16 sm:%s1002_s29]   ;;  %947 = vrot.lane.b32.xlu0 %v946_v5, %s7114_s27  ;;  %s1218_s29 = smov 192 }
  0x5d   :  { %v1005_v6 = vsel %vm6_vm0, %v6057_v4, %v6056_v3  ;;  %v6058_v7 = vld [vmem:[%s12308_s0 + $0x38e] ss:$16 sm:%s1007_s5]   ;;  %s1022_s5 = smov 3  ;;  %v6098_v0 = vld [vmem:[%s12308_s0 + $0x28d] ss:$16 sm:%s1195_s6]   ;;  %s1254_s6 = smov 12 }
  0x5e   :  { %v6059_v8 = vld [vmem:[%s12308_s0 + $0x38e] ss:$16 sm:%s1012_s7]   ;;  %v1010_v9 = vsel %vm10_vm1, %v6058_v7, %v1005_v6  ;;  %s1071_s7 = smov 12  ;;  %v6091_v4 = vld [vmem:[%s12308_s0 + $0x8d] ss:$16 sm:%s1162_s26]   ;;  %s1425_s26 = smov 192 }
  0x5f   :  { %v6051_v10 = vld [vmem:[%s12308_s0 + $0x18e] ss:$16 sm:%s976_s10]   ;;  %v1015_v11 = vsel %vm14_vm2, %v6059_v8, %v1010_v9  ;;  %v6072_v40 = vld [vmem:[%s12308_s0 + $0xd] ss:$16 sm:%s1071_s7]   ;;  %s1282_s10 = smov 48  ;;  %s1333_s7 = smov 192 }
  0x60   :  { %v6052_v12 = vld [vmem:[%s12308_s0 + $0x18e] ss:$16 sm:%s979_s15]   ;;  %1016 = vrot.lane.b32.xlu1 %v1015_v11, %s7114_s27  ;;  %s1136_s15 = smov 3 }
  0x61   :  { %v6053_v13 = vld [vmem:[%s12308_s0 + $0x18e] ss:$16 sm:%s984_s16]   ;;  %v982_v14 = vsel %vm6_vm0, %v6052_v12, %v6051_v10  ;;  %s1139_s16 = smov 12  ;;  %v6085_v45 = vld [vmem:[%s12308_s0 + $0x60d] ss:$16 sm:%s1136_s15]   ;;  %s1305_s15 = smov 48 }
  0x62   :  { %v6054_v15 = vld [vmem:[%s12308_s0 + $0x18e] ss:$16 sm:%s989_s20]   ;;  %v987_v16 = vsel %vm10_vm1, %v6053_v13, %v982_v14  ;;  %s1093_s20 = smov 12  ;;  %v6086_v46 = vld [vmem:[%s12308_s0 + $0x60d] ss:$16 sm:%s1139_s16]   ;;  %s1356_s16 = smov 192 }
  0x63   :  { %v6066_v17 = vld [vmem:[%s12308_s0 + $0x78e] ss:$16 sm:%s1045_s23]   ;;  %v992_v19 = vsel %vm14_vm2, %v6054_v15, %v987_v16  ;;  %v6076_v32 = vld [vmem:[%s12308_s0 + $0x20d] ss:$16 sm:%s1093_s20]   ;;  %s1144_s20 = smov 48  ;;  %v1142_v48 = vsel %vm6_vm0, %v6086_v46, %v6085_v45  ;;  %s1213_s23 = smov 48 }
  0x64   :  { %v6067_v18 = vld [vmem:[%s12308_s0 + $0x78e] ss:$16 sm:%s1048_s24]   ;;  %993 = vrot.lane.b32.xlu0 %v992_v19, %s7114_s27  ;;  %v1096_v34 = vsel %vm6_vm0, %v6076_v32, %v6075_v31  ;;  %s1264_s24 = smov 192 }
  0x65   :  { %v1051_v20 = vsel %vm6_vm0, %v6067_v18, %v6066_v17  ;;  %v6068_v21 = vld [vmem:[%s12308_s0 + $0x78e] ss:$16 sm:%s1053_s30]   ;;  %s1068_s30 = smov 3  ;;  %v1101_v37 = vsel %vm10_vm1, %v6077_v35, %v1096_v34  ;;  %v6087_v49 = vld [vmem:[%s12308_s0 + $0x60d] ss:$16 sm:%s1144_s20]   ;;  %s1159_s20 = smov 3 }
  0x66   :  { %v6069_v22 = vld [vmem:[%s12308_s0 + $0x78e] ss:$16 sm:%s1058_s2]   ;;  %v1056_v23 = vsel %vm10_vm1, %v6068_v21, %v1051_v20  ;;  %v6071_v38 = vld [vmem:[%s12308_s0 + $0xd] ss:$16 sm:%s1068_s30]   ;;  %v1106_v39 = vsel %vm14_vm2, %v6078_v36, %v1101_v37  ;;  %s1116_s2 = smov 12  ;;  %v1147_v51 = vsel %vm10_vm1, %v6087_v49, %v1142_v48  ;;  %s1374_s30 = smov 48 }
  0x67   :  { %v6061_v24 = vld [vmem:[%s12308_s0 + $0x58e] ss:$16 sm:%s1022_s5]   ;;  %v1061_v25 = vsel %vm14_vm2, %v6069_v22, %v1056_v23  ;;  %v1074_v42 = vsel %vm6_vm0, %v6072_v40, %v6071_v38  ;;  %v1152_v53 = vsel %vm14_vm2, %v6088_v50, %v1147_v51  ;;  %v6081_v54 = vld [vmem:[%s12308_s0 + $0x40d] ss:$16 sm:%s1116_s2]   ;;  %s1328_s5 = smov 48  ;;  %s1379_s2 = smov 192 }
  0x68   :  { %v6062_v26 = vld [vmem:[%s12308_s0 + $0x58e] ss:$16 sm:%s1025_s11]   ;;  %1062 = vrot.lane.b32.xlu1 %v1061_v25, %s7114_s27  ;;  %v1079_v44 = vsel %vm10_vm1, %v6073_v41, %v1074_v42  ;;  %v1119_v56 = vsel %vm6_vm0, %v6081_v54, %v6080_v52  ;;  %s1287_s11 = smov 192 }
  0x69   :  { %v6063_v27 = vld [vmem:[%s12308_s0 + $0x58e] ss:$16 sm:%s1030_s12]   ;;  %v1028_v28 = vsel %vm6_vm0, %v6062_v26, %v6061_v24  ;;  %v1084_v47 = vsel %vm14_vm2, %v6074_v43, %v1079_v44  ;;  %s1182_s12 = smov 3  ;;  %v1124_v58 = vsel %vm10_vm1, %v6082_v55, %v1119_v56  ;;  %v6090_v2 = vld [vmem:[%s12308_s0 + $0x8d] ss:$16 sm:%s1159_s20]   ;;  %s1465_s20 = smov 48 }
  0x6a   :  { %v6064_v29 = vld [vmem:[%s12308_s0 + $0x58e] ss:$16 sm:%s1035_s17]   ;;  %v1033_v30 = vsel %vm10_vm1, %v6063_v27, %v1028_v28  ;;  %s1190_s17 = smov 48  ;;  %v6095_v59 = vld [vmem:[%s12308_s0 + $0x28d] ss:$16 sm:%s1182_s12]   ;;  %v1129_v61 = vsel %vm14_vm2, %v6083_v57, %v1124_v58  ;;  %v1165_v6 = vsel %vm6_vm0, %v6091_v4, %v6090_v2  ;;  %s1351_s12 = smov 48 }
  0x6b   :  { %v1038_v33 = vsel %vm14_vm2, %v6064_v29, %v1033_v30  ;;  %v1188_v62 = vsel %vm6_vm0, %v6096_v60, %v6095_v59  ;;  %v6097_v63 = vld [vmem:[%s12308_s0 + $0x28d] ss:$16 sm:%s1190_s17]   ;;  %s1205_s17 = smov 3 }
  0x6c   :  { %1039 = vrot.lane.b32.xlu0 %v1038_v33, %s7114_s27  ;;  %1107 = vrot.lane.b32.xlu1 %v1106_v39, %s7115_s22  ;;  %v1193_v1 = vsel %vm10_vm1, %v6097_v63, %v1188_v62  ;;  %v6092_v5 = vld [vmem:[%s12308_s0 + $0x8d] ss:$16 sm:%s1167_s28]   ;;  %s1236_s27 = smov 48  ;;  %s1320_s28 = smov 3 }
  0x6d   :  { %v1198_v3 = vsel %vm14_vm2, %v6098_v0, %v1193_v1  ;;  %v6093_v7 = vld [vmem:[%s12308_s0 + $0x8d] ss:$16 sm:%s1172_s4]   ;;  %v1170_v8 = vsel %vm10_vm1, %v6092_v5, %v1165_v6  ;;  %s1277_s4 = smov 12 }
  0x6e   :  { %v6105_v9 = vld [vmem:[%s12308_s0 + $0x68d] ss:$16 sm:%s1228_s8]   ;;  %v1175_v11 = vsel %vm14_vm2, %v6093_v7, %v1170_v8  ;;  %s1397_s8 = smov 48 }
  0x6f   :  { %v6106_v10 = vld [vmem:[%s12308_s0 + $0x68d] ss:$16 sm:%s1231_s9]   ;;  %s1448_s9 = smov 192 }
  0x70   :  { %1085 = vrot.lane.b32.xlu0 %v1084_v47, %s7115_s22  ;;  %1153 = vrot.lane.b32.xlu1 %v1152_v53, %s7115_s22  ;;  %v1234_v12 = vsel %vm6_vm0, %v6106_v10, %v6105_v9  ;;  %v6107_v13 = vld [vmem:[%s12308_s0 + $0x68d] ss:$16 sm:%s1236_s27]   ;;  %s1251_s27 = smov 3 }
  0x71   :  { %v6108_v14 = vld [vmem:[%s12308_s0 + $0x68d] ss:$16 sm:%s1241_s14]   ;;  %v1239_v15 = vsel %vm10_vm1, %v6107_v13, %v1234_v12  ;;  %s1300_s14 = smov 12 }
  0x72   :  { %v6100_v16 = vld [vmem:[%s12308_s0 + $0x48d] ss:$16 sm:%s1205_s17]   ;;  %v1244_v17 = vsel %vm14_vm2, %v6108_v14, %v1239_v15  ;;  %s1516_s17 = smov 192 }
  0x73   :  { %v6101_v18 = vld [vmem:[%s12308_s0 + $0x48d] ss:$16 sm:%s1208_s21]   ;;  %s1470_s21 = smov 192 }
  0x74   :  { %1130 = vrot.lane.b32.xlu0 %v1129_v61, %s7115_s22  ;;  %1199 = vrot.lane.b32.xlu1 %v1198_v3, %s7115_s22  ;;  %v6102_v19 = vld [vmem:[%s12308_s0 + $0x48d] ss:$16 sm:%s1213_s23]   ;;  %v1211_v20 = vsel %vm6_vm0, %v6101_v18, %v6100_v16  ;;  %s1366_s23 = smov 3 }
  0x75   :  { %v6103_v21 = vld [vmem:[%s12308_s0 + $0x48d] ss:$16 sm:%s1218_s29]   ;;  %v1216_v22 = vsel %vm10_vm1, %v6102_v19, %v1211_v20  ;;  %s1323_s29 = smov 12  ;;  %v6156_v20 = vld [vmem:[%s12308_s0 + $0x20c] ss:$16 sm:%s1465_s20]   ;;  %s1480_s20 = smov 3 }
  0x76   :  { %v6115_v23 = vld [vmem:[%s12308_s0 + $0x30d] ss:$16 sm:%s1274_s3]   ;;  %v1221_v25 = vsel %vm14_vm2, %v6103_v21, %v1216_v22  ;;  %s1443_s3 = smov 48  ;;  %v6157_v21 = vld [vmem:[%s12308_s0 + $0x20c] ss:$16 sm:%s1470_s21]   ;;  %s1529_s21 = smov 12 }
  0x77   :  { %v6116_v24 = vld [vmem:[%s12308_s0 + $0x30d] ss:$16 sm:%s1277_s4]   ;;  %s1493_s4 = smov 192 }
  0x78   :  { %1176 = vrot.lane.b32.xlu0 %v1175_v11, %s7115_s22  ;;  %1245 = vrot.lane.b32.xlu1 %v1244_v17, %s7115_s22  ;;  %v1280_v26 = vsel %vm6_vm0, %v6116_v24, %v6115_v23  ;;  %v6117_v27 = vld [vmem:[%s12308_s0 + $0x30d] ss:$16 sm:%s1282_s10]   ;;  %s1297_s10 = smov 3  ;;  %v7903_v14 = vpop.permute.xlu1 %396  }
  0x79   :  { %v6118_v28 = vld [vmem:[%s12308_s0 + $0x30d] ss:$16 sm:%s1287_s11]   ;;  %v1285_v29 = vsel %vm10_vm1, %v6117_v27, %v1280_v26  ;;  %s1346_s11 = smov 12  ;;  %v6152_v27 = vld [vmem:[%s12308_s0 + $0xc] ss:$16 sm:%s1443_s3]   ;;  %s1595_s3 = smov 3 }
  0x7a   :  { %v6110_v30 = vld [vmem:[%s12308_s0 + $0x10d] ss:$16 sm:%s1251_s27]   ;;  %v1290_v31 = vsel %vm14_vm2, %v6118_v28, %v1285_v29  ;;  %s1562_s27 = smov 192 }
  0x7b   :  { %v6111_v32 = vld [vmem:[%s12308_s0 + $0x10d] ss:$16 sm:%s1254_s6]   ;;  %s7116_s6 = smov 96  }
  0x7c   :  { %1222 = vrot.lane.b32.xlu0 %v1221_v25, %s7115_s22  ;;  %v6112_v33 = vld [vmem:[%s12308_s0 + $0x10d] ss:$16 sm:%s1259_s18]   ;;  %1291 = vrot.lane.b32.xlu1 %v1290_v31, %s7115_s22  ;;  %v1257_v34 = vsel %vm6_vm0, %v6111_v32, %v6110_v30  ;;  %s1412_s18 = smov 3  ;;  %v7920_v22 = vpop.permute.xlu0 %351  }
  0x7d   :  { %v6113_v35 = vld [vmem:[%s12308_s0 + $0x10d] ss:$16 sm:%s1264_s24]   ;;  %v1262_v36 = vsel %vm10_vm1, %v6112_v33, %v1257_v34  ;;  %s1369_s24 = smov 12  ;;  %v6153_v30 = vld [vmem:[%s12308_s0 + $0xc] ss:$16 sm:%s1448_s9]   ;;  %s1552_s9 = smov 12 }
  0x7e   :  { %v6125_v37 = vld [vmem:[%s12308_s0 + $0x70d] ss:$16 sm:%s1320_s28]   ;;  %v1267_v39 = vsel %vm14_vm2, %v6113_v35, %v1262_v36  ;;  %s1488_s28 = smov 48 }
  0x7f   :  { %v6126_v38 = vld [vmem:[%s12308_s0 + $0x70d] ss:$16 sm:%s1323_s29]   ;;  %s1539_s29 = smov 192 }
  0x80   :  { %v1326_v40 = vsel %vm6_vm0, %v6126_v38, %v6125_v37  ;;  %v6127_v41 = vld [vmem:[%s12308_s0 + $0x70d] ss:$16 sm:%s1328_s5]   ;;  %1268 = vrot.lane.b32.xlu0 %v1267_v39, %s7115_s22  ;;  %s1343_s5 = smov 3  ;;  %v7934_v28 = vpop.permute.xlu1 %419  }
  0x81   :  { %v6128_v42 = vld [vmem:[%s12308_s0 + $0x70d] ss:$16 sm:%s1333_s7]   ;;  %v1331_v43 = vsel %vm10_vm1, %v6127_v41, %v1326_v40  ;;  %s1392_s7 = smov 12  ;;  %v6167_v37 = vld [vmem:[%s12308_s0 + $0x60c] ss:$16 sm:%s1516_s17]   ;;  %s1575_s17 = smov 12 }
  0x82   :  { %v6120_v44 = vld [vmem:[%s12308_s0 + $0x50d] ss:$16 sm:%s1297_s10]   ;;  %v1336_v45 = vsel %vm14_vm2, %v6128_v42, %v1331_v43  ;;  %v6159_v40 = vld [vmem:[%s12308_s0 + $0x40c] ss:$16 sm:%s1480_s20]   ;;  %s1608_s10 = smov 192  ;;  %s1695_s20 = smov 48 }
  0x83   :  { %v6121_v46 = vld [vmem:[%s12308_s0 + $0x50d] ss:$16 sm:%s1300_s14]   ;;  %1337 = vrot.lane.b32.xlu1 %v1336_v45, %s7115_s22  ;;  %s1626_s14 = smov 48 }
  0x84   :  { %v6122_v47 = vld [vmem:[%s12308_s0 + $0x50d] ss:$16 sm:%s1305_s15]   ;;  %v1303_v48 = vsel %vm6_vm0, %v6121_v46, %v6120_v44  ;;  %s1457_s15 = smov 3  ;;  %v7956_v38 = vpop.permute.xlu0 %373   ;;  %v6161_v43 = vld [vmem:[%s12308_s0 + $0x40c] ss:$16 sm:%s1488_s28]   ;;  %s1641_s28 = smov 3 }
  0x85   :  { %v6123_v49 = vld [vmem:[%s12308_s0 + $0x50d] ss:$16 sm:%s1310_s19]   ;;  %v1308_v50 = vsel %vm10_vm1, %v6122_v47, %v1303_v48  ;;  %s1415_s19 = smov 12  ;;  %v6154_v16 = vld [vmem:[%s12308_s0 + $0x20c] ss:$16 sm:%s1457_s15]   ;;  %s12_s15 = smov 192 }
  0x86   :  { %v6135_v51 = vld [vmem:[%s12308_s0 + $0x38d] ss:$16 sm:%s1366_s23]   ;;  %v1313_v53 = vsel %vm14_vm2, %v6123_v49, %v1308_v50  ;;  %v6162_v46 = vld [vmem:[%s12308_s0 + $0x40c] ss:$16 sm:%s1493_s4]   ;;  %s1534_s23 = smov 48  ;;  %s1598_s4 = smov 12 }
  0x87   :  { %v6136_v52 = vld [vmem:[%s12308_s0 + $0x38d] ss:$16 sm:%s1369_s24]   ;;  %1314 = vrot.lane.b32.xlu0 %v1313_v53, %s7115_s22  ;;  %s1585_s24 = smov 192 }
  0x88   :  { %v1372_v54 = vsel %vm6_vm0, %v6136_v52, %v6135_v51  ;;  %v6137_v55 = vld [vmem:[%s12308_s0 + $0x38d] ss:$16 sm:%s1374_s30]   ;;  %s1389_s30 = smov 3  ;;  %v7970_v44 = vpop.permute.xlu1 %465   ;;  %v6175_v49 = vld [vmem:[%s12308_s0 + $0x28c] ss:$16 sm:%s1552_s9]   ;;  %s2237_s9 = smov 3 }
  0x89   :  { %v6138_v56 = vld [vmem:[%s12308_s0 + $0x38d] ss:$16 sm:%s1379_s2]   ;;  %v1377_v57 = vsel %vm10_vm1, %v6137_v55, %v1372_v54  ;;  %s1438_s2 = smov 12  ;;  %v6177_v53 = vld [vmem:[%s12308_s0 + $0x28c] ss:$16 sm:%s1562_s27]   ;;  %s1621_s27 = smov 12 }
  0x8a   :  { %v6130_v58 = vld [vmem:[%s12308_s0 + $0x18d] ss:$16 sm:%s1343_s5]   ;;  %v1382_v59 = vsel %vm14_vm2, %v6138_v56, %v1377_v57  ;;  %v6151_v26 = vld [vmem:[%s12308_s0 + $0xc] ss:$16 sm:%s1438_s2]   ;;  %s1649_s5 = smov 48  ;;  %s179_s2 = smov 192 }
  0x8b   :  { %v6131_v60 = vld [vmem:[%s12308_s0 + $0x18d] ss:$16 sm:%s1346_s11]   ;;  %1383 = vrot.lane.b32.xlu1 %v1382_v59, %s7115_s22  ;;  %s1503_s11 = smov 3 }
  0x8c   :  { %v6132_v61 = vld [vmem:[%s12308_s0 + $0x18d] ss:$16 sm:%s1351_s12]   ;;  %v1349_v62 = vsel %vm6_vm0, %v6131_v60, %v6130_v58  ;;  %s1506_s12 = smov 12  ;;  %v6164_v32 = vld [vmem:[%s12308_s0 + $0x60c] ss:$16 sm:%s1503_s11]   ;;  %v7992_v54 = vpop.permute.xlu0 %442   ;;  %s8_s11 = smov 48 }
  0x8d   :  { %v6133_v63 = vld [vmem:[%s12308_s0 + $0x18d] ss:$16 sm:%s1356_s16]   ;;  %v1354_v0 = vsel %vm10_vm1, %v6132_v61, %v1349_v62  ;;  %s1460_s16 = smov 12  ;;  %v6165_v33 = vld [vmem:[%s12308_s0 + $0x60c] ss:$16 sm:%s1506_s12]   ;;  %s22_s12 = smov 12 }
  0x8e   :  { %v6145_v1 = vld [vmem:[%s12308_s0 + $0x78d] ss:$16 sm:%s1412_s18]   ;;  %v1359_v3 = vsel %vm14_vm2, %v6133_v63, %v1354_v0  ;;  %v6155_v17 = vld [vmem:[%s12308_s0 + $0x20c] ss:$16 sm:%s1460_s16]   ;;  %s1511_s16 = smov 48  ;;  %v1509_v35 = vsel %vm6_vm0, %v6165_v33, %v6164_v32  ;;  %s1580_s18 = smov 48 }
  0x8f   :  { %v6146_v2 = vld [vmem:[%s12308_s0 + $0x78d] ss:$16 sm:%s1415_s19]   ;;  %1360 = vrot.lane.b32.xlu0 %v1359_v3, %s7115_s22  ;;  %v1463_v19 = vsel %vm6_vm0, %v6155_v17, %v6154_v16  ;;  %s1631_s19 = smov 192 }
  0x90   :  { %v1418_v4 = vsel %vm6_vm0, %v6146_v2, %v6145_v1  ;;  %v6147_v5 = vld [vmem:[%s12308_s0 + $0x78d] ss:$16 sm:%s1420_s25]   ;;  %s1435_s25 = smov 3  ;;  %v1468_v23 = vsel %vm10_vm1, %v6156_v20, %v1463_v19  ;;  %v6166_v36 = vld [vmem:[%s12308_s0 + $0x60c] ss:$16 sm:%s1511_s16]   ;;  %s1526_s16 = smov 3  ;;  %v8006_v60 = vpop.permute.xlu1 %511  }
  0x91   :  { %v6148_v6 = vld [vmem:[%s12308_s0 + $0x78d] ss:$16 sm:%s1425_s26]   ;;  %v1423_v7 = vsel %vm10_vm1, %v6147_v5, %v1418_v4  ;;  %v6150_v24 = vld [vmem:[%s12308_s0 + $0xc] ss:$16 sm:%s1435_s25]   ;;  %v1473_v25 = vsel %vm14_vm2, %v6157_v21, %v1468_v23  ;;  %s1483_s26 = smov 12  ;;  %v1514_v39 = vsel %vm10_vm1, %v6166_v36, %v1509_v35  ;;  %s1815_s25 = smov 192 }
  0x92   :  { %v6140_v8 = vld [vmem:[%s12308_s0 + $0x58d] ss:$16 sm:%s1389_s30]   ;;  %v1428_v9 = vsel %vm14_vm2, %v6148_v6, %v1423_v7  ;;  %v1441_v29 = vsel %vm6_vm0, %v6151_v26, %v6150_v24  ;;  %v1519_v41 = vsel %vm14_vm2, %v6167_v37, %v1514_v39  ;;  %v6160_v42 = vld [vmem:[%s12308_s0 + $0x40c] ss:$16 sm:%s1483_s26]   ;;  %s174_s30 = smov 48  ;;  %s1700_s26 = smov 192 }
  0x93   :  { %v6141_v10 = vld [vmem:[%s12308_s0 + $0x58d] ss:$16 sm:%s1392_s7]   ;;  %1429 = vrot.lane.b32.xlu1 %v1428_v9, %s7115_s22  ;;  %v1446_v31 = vsel %vm10_vm1, %v6152_v27, %v1441_v29  ;;  %v1486_v45 = vsel %vm6_vm0, %v6160_v42, %v6159_v40  ;;  %s1654_s7 = smov 192 }
  0x94   :  { %v6142_v11 = vld [vmem:[%s12308_s0 + $0x58d] ss:$16 sm:%s1397_s8]   ;;  %v1395_v12 = vsel %vm6_vm0, %v6141_v10, %v6140_v8  ;;  %v1451_v34 = vsel %vm14_vm2, %v6153_v30, %v1446_v31  ;;  %s1549_s8 = smov 3  ;;  %v1491_v47 = vsel %vm10_vm1, %v6161_v43, %v1486_v45  ;;  %v6169_v56 = vld [vmem:[%s12308_s0 + $0x8c] ss:$16 sm:%s1526_s16]   ;;  %v8028_v6 = vpop.permute.xlu0 %488   ;;  %s1687_s16 = smov 3 }
  0x95   :  { %v6143_v13 = vld [vmem:[%s12308_s0 + $0x58d] ss:$16 sm:%s1402_s13]   ;;  %v1400_v15 = vsel %vm10_vm1, %v6142_v11, %v1395_v12  ;;  %s1557_s13 = smov 48  ;;  %v6174_v48 = vld [vmem:[%s12308_s0 + $0x28c] ss:$16 sm:%s1549_s8]   ;;  %v1496_v50 = vsel %vm14_vm2, %v6162_v46, %v1491_v47  ;;  %s1672_s8 = smov 48 }
  0x96   :  { %v1405_v18 = vsel %vm14_vm2, %v6143_v13, %v1400_v15  ;;  %v1555_v51 = vsel %vm6_vm0, %v6175_v49, %v6174_v48  ;;  %v6176_v52 = vld [vmem:[%s12308_s0 + $0x28c] ss:$16 sm:%s1557_s13]   ;;  %s1572_s13 = smov 3  ;;  %v5875_v40 = vld [vmem:[%s12308_s0 + $0x400] ss:$16 sm:%s174_s30]   ;;  %s1824_s30 = smov 3 }
  0x97   :  { %1406 = vrot.lane.b32.xlu0 %v1405_v18, %s7115_s22  ;;  %1474 = vrot.lane.b32.xlu1 %v1473_v25, %s7116_s6  ;;  %v1560_v55 = vsel %vm10_vm1, %v6176_v52, %v1555_v51  ;;  %v6170_v58 = vld [vmem:[%s12308_s0 + $0x8c] ss:$16 sm:%s1529_s21]   ;;  %s1603_s22 = smov 48  ;;  %s1769_s21 = smov 192 }
  0x98   :  { %v1565_v57 = vsel %vm14_vm2, %v6177_v53, %v1560_v55  ;;  %v6171_v59 = vld [vmem:[%s12308_s0 + $0x8c] ss:$16 sm:%s1534_s23]   ;;  %v1532_v61 = vsel %vm6_vm0, %v6170_v58, %v6169_v56  ;;  %v8042_v12 = vpop.permute.xlu1 %557   ;;  %s166_s23 = smov 3  ;;  %v9_v48 = vld [vmem:[%s12308_s0] ss:$16 sm:%s8_s11]   ;;  %s90_s11 = smov 48 }
  0x99   :  { %v6172_v62 = vld [vmem:[%s12308_s0 + $0x8c] ss:$16 sm:%s1539_s29]   ;;  %v1537_v63 = vsel %vm10_vm1, %v6171_v59, %v1532_v61  ;;  %s1644_s29 = smov 12  ;;  %v5873_v35 = vld [vmem:[%s12308_s0 + $0x400] ss:$16 sm:%s166_s23]   ;;  %s271_s23 = smov 3 }
  0x9a   :  { %v6184_v0 = vld [vmem:[%s12308_s0 + $0x68c] ss:$16 sm:%s1595_s3]   ;;  %v1542_v2 = vsel %vm14_vm2, %v6172_v62, %v1537_v63  ;;  %v13_v51 = vld [vmem:[%s12308_s0] ss:$16 sm:%s12_s15]   ;;  %s95_s15 = smov 192  ;;  %s1827_s3 = smov 12 }
  0x9b   :  { %1452 = vrot.lane.b32.xlu0 %v1451_v34, %s7116_s6  ;;  %1520 = vrot.lane.b32.xlu1 %v1519_v41, %s7116_s6  ;;  %v6185_v1 = vld [vmem:[%s12308_s0 + $0x68c] ss:$16 sm:%s1598_s4]   ;;  %s1792_s4 = smov 192 }
  0x9c   :  { %v1601_v3 = vsel %vm6_vm0, %v6185_v1, %v6184_v0  ;;  %v6186_v4 = vld [vmem:[%s12308_s0 + $0x68c] ss:$16 sm:%s1603_s22]   ;;  %s1618_s22 = smov 3  ;;  %v8064_v24 = vpop.permute.xlu0 %534   ;;  %v5876_v41 = vld [vmem:[%s12308_s0 + $0x400] ss:$16 sm:%s179_s2]   ;;  %s127_s2 = smov 12 }
  0x9d   :  { %v6187_v5 = vld [vmem:[%s12308_s0 + $0x68c] ss:$16 sm:%s1608_s10]   ;;  %v1606_v7 = vsel %vm10_vm1, %v6186_v4, %v1601_v3  ;;  %s4_s10 = smov 12 }
  0x9e   :  { %v6179_v8 = vld [vmem:[%s12308_s0 + $0x48c] ss:$16 sm:%s1572_s13]   ;;  %v1611_v9 = vsel %vm14_vm2, %v6187_v5, %v1606_v7  ;;  %v5_v47 = vld [vmem:[%s12308_s0] ss:$16 sm:%s4_s10]   ;;  %s85_s10 = smov 12  ;;  %s27_s13 = smov 48 }
  0x9f   :  { %1497 = vrot.lane.b32.xlu0 %v1496_v50, %s7116_s6  ;;  %1566 = vrot.lane.b32.xlu1 %v1565_v57, %s7116_s6  ;;  %v6180_v10 = vld [vmem:[%s12308_s0 + $0x48c] ss:$16 sm:%s1575_s17]   ;;  %s1810_s17 = smov 48 }
  0xa0   :  { %v6181_v11 = vld [vmem:[%s12308_s0 + $0x48c] ss:$16 sm:%s1580_s18]   ;;  %v1578_v13 = vsel %vm6_vm0, %v6180_v10, %v6179_v8  ;;  %v8078_v31 = vpop.permute.xlu1 %603   ;;  %s40_s18 = smov 3 }
  0xa1   :  { %v6182_v15 = vld [vmem:[%s12308_s0 + $0x48c] ss:$16 sm:%s1585_s24]   ;;  %v1583_v16 = vsel %vm10_vm1, %v6181_v11, %v1578_v13  ;;  %s169_s24 = smov 12 }
  0xa2   :  { %v6194_v17 = vld [vmem:[%s12308_s0 + $0x30c] ss:$16 sm:%s1641_s28]   ;;  %v1588_v19 = vsel %vm14_vm2, %v6182_v15, %v1583_v16  ;;  %v5874_v36 = vld [vmem:[%s12308_s0 + $0x400] ss:$16 sm:%s169_s24]   ;;  %s1664_s28 = smov 3  ;;  %s48_s24 = smov 48 }
  0xa3   :  { %1543 = vrot.lane.b32.xlu0 %v1542_v2, %s7116_s6  ;;  %1612 = vrot.lane.b32.xlu1 %v1611_v9, %s7116_s6  ;;  %v6195_v18 = vld [vmem:[%s12308_s0 + $0x30c] ss:$16 sm:%s1644_s29]   ;;  %v172_v39 = vsel %vm6_vm0, %v5874_v36, %v5873_v35  ;;  %s263_s29 = smov 192 }
  0xa4   :  { %v1647_v20 = vsel %vm6_vm0, %v6195_v18, %v6194_v17  ;;  %v6196_v21 = vld [vmem:[%s12308_s0 + $0x30c] ss:$16 sm:%s1649_s5]   ;;  %s2_s5 = smov 3  ;;  %v8100_v42 = vpop.permute.xlu0 %580   ;;  %v177_v43 = vsel %vm10_vm1, %v5875_v40, %v172_v39  ;;  %v5896_v11 = vld [vmem:[%s12308_s0 + $0x600] ss:$16 sm:%s263_s29]   ;;  %s116_s29 = smov 192 }
  0xa5   :  { %v6197_v23 = vld [vmem:[%s12308_s0 + $0x30c] ss:$16 sm:%s1654_s7]   ;;  %v1652_v25 = vsel %vm10_vm1, %v6196_v21, %v1647_v20  ;;  %v3_v45 = vld [vmem:[%s12308_s0] ss:$16 sm:%s2_s5]   ;;  %v182_v46 = vsel %vm14_vm2, %v5876_v41, %v177_v43  ;;  %s1667_s7 = smov 12  ;;  %s1756_s5 = smov 3 }
  0xa6   :  { %v6189_v26 = vld [vmem:[%s12308_s0 + $0x10c] ss:$16 sm:%s1618_s22]   ;;  %v1657_v27 = vsel %vm14_vm2, %v6197_v23, %v1652_v25  ;;  %5877 = vst.msk [vmem:[%s12309_s1 + $0x40] sm:$0xff] %vm16_vm3, %v182_v46   ;;  %v7_v50 = vsel %vm6_vm0, %v5_v47, %v3_v45  ;;  %s279_s22 = smov 48 }
  0xa7   :  { %1589 = vrot.lane.b32.xlu0 %v1588_v19, %s7116_s6  ;;  %v6190_v29 = vld [vmem:[%s12308_s0 + $0x10c] ss:$16 sm:%s1621_s27]   ;;  %1658 = vrot.lane.b32.xlu1 %v1657_v27, %s7116_s6  ;;  %s1677_s27 = smov 192 }
  0xa8   :  { %v6191_v30 = vld [vmem:[%s12308_s0 + $0x10c] ss:$16 sm:%s1626_s14]   ;;  %v1624_v32 = vsel %vm6_vm0, %v6190_v29, %v6189_v26  ;;  %v8114_v49 = vpop.permute.xlu1 %649   ;;  %5926 = vst.msk [vmem:[%s12309_s1 + $0x40] sm:$0xff] %vm353_vm4, %v7903_v14   ;;  %v11_v14 = vsel %vm10_vm1, %v9_v48, %v7_v50  ;;  %s250_s14 = smov 3 }
  0xa9   :  { %v6192_v33 = vld [vmem:[%s12308_s0 + $0x10c] ss:$16 sm:%s1631_s19]   ;;  %v1629_v34 = vsel %vm10_vm1, %v6191_v30, %v1624_v32  ;;  %s1690_s19 = smov 12  ;;  %v15_v56 = vsel %vm14_vm2, %v13_v51, %v11_v14  ;;  %v5893_v3 = vld [vmem:[%s12308_s0 + $0x600] ss:$16 sm:%s250_s14]   ;;  %s103_s14 = smov 3 }
  0xaa   :  { %v1634_v37 = vsel %vm14_vm2, %v6192_v33, %v1629_v34  ;;  %v6204_v52 = vld [vmem:[%s12308_s0 + $0x70c] ss:$16 sm:%s1687_s16]   ;;  %17 = vst.msk [vmem:[%s12309_s1] sm:$0xff] %vm16_vm3, %v15_v56   ;;  %s1733_s16 = smov 3 }
  0xab   :  { %1635 = vrot.lane.b32.xlu0 %v1634_v37, %s7116_s6  ;;  %v6205_v53 = vld [vmem:[%s12308_s0 + $0x70c] ss:$16 sm:%s1690_s19]   ;;  %s253_s19 = smov 12  ;;  %354 = vst.msk [vmem:[%s12309_s1] sm:$0xff] %vm353_vm4, %v7920_v22  }
  0xac   :  { %v6206_v55 = vld [vmem:[%s12308_s0 + $0x70c] ss:$16 sm:%s1695_s20]   ;;  %v1693_v57 = vsel %vm6_vm0, %v6205_v53, %v6204_v52  ;;  %v8147_v61 = vpop.permute.xlu0 %626   ;;  %v5894_v7 = vld [vmem:[%s12308_s0 + $0x600] ss:$16 sm:%s253_s19]   ;;  %s1736_s19 = smov 12  ;;  %s1741_s20 = smov 48 }
  0xad   :  { %v6207_v58 = vld [vmem:[%s12308_s0 + $0x70c] ss:$16 sm:%s1700_s26]   ;;  %v1698_v62 = vsel %vm10_vm1, %v6206_v55, %v1693_v57  ;;  %v256_v9 = vsel %vm6_vm0, %v5894_v7, %v5893_v3  ;;  %v5854_v18 = vld [vmem:[%s12308_s0 + $0x200] ss:$16 sm:%s85_s10]   ;;  %s1746_s26 = smov 192  ;;  %s284_s10 = smov 192 }
  0xae   :  { %v6199_v59 = vld [vmem:[%s12308_s0 + $0x50c] ss:$16 sm:%s1664_s28]   ;;  %s258_s28 = smov 48  ;;  %v1703_v22 = vsel %vm14_vm2, %v6207_v58, %v1698_v62  ;;  %v5855_v19 = vld [vmem:[%s12308_s0 + $0x200] ss:$16 sm:%s90_s11]   ;;  %s132_s11 = smov 48 }
  0xaf   :  { %v6200_v63 = vld [vmem:[%s12308_s0 + $0x50c] ss:$16 sm:%s1667_s7]   ;;  %1704 = vrot.lane.b32.xlu1 %v1703_v22, %s7116_s6  ;;  %s1713_s7 = smov 12 }
  0xb0   :  { %v6201_v0 = vld [vmem:[%s12308_s0 + $0x50c] ss:$16 sm:%s1672_s8]   ;;  %v1670_v1 = vsel %vm6_vm0, %v6200_v63, %v6199_v59  ;;  %s82_s8 = smov 3  ;;  %v8173_v4 = vpop.permute.xlu1 %695   ;;  %v5895_v10 = vld [vmem:[%s12308_s0 + $0x600] ss:$16 sm:%s258_s28]   ;;  %s1710_s28 = smov 3 }
  0xb1   :  { %v6202_v2 = vld [vmem:[%s12308_s0 + $0x50c] ss:$16 sm:%s1677_s27]   ;;  %v1675_v5 = vsel %vm10_vm1, %v6201_v0, %v1670_v1  ;;  %v261_v13 = vsel %vm10_vm1, %v5895_v10, %v256_v9  ;;  %v5853_v15 = vld [vmem:[%s12308_s0 + $0x200] ss:$16 sm:%s82_s8]   ;;  %s1718_s8 = smov 48  ;;  %s1723_s27 = smov 192 }
  0xb2   :  { %v1680_v8 = vsel %vm14_vm2, %v6202_v2, %v1675_v5  ;;  %v266_v17 = vsel %vm14_vm2, %v5896_v11, %v261_v13  ;;  %v88_v20 = vsel %vm6_vm0, %v5854_v18, %v5853_v15  ;;  %v5856_v21 = vld [vmem:[%s12308_s0 + $0x200] ss:$16 sm:%s95_s15]   ;;  %v6214_v23 = vld [vmem:[%s12308_s0 + $0x38c] ss:$16 sm:%s1733_s16]   ;;  %s187_s16 = smov 3  ;;  %s305_s15 = smov 192 }
  0xb3   :  { %1681 = vrot.lane.b32.xlu0 %v1680_v8, %s7116_s6  ;;  %5897 = vst.msk [vmem:[%s12309_s1 + $0x60] sm:$0xff] %vm16_vm3, %v266_v17   ;;  %v6215_v26 = vld [vmem:[%s12308_s0 + $0x38c] ss:$16 sm:%s1736_s19]   ;;  %s106_s19 = smov 12 }
  0xb4   :  { %v8193_v16 = vpop.permute.xlu0 %672   ;;  %v741_v25 = vpop.permute.xlu1 %740   ;;  %5931 = vst.msk [vmem:[%s12309_s1 + $0x60] sm:$0xff] %vm353_vm4, %v7934_v28   ;;  %v93_v28 = vsel %vm10_vm1, %v5855_v19, %v88_v20  ;;  %v6216_v27 = vld [vmem:[%s12308_s0 + $0x38c] ss:$16 sm:%s1741_s20]   ;;  %v1739_v30 = vsel %vm6_vm0, %v6215_v26, %v6214_v23  ;;  %s1779_s20 = smov 3 }
  0xb5   :  { %v98_v29 = vsel %vm14_vm2, %v5856_v21, %v93_v28  ;;  %v6217_v32 = vld [vmem:[%s12308_s0 + $0x38c] ss:$16 sm:%s1746_s26]   ;;  %v1744_v34 = vsel %vm10_vm1, %v6216_v27, %v1739_v30  ;;  %v5858_v41 = vld [vmem:[%s12308_s0 + $0x280] ss:$16 sm:%s103_s14]   ;;  %s1782_s26 = smov 12  ;;  %s300_s14 = smov 48 }
  0xb6   :  { %v6209_v33 = vld [vmem:[%s12308_s0 + $0x18c] ss:$16 sm:%s1710_s28]   ;;  %5857 = vst.msk [vmem:[%s12309_s1 + $0x20] sm:$0xff] %vm16_vm3, %v98_v29   ;;  %s111_s28 = smov 48 }
  0xb7   :  { %v6210_v35 = vld [vmem:[%s12308_s0 + $0x18c] ss:$16 sm:%s1713_s7]   ;;  %5921 = vst.msk [vmem:[%s12309_s1 + $0x20] sm:$0xff] %vm353_vm4, %v7956_v38   ;;  %v1749_v38 = vsel %vm14_vm2, %v6217_v32, %v1744_v34  ;;  %s1873_s7 = smov 12 }
  0xb8   :  { %v6211_v36 = vld [vmem:[%s12308_s0 + $0x18c] ss:$16 sm:%s1718_s8]   ;;  %v719_v37 = vpop.permute.xlu0 %718   ;;  %v1716_v39 = vsel %vm6_vm0, %v6210_v35, %v6209_v33  ;;  %s19_s8 = smov 3  ;;  %1750 = vrot.lane.b32.xlu1 %v1749_v38, %s7116_s6  ;;  %6000 = vst.msk [vmem:[%s12309_s1 + $0x20] sm:$0xff] %vm720_vm5, %v741_v25   ;;  %v787_v46 = vpop.permute.xlu1 %786  }
  0xb9   :  { %v6212_v40 = vld [vmem:[%s12308_s0 + $0x18c] ss:$16 sm:%s1723_s27]   ;;  %721 = vst.msk [vmem:[%s12309_s1] sm:$0xff] %vm720_vm5, %v719_v37   ;;  %v1721_v43 = vsel %vm10_vm1, %v6211_v36, %v1716_v39  ;;  %6010 = vst.msk [vmem:[%s12309_s1 + $0x60] sm:$0xff] %vm720_vm5, %v787_v46   ;;  %s232_s27 = smov 12 }
  0xba   :  { %v5859_v45 = vld [vmem:[%s12308_s0 + $0x280] ss:$16 sm:%s106_s19]   ;;  %v1726_v47 = vsel %vm14_vm2, %v6212_v40, %v1721_v43  ;;  %s32_s19 = smov 192  ;;  %v6224_v62 = vld [vmem:[%s12308_s0 + $0x78c] ss:$16 sm:%s1779_s20]   ;;  %s195_s20 = smov 48 }
  0xbb   :  { %v109_v48 = vsel %vm6_vm0, %v5859_v45, %v5858_v41  ;;  %v5860_v50 = vld [vmem:[%s12308_s0 + $0x280] ss:$16 sm:%s111_s28]   ;;  %1727 = vrot.lane.b32.xlu0 %v1726_v47, %s7116_s6  ;;  %s1787_s28 = smov 48 }
  0xbc   :  { %v5861_v51 = vld [vmem:[%s12308_s0 + $0x280] ss:$16 sm:%s116_s29]   ;;  %v114_v52 = vsel %vm10_vm1, %v5860_v50, %v109_v48  ;;  %v764_v57 = vpop.permute.xlu0 %763   ;;  %v6225_v63 = vld [vmem:[%s12308_s0 + $0x78c] ss:$16 sm:%s1782_s26]   ;;  %v833_v22 = vpop.permute.xlu1 %832   ;;  %s274_s29 = smov 12  ;;  %s124_s26 = smov 3 }
  0xbd   :  { %v5838_v14 = vld [vmem:[%s12308_s0 + $0x80] ss:$16 sm:%s19_s8]   ;;  %v119_v53 = vsel %vm14_vm2, %v5861_v51, %v114_v52  ;;  %6005 = vst.msk [vmem:[%s12309_s1 + $0x40] sm:$0xff] %vm720_vm5, %v764_v57   ;;  %v1785_v2 = vsel %vm6_vm0, %v6225_v63, %v6224_v62  ;;  %s1878_s8 = smov 48 }
  0xbe   :  { %v5839_v55 = vld [vmem:[%s12308_s0 + $0x80] ss:$16 sm:%s22_s12]   ;;  %5862 = vst.msk [vmem:[%s12309_s1 + $0x28] sm:$0xff] %vm16_vm3, %v119_v53   ;;  %s1759_s12 = smov 12 }
  0xbf   :  { %v5840_v56 = vld [vmem:[%s12308_s0 + $0x80] ss:$16 sm:%s27_s13]   ;;  %v25_v58 = vsel %vm6_vm0, %v5839_v55, %v5838_v14  ;;  %s1764_s13 = smov 48  ;;  %5941 = vst.msk [vmem:[%s12309_s1 + $0x28] sm:$0xff] %vm353_vm4, %v7970_v44  }
  0xc0   :  { %v5841_v59 = vld [vmem:[%s12308_s0 + $0x80] ss:$16 sm:%s32_s19]   ;;  %v30_v44 = vsel %vm10_vm1, %v5840_v56, %v25_v58  ;;  %v6226_v0 = vld [vmem:[%s12308_s0 + $0x78c] ss:$16 sm:%s1787_s28]   ;;  %v810_v15 = vpop.permute.xlu0 %809   ;;  %s190_s19 = smov 12  ;;  %v879_v25 = vpop.permute.xlu1 %878   ;;  %s211_s28 = smov 12 }
  0xc1   :  { %v35_v1 = vsel %vm14_vm2, %v5841_v59, %v30_v44  ;;  %v6227_v3 = vld [vmem:[%s12308_s0 + $0x78c] ss:$16 sm:%s1792_s4]   ;;  %6020 = vst.msk [vmem:[%s12309_s1 + $0x28] sm:$0xff] %vm720_vm5, %v833_v22   ;;  %v1790_v7 = vsel %vm10_vm1, %v6226_v0, %v1785_v2  ;;  %s1832_s4 = smov 48 }
  0xc2   :  { %v6219_v5 = vld [vmem:[%s12308_s0 + $0x58c] ss:$16 sm:%s1756_s5]   ;;  %5842 = vst.msk [vmem:[%s12309_s1 + $0x8] sm:$0xff] %vm16_vm3, %v35_v1   ;;  %s145_s5 = smov 3 }
  0xc3   :  { %v6220_v8 = vld [vmem:[%s12308_s0 + $0x58c] ss:$16 sm:%s1759_s12]   ;;  %5936 = vst.msk [vmem:[%s12309_s1 + $0x8] sm:$0xff] %vm353_vm4, %v7992_v54   ;;  %v1795_v54 = vsel %vm14_vm2, %v6227_v3, %v1790_v7  ;;  %s137_s12 = smov 192 }
  0xc4   :  { %v6221_v9 = vld [vmem:[%s12308_s0 + $0x58c] ss:$16 sm:%s1764_s13]   ;;  %v1762_v10 = vsel %vm6_vm0, %v6220_v8, %v6219_v5  ;;  %v5898_v13 = vld [vmem:[%s12308_s0 + $0x680] ss:$16 sm:%s271_s23]   ;;  %v856_v35 = vpop.permute.xlu0 %855   ;;  %v925_v43 = vpop.permute.xlu1 %924   ;;  %s43_s23 = smov 12  ;;  %s1847_s13 = smov 3 }
  0xc5   :  { %v6222_v11 = vld [vmem:[%s12308_s0 + $0x58c] ss:$16 sm:%s1769_s21]   ;;  %1796 = vrot.lane.b32.xlu1 %v1795_v54, %s7116_s6  ;;  %v1767_v17 = vsel %vm10_vm1, %v6221_v9, %v1762_v10  ;;  %6015 = vst.msk [vmem:[%s12309_s1 + $0x8] sm:$0xff] %vm720_vm5, %v810_v15   ;;  %s1855_s21 = smov 48 }
  0xc6   :  { %v5899_v18 = vld [vmem:[%s12308_s0 + $0x680] ss:$16 sm:%s274_s29]   ;;  %v1772_v19 = vsel %vm14_vm2, %v6222_v11, %v1767_v17  ;;  %s200_s29 = smov 192  ;;  %v6233_v34 = vld [vmem:[%s12308_s0 + $0x20b] ss:$16 sm:%s1824_s30]   ;;  %s1860_s30 = smov 192 }
  0xc7   :  { %v277_v20 = vsel %vm6_vm0, %v5899_v18, %v5898_v13  ;;  %v5900_v21 = vld [vmem:[%s12308_s0 + $0x680] ss:$16 sm:%s279_s22]   ;;  %1773 = vrot.lane.b32.xlu0 %v1772_v19, %s7116_s6  ;;  %s1837_s22 = smov 192  ;;  %s292_s6 = smov 3 }
  0xc8   :  { %v5901_v23 = vld [vmem:[%s12308_s0 + $0x680] ss:$16 sm:%s284_s10]   ;;  %v282_v28 = vsel %vm10_vm1, %v5900_v21, %v277_v20  ;;  %s1802_s10 = smov 3  ;;  %v6234_v36 = vld [vmem:[%s12308_s0 + $0x20b] ss:$16 sm:%s1827_s3]   ;;  %v902_v53 = vpop.permute.xlu0 %901   ;;  %s1870_s3 = smov 3 }
  0xc9   :  { %v5878_v26 = vld [vmem:[%s12308_s0 + $0x480] ss:$16 sm:%s187_s16]   ;;  %v287_v27 = vsel %vm14_vm2, %v5901_v23, %v282_v28  ;;  %s1805_s16 = smov 12  ;;  %v6235_v37 = vld [vmem:[%s12308_s0 + $0x20b] ss:$16 sm:%s1832_s4]   ;;  %v1830_v39 = vsel %vm6_vm0, %v6234_v36, %v6233_v34  ;;  %s1906_s4 = smov 192 }
  0xca   :  { %v5879_v29 = vld [vmem:[%s12308_s0 + $0x480] ss:$16 sm:%s190_s19]   ;;  %5902 = vst.msk [vmem:[%s12309_s1 + $0x68] sm:$0xff] %vm16_vm3, %v287_v27   ;;  %v1835_v45 = vsel %vm10_vm1, %v6235_v37, %v1830_v39  ;;  %s7117_s19 = smov 88   ;;  %v8467_v44 = vpop.permute.xlu1 %970  }
  0xcb   :  { %v5880_v30 = vld [vmem:[%s12308_s0 + $0x480] ss:$16 sm:%s195_s20]   ;;  %v193_v32 = vsel %vm6_vm0, %v5879_v29, %v5878_v26  ;;  %5951 = vst.msk [vmem:[%s12309_s1 + $0x68] sm:$0xff] %vm353_vm4, %v8006_v60   ;;  %s1850_s20 = smov 12 }
  0xcc   :  { %v5881_v33 = vld [vmem:[%s12308_s0 + $0x480] ss:$16 sm:%s200_s29]   ;;  %v198_v60 = vsel %vm10_vm1, %v5880_v30, %v193_v32  ;;  %v6236_v40 = vld [vmem:[%s12308_s0 + $0x20b] ss:$16 sm:%s1837_s22]   ;;  %s216_s29 = smov 48  ;;  %s229_s22 = smov 3 }
  0xcd   :  { %v203_v38 = vsel %vm14_vm2, %v5881_v33, %v198_v60  ;;  %v6229_v41 = vld [vmem:[%s12308_s0 + $0xb] ss:$16 sm:%s1802_s10]   ;;  %6030 = vst.msk [vmem:[%s12309_s1 + $0x68] sm:$0xff] %vm720_vm5, %v879_v25   ;;  %s1919_s10 = smov 12 }
  0xce   :  { %5882 = vst.msk [vmem:[%s12309_s1 + $0x48] sm:$0xff] %vm16_vm3, %v203_v38   ;;  %v6230_v46 = vld [vmem:[%s12308_s0 + $0xb] ss:$16 sm:%s1805_s16]   ;;  %v8499_v8 = vpop.permute.xlu0 %947   ;;  %s1893_s16 = smov 3 }
  0xcf   :  { %v6231_v47 = vld [vmem:[%s12308_s0 + $0xb] ss:$16 sm:%s1810_s17]   ;;  %5946 = vst.msk [vmem:[%s12309_s1 + $0x48] sm:$0xff] %vm353_vm4, %v8028_v6   ;;  %v1840_v6 = vsel %vm14_vm2, %v6236_v40, %v1835_v45  ;;  %v1808_v48 = vsel %vm6_vm0, %v6230_v46, %v6229_v41  ;;  %s2113_s17 = smov 192 }
  0xd0   :  { %v6232_v50 = vld [vmem:[%s12308_s0 + $0xb] ss:$16 sm:%s1815_s25]   ;;  %v5863_v51 = vld [vmem:[%s12308_s0 + $0x300] ss:$16 sm:%s124_s26]   ;;  %v1813_v52 = vsel %vm10_vm1, %v6231_v47, %v1808_v48  ;;  %s1896_s25 = smov 12  ;;  %s1901_s26 = smov 48 }
  0xd1   :  { %1841 = vrot.lane.b32.xlu1 %v1840_v6, %s7117_s19  ;;  %v5864_v14 = vld [vmem:[%s12308_s0 + $0x300] ss:$16 sm:%s127_s2]   ;;  %6025 = vst.msk [vmem:[%s12309_s1 + $0x48] sm:$0xff] %vm720_vm5, %v856_v35   ;;  %v1818_v55 = vsel %vm14_vm2, %v6232_v50, %v1813_v52  ;;  %s53_s2 = smov 192 }
  0xd2   :  { %v130_v56 = vsel %vm6_vm0, %v5864_v14, %v5863_v51  ;;  %v5865_v57 = vld [vmem:[%s12308_s0 + $0x300] ss:$16 sm:%s132_s11]   ;;  %1819 = vrot.lane.b32.xlu0 %v1818_v55, %s7117_s19  ;;  %v8524_v18 = vpop.permute.xlu1 %1016   ;;  %s1924_s11 = smov 48 }
  0xd3   :  { %v5866_v58 = vld [vmem:[%s12308_s0 + $0x300] ss:$16 sm:%s137_s12]   ;;  %v135_v59 = vsel %vm10_vm1, %v5865_v57, %v130_v56  ;;  %s1883_s12 = smov 192  ;;  %v6243_v3 = vld [vmem:[%s12308_s0 + $0x60b] ss:$16 sm:%s1870_s3]   ;;  %s69_s3 = smov 48 }
  0xd4   :  { %v5843_v62 = vld [vmem:[%s12308_s0 + $0x100] ss:$16 sm:%s40_s18]   ;;  %v140_v63 = vsel %vm14_vm2, %v5866_v58, %v135_v59  ;;  %v6244_v5 = vld [vmem:[%s12308_s0 + $0x60b] ss:$16 sm:%s1873_s7]   ;;  %s295_s7 = smov 12  ;;  %s153_s18 = smov 48 }
  0xd5   :  { %v5844_v0 = vld [vmem:[%s12308_s0 + $0x100] ss:$16 sm:%s43_s23]   ;;  %5867 = vst.msk [vmem:[%s12309_s1 + $0x30] sm:$0xff] %vm16_vm3, %v140_v63   ;;  %v1876_v54 = vsel %vm6_vm0, %v6244_v5, %v6243_v3  ;;  %s1975_s23 = smov 192 }
  0xd6   :  { %v5845_v22 = vld [vmem:[%s12308_s0 + $0x100] ss:$16 sm:%s48_s24]   ;;  %v46_v1 = vsel %vm6_vm0, %v5844_v0, %v5843_v62  ;;  %5961 = vst.msk [vmem:[%s12309_s1 + $0x30] sm:$0xff] %vm353_vm4, %v8042_v12   ;;  %s208_s24 = smov 3  ;;  %v8556_v30 = vpop.permute.xlu0 %993  }
  0xd7   :  { %v5846_v2 = vld [vmem:[%s12308_s0 + $0x100] ss:$16 sm:%s53_s2]   ;;  %v51_v12 = vsel %vm10_vm1, %v5845_v22, %v46_v1  ;;  %v6245_v7 = vld [vmem:[%s12308_s0 + $0x60b] ss:$16 sm:%s1878_s8]   ;;  %s1916_s8 = smov 3  ;;  %s64_s2 = smov 12 }
  0xd8   :  { %v56_v9 = vsel %vm14_vm2, %v5846_v2, %v51_v12  ;;  %v6246_v10 = vld [vmem:[%s12308_s0 + $0x60b] ss:$16 sm:%s1883_s12]   ;;  %6040 = vst.msk [vmem:[%s12309_s1 + $0x30] sm:$0xff] %vm720_vm5, %v925_v43   ;;  %v1881_v13 = vsel %vm10_vm1, %v6245_v7, %v1876_v54  ;;  %s74_s12 = smov 192 }
  0xd9   :  { %v6238_v11 = vld [vmem:[%s12308_s0 + $0x40b] ss:$16 sm:%s1847_s13]   ;;  %5847 = vst.msk [vmem:[%s12309_s1 + $0x10] sm:$0xff] %vm16_vm3, %v56_v9   ;;  %s1962_s13 = smov 3 }
  0xda   :  { %v6239_v15 = vld [vmem:[%s12308_s0 + $0x40b] ss:$16 sm:%s1850_s20]   ;;  %5956 = vst.msk [vmem:[%s12309_s1 + $0x10] sm:$0xff] %vm353_vm4, %v8064_v24   ;;  %v1886_v24 = vsel %vm14_vm2, %v6246_v10, %v1881_v13  ;;  %v8570_v36 = vpop.permute.xlu1 %1062   ;;  %s158_s20 = smov 192 }
  0xdb   :  { %v6240_v17 = vld [vmem:[%s12308_s0 + $0x40b] ss:$16 sm:%s1855_s21]   ;;  %v1853_v19 = vsel %vm6_vm0, %v6239_v15, %v6238_v11  ;;  %v5903_v21 = vld [vmem:[%s12308_s0 + $0x700] ss:$16 sm:%s292_s6]   ;;  %s321_s6 = smov 48  ;;  %s2031_s21 = smov 3 }
  0xdc   :  { %v6241_v20 = vld [vmem:[%s12308_s0 + $0x40b] ss:$16 sm:%s1860_s30]   ;;  %1887 = vrot.lane.b32.xlu1 %v1886_v24, %s7117_s19  ;;  %v1858_v23 = vsel %vm10_vm1, %v6240_v17, %v1853_v19  ;;  %6035 = vst.msk [vmem:[%s12309_s1 + $0x10] sm:$0xff] %vm720_vm5, %v902_v53   ;;  %s2011_s30 = smov 12 }
  0xdd   :  { %v5904_v25 = vld [vmem:[%s12308_s0 + $0x700] ss:$16 sm:%s295_s7]   ;;  %v1863_v28 = vsel %vm14_vm2, %v6241_v20, %v1858_v23  ;;  %s221_s7 = smov 192  ;;  %v6253_v39 = vld [vmem:[%s12308_s0 + $0x28b] ss:$16 sm:%s1916_s8]   ;;  %s1985_s8 = smov 3 }
  0xde   :  { %v298_v26 = vsel %vm6_vm0, %v5904_v25, %v5903_v21  ;;  %v5905_v27 = vld [vmem:[%s12308_s0 + $0x700] ss:$16 sm:%s300_s14]   ;;  %1864 = vrot.lane.b32.xlu0 %v1863_v28, %s7117_s19  ;;  %v8608_v6 = vpop.permute.xlu0 %1039   ;;  %v1108_v55 = vpop.permute.xlu1 %1107   ;;  %s237_s14 = smov 48 }
  0xdf   :  { %v5906_v29 = vld [vmem:[%s12308_s0 + $0x700] ss:$16 sm:%s305_s15]   ;;  %v303_v32 = vsel %vm10_vm1, %v5905_v27, %v298_v26  ;;  %s1929_s15 = smov 192  ;;  %v6254_v40 = vld [vmem:[%s12308_s0 + $0x28b] ss:$16 sm:%s1919_s10]   ;;  %s148_s10 = smov 12 }
  0xe0   :  { %v5883_v33 = vld [vmem:[%s12308_s0 + $0x500] ss:$16 sm:%s208_s24]   ;;  %v308_v34 = vsel %vm14_vm2, %v5906_v29, %v303_v32  ;;  %v6255_v41 = vld [vmem:[%s12308_s0 + $0x28b] ss:$16 sm:%s1924_s11]   ;;  %v1922_v45 = vsel %vm6_vm0, %v6254_v40, %v6253_v39  ;;  %s1939_s24 = smov 3  ;;  %s7119_s11 = smov 72  }
  0xe1   :  { %v5884_v35 = vld [vmem:[%s12308_s0 + $0x500] ss:$16 sm:%s211_s28]   ;;  %5907 = vst.msk [vmem:[%s12309_s1 + $0x70] sm:$0xff] %vm16_vm3, %v308_v34   ;;  %v1927_v48 = vsel %vm10_vm1, %v6255_v41, %v1922_v45  ;;  %s2080_s28 = smov 12 }
  0xe2   :  { %v5885_v60 = vld [vmem:[%s12308_s0 + $0x500] ss:$16 sm:%s216_s29]   ;;  %v214_v37 = vsel %vm6_vm0, %v5884_v35, %v5883_v33  ;;  %5971 = vst.msk [vmem:[%s12309_s1 + $0x70] sm:$0xff] %vm353_vm4, %v8078_v31   ;;  %s61_s29 = smov 3  ;;  %v1086_v22 = vpop.permute.xlu0 %1085  }
  0xe3   :  { %v5886_v38 = vld [vmem:[%s12308_s0 + $0x500] ss:$16 sm:%s221_s7]   ;;  %v219_v31 = vsel %vm10_vm1, %v5885_v60, %v214_v37  ;;  %v6256_v46 = vld [vmem:[%s12308_s0 + $0x28b] ss:$16 sm:%s1929_s15]   ;;  %s1965_s15 = smov 12  ;;  %s2021_s7 = smov 192 }
  0xe4   :  { %v224_v43 = vsel %vm14_vm2, %v5886_v38, %v219_v31  ;;  %v6248_v47 = vld [vmem:[%s12308_s0 + $0x8b] ss:$16 sm:%s1893_s16]   ;;  %6050 = vst.msk [vmem:[%s12309_s1 + $0x70] sm:$0xff] %vm720_vm5, %v8467_v44   ;;  %s1970_s16 = smov 48 }
  0xe5   :  { %5887 = vst.msk [vmem:[%s12309_s1 + $0x50] sm:$0xff] %vm16_vm3, %v224_v43   ;;  %v6249_v50 = vld [vmem:[%s12308_s0 + $0x8b] ss:$16 sm:%s1896_s25]   ;;  %s1998_s25 = smov 192 }
  0xe6   :  { %v6250_v51 = vld [vmem:[%s12308_s0 + $0x8b] ss:$16 sm:%s1901_s26]   ;;  %5966 = vst.msk [vmem:[%s12309_s1 + $0x50] sm:$0xff] %vm353_vm4, %v8100_v42   ;;  %v1932_v42 = vsel %vm14_vm2, %v6256_v46, %v1927_v48  ;;  %v1899_v52 = vsel %vm6_vm0, %v6249_v50, %v6248_v47  ;;  %v1131_v19 = vpop.permute.xlu0 %1130   ;;  %s2054_s26 = smov 3 }
  0xe7   :  { %v6251_v14 = vld [vmem:[%s12308_s0 + $0x8b] ss:$16 sm:%s1906_s4]   ;;  %v5868_v53 = vld [vmem:[%s12308_s0 + $0x380] ss:$16 sm:%s145_s5]   ;;  %v1904_v56 = vsel %vm10_vm1, %v6250_v51, %v1899_v52  ;;  %s1942_s4 = smov 12  ;;  %s1947_s5 = smov 48 }
  0xe8   :  { %1933 = vrot.lane.b32.xlu1 %v1932_v42, %s7117_s19  ;;  %v5869_v57 = vld [vmem:[%s12308_s0 + $0x380] ss:$16 sm:%s148_s10]   ;;  %6045 = vst.msk [vmem:[%s12309_s1 + $0x50] sm:$0xff] %vm720_vm5, %v8499_v8   ;;  %v1909_v58 = vsel %vm14_vm2, %v6251_v14, %v1904_v56  ;;  %v1154_v8 = vpop.permute.xlu1 %1153   ;;  %s2103_s10 = smov 12 }
  0xe9   :  { %6079 = vst.msk [vmem:[%s12309_s1 + $0x20] sm:$0xff] %vm1087_vm6, %v1108_v55   ;;  %v151_v59 = vsel %vm6_vm0, %v5869_v57, %v5868_v53  ;;  %v5870_v62 = vld [vmem:[%s12308_s0 + $0x380] ss:$16 sm:%s153_s18]   ;;  %1910 = vrot.lane.b32.xlu0 %v1909_v58, %s7117_s19  ;;  %s2490_s18 = smov 3 }
  0xea   :  { %v5871_v44 = vld [vmem:[%s12308_s0 + $0x380] ss:$16 sm:%s158_s20]   ;;  %v156_v63 = vsel %vm10_vm1, %v5870_v62, %v151_v59  ;;  %1088 = vst.msk [vmem:[%s12309_s1] sm:$0xff] %vm1087_vm6, %v1086_v22   ;;  %6089 = vst.msk [vmem:[%s12309_s1 + $0x60] sm:$0xff] %vm1087_vm6, %v1154_v8   ;;  %s316_s20 = smov 12  ;;  %v1177_v38 = vpop.permute.xlu0 %1176  }
  0xeb   :  { %v5848_v0 = vld [vmem:[%s12308_s0 + $0x180] ss:$16 sm:%s61_s29]   ;;  %v161_v1 = vsel %vm14_vm2, %v5871_v44, %v156_v63  ;;  %v6263_v7 = vld [vmem:[%s12308_s0 + $0x68b] ss:$16 sm:%s1962_s13]   ;;  %s313_s13 = smov 3  ;;  %s2085_s29 = smov 48 }
  0xec   :  { %v5849_v2 = vld [vmem:[%s12308_s0 + $0x180] ss:$16 sm:%s64_s2]   ;;  %5872 = vst.msk [vmem:[%s12309_s1 + $0x38] sm:$0xff] %vm16_vm3, %v161_v1   ;;  %s326_s2 = smov 192  ;;  %v1200_v26 = vpop.permute.xlu1 %1199  }
  0xed   :  { %v5850_v3 = vld [vmem:[%s12308_s0 + $0x180] ss:$16 sm:%s69_s3]   ;;  %v67_v12 = vsel %vm6_vm0, %v5849_v2, %v5848_v0  ;;  %5981 = vst.msk [vmem:[%s12309_s1 + $0x38] sm:$0xff] %vm353_vm4, %v8114_v49   ;;  %s2653_s3 = smov 12 }
  0xee   :  { %v5851_v5 = vld [vmem:[%s12308_s0 + $0x180] ss:$16 sm:%s74_s12]   ;;  %v72_v49 = vsel %vm10_vm1, %v5850_v3, %v67_v12  ;;  %v6264_v9 = vld [vmem:[%s12308_s0 + $0x68b] ss:$16 sm:%s1965_s15]   ;;  %s1952_s12 = smov 192  ;;  %v1223_v55 = vpop.permute.xlu0 %1222   ;;  %s2245_s15 = smov 48 }
  0xef   :  { %v6265_v54 = vld [vmem:[%s12308_s0 + $0x68b] ss:$16 sm:%s1970_s16]   ;;  %v77_v10 = vsel %vm14_vm2, %v5851_v5, %v72_v49  ;;  %v1968_v11 = vsel %vm6_vm0, %v6264_v9, %v6263_v7  ;;  %6060 = vst.msk [vmem:[%s12309_s1 + $0x38] sm:$0xff] %vm720_vm5, %v8524_v18   ;;  %s2108_s16 = smov 48 }
  0xf0   :  { %v6266_v13 = vld [vmem:[%s12308_s0 + $0x68b] ss:$16 sm:%s1975_s23]   ;;  %5852 = vst.msk [vmem:[%s12309_s1 + $0x18] sm:$0xff] %vm16_vm3, %v77_v10   ;;  %v1973_v17 = vsel %vm10_vm1, %v6265_v54, %v1968_v11  ;;  %s242_s23 = smov 192  ;;  %v1246_v45 = vpop.permute.xlu1 %1245  }
  0xf1   :  { %v6258_v15 = vld [vmem:[%s12308_s0 + $0x48b] ss:$16 sm:%s1939_s24]   ;;  %5976 = vst.msk [vmem:[%s12309_s1 + $0x18] sm:$0xff] %vm353_vm4, %v8147_v61   ;;  %v1978_v61 = vsel %vm14_vm2, %v6266_v13, %v1973_v17  ;;  %s2008_s24 = smov 3 }
  0xf2   :  { %v6259_v18 = vld [vmem:[%s12308_s0 + $0x48b] ss:$16 sm:%s1942_s4]   ;;  %v5908_v23 = vld [vmem:[%s12308_s0 + $0x780] ss:$16 sm:%s313_s13]   ;;  %s2062_s13 = smov 48  ;;  %v1269_v5 = vpop.permute.xlu0 %1268   ;;  %s2604_s4 = smov 3 }
  0xf3   :  { %v6260_v24 = vld [vmem:[%s12308_s0 + $0x48b] ss:$16 sm:%s1947_s5]   ;;  %v1945_v20 = vsel %vm6_vm0, %v6259_v18, %v6258_v15  ;;  %6084 = vst.msk [vmem:[%s12309_s1 + $0x40] sm:$0xff] %vm1087_vm6, %v1131_v19   ;;  %1979 = vrot.lane.b32.xlu1 %v1978_v61, %s7117_s19  ;;  %s2558_s5 = smov 3 }
  0xf4   :  { %v6261_v21 = vld [vmem:[%s12308_s0 + $0x48b] ss:$16 sm:%s1952_s12]   ;;  %v1950_v25 = vsel %vm10_vm1, %v6260_v24, %v1945_v20  ;;  %v5909_v28 = vld [vmem:[%s12308_s0 + $0x780] ss:$16 sm:%s316_s20]   ;;  %v1292_v44 = vpop.permute.xlu1 %1291   ;;  %s2566_s12 = smov 48  ;;  %s2584_s20 = smov 12 }
  0xf5   :  { %6055 = vst.msk [vmem:[%s12309_s1 + $0x18] sm:$0xff] %vm720_vm5, %v8556_v30   ;;  %v1955_v27 = vsel %vm14_vm2, %v6261_v21, %v1950_v25  ;;  %v319_v29 = vsel %vm6_vm0, %v5909_v28, %v5908_v23  ;;  %v5910_v30 = vld [vmem:[%s12308_s0 + $0x780] ss:$16 sm:%s321_s6]   ;;  %s2016_s6 = smov 48 }
  0xf6   :  { %v5911_v32 = vld [vmem:[%s12308_s0 + $0x780] ss:$16 sm:%s326_s2]   ;;  %6099 = vst.msk [vmem:[%s12309_s1 + $0x28] sm:$0xff] %vm1087_vm6, %v1200_v26   ;;  %1956 = vrot.lane.b32.xlu0 %v1955_v27, %s7117_s19  ;;  %v324_v33 = vsel %vm10_vm1, %v5910_v30, %v319_v29  ;;  %s2057_s2 = smov 12 }
  0xf7   :  { %v5888_v34 = vld [vmem:[%s12308_s0 + $0x580] ss:$16 sm:%s229_s22]   ;;  %v329_v35 = vsel %vm14_vm2, %v5911_v32, %v324_v33  ;;  %v6273_v40 = vld [vmem:[%s12308_s0 + $0x30b] ss:$16 sm:%s2008_s24]   ;;  %s2100_s22 = smov 3  ;;  %s3030_s24 = smov 192 }
  0xf8   :  { %v5889_v60 = vld [vmem:[%s12308_s0 + $0x580] ss:$16 sm:%s232_s27]   ;;  %5912 = vst.msk [vmem:[%s12309_s1 + $0x78] sm:$0xff] %vm16_vm3, %v329_v35   ;;  %s1988_s27 = smov 12  ;;  %v1338_v13 = vpop.permute.xlu1 %1337  }
  0xf9   :  { %v5890_v37 = vld [vmem:[%s12308_s0 + $0x580] ss:$16 sm:%s237_s14]   ;;  %v235_v39 = vsel %vm6_vm0, %v5889_v60, %v5888_v34  ;;  %s1993_s14 = smov 48  ;;  %6094 = vst.msk [vmem:[%s12309_s1 + $0x8] sm:$0xff] %vm1087_vm6, %v1177_v38   ;;  %6109 = vst.msk [vmem:[%s12309_s1 + $0x68] sm:$0xff] %vm1087_vm6, %v1246_v45   ;;  %v1315_v21 = vpop.permute.xlu0 %1314  }
  0xfa   :  { %v5891_v31 = vld [vmem:[%s12308_s0 + $0x580] ss:$16 sm:%s242_s23]   ;;  %5991 = vst.msk [vmem:[%s12309_s1 + $0x78] sm:$0xff] %vm353_vm4, %v8173_v4   ;;  %v240_v4 = vsel %vm10_vm1, %v5890_v37, %v235_v39  ;;  %s2732_s23 = smov 192 }
  0xfb   :  { %v6274_v41 = vld [vmem:[%s12308_s0 + $0x30b] ss:$16 sm:%s2011_s30]   ;;  %v245_v46 = vsel %vm14_vm2, %v5891_v31, %v240_v4  ;;  %6070 = vst.msk [vmem:[%s12309_s1 + $0x78] sm:$0xff] %vm720_vm5, %v8570_v36   ;;  %s2745_s30 = smov 12 }
  0xfc   :  { %v6275_v43 = vld [vmem:[%s12308_s0 + $0x30b] ss:$16 sm:%s2016_s6]   ;;  %v2014_v47 = vsel %vm6_vm0, %v6274_v41, %v6273_v40  ;;  %5892 = vst.msk [vmem:[%s12309_s1 + $0x58] sm:$0xff] %vm16_vm3, %v245_v46   ;;  %s2696_s6 = smov 3  ;;  %vm4757_vm3 = vcmask 261312  }
  0xfd   :  { %v6276_v48 = vld [vmem:[%s12308_s0 + $0x30b] ss:$16 sm:%s2021_s7]   ;;  %v2019_v36 = vsel %vm10_vm1, %v6275_v43, %v2014_v47  ;;  %5986 = vst.msk [vmem:[%s12309_s1 + $0x58] sm:$0xff] %vm353_vm4, %v8193_v16   ;;  %s2044_s7 = smov 192  ;;  %v1384_v32 = vpop.permute.xlu1 %1383  }
  0xfe   :  { %v6268_v50 = vld [vmem:[%s12308_s0 + $0x10b] ss:$16 sm:%s1985_s8]   ;;  %v2024_v16 = vsel %vm14_vm2, %v6276_v48, %v2019_v36  ;;  %6065 = vst.msk [vmem:[%s12309_s1 + $0x58] sm:$0xff] %vm720_vm5, %v8608_v6   ;;  %s2658_s8 = smov 48 }
  0xff   :  { %v6269_v51 = vld [vmem:[%s12308_s0 + $0x10b] ss:$16 sm:%s1988_s27]   ;;  %s2067_s27 = smov 192  ;;  %2025 = vrot.lane.b32.xlu1 %v2024_v16, %s7117_s19  ;;  %6104 = vst.msk [vmem:[%s12309_s1 + $0x48] sm:$0xff] %vm1087_vm6, %v1223_v55  }
 0x100   :  { %v6270_v42 = vld [vmem:[%s12308_s0 + $0x10b] ss:$16 sm:%s1993_s14]   ;;  %v1991_v52 = vsel %vm6_vm0, %v6269_v51, %v6268_v50  ;;  %6119 = vst.msk [vmem:[%s12309_s1 + $0x30] sm:$0xff] %vm1087_vm6, %v1292_v44   ;;  %6114 = vst.msk [vmem:[%s12309_s1 + $0x10] sm:$0xff] %vm1087_vm6, %v1269_v5   ;;  %s2526_s14 = smov 192 }
 0x101   :  { %v6271_v14 = vld [vmem:[%s12308_s0 + $0x10b] ss:$16 sm:%s1998_s25]   ;;  %v1996_v56 = vsel %vm10_vm1, %v6270_v42, %v1991_v52  ;;  %s2034_s25 = smov 12  ;;  %6129 = vst.msk [vmem:[%s12309_s1 + $0x70] sm:$0xff] %vm1087_vm6, %v1338_v13   ;;  %6124 = vst.msk [vmem:[%s12309_s1 + $0x50] sm:$0xff] %vm1087_vm6, %v1315_v21   ;;  %v1361_v31 = vpop.permute.xlu0 %1360  }
 0x102   :  { %v6283_v53 = vld [vmem:[%s12308_s0 + $0x70b] ss:$16 sm:%s2054_s26]   ;;  %s2039_s26 = smov 48  ;;  %v2001_v6 = vsel %vm14_vm2, %v6271_v14, %v1996_v56  ;;  %6139 = vst.msk [vmem:[%s12309_s1 + $0x38] sm:$0xff] %vm1087_vm6, %v1384_v32   ;;  %6134 = vst.msk [vmem:[%s12309_s1 + $0x18] sm:$0xff] %vm1087_vm6, %v1361_v31  }
 0x103   :  { %v6284_v57 = vld [vmem:[%s12308_s0 + $0x70b] ss:$16 sm:%s2057_s2]   ;;  %2002 = vrot.lane.b32.xlu0 %v2001_v6, %s7117_s19  ;;  %s2503_s2 = smov 192 }
 0x104   :  { %v2060_v58 = vsel %vm6_vm0, %v6284_v57, %v6283_v53  ;;  %v6285_v59 = vld [vmem:[%s12308_s0 + $0x70b] ss:$16 sm:%s2062_s13]   ;;  %v6322_v56 = vld [vmem:[%s12308_s0 + $0x60a] ss:$16 sm:%s2237_s9]   ;;  %s2283_s9 = smov 3  ;;  %s2571_s13 = smov 192 }
 0x105   :  { %v6286_v62 = vld [vmem:[%s12308_s0 + $0x70b] ss:$16 sm:%s2067_s27]   ;;  %v2065_v63 = vsel %vm10_vm1, %v6285_v59, %v2060_v58  ;;  %v1430_v48 = vpop.permute.xlu1 %1429   ;;  %v6324_v59 = vld [vmem:[%s12308_s0 + $0x60a] ss:$16 sm:%s2245_s15]   ;;  %s2291_s15 = smov 48  ;;  %s2521_s27 = smov 48 }
 0x106   :  { %v6278_v0 = vld [vmem:[%s12308_s0 + $0x50b] ss:$16 sm:%s2031_s21]   ;;  %v2070_v22 = vsel %vm14_vm2, %v6286_v62, %v2065_v63  ;;  %s2077_s21 = smov 3  ;;  %6149 = vst.msk [vmem:[%s12309_s1 + $0x78] sm:$0xff] %vm1087_vm6, %v1430_v48  }
 0x107   :  { %v6279_v1 = vld [vmem:[%s12308_s0 + $0x50b] ss:$16 sm:%s2034_s25]   ;;  %2071 = vrot.lane.b32.xlu1 %v2070_v22, %s7117_s19  ;;  %s2493_s25 = smov 12 }
 0x108   :  { %v6280_v2 = vld [vmem:[%s12308_s0 + $0x50b] ss:$16 sm:%s2039_s26]   ;;  %v2037_v3 = vsel %vm6_vm0, %v6279_v1, %v6278_v0  ;;  %s2498_s26 = smov 48 }
 0x109   :  { %v6281_v12 = vld [vmem:[%s12308_s0 + $0x50b] ss:$16 sm:%s2044_s7]   ;;  %v2042_v7 = vsel %vm10_vm1, %v6280_v2, %v2037_v3  ;;  %s2090_s7 = smov 192  ;;  %v1407_v53 = vpop.permute.xlu0 %1406   ;;  %v1475_v44 = vpop.permute.xlu1 %1474  }
 0x10a   :  { %v6293_v8 = vld [vmem:[%s12308_s0 + $0x38b] ss:$16 sm:%s2100_s22]   ;;  %v2047_v9 = vsel %vm14_vm2, %v6281_v12, %v2042_v7  ;;  %s2146_s22 = smov 3  ;;  %6144 = vst.msk [vmem:[%s12309_s1 + $0x58] sm:$0xff] %vm1087_vm6, %v1407_v53  }
 0x10b   :  { %v6294_v49 = vld [vmem:[%s12308_s0 + $0x38b] ss:$16 sm:%s2103_s10]   ;;  %2048 = vrot.lane.b32.xlu0 %v2047_v9, %s7117_s19  ;;  %s2149_s10 = smov 12  ;;  %6158 = vst.msk [vmem:[%s12309_s1 + $0x20] sm:$0xff] %vm1454_vm7, %v1475_v44  }
 0x10c   :  { %v2106_v54 = vsel %vm6_vm0, %v6294_v49, %v6293_v8  ;;  %v6295_v10 = vld [vmem:[%s12308_s0 + $0x38b] ss:$16 sm:%s2108_s16]   ;;  %s2154_s16 = smov 48  ;;  %v6332_v8 = vld [vmem:[%s12308_s0 + $0x28a] ss:$16 sm:%s2283_s9]   ;;  %s2329_s9 = smov 3 }
 0x10d   :  { %v6296_v11 = vld [vmem:[%s12308_s0 + $0x38b] ss:$16 sm:%s2113_s17]   ;;  %v2111_v15 = vsel %vm10_vm1, %v6295_v10, %v2106_v54  ;;  %s2159_s17 = smov 192  ;;  %v1453_v5 = vpop.permute.xlu0 %1452   ;;  %v6334_v10 = vld [vmem:[%s12308_s0 + $0x28a] ss:$16 sm:%s2291_s15]   ;;  %v1521_v13 = vpop.permute.xlu1 %1520   ;;  %s2337_s15 = smov 48 }
 0x10e   :  { %v6288_v17 = vld [vmem:[%s12308_s0 + $0x18b] ss:$16 sm:%s2077_s21]   ;;  %v2116_v18 = vsel %vm14_vm2, %v6296_v11, %v2111_v15  ;;  %s2123_s21 = smov 3  ;;  %1455 = vst.msk [vmem:[%s12309_s1] sm:$0xff] %vm1454_vm7, %v1453_v5   ;;  %6168 = vst.msk [vmem:[%s12309_s1 + $0x60] sm:$0xff] %vm1454_vm7, %v1521_v13  }
 0x10f   :  { %v6289_v24 = vld [vmem:[%s12308_s0 + $0x18b] ss:$16 sm:%s2080_s28]   ;;  %2117 = vrot.lane.b32.xlu1 %v2116_v18, %s7117_s19  ;;  %s2126_s28 = smov 12 }
 0x110   :  { %v6290_v19 = vld [vmem:[%s12308_s0 + $0x18b] ss:$16 sm:%s2085_s29]   ;;  %v2083_v61 = vsel %vm6_vm0, %v6289_v24, %v6288_v17  ;;  %s2131_s29 = smov 48 }
 0x111   :  { %v6291_v20 = vld [vmem:[%s12308_s0 + $0x18b] ss:$16 sm:%s2090_s7]   ;;  %v2088_v23 = vsel %vm10_vm1, %v6290_v19, %v2083_v61  ;;  %s2136_s7 = smov 192  ;;  %v1498_v21 = vpop.permute.xlu0 %1497   ;;  %v1567_v32 = vpop.permute.xlu1 %1566  }
 0x112   :  { %v6303_v25 = vld [vmem:[%s12308_s0 + $0x78b] ss:$16 sm:%s2146_s22]   ;;  %v2093_v26 = vsel %vm14_vm2, %v6291_v20, %v2088_v23  ;;  %s2191_s22 = smov 3  ;;  %6163 = vst.msk [vmem:[%s12309_s1 + $0x40] sm:$0xff] %vm1454_vm7, %v1498_v21   ;;  %6178 = vst.msk [vmem:[%s12309_s1 + $0x28] sm:$0xff] %vm1454_vm7, %v1567_v32  }
 0x113   :  { %v6304_v28 = vld [vmem:[%s12308_s0 + $0x78b] ss:$16 sm:%s2149_s10]   ;;  %2094 = vrot.lane.b32.xlu0 %v2093_v26, %s7117_s19  ;;  %s2194_s10 = smov 12 }
 0x114   :  { %v2152_v27 = vsel %vm6_vm0, %v6304_v28, %v6303_v25  ;;  %v6305_v29 = vld [vmem:[%s12308_s0 + $0x78b] ss:$16 sm:%s2154_s16]   ;;  %s2199_s16 = smov 48  ;;  %v6312_v4 = vld [vmem:[%s12308_s0 + $0x20a] ss:$16 sm:%s2191_s22]   ;;  %s2240_s22 = smov 12 }
 0x115   :  { %v6306_v30 = vld [vmem:[%s12308_s0 + $0x78b] ss:$16 sm:%s2159_s17]   ;;  %v2157_v33 = vsel %vm10_vm1, %v6305_v29, %v2152_v27  ;;  %s2204_s17 = smov 192  ;;  %v6313_v41 = vld [vmem:[%s12308_s0 + $0x20a] ss:$16 sm:%s2194_s10]   ;;  %v1544_v31 = vpop.permute.xlu0 %1543   ;;  %v1613_v48 = vpop.permute.xlu1 %1612   ;;  %s2617_s10 = smov 192 }
 0x116   :  { %v6298_v34 = vld [vmem:[%s12308_s0 + $0x58b] ss:$16 sm:%s2123_s21]   ;;  %v2162_v35 = vsel %vm14_vm2, %v6306_v30, %v2157_v33  ;;  %s2169_s21 = smov 3  ;;  %v2197_v45 = vsel %vm6_vm0, %v6313_v41, %v6312_v4  ;;  %v6314_v46 = vld [vmem:[%s12308_s0 + $0x20a] ss:$16 sm:%s2199_s16]   ;;  %s2250_s16 = smov 192 }
 0x117   :  { %v6299_v60 = vld [vmem:[%s12308_s0 + $0x58b] ss:$16 sm:%s2126_s28]   ;;  %2163 = vrot.lane.b32.xlu1 %v2162_v35, %s7117_s19  ;;  %s2172_s28 = smov 12  ;;  %v2202_v50 = vsel %vm10_vm1, %v6314_v46, %v2197_v45  ;;  %6173 = vst.msk [vmem:[%s12309_s1 + $0x8] sm:$0xff] %vm1454_vm7, %v1544_v31  }
 0x118   :  { %v6300_v37 = vld [vmem:[%s12308_s0 + $0x58b] ss:$16 sm:%s2131_s29]   ;;  %v2129_v38 = vsel %vm6_vm0, %v6299_v60, %v6298_v34  ;;  %s2177_s29 = smov 48  ;;  %v6315_v47 = vld [vmem:[%s12308_s0 + $0x20a] ss:$16 sm:%s2204_s17]   ;;  %s7118_s17 = smov 80  }
 0x119   :  { %v6301_v39 = vld [vmem:[%s12308_s0 + $0x58b] ss:$16 sm:%s2136_s7]   ;;  %v2134_v40 = vsel %vm10_vm1, %v6300_v37, %v2129_v38  ;;  %s2182_s7 = smov 192  ;;  %v6308_v36 = vld [vmem:[%s12308_s0 + $0xa] ss:$16 sm:%s2169_s21]   ;;  %v2207_v51 = vsel %vm14_vm2, %v6315_v47, %v2202_v50  ;;  %s2214_s21 = smov 3  ;;  %v1590_v53 = vpop.permute.xlu0 %1589   ;;  %v1659_v44 = vpop.permute.xlu1 %1658  }
 0x11a   :  { %v2139_v43 = vsel %vm14_vm2, %v6301_v39, %v2134_v40  ;;  %v6309_v42 = vld [vmem:[%s12308_s0 + $0xa] ss:$16 sm:%s2172_s28]   ;;  %s2217_s28 = smov 12  ;;  %6188 = vst.msk [vmem:[%s12309_s1 + $0x68] sm:$0xff] %vm1454_vm7, %v1613_v48   ;;  %6183 = vst.msk [vmem:[%s12309_s1 + $0x48] sm:$0xff] %vm1454_vm7, %v1590_v53  }
 0x11b   :  { %2140 = vrot.lane.b32.xlu0 %v2139_v43, %s7117_s19  ;;  %v6310_v16 = vld [vmem:[%s12308_s0 + $0xa] ss:$16 sm:%s2177_s29]   ;;  %2208 = vrot.lane.b32.xlu1 %v2207_v51, %s7118_s17  ;;  %v2175_v52 = vsel %vm6_vm0, %v6309_v42, %v6308_v36  ;;  %s2222_s29 = smov 48  ;;  %s2709_s19 = smov 192 }
 0x11c   :  { %v6311_v14 = vld [vmem:[%s12308_s0 + $0xa] ss:$16 sm:%s2182_s7]   ;;  %v2180_v55 = vsel %vm10_vm1, %v6310_v16, %v2175_v52  ;;  %s2227_s7 = smov 192  ;;  %6198 = vst.msk [vmem:[%s12309_s1 + $0x30] sm:$0xff] %vm1454_vm7, %v1659_v44  }
 0x11d   :  { %v6323_v57 = vld [vmem:[%s12308_s0 + $0x60a] ss:$16 sm:%s2240_s22]   ;;  %v2185_v6 = vsel %vm14_vm2, %v6311_v14, %v2180_v55  ;;  %s2286_s22 = smov 12  ;;  %v1636_v5 = vpop.permute.xlu0 %1635   ;;  %v6391_v31 = vld [vmem:[%s12308_s0 + $0x209] ss:$16 sm:%s2558_s5]   ;;  %s2607_s5 = smov 12 }
 0x11e   :  { %v2243_v58 = vsel %vm6_vm0, %v6323_v57, %v6322_v56  ;;  %v6325_v62 = vld [vmem:[%s12308_s0 + $0x60a] ss:$16 sm:%s2250_s16]   ;;  %s2296_s16 = smov 192  ;;  %6193 = vst.msk [vmem:[%s12309_s1 + $0x10] sm:$0xff] %vm1454_vm7, %v1636_v5  }
 0x11f   :  { %2186 = vrot.lane.b32.xlu0 %v2185_v6, %s7118_s17  ;;  %v2248_v63 = vsel %vm10_vm1, %v6324_v59, %v2243_v58  ;;  %v6317_v0 = vld [vmem:[%s12308_s0 + $0x40a] ss:$16 sm:%s2214_s21]   ;;  %s2260_s21 = smov 3 }
 0x120   :  { %v2253_v22 = vsel %vm14_vm2, %v6325_v62, %v2248_v63  ;;  %v6318_v1 = vld [vmem:[%s12308_s0 + $0x40a] ss:$16 sm:%s2217_s28]   ;;  %s2263_s28 = smov 12 }
 0x121   :  { %v6319_v2 = vld [vmem:[%s12308_s0 + $0x40a] ss:$16 sm:%s2222_s29]   ;;  %2254 = vrot.lane.b32.xlu1 %v2253_v22, %s7118_s17  ;;  %v2220_v3 = vsel %vm6_vm0, %v6318_v1, %v6317_v0  ;;  %s2268_s29 = smov 48 }
 0x122   :  { %v6320_v12 = vld [vmem:[%s12308_s0 + $0x40a] ss:$16 sm:%s2227_s7]   ;;  %v2225_v7 = vsel %vm10_vm1, %v6319_v2, %v2220_v3  ;;  %s2273_s7 = smov 192 }
 0x123   :  { %v6333_v49 = vld [vmem:[%s12308_s0 + $0x28a] ss:$16 sm:%s2286_s22]   ;;  %v2230_v9 = vsel %vm14_vm2, %v6320_v12, %v2225_v7  ;;  %s2332_s22 = smov 12 }
 0x124   :  { %v2289_v54 = vsel %vm6_vm0, %v6333_v49, %v6332_v8  ;;  %v6335_v11 = vld [vmem:[%s12308_s0 + $0x28a] ss:$16 sm:%s2296_s16]   ;;  %2231 = vrot.lane.b32.xlu0 %v2230_v9, %s7118_s17  ;;  %s2342_s16 = smov 192 }
 0x125   :  { %v2294_v15 = vsel %vm10_vm1, %v6334_v10, %v2289_v54  ;;  %v6327_v17 = vld [vmem:[%s12308_s0 + $0x8a] ss:$16 sm:%s2260_s21]   ;;  %s2306_s21 = smov 3 }
 0x126   :  { %v2299_v18 = vsel %vm14_vm2, %v6335_v11, %v2294_v15  ;;  %v6328_v24 = vld [vmem:[%s12308_s0 + $0x8a] ss:$16 sm:%s2263_s28]   ;;  %s2309_s28 = smov 12 }
 0x127   :  { %v6329_v19 = vld [vmem:[%s12308_s0 + $0x8a] ss:$16 sm:%s2268_s29]   ;;  %2300 = vrot.lane.b32.xlu1 %v2299_v18, %s7118_s17  ;;  %v2266_v61 = vsel %vm6_vm0, %v6328_v24, %v6327_v17  ;;  %s2314_s29 = smov 48 }
 0x128   :  { %v6330_v20 = vld [vmem:[%s12308_s0 + $0x8a] ss:$16 sm:%s2273_s7]   ;;  %v2271_v23 = vsel %vm10_vm1, %v6329_v19, %v2266_v61  ;;  %s2319_s7 = smov 192 }
 0x129   :  { %v6342_v25 = vld [vmem:[%s12308_s0 + $0x68a] ss:$16 sm:%s2329_s9]   ;;  %v2276_v26 = vsel %vm14_vm2, %v6330_v20, %v2271_v23  ;;  %s2375_s9 = smov 3 }
 0x12a   :  { %v6343_v28 = vld [vmem:[%s12308_s0 + $0x68a] ss:$16 sm:%s2332_s22]   ;;  %2277 = vrot.lane.b32.xlu0 %v2276_v26, %s7118_s17  ;;  %s2378_s22 = smov 12 }
 0x12b   :  { %v2335_v27 = vsel %vm6_vm0, %v6343_v28, %v6342_v25  ;;  %v6344_v29 = vld [vmem:[%s12308_s0 + $0x68a] ss:$16 sm:%s2337_s15]   ;;  %s2383_s15 = smov 48 }
 0x12c   :  { %v6345_v30 = vld [vmem:[%s12308_s0 + $0x68a] ss:$16 sm:%s2342_s16]   ;;  %v2340_v33 = vsel %vm10_vm1, %v6344_v29, %v2335_v27  ;;  %s2388_s16 = smov 192  ;;  %v1705_v29 = vpop.permute.xlu1 %1704  }
 0x12d   :  { %v6337_v34 = vld [vmem:[%s12308_s0 + $0x48a] ss:$16 sm:%s2306_s21]   ;;  %v2345_v35 = vsel %vm14_vm2, %v6345_v30, %v2340_v33  ;;  %s2352_s21 = smov 3  ;;  %6208 = vst.msk [vmem:[%s12309_s1 + $0x70] sm:$0xff] %vm1454_vm7, %v1705_v29  }
 0x12e   :  { %v6338_v60 = vld [vmem:[%s12308_s0 + $0x48a] ss:$16 sm:%s2309_s28]   ;;  %2346 = vrot.lane.b32.xlu1 %v2345_v35, %s7118_s17  ;;  %s2355_s28 = smov 12 }
 0x12f   :  { %v6339_v37 = vld [vmem:[%s12308_s0 + $0x48a] ss:$16 sm:%s2314_s29]   ;;  %v2312_v38 = vsel %vm6_vm0, %v6338_v60, %v6337_v34  ;;  %s2360_s29 = smov 48  ;;  %v1682_v60 = vpop.permute.xlu0 %1681  }
 0x130   :  { %v6340_v39 = vld [vmem:[%s12308_s0 + $0x48a] ss:$16 sm:%s2319_s7]   ;;  %v2317_v40 = vsel %vm10_vm1, %v6339_v37, %v2312_v38  ;;  %s2365_s7 = smov 192  ;;  %6203 = vst.msk [vmem:[%s12309_s1 + $0x50] sm:$0xff] %vm1454_vm7, %v1682_v60   ;;  %v1751_v53 = vpop.permute.xlu1 %1750  }
 0x131   :  { %v6352_v4 = vld [vmem:[%s12308_s0 + $0x30a] ss:$16 sm:%s2375_s9]   ;;  %v2322_v43 = vsel %vm14_vm2, %v6340_v39, %v2317_v40  ;;  %s2421_s9 = smov 3  ;;  %6218 = vst.msk [vmem:[%s12309_s1 + $0x38] sm:$0xff] %vm1454_vm7, %v1751_v53  }
 0x132   :  { %v6353_v41 = vld [vmem:[%s12308_s0 + $0x30a] ss:$16 sm:%s2378_s22]   ;;  %2323 = vrot.lane.b32.xlu0 %v2322_v43, %s7118_s17  ;;  %s2424_s22 = smov 12 }
 0x133   :  { %v2381_v45 = vsel %vm6_vm0, %v6353_v41, %v6352_v4  ;;  %v6354_v46 = vld [vmem:[%s12308_s0 + $0x30a] ss:$16 sm:%s2383_s15]   ;;  %s2429_s15 = smov 48  ;;  %v6393_v43 = vld [vmem:[%s12308_s0 + $0x209] ss:$16 sm:%s2566_s12]   ;;  %s2819_s12 = smov 48 }
 0x134   :  { %v6355_v47 = vld [vmem:[%s12308_s0 + $0x30a] ss:$16 sm:%s2388_s16]   ;;  %v2386_v50 = vsel %vm10_vm1, %v6354_v46, %v2381_v45  ;;  %s2434_s16 = smov 192  ;;  %v6394_v45 = vld [vmem:[%s12308_s0 + $0x209] ss:$16 sm:%s2571_s13]   ;;  %s2768_s13 = smov 12 }
 0x135   :  { %v6347_v36 = vld [vmem:[%s12308_s0 + $0x10a] ss:$16 sm:%s2352_s21]   ;;  %v2391_v51 = vsel %vm14_vm2, %v6355_v47, %v2386_v50  ;;  %s2398_s21 = smov 3 }
 0x136   :  { %v6348_v42 = vld [vmem:[%s12308_s0 + $0x10a] ss:$16 sm:%s2355_s28]   ;;  %2392 = vrot.lane.b32.xlu1 %v2391_v51, %s7118_s17  ;;  %s2401_s28 = smov 12 }
 0x137   :  { %v6349_v16 = vld [vmem:[%s12308_s0 + $0x10a] ss:$16 sm:%s2360_s29]   ;;  %v2358_v52 = vsel %vm6_vm0, %v6348_v42, %v6347_v36  ;;  %s2406_s29 = smov 48 }
 0x138   :  { %v6350_v14 = vld [vmem:[%s12308_s0 + $0x10a] ss:$16 sm:%s2365_s7]   ;;  %v2363_v55 = vsel %vm10_vm1, %v6349_v16, %v2358_v52  ;;  %s2411_s7 = smov 192  ;;  %v6401_v52 = vld [vmem:[%s12308_s0 + $0x609] ss:$16 sm:%s2604_s4]   ;;  %s2857_s4 = smov 3 }
 0x139   :  { %v6362_v56 = vld [vmem:[%s12308_s0 + $0x70a] ss:$16 sm:%s2421_s9]   ;;  %v2368_v6 = vsel %vm14_vm2, %v6350_v14, %v2363_v55  ;;  %s2467_s9 = smov 3  ;;  %v6402_v14 = vld [vmem:[%s12308_s0 + $0x609] ss:$16 sm:%s2607_s5]  }
 0x13a   :  { %v6363_v57 = vld [vmem:[%s12308_s0 + $0x70a] ss:$16 sm:%s2424_s22]   ;;  %2369 = vrot.lane.b32.xlu0 %v2368_v6, %s7118_s17  ;;  %s2470_s22 = smov 12 }
 0x13b   :  { %v2427_v58 = vsel %vm6_vm0, %v6363_v57, %v6362_v56  ;;  %v6364_v59 = vld [vmem:[%s12308_s0 + $0x70a] ss:$16 sm:%s2429_s15]   ;;  %s2475_s15 = smov 48  ;;  %v2610_v56 = vsel %vm6_vm0, %v6402_v14, %v6401_v52  ;;  %v6404_v6 = vld [vmem:[%s12308_s0 + $0x609] ss:$16 sm:%s2617_s10]   ;;  %s2814_s10 = smov 12 }
 0x13c   :  { %v6365_v62 = vld [vmem:[%s12308_s0 + $0x70a] ss:$16 sm:%s2434_s16]   ;;  %v2432_v63 = vsel %vm10_vm1, %v6364_v59, %v2427_v58  ;;  %s2480_s16 = smov 192 }
 0x13d   :  { %v6357_v0 = vld [vmem:[%s12308_s0 + $0x50a] ss:$16 sm:%s2398_s21]   ;;  %v2437_v22 = vsel %vm14_vm2, %v6365_v62, %v2432_v63  ;;  %s2444_s21 = smov 3  ;;  %v1728_v62 = vpop.permute.xlu0 %1727   ;;  %v6397_v63 = vld [vmem:[%s12308_s0 + $0x409] ss:$16 sm:%s2584_s20]   ;;  %s2630_s20 = smov 12 }
 0x13e   :  { %v6358_v1 = vld [vmem:[%s12308_s0 + $0x50a] ss:$16 sm:%s2401_s28]   ;;  %2438 = vrot.lane.b32.xlu1 %v2437_v22, %s7118_s17  ;;  %s2447_s28 = smov 12  ;;  %6213 = vst.msk [vmem:[%s12309_s1 + $0x18] sm:$0xff] %vm1454_vm7, %v1728_v62  }
 0x13f   :  { %v6359_v2 = vld [vmem:[%s12308_s0 + $0x50a] ss:$16 sm:%s2406_s29]   ;;  %v2404_v3 = vsel %vm6_vm0, %v6358_v1, %v6357_v0  ;;  %s2452_s29 = smov 48 }
 0x140   :  { %v6360_v12 = vld [vmem:[%s12308_s0 + $0x50a] ss:$16 sm:%s2411_s7]   ;;  %v2409_v7 = vsel %vm10_vm1, %v6359_v2, %v2404_v3  ;;  %s2457_s7 = smov 192 }
 0x141   :  { %v6372_v8 = vld [vmem:[%s12308_s0 + $0x38a] ss:$16 sm:%s2467_s9]   ;;  %v2414_v9 = vsel %vm14_vm2, %v6360_v12, %v2409_v7  ;;  %s2513_s9 = smov 3  ;;  %v6412_v12 = vld [vmem:[%s12308_s0 + $0x289] ss:$16 sm:%s2653_s3]   ;;  %s2801_s3 = smov 192 }
 0x142   :  { %v6373_v49 = vld [vmem:[%s12308_s0 + $0x38a] ss:$16 sm:%s2470_s22]   ;;  %2415 = vrot.lane.b32.xlu0 %v2414_v9, %s7118_s17  ;;  %s2516_s22 = smov 12 }
 0x143   :  { %v2473_v54 = vsel %vm6_vm0, %v6373_v49, %v6372_v8  ;;  %v6374_v10 = vld [vmem:[%s12308_s0 + $0x38a] ss:$16 sm:%s2475_s15]   ;;  %s2536_s15 = smov 3  ;;  %v6413_v8 = vld [vmem:[%s12308_s0 + $0x289] ss:$16 sm:%s2658_s8]   ;;  %s2911_s8 = smov 48 }
 0x144   :  { %v6375_v11 = vld [vmem:[%s12308_s0 + $0x38a] ss:$16 sm:%s2480_s16]   ;;  %v2478_v13 = vsel %vm10_vm1, %v6374_v10, %v2473_v54  ;;  %v6387_v47 = vld [vmem:[%s12308_s0 + $0x9] ss:$16 sm:%s2536_s15]   ;;  %s2681_s15 = smov 48  ;;  %s2824_s16 = smov 192 }
 0x145   :  { %v6367_v15 = vld [vmem:[%s12308_s0 + $0x18a] ss:$16 sm:%s2444_s21]   ;;  %v2483_v17 = vsel %vm14_vm2, %v6375_v11, %v2478_v13  ;;  %s2589_s21 = smov 48  ;;  %v6407_v11 = vld [vmem:[%s12308_s0 + $0x89] ss:$16 sm:%s2630_s20]   ;;  %s2778_s20 = smov 192 }
 0x146   :  { %v6368_v18 = vld [vmem:[%s12308_s0 + $0x18a] ss:$16 sm:%s2447_s28]   ;;  %2484 = vrot.lane.b32.xlu1 %v2483_v17, %s7118_s17  ;;  %s2594_s28 = smov 192 }
 0x147   :  { %v6369_v24 = vld [vmem:[%s12308_s0 + $0x18a] ss:$16 sm:%s2452_s29]   ;;  %v2450_v19 = vsel %vm6_vm0, %v6368_v18, %v6367_v15  ;;  %v6398_v0 = vld [vmem:[%s12308_s0 + $0x409] ss:$16 sm:%s2589_s21]   ;;  %s2635_s21 = smov 48  ;;  %v1797_v18 = vpop.permute.xlu1 %1796   ;;  %s2742_s29 = smov 3 }
 0x148   :  { %v6370_v61 = vld [vmem:[%s12308_s0 + $0x18a] ss:$16 sm:%s2457_s7]   ;;  %v2455_v20 = vsel %vm10_vm1, %v6369_v24, %v2450_v19  ;;  %s2561_s7 = smov 12  ;;  %v6399_v1 = vld [vmem:[%s12308_s0 + $0x409] ss:$16 sm:%s2594_s28]   ;;  %s2640_s28 = smov 192 }
 0x149   :  { %v6382_v21 = vld [vmem:[%s12308_s0 + $0x78a] ss:$16 sm:%s2513_s9]   ;;  %v2460_v25 = vsel %vm14_vm2, %v6370_v61, %v2455_v20  ;;  %v6392_v40 = vld [vmem:[%s12308_s0 + $0x209] ss:$16 sm:%s2561_s7]   ;;  %s2663_s9 = smov 192  ;;  %s2704_s7 = smov 48 }
 0x14a   :  { %v6383_v23 = vld [vmem:[%s12308_s0 + $0x78a] ss:$16 sm:%s2516_s22]   ;;  %2461 = vrot.lane.b32.xlu0 %v2460_v25, %s7118_s17  ;;  %v2564_v41 = vsel %vm6_vm0, %v6392_v40, %v6391_v31  ;;  %s2612_s22 = smov 48  ;;  %6228 = vst.msk [vmem:[%s12309_s1 + $0x78] sm:$0xff] %vm1454_vm7, %v1797_v18  }
 0x14b   :  { %v2519_v28 = vsel %vm6_vm0, %v6383_v23, %v6382_v21  ;;  %v6384_v26 = vld [vmem:[%s12308_s0 + $0x78a] ss:$16 sm:%s2521_s27]   ;;  %v2569_v46 = vsel %vm10_vm1, %v6393_v43, %v2564_v41  ;;  %s2581_s27 = smov 3  ;;  %v6403_v57 = vld [vmem:[%s12308_s0 + $0x609] ss:$16 sm:%s2612_s22]   ;;  %s2673_s22 = smov 3 }
 0x14c   :  { %v6385_v27 = vld [vmem:[%s12308_s0 + $0x78a] ss:$16 sm:%s2526_s14]   ;;  %v2524_v30 = vsel %vm10_vm1, %v6384_v26, %v2519_v28  ;;  %v2574_v48 = vsel %vm14_vm2, %v6394_v45, %v2569_v46  ;;  %v2615_v58 = vsel %vm10_vm1, %v6403_v57, %v2610_v56  ;;  %v6396_v59 = vld [vmem:[%s12308_s0 + $0x409] ss:$16 sm:%s2581_s27]   ;;  %s2627_s27 = smov 3  ;;  %s2676_s14 = smov 12  ;;  %v1774_v28 = vpop.permute.xlu0 %1773  }
 0x14d   :  { %v6377_v32 = vld [vmem:[%s12308_s0 + $0x58a] ss:$16 sm:%s2490_s18]   ;;  %v2529_v33 = vsel %vm14_vm2, %v6385_v27, %v2524_v30  ;;  %v2620_v44 = vsel %vm14_vm2, %v6404_v6, %v2615_v58  ;;  %v2587_v22 = vsel %vm6_vm0, %v6397_v63, %v6396_v59  ;;  %v6414_v49 = vld [vmem:[%s12308_s0 + $0x289] ss:$16 sm:%s2663_s9]   ;;  %s2860_s9 = smov 12  ;;  %s3122_s18 = smov 192 }
 0x14e   :  { %v6378_v34 = vld [vmem:[%s12308_s0 + $0x58a] ss:$16 sm:%s2493_s25]   ;;  %2530 = vrot.lane.b32.xlu1 %v2529_v33, %s7118_s17  ;;  %s2539_s25 = smov 12  ;;  %v2592_v2 = vsel %vm10_vm1, %v6398_v0, %v2587_v22  ;;  %6223 = vst.msk [vmem:[%s12309_s1 + $0x58] sm:$0xff] %vm1454_vm7, %v1774_v28  }
 0x14f   :  { %v6379_v35 = vld [vmem:[%s12308_s0 + $0x58a] ss:$16 sm:%s2498_s26]   ;;  %v2496_v37 = vsel %vm6_vm0, %v6378_v34, %v6377_v32  ;;  %s2544_s26 = smov 48  ;;  %v6388_v50 = vld [vmem:[%s12308_s0 + $0x9] ss:$16 sm:%s2539_s25]   ;;  %v2597_v5 = vsel %vm14_vm2, %v6399_v1, %v2592_v2  ;;  %s2686_s25 = smov 192 }
 0x150   :  { %v6380_v38 = vld [vmem:[%s12308_s0 + $0x58a] ss:$16 sm:%s2503_s2]   ;;  %v2501_v39 = vsel %vm10_vm1, %v6379_v35, %v2496_v37  ;;  %s2549_s2 = smov 192  ;;  %v6389_v36 = vld [vmem:[%s12308_s0 + $0x9] ss:$16 sm:%s2544_s26]   ;;  %v2542_v51 = vsel %vm6_vm0, %v6388_v50, %v6387_v47  ;;  %s2788_s26 = smov 3  ;;  %v1842_v47 = vpop.permute.xlu1 %1841  }
 0x151   :  { %v2506_v4 = vsel %vm14_vm2, %v6380_v38, %v2501_v39  ;;  %v6390_v42 = vld [vmem:[%s12308_s0 + $0x9] ss:$16 sm:%s2549_s2]   ;;  %v2547_v16 = vsel %vm10_vm1, %v6389_v36, %v2542_v51  ;;  %s2699_s2 = smov 12  ;;  %6237 = vst.msk [vmem:[%s12309_s1 + $0x20] sm:$0xff] %vm1821_vm8, %v1842_v47  }
 0x152   :  { %2507 = vrot.lane.b32.xlu0 %v2506_v4, %s7118_s17  ;;  %2575 = vrot.lane.b32.xlu1 %v2574_v48, %s7119_s11  ;;  %v2552_v55 = vsel %vm14_vm2, %v6390_v42, %v2547_v16  ;;  %s2650_s17 = smov 3  ;;  %v6406_v54 = vld [vmem:[%s12308_s0 + $0x89] ss:$16 sm:%s2627_s27]   ;;  %s2773_s27 = smov 48  ;;  %v1820_v16 = vpop.permute.xlu0 %1819  }
 0x153   :  { %v6411_v3 = vld [vmem:[%s12308_s0 + $0x289] ss:$16 sm:%s2650_s17]   ;;  %v2633_v15 = vsel %vm6_vm0, %v6407_v11, %v6406_v54  ;;  %s2796_s17 = smov 48  ;;  %1822 = vst.msk [vmem:[%s12309_s1] sm:$0xff] %vm1821_vm8, %v1820_v16  }
 0x154   :  { %v2656_v7 = vsel %vm6_vm0, %v6412_v12, %v6411_v3  ;;  %v6408_v13 = vld [vmem:[%s12308_s0 + $0x89] ss:$16 sm:%s2635_s21]   ;;  %s2880_s21 = smov 3 }
 0x155   :  { %v2661_v9 = vsel %vm10_vm1, %v6413_v8, %v2656_v7  ;;  %v6409_v17 = vld [vmem:[%s12308_s0 + $0x89] ss:$16 sm:%s2640_s28]   ;;  %v2638_v24 = vsel %vm10_vm1, %v6408_v13, %v2633_v15  ;;  %s2791_s28 = smov 12  ;;  %v1888_v8 = vpop.permute.xlu1 %1887  }
 0x156   :  { %2553 = vrot.lane.b32.xlu0 %v2552_v55, %s7119_s11  ;;  %2621 = vrot.lane.b32.xlu1 %v2620_v44, %s7119_s11  ;;  %v2666_v10 = vsel %vm14_vm2, %v6414_v49, %v2661_v9  ;;  %v6421_v19 = vld [vmem:[%s12308_s0 + $0x689] ss:$16 sm:%s2696_s6]   ;;  %v2643_v20 = vsel %vm14_vm2, %v6409_v17, %v2638_v24  ;;  %v1865_v13 = vpop.permute.xlu0 %1864   ;;  %s2948_s6 = smov 3 }
 0x157   :  { %v6422_v61 = vld [vmem:[%s12308_s0 + $0x689] ss:$16 sm:%s2699_s2]   ;;  %6247 = vst.msk [vmem:[%s12309_s1 + $0x60] sm:$0xff] %vm1821_vm8, %v1888_v8   ;;  %6242 = vst.msk [vmem:[%s12309_s1 + $0x40] sm:$0xff] %vm1821_vm8, %v1865_v13   ;;  %s3135_s2 = smov 12 }
 0x158   :  { %v2702_v21 = vsel %vm6_vm0, %v6422_v61, %v6421_v19  ;;  %v6423_v23 = vld [vmem:[%s12308_s0 + $0x689] ss:$16 sm:%s2704_s7]   ;;  %s2750_s7 = smov 48 }
 0x159   :  { %v6424_v25 = vld [vmem:[%s12308_s0 + $0x689] ss:$16 sm:%s2709_s19]   ;;  %v2707_v26 = vsel %vm10_vm1, %v6423_v23, %v2702_v21  ;;  %s2755_s19 = smov 192 }
 0x15a   :  { %2598 = vrot.lane.b32.xlu0 %v2597_v5, %s7119_s11  ;;  %2667 = vrot.lane.b32.xlu1 %v2666_v10, %s7119_s11  ;;  %v6416_v27 = vld [vmem:[%s12308_s0 + $0x489] ss:$16 sm:%s2673_s22]   ;;  %v2712_v29 = vsel %vm14_vm2, %v6424_v25, %v2707_v26  ;;  %s2719_s22 = smov 3 }
 0x15b   :  { %v6417_v30 = vld [vmem:[%s12308_s0 + $0x489] ss:$16 sm:%s2676_s14]   ;;  %s2722_s14 = smov 12 }
 0x15c   :  { %v6418_v32 = vld [vmem:[%s12308_s0 + $0x489] ss:$16 sm:%s2681_s15]   ;;  %v2679_v33 = vsel %vm6_vm0, %v6417_v30, %v6416_v27  ;;  %s2727_s15 = smov 48 }
 0x15d   :  { %v6419_v34 = vld [vmem:[%s12308_s0 + $0x489] ss:$16 sm:%s2686_s25]   ;;  %v2684_v35 = vsel %vm10_vm1, %v6418_v32, %v2679_v33  ;;  %s2979_s25 = smov 48 }
 0x15e   :  { %2644 = vrot.lane.b32.xlu0 %v2643_v20, %s7119_s11  ;;  %2713 = vrot.lane.b32.xlu1 %v2712_v29, %s7119_s11  ;;  %v6431_v60 = vld [vmem:[%s12308_s0 + $0x309] ss:$16 sm:%s2742_s29]   ;;  %v2689_v38 = vsel %vm14_vm2, %v6419_v34, %v2684_v35  ;;  %s2888_s29 = smov 48 }
 0x15f   :  { %v6432_v37 = vld [vmem:[%s12308_s0 + $0x309] ss:$16 sm:%s2745_s30]   ;;  %s2893_s30 = smov 192 }
 0x160   :  { %v2748_v39 = vsel %vm6_vm0, %v6432_v37, %v6431_v60  ;;  %v6433_v31 = vld [vmem:[%s12308_s0 + $0x309] ss:$16 sm:%s2750_s7]   ;;  %s2765_s7 = smov 3 }
 0x161   :  { %v6434_v40 = vld [vmem:[%s12308_s0 + $0x309] ss:$16 sm:%s2755_s19]   ;;  %v2753_v4 = vsel %vm10_vm1, %v6433_v31, %v2748_v39  ;;  %s2906_s19 = smov 12 }
 0x162   :  { %2690 = vrot.lane.b32.xlu0 %v2689_v38, %s7119_s11  ;;  %v6426_v41 = vld [vmem:[%s12308_s0 + $0x109] ss:$16 sm:%s2719_s22]   ;;  %v2758_v43 = vsel %vm14_vm2, %v6434_v40, %v2753_v4  ;;  %s2865_s22 = smov 48  ;;  %v1934_v38 = vpop.permute.xlu1 %1933  }
 0x163   :  { %v6427_v45 = vld [vmem:[%s12308_s0 + $0x109] ss:$16 sm:%s2722_s14]   ;;  %2759 = vrot.lane.b32.xlu1 %v2758_v43, %s7119_s11  ;;  %s2971_s14 = smov 3  ;;  %6257 = vst.msk [vmem:[%s12309_s1 + $0x28] sm:$0xff] %vm1821_vm8, %v1934_v38   ;;  %v1911_v43 = vpop.permute.xlu0 %1910  }
 0x164   :  { %v6428_v46 = vld [vmem:[%s12308_s0 + $0x109] ss:$16 sm:%s2727_s15]   ;;  %v2725_v48 = vsel %vm6_vm0, %v6427_v45, %v6426_v41  ;;  %s2974_s15 = smov 12  ;;  %v6467_v4 = vld [vmem:[%s12308_s0 + $0x8] ss:$16 sm:%s2906_s19]   ;;  %s2951_s19 = smov 12 }
 0x165   :  { %v6429_v50 = vld [vmem:[%s12308_s0 + $0x109] ss:$16 sm:%s2732_s23]   ;;  %v2730_v36 = vsel %vm10_vm1, %v6428_v46, %v2725_v48  ;;  %s2883_s23 = smov 12  ;;  %v6468_v41 = vld [vmem:[%s12308_s0 + $0x8] ss:$16 sm:%s2911_s8]   ;;  %s2956_s8 = smov 48 }
 0x166   :  { %v6441_v51 = vld [vmem:[%s12308_s0 + $0x709] ss:$16 sm:%s2788_s26]   ;;  %v2735_v52 = vsel %vm14_vm2, %v6429_v50, %v2730_v36  ;;  %s2834_s26 = smov 3  ;;  %6252 = vst.msk [vmem:[%s12309_s1 + $0x8] sm:$0xff] %vm1821_vm8, %v1911_v43  }
 0x167   :  { %v6442_v42 = vld [vmem:[%s12308_s0 + $0x709] ss:$16 sm:%s2791_s28]   ;;  %2736 = vrot.lane.b32.xlu0 %v2735_v52, %s7119_s11  ;;  %s2837_s28 = smov 12 }
 0x168   :  { %v2794_v14 = vsel %vm6_vm0, %v6442_v42, %v6441_v51  ;;  %v6443_v53 = vld [vmem:[%s12308_s0 + $0x709] ss:$16 sm:%s2796_s17]   ;;  %s2842_s17 = smov 48  ;;  %v6480_v48 = vld [vmem:[%s12308_s0 + $0x608] ss:$16 sm:%s2971_s14]   ;;  %s3017_s14 = smov 3 }
 0x169   :  { %v6444_v55 = vld [vmem:[%s12308_s0 + $0x709] ss:$16 sm:%s2801_s3]   ;;  %v2799_v56 = vsel %vm10_vm1, %v6443_v53, %v2794_v14  ;;  %s2847_s3 = smov 192  ;;  %v6481_v50 = vld [vmem:[%s12308_s0 + $0x608] ss:$16 sm:%s2974_s15]   ;;  %s3020_s15 = smov 12 }
 0x16a   :  { %v6436_v57 = vld [vmem:[%s12308_s0 + $0x509] ss:$16 sm:%s2765_s7]   ;;  %v2804_v6 = vsel %vm14_vm2, %v6444_v55, %v2799_v56  ;;  %s2811_s7 = smov 3  ;;  %v2977_v51 = vsel %vm6_vm0, %v6481_v50, %v6480_v48  ;;  %v6482_v42 = vld [vmem:[%s12308_s0 + $0x608] ss:$16 sm:%s2979_s25]  }
 0x16b   :  { %v6437_v58 = vld [vmem:[%s12308_s0 + $0x509] ss:$16 sm:%s2768_s13]   ;;  %2805 = vrot.lane.b32.xlu1 %v2804_v6, %s7119_s11  ;;  %s2916_s13 = smov 192  ;;  %v2982_v52 = vsel %vm10_vm1, %v6482_v42, %v2977_v51 }
 0x16c   :  { %v6438_v59 = vld [vmem:[%s12308_s0 + $0x509] ss:$16 sm:%s2773_s27]   ;;  %v2771_v62 = vsel %vm6_vm0, %v6437_v58, %v6436_v57  ;;  %v6469_v46 = vld [vmem:[%s12308_s0 + $0x8] ss:$16 sm:%s2916_s13]   ;;  %s2961_s13 = smov 192  ;;  %s3066_s27 = smov 12 }
 0x16d   :  { %v6439_v44 = vld [vmem:[%s12308_s0 + $0x509] ss:$16 sm:%s2778_s20]   ;;  %v2776_v63 = vsel %vm10_vm1, %v6438_v59, %v2771_v62  ;;  %v6475_v14 = vld [vmem:[%s12308_s0 + $0x408] ss:$16 sm:%s2948_s6]   ;;  %s3071_s20 = smov 48  ;;  %s3094_s6 = smov 48 }
 0x16e   :  { %v6451_v0 = vld [vmem:[%s12308_s0 + $0x389] ss:$16 sm:%s2834_s26]   ;;  %v2781_v1 = vsel %vm14_vm2, %v6439_v44, %v2776_v63  ;;  %s2984_s26 = smov 192  ;;  %v6476_v55 = vld [vmem:[%s12308_s0 + $0x408] ss:$16 sm:%s2951_s19]   ;;  %v1980_v44 = vpop.permute.xlu1 %1979   ;;  %s3099_s19 = smov 192 }
 0x16f   :  { %v6452_v22 = vld [vmem:[%s12308_s0 + $0x389] ss:$16 sm:%s2837_s28]   ;;  %2782 = vrot.lane.b32.xlu0 %v2781_v1, %s7119_s11  ;;  %s7120_s28 = smov 64   ;;  %v2954_v57 = vsel %vm6_vm0, %v6476_v55, %v6475_v14  ;;  %6267 = vst.msk [vmem:[%s12309_s1 + $0x68] sm:$0xff] %vm1821_vm8, %v1980_v44  }
 0x170   :  { %v2840_v2 = vsel %vm6_vm0, %v6452_v22, %v6451_v0  ;;  %v6453_v3 = vld [vmem:[%s12308_s0 + $0x389] ss:$16 sm:%s2842_s17]   ;;  %s2903_s17 = smov 3  ;;  %v6483_v16 = vld [vmem:[%s12308_s0 + $0x608] ss:$16 sm:%s2984_s26]  }
 0x171   :  { %v6454_v12 = vld [vmem:[%s12308_s0 + $0x389] ss:$16 sm:%s2847_s3]   ;;  %v2845_v5 = vsel %vm10_vm1, %v6453_v3, %v2840_v2  ;;  %v6466_v31 = vld [vmem:[%s12308_s0 + $0x8] ss:$16 sm:%s2903_s17]   ;;  %v2987_v53 = vsel %vm14_vm2, %v6483_v16, %v2982_v52  ;;  %s2997_s3 = smov 12  ;;  %s3140_s17 = smov 48 }
 0x172   :  { %v6446_v7 = vld [vmem:[%s12308_s0 + $0x189] ss:$16 sm:%s2811_s7]   ;;  %v2850_v49 = vsel %vm14_vm2, %v6454_v12, %v2845_v5  ;;  %v2909_v45 = vsel %vm6_vm0, %v6467_v4, %v6466_v31  ;;  %v6477_v56 = vld [vmem:[%s12308_s0 + $0x408] ss:$16 sm:%s2956_s8]   ;;  %v1957_v12 = vpop.permute.xlu0 %1956   ;;  %s3705_s8 = smov 3 }
 0x173   :  { %v6447_v9 = vld [vmem:[%s12308_s0 + $0x189] ss:$16 sm:%s2814_s10]   ;;  %2851 = vrot.lane.b32.xlu1 %v2850_v49, %s7119_s11  ;;  %v2914_v47 = vsel %vm10_vm1, %v6468_v41, %v2909_v45  ;;  %v2959_v58 = vsel %vm10_vm1, %v6477_v56, %v2954_v57  ;;  %6262 = vst.msk [vmem:[%s12309_s1 + $0x48] sm:$0xff] %vm1821_vm8, %v1957_v12   ;;  %s3158_s10 = smov 12 }
 0x174   :  { %v6448_v54 = vld [vmem:[%s12308_s0 + $0x189] ss:$16 sm:%s2819_s12]   ;;  %v2817_v10 = vsel %vm6_vm0, %v6447_v9, %v6446_v7  ;;  %v2919_v36 = vsel %vm14_vm2, %v6469_v46, %v2914_v47  ;;  %v6478_v6 = vld [vmem:[%s12308_s0 + $0x408] ss:$16 sm:%s2961_s13]   ;;  %s3109_s12 = smov 3  ;;  %s3112_s13 = smov 12 }
 0x175   :  { %v6449_v11 = vld [vmem:[%s12308_s0 + $0x189] ss:$16 sm:%s2824_s16]   ;;  %v2822_v15 = vsel %vm10_vm1, %v6448_v54, %v2817_v10  ;;  %s2870_s16 = smov 192  ;;  %v6490_v59 = vld [vmem:[%s12308_s0 + $0x288] ss:$16 sm:%s3017_s14]   ;;  %v2964_v63 = vsel %vm14_vm2, %v6478_v6, %v2959_v58  ;;  %s3713_s14 = smov 48 }
 0x176   :  { %v6461_v17 = vld [vmem:[%s12308_s0 + $0x789] ss:$16 sm:%s2880_s21]   ;;  %v2827_v24 = vsel %vm14_vm2, %v6449_v11, %v2822_v15  ;;  %s2925_s21 = smov 3  ;;  %v6491_v62 = vld [vmem:[%s12308_s0 + $0x288] ss:$16 sm:%s3020_s15]   ;;  %s3346_s15 = smov 48 }
 0x177   :  { %v6462_v18 = vld [vmem:[%s12308_s0 + $0x789] ss:$16 sm:%s2883_s23]   ;;  %2828 = vrot.lane.b32.xlu0 %v2827_v24, %s7119_s11  ;;  %s2928_s23 = smov 12  ;;  %v3023_v0 = vsel %vm6_vm0, %v6491_v62, %v6490_v59 }
 0x178   :  { %v2886_v19 = vsel %vm6_vm0, %v6462_v18, %v6461_v17  ;;  %v6463_v61 = vld [vmem:[%s12308_s0 + $0x789] ss:$16 sm:%s2888_s29]   ;;  %s2933_s29 = smov 48  ;;  %v6470_v32 = vld [vmem:[%s12308_s0 + $0x208] ss:$16 sm:%s2925_s21]   ;;  %s3076_s21 = smov 192 }
 0x179   :  { %v6464_v20 = vld [vmem:[%s12308_s0 + $0x789] ss:$16 sm:%s2893_s30]   ;;  %v2891_v21 = vsel %vm10_vm1, %v6463_v61, %v2886_v19  ;;  %s2938_s30 = smov 192  ;;  %v6471_v33 = vld [vmem:[%s12308_s0 + $0x208] ss:$16 sm:%s2928_s23]   ;;  %s3025_s23 = smov 48 }
 0x17a   :  { %v6456_v23 = vld [vmem:[%s12308_s0 + $0x589] ss:$16 sm:%s2857_s4]   ;;  %v2896_v25 = vsel %vm14_vm2, %v6464_v20, %v2891_v21  ;;  %v2931_v35 = vsel %vm6_vm0, %v6471_v33, %v6470_v32  ;;  %v6472_v60 = vld [vmem:[%s12308_s0 + $0x208] ss:$16 sm:%s2933_s29]   ;;  %s2994_s29 = smov 3  ;;  %s3002_s4 = smov 48 }
 0x17b   :  { %v6457_v28 = vld [vmem:[%s12308_s0 + $0x589] ss:$16 sm:%s2860_s9]   ;;  %2897 = vrot.lane.b32.xlu1 %v2896_v25, %s7119_s11  ;;  %v2936_v39 = vsel %vm10_vm1, %v6472_v60, %v2931_v35  ;;  %s3007_s9 = smov 192  ;;  %v2003_v35 = vpop.permute.xlu0 %2002  }
 0x17c   :  { %v6458_v26 = vld [vmem:[%s12308_s0 + $0x589] ss:$16 sm:%s2865_s22]   ;;  %v2863_v27 = vsel %vm6_vm0, %v6457_v28, %v6456_v23  ;;  %v6473_v37 = vld [vmem:[%s12308_s0 + $0x208] ss:$16 sm:%s2938_s30]   ;;  %v2026_v28 = vpop.permute.xlu1 %2025   ;;  %s3089_s30 = smov 12  ;;  %s3155_s22 = smov 3 }
 0x17d   :  { %v6459_v29 = vld [vmem:[%s12308_s0 + $0x589] ss:$16 sm:%s2870_s16]   ;;  %v2868_v30 = vsel %vm10_vm1, %v6458_v26, %v2863_v27  ;;  %v2941_v40 = vsel %vm14_vm2, %v6473_v37, %v2936_v39  ;;  %v6492_v22 = vld [vmem:[%s12308_s0 + $0x288] ss:$16 sm:%s3025_s23]   ;;  %s3117_s16 = smov 48  ;;  %s3086_s23 = smov 3 }
 0x17e   :  { %v2873_v34 = vsel %vm14_vm2, %v6459_v29, %v2868_v30  ;;  %v6493_v1 = vld [vmem:[%s12308_s0 + $0x288] ss:$16 sm:%s3030_s24]   ;;  %v3028_v2 = vsel %vm10_vm1, %v6492_v22, %v3023_v0  ;;  %6277 = vst.msk [vmem:[%s12309_s1 + $0x30] sm:$0xff] %vm1821_vm8, %v2026_v28   ;;  %6272 = vst.msk [vmem:[%s12309_s1 + $0x10] sm:$0xff] %vm1821_vm8, %v2003_v35  }
 0x17f   :  { %2874 = vrot.lane.b32.xlu0 %v2873_v34, %s7119_s11  ;;  %2942 = vrot.lane.b32.xlu1 %v2941_v40, %s7120_s28  ;;  %v6485_v3 = vld [vmem:[%s12308_s0 + $0x88] ss:$16 sm:%s2994_s29]   ;;  %s3063_s11 = smov 3  ;;  %v3033_v5 = vsel %vm14_vm2, %v6493_v1, %v3028_v2  ;;  %s3040_s29 = smov 3  ;;  %v2049_v51 = vpop.permute.xlu0 %2048  }
 0x180   :  { %v6486_v7 = vld [vmem:[%s12308_s0 + $0x88] ss:$16 sm:%s2997_s3]   ;;  %s3043_s3 = smov 12  ;;  %v2072_v40 = vpop.permute.xlu1 %2071   ;;  %6282 = vst.msk [vmem:[%s12309_s1 + $0x50] sm:$0xff] %vm1821_vm8, %v2049_v51  }
 0x181   :  { %v6487_v8 = vld [vmem:[%s12308_s0 + $0x88] ss:$16 sm:%s3002_s4]   ;;  %v3000_v49 = vsel %vm6_vm0, %v6486_v7, %v6485_v3  ;;  %s3048_s4 = smov 48  ;;  %6287 = vst.msk [vmem:[%s12309_s1 + $0x70] sm:$0xff] %vm1821_vm8, %v2072_v40  }
 0x182   :  { %v6488_v9 = vld [vmem:[%s12308_s0 + $0x88] ss:$16 sm:%s3007_s9]   ;;  %v3005_v54 = vsel %vm10_vm1, %v6487_v8, %v3000_v49  ;;  %s3053_s9 = smov 192 }
 0x183   :  { %2920 = vrot.lane.b32.xlu0 %v2919_v36, %s7120_s28  ;;  %2988 = vrot.lane.b32.xlu1 %v2987_v53, %s7120_s28  ;;  %v6500_v10 = vld [vmem:[%s12308_s0 + $0x688] ss:$16 sm:%s3063_s11]   ;;  %v3010_v13 = vsel %vm14_vm2, %v6488_v9, %v3005_v54  ;;  %s4447_s11 = smov 48 }
 0x184   :  { %v6501_v11 = vld [vmem:[%s12308_s0 + $0x688] ss:$16 sm:%s3066_s27]   ;;  %v2118_v55 = vpop.permute.xlu1 %2117   ;;  %s4080_s27 = smov 48 }
 0x185   :  { %v3069_v15 = vsel %vm6_vm0, %v6501_v11, %v6500_v10  ;;  %v6502_v17 = vld [vmem:[%s12308_s0 + $0x688] ss:$16 sm:%s3071_s20]   ;;  %6297 = vst.msk [vmem:[%s12309_s1 + $0x38] sm:$0xff] %vm1821_vm8, %v2118_v55   ;;  %v2095_v22 = vpop.permute.xlu0 %2094  }
 0x186   :  { %v6503_v18 = vld [vmem:[%s12308_s0 + $0x688] ss:$16 sm:%s3076_s21]   ;;  %v3074_v24 = vsel %vm10_vm1, %v6502_v17, %v3069_v15  ;;  %6292 = vst.msk [vmem:[%s12309_s1 + $0x18] sm:$0xff] %vm1821_vm8, %v2095_v22  }
 0x187   :  { %2965 = vrot.lane.b32.xlu0 %v2964_v63, %s7120_s28  ;;  %3034 = vrot.lane.b32.xlu1 %v3033_v5, %s7120_s28  ;;  %v6495_v19 = vld [vmem:[%s12308_s0 + $0x488] ss:$16 sm:%s3040_s29]   ;;  %v3079_v61 = vsel %vm14_vm2, %v6503_v18, %v3074_v24 }
 0x188   :  { %v6496_v20 = vld [vmem:[%s12308_s0 + $0x488] ss:$16 sm:%s3043_s3]  }
 0x189   :  { %v6497_v21 = vld [vmem:[%s12308_s0 + $0x488] ss:$16 sm:%s3048_s4]   ;;  %v3046_v23 = vsel %vm6_vm0, %v6496_v20, %v6495_v19  ;;  %v2164_v7 = vpop.permute.xlu1 %2163  }
 0x18a   :  { %v6498_v25 = vld [vmem:[%s12308_s0 + $0x488] ss:$16 sm:%s3053_s9]   ;;  %v3051_v26 = vsel %vm10_vm1, %v6497_v21, %v3046_v23  ;;  %6307 = vst.msk [vmem:[%s12309_s1 + $0x78] sm:$0xff] %vm1821_vm8, %v2164_v7   ;;  %s3338_s9 = smov 3 }
 0x18b   :  { %3011 = vrot.lane.b32.xlu0 %v3010_v13, %s7120_s28  ;;  %3080 = vrot.lane.b32.xlu1 %v3079_v61, %s7120_s28  ;;  %v6510_v27 = vld [vmem:[%s12308_s0 + $0x308] ss:$16 sm:%s3109_s12]   ;;  %v3056_v30 = vsel %vm14_vm2, %v6498_v25, %v3051_v26  ;;  %s5181_s12 = smov 48 }
 0x18c   :  { %v6511_v29 = vld [vmem:[%s12308_s0 + $0x308] ss:$16 sm:%s3112_s13]   ;;  %s4814_s13 = smov 48 }
 0x18d   :  { %v3115_v32 = vsel %vm6_vm0, %v6511_v29, %v6510_v27  ;;  %v6512_v33 = vld [vmem:[%s12308_s0 + $0x308] ss:$16 sm:%s3117_s16]   ;;  %s3163_s16 = smov 48  ;;  %v2141_v18 = vpop.permute.xlu0 %2140   ;;  %v2209_v23 = vpop.permute.xlu1 %2208  }
 0x18e   :  { %v6513_v34 = vld [vmem:[%s12308_s0 + $0x308] ss:$16 sm:%s3122_s18]   ;;  %v3120_v60 = vsel %vm10_vm1, %v6512_v33, %v3115_v32  ;;  %s3168_s18 = smov 192  ;;  %6302 = vst.msk [vmem:[%s12309_s1 + $0x58] sm:$0xff] %vm1821_vm8, %v2141_v18  }
 0x18f   :  { %3057 = vrot.lane.b32.xlu0 %v3056_v30, %s7120_s28  ;;  %v6505_v37 = vld [vmem:[%s12308_s0 + $0x108] ss:$16 sm:%s3086_s23]   ;;  %v3125_v38 = vsel %vm14_vm2, %v6513_v34, %v3120_v60  ;;  %s3132_s23 = smov 3  ;;  %6316 = vst.msk [vmem:[%s12309_s1 + $0x20] sm:$0xff] %vm2188_vm9, %v2209_v23  }
 0x190   :  { %v6506_v39 = vld [vmem:[%s12308_s0 + $0x108] ss:$16 sm:%s3089_s30]   ;;  %3126 = vrot.lane.b32.xlu1 %v3125_v38, %s7120_s28 }
 0x191   :  { %v6507_v31 = vld [vmem:[%s12308_s0 + $0x108] ss:$16 sm:%s3094_s6]   ;;  %v3092_v4 = vsel %vm6_vm0, %v6506_v39, %v6505_v37  ;;  %v2187_v35 = vpop.permute.xlu0 %2186  }
 0x192   :  { %v6508_v41 = vld [vmem:[%s12308_s0 + $0x108] ss:$16 sm:%s3099_s19]   ;;  %v3097_v43 = vsel %vm10_vm1, %v6507_v31, %v3092_v4  ;;  %s3145_s19 = smov 192  ;;  %2189 = vst.msk [vmem:[%s12309_s1] sm:$0xff] %vm2188_vm9, %v2187_v35  }
 0x193   :  { %v6520_v45 = vld [vmem:[%s12308_s0 + $0x708] ss:$16 sm:%s3155_s22]   ;;  %v3102_v47 = vsel %vm14_vm2, %v6508_v41, %v3097_v43  ;;  %s3201_s22 = smov 3  ;;  %v2255_v40 = vpop.permute.xlu1 %2254  }
 0x194   :  { %v6521_v46 = vld [vmem:[%s12308_s0 + $0x708] ss:$16 sm:%s3158_s10]   ;;  %3103 = vrot.lane.b32.xlu0 %v3102_v47, %s7120_s28  ;;  %s3204_s10 = smov 12  ;;  %6326 = vst.msk [vmem:[%s12309_s1 + $0x60] sm:$0xff] %vm2188_vm9, %v2255_v40  }
 0x195   :  { %v3161_v48 = vsel %vm6_vm0, %v6521_v46, %v6520_v45  ;;  %v6522_v50 = vld [vmem:[%s12308_s0 + $0x708] ss:$16 sm:%s3163_s16]   ;;  %s3209_s16 = smov 48  ;;  %v6559_v45 = vld [vmem:[%s12308_s0 + $0x607] ss:$16 sm:%s3338_s9]   ;;  %s3384_s9 = smov 3 }
 0x196   :  { %v6523_v36 = vld [vmem:[%s12308_s0 + $0x708] ss:$16 sm:%s3168_s18]   ;;  %v3166_v42 = vsel %vm10_vm1, %v6522_v50, %v3161_v48  ;;  %s3214_s18 = smov 192  ;;  %v6561_v50 = vld [vmem:[%s12308_s0 + $0x607] ss:$16 sm:%s3346_s15]   ;;  %v2232_v51 = vpop.permute.xlu0 %2231   ;;  %s3392_s15 = smov 48 }
 0x197   :  { %v6515_v16 = vld [vmem:[%s12308_s0 + $0x508] ss:$16 sm:%s3132_s23]   ;;  %v3171_v52 = vsel %vm14_vm2, %v6523_v36, %v3166_v42  ;;  %s3178_s23 = smov 3  ;;  %6321 = vst.msk [vmem:[%s12309_s1 + $0x40] sm:$0xff] %vm2188_vm9, %v2232_v51  }
 0x198   :  { %v6516_v14 = vld [vmem:[%s12308_s0 + $0x508] ss:$16 sm:%s3135_s2]   ;;  %3172 = vrot.lane.b32.xlu1 %v3171_v52, %s7120_s28  ;;  %s3181_s2 = smov 12 }
 0x199   :  { %v6517_v53 = vld [vmem:[%s12308_s0 + $0x508] ss:$16 sm:%s3140_s17]   ;;  %v3138_v56 = vsel %vm6_vm0, %v6516_v14, %v6515_v16  ;;  %s3186_s17 = smov 48  ;;  %v2301_v55 = vpop.permute.xlu1 %2300  }
 0x19a   :  { %v6518_v57 = vld [vmem:[%s12308_s0 + $0x508] ss:$16 sm:%s3145_s19]   ;;  %v3143_v6 = vsel %vm10_vm1, %v6517_v53, %v3138_v56  ;;  %s3191_s19 = smov 192  ;;  %6336 = vst.msk [vmem:[%s12309_s1 + $0x28] sm:$0xff] %vm2188_vm9, %v2301_v55  }
 0x19b   :  { %v6530_v58 = vld [vmem:[%s12308_s0 + $0x388] ss:$16 sm:%s3201_s22]   ;;  %v3148_v62 = vsel %vm14_vm2, %v6518_v57, %v3143_v6  ;;  %s3247_s22 = smov 3 }
 0x19c   :  { %v6531_v59 = vld [vmem:[%s12308_s0 + $0x388] ss:$16 sm:%s3204_s10]   ;;  %3149 = vrot.lane.b32.xlu0 %v3148_v62, %s7120_s28  ;;  %s3250_s10 = smov 12  ;;  %v2278_v22 = vpop.permute.xlu0 %2277  }
 0x19d   :  { %v3207_v44 = vsel %vm6_vm0, %v6531_v59, %v6530_v58  ;;  %v6532_v63 = vld [vmem:[%s12308_s0 + $0x388] ss:$16 sm:%s3209_s16]   ;;  %s3255_s16 = smov 48  ;;  %v6569_v58 = vld [vmem:[%s12308_s0 + $0x287] ss:$16 sm:%s3384_s9]   ;;  %s3430_s9 = smov 3 }
 0x19e   :  { %v6533_v0 = vld [vmem:[%s12308_s0 + $0x388] ss:$16 sm:%s3214_s18]   ;;  %v3212_v1 = vsel %vm10_vm1, %v6532_v63, %v3207_v44  ;;  %s3260_s18 = smov 192  ;;  %v6571_v63 = vld [vmem:[%s12308_s0 + $0x287] ss:$16 sm:%s3392_s15]   ;;  %s3438_s15 = smov 48 }
 0x19f   :  { %v6525_v2 = vld [vmem:[%s12308_s0 + $0x188] ss:$16 sm:%s3178_s23]   ;;  %v3217_v3 = vsel %vm14_vm2, %v6533_v0, %v3212_v1  ;;  %s3224_s23 = smov 3  ;;  %6331 = vst.msk [vmem:[%s12309_s1 + $0x8] sm:$0xff] %vm2188_vm9, %v2278_v22  }
 0x1a0   :  { %v6526_v12 = vld [vmem:[%s12308_s0 + $0x188] ss:$16 sm:%s3181_s2]   ;;  %3218 = vrot.lane.b32.xlu1 %v3217_v3, %s7120_s28  ;;  %s3227_s2 = smov 12  ;;  %v2347_v7 = vpop.permute.xlu1 %2346  }
 0x1a1   :  { %v6527_v5 = vld [vmem:[%s12308_s0 + $0x188] ss:$16 sm:%s3186_s17]   ;;  %v3184_v8 = vsel %vm6_vm0, %v6526_v12, %v6525_v2  ;;  %s3232_s17 = smov 48  ;;  %6346 = vst.msk [vmem:[%s12309_s1 + $0x68] sm:$0xff] %vm2188_vm9, %v2347_v7  }
 0x1a2   :  { %v6528_v49 = vld [vmem:[%s12308_s0 + $0x188] ss:$16 sm:%s3191_s19]   ;;  %v3189_v9 = vsel %vm10_vm1, %v6527_v5, %v3184_v8  ;;  %s3237_s19 = smov 192 }
 0x1a3   :  { %v6540_v54 = vld [vmem:[%s12308_s0 + $0x788] ss:$16 sm:%s3247_s22]   ;;  %v3194_v11 = vsel %vm14_vm2, %v6528_v49, %v3189_v9  ;;  %s3292_s22 = smov 3 }
 0x1a4   :  { %v6541_v10 = vld [vmem:[%s12308_s0 + $0x788] ss:$16 sm:%s3250_s10]   ;;  %3195 = vrot.lane.b32.xlu0 %v3194_v11, %s7120_s28  ;;  %s3295_s10 = smov 12  ;;  %v2324_v18 = vpop.permute.xlu0 %2323  }
 0x1a5   :  { %v3253_v13 = vsel %vm6_vm0, %v6541_v10, %v6540_v54  ;;  %v6542_v15 = vld [vmem:[%s12308_s0 + $0x788] ss:$16 sm:%s3255_s16]   ;;  %s3300_s16 = smov 48  ;;  %v6549_v27 = vld [vmem:[%s12308_s0 + $0x207] ss:$16 sm:%s3292_s22]   ;;  %s3341_s22 = smov 12 }
 0x1a6   :  { %v6543_v17 = vld [vmem:[%s12308_s0 + $0x788] ss:$16 sm:%s3260_s18]   ;;  %v3258_v24 = vsel %vm10_vm1, %v6542_v15, %v3253_v13  ;;  %s3305_s18 = smov 192  ;;  %v6550_v29 = vld [vmem:[%s12308_s0 + $0x207] ss:$16 sm:%s3295_s10]   ;;  %s5548_s10 = smov 48 }
 0x1a7   :  { %v6535_v19 = vld [vmem:[%s12308_s0 + $0x588] ss:$16 sm:%s3224_s23]   ;;  %v3263_v61 = vsel %vm14_vm2, %v6543_v17, %v3258_v24  ;;  %s3270_s23 = smov 3  ;;  %v3298_v32 = vsel %vm6_vm0, %v6550_v29, %v6549_v27  ;;  %v6551_v33 = vld [vmem:[%s12308_s0 + $0x207] ss:$16 sm:%s3300_s16]   ;;  %s3351_s16 = smov 192 }
 0x1a8   :  { %v6536_v20 = vld [vmem:[%s12308_s0 + $0x588] ss:$16 sm:%s3227_s2]   ;;  %3264 = vrot.lane.b32.xlu1 %v3263_v61, %s7120_s28  ;;  %s3273_s2 = smov 12  ;;  %v3303_v60 = vsel %vm10_vm1, %v6551_v33, %v3298_v32  ;;  %6341 = vst.msk [vmem:[%s12309_s1 + $0x48] sm:$0xff] %vm2188_vm9, %v2324_v18   ;;  %v2393_v23 = vpop.permute.xlu1 %2392  }
 0x1a9   :  { %v6537_v21 = vld [vmem:[%s12308_s0 + $0x588] ss:$16 sm:%s3232_s17]   ;;  %v3230_v25 = vsel %vm6_vm0, %v6536_v20, %v6535_v19  ;;  %s3278_s17 = smov 48  ;;  %v6552_v34 = vld [vmem:[%s12308_s0 + $0x207] ss:$16 sm:%s3305_s18]   ;;  %s7121_s18 = smov 56  }
 0x1aa   :  { %v6538_v28 = vld [vmem:[%s12308_s0 + $0x588] ss:$16 sm:%s3237_s19]   ;;  %v3235_v26 = vsel %vm10_vm1, %v6537_v21, %v3230_v25  ;;  %s3283_s19 = smov 192  ;;  %v6545_v37 = vld [vmem:[%s12308_s0 + $0x7] ss:$16 sm:%s3270_s23]   ;;  %v3308_v38 = vsel %vm14_vm2, %v6552_v34, %v3303_v60  ;;  %s3315_s23 = smov 3 }
 0x1ab   :  { %v3240_v30 = vsel %vm14_vm2, %v6538_v28, %v3235_v26  ;;  %v6546_v39 = vld [vmem:[%s12308_s0 + $0x7] ss:$16 sm:%s3273_s2]   ;;  %s3318_s2 = smov 12  ;;  %6356 = vst.msk [vmem:[%s12309_s1 + $0x30] sm:$0xff] %vm2188_vm9, %v2393_v23  }
 0x1ac   :  { %3241 = vrot.lane.b32.xlu0 %v3240_v30, %s7120_s28  ;;  %v6547_v31 = vld [vmem:[%s12308_s0 + $0x7] ss:$16 sm:%s3278_s17]   ;;  %3309 = vrot.lane.b32.xlu1 %v3308_v38, %s7121_s18  ;;  %v3276_v4 = vsel %vm6_vm0, %v6546_v39, %v6545_v37  ;;  %s3323_s17 = smov 48  ;;  %v2370_v35 = vpop.permute.xlu0 %2369   ;;  %s4072_s28 = smov 3 }
 0x1ad   :  { %v6548_v41 = vld [vmem:[%s12308_s0 + $0x7] ss:$16 sm:%s3283_s19]   ;;  %v3281_v43 = vsel %vm10_vm1, %v6547_v31, %v3276_v4  ;;  %s3328_s19 = smov 192  ;;  %6351 = vst.msk [vmem:[%s12309_s1 + $0x10] sm:$0xff] %vm2188_vm9, %v2370_v35  }
 0x1ae   :  { %v6560_v46 = vld [vmem:[%s12308_s0 + $0x607] ss:$16 sm:%s3341_s22]   ;;  %v3286_v47 = vsel %vm14_vm2, %v6548_v41, %v3281_v43  ;;  %s3387_s22 = smov 12 }
 0x1af   :  { %v3344_v48 = vsel %vm6_vm0, %v6560_v46, %v6559_v45  ;;  %v6562_v36 = vld [vmem:[%s12308_s0 + $0x607] ss:$16 sm:%s3351_s16]   ;;  %s3397_s16 = smov 192 }
 0x1b0   :  { %3287 = vrot.lane.b32.xlu0 %v3286_v47, %s7121_s18  ;;  %v3349_v42 = vsel %vm10_vm1, %v6561_v50, %v3344_v48  ;;  %v6554_v16 = vld [vmem:[%s12308_s0 + $0x407] ss:$16 sm:%s3315_s23]   ;;  %s3361_s23 = smov 3  ;;  %v2439_v40 = vpop.permute.xlu1 %2438  }
 0x1b1   :  { %v3354_v52 = vsel %vm14_vm2, %v6562_v36, %v3349_v42  ;;  %v6555_v14 = vld [vmem:[%s12308_s0 + $0x407] ss:$16 sm:%s3318_s2]   ;;  %s3364_s2 = smov 12  ;;  %6366 = vst.msk [vmem:[%s12309_s1 + $0x70] sm:$0xff] %vm2188_vm9, %v2439_v40  }
 0x1b2   :  { %v6556_v53 = vld [vmem:[%s12308_s0 + $0x407] ss:$16 sm:%s3323_s17]   ;;  %3355 = vrot.lane.b32.xlu1 %v3354_v52, %s7121_s18  ;;  %v3321_v56 = vsel %vm6_vm0, %v6555_v14, %v6554_v16  ;;  %s3369_s17 = smov 48 }
 0x1b3   :  { %v6557_v57 = vld [vmem:[%s12308_s0 + $0x407] ss:$16 sm:%s3328_s19]   ;;  %v3326_v6 = vsel %vm10_vm1, %v6556_v53, %v3321_v56  ;;  %s3374_s19 = smov 192 }
 0x1b4   :  { %v6570_v59 = vld [vmem:[%s12308_s0 + $0x287] ss:$16 sm:%s3387_s22]   ;;  %v3331_v62 = vsel %vm14_vm2, %v6557_v57, %v3326_v6  ;;  %s3433_s22 = smov 12  ;;  %v2416_v51 = vpop.permute.xlu0 %2415  }
 0x1b5   :  { %v3390_v44 = vsel %vm6_vm0, %v6570_v59, %v6569_v58  ;;  %v6572_v0 = vld [vmem:[%s12308_s0 + $0x287] ss:$16 sm:%s3397_s16]   ;;  %3332 = vrot.lane.b32.xlu0 %v3331_v62, %s7121_s18  ;;  %s3443_s16 = smov 192  ;;  %6361 = vst.msk [vmem:[%s12309_s1 + $0x50] sm:$0xff] %vm2188_vm9, %v2416_v51  }
 0x1b6   :  { %v3395_v1 = vsel %vm10_vm1, %v6571_v63, %v3390_v44  ;;  %v6564_v2 = vld [vmem:[%s12308_s0 + $0x87] ss:$16 sm:%s3361_s23]   ;;  %s3407_s23 = smov 3 }
 0x1b7   :  { %v3400_v3 = vsel %vm14_vm2, %v6572_v0, %v3395_v1  ;;  %v6565_v12 = vld [vmem:[%s12308_s0 + $0x87] ss:$16 sm:%s3364_s2]   ;;  %s3410_s2 = smov 12 }
 0x1b8   :  { %v6566_v5 = vld [vmem:[%s12308_s0 + $0x87] ss:$16 sm:%s3369_s17]   ;;  %3401 = vrot.lane.b32.xlu1 %v3400_v3, %s7121_s18  ;;  %v3367_v8 = vsel %vm6_vm0, %v6565_v12, %v6564_v2  ;;  %s3415_s17 = smov 48  ;;  %v2485_v55 = vpop.permute.xlu1 %2484  }
 0x1b9   :  { %v6567_v49 = vld [vmem:[%s12308_s0 + $0x87] ss:$16 sm:%s3374_s19]   ;;  %v3372_v9 = vsel %vm10_vm1, %v6566_v5, %v3367_v8  ;;  %s3420_s19 = smov 192  ;;  %6376 = vst.msk [vmem:[%s12309_s1 + $0x38] sm:$0xff] %vm2188_vm9, %v2485_v55  }
 0x1ba   :  { %v6579_v54 = vld [vmem:[%s12308_s0 + $0x687] ss:$16 sm:%s3430_s9]   ;;  %v3377_v11 = vsel %vm14_vm2, %v6567_v49, %v3372_v9  ;;  %s3476_s9 = smov 3 }
 0x1bb   :  { %v6580_v10 = vld [vmem:[%s12308_s0 + $0x687] ss:$16 sm:%s3433_s22]   ;;  %3378 = vrot.lane.b32.xlu0 %v3377_v11, %s7121_s18  ;;  %s3479_s22 = smov 12 }
 0x1bc   :  { %v3436_v13 = vsel %vm6_vm0, %v6580_v10, %v6579_v54  ;;  %v6581_v15 = vld [vmem:[%s12308_s0 + $0x687] ss:$16 sm:%s3438_s15]   ;;  %s3484_s15 = smov 48  ;;  %v2462_v22 = vpop.permute.xlu0 %2461  }
 0x1bd   :  { %v6582_v17 = vld [vmem:[%s12308_s0 + $0x687] ss:$16 sm:%s3443_s16]   ;;  %v3441_v24 = vsel %vm10_vm1, %v6581_v15, %v3436_v13  ;;  %s3489_s16 = smov 192  ;;  %6371 = vst.msk [vmem:[%s12309_s1 + $0x18] sm:$0xff] %vm2188_vm9, %v2462_v22  }
 0x1be   :  { %v6574_v19 = vld [vmem:[%s12308_s0 + $0x487] ss:$16 sm:%s3407_s23]   ;;  %v3446_v61 = vsel %vm14_vm2, %v6582_v17, %v3441_v24  ;;  %s3453_s23 = smov 3 }
 0x1bf   :  { %v6575_v20 = vld [vmem:[%s12308_s0 + $0x487] ss:$16 sm:%s3410_s2]   ;;  %3447 = vrot.lane.b32.xlu1 %v3446_v61, %s7121_s18  ;;  %s3456_s2 = smov 12 }
 0x1c0   :  { %v6576_v21 = vld [vmem:[%s12308_s0 + $0x487] ss:$16 sm:%s3415_s17]   ;;  %v3413_v25 = vsel %vm6_vm0, %v6575_v20, %v6574_v19  ;;  %s3461_s17 = smov 48  ;;  %v2531_v7 = vpop.permute.xlu1 %2530  }
 0x1c1   :  { %v6577_v28 = vld [vmem:[%s12308_s0 + $0x487] ss:$16 sm:%s3420_s19]   ;;  %v3418_v26 = vsel %vm10_vm1, %v6576_v21, %v3413_v25  ;;  %s3466_s19 = smov 192  ;;  %6386 = vst.msk [vmem:[%s12309_s1 + $0x78] sm:$0xff] %vm2188_vm9, %v2531_v7  }
 0x1c2   :  { %v6589_v27 = vld [vmem:[%s12308_s0 + $0x307] ss:$16 sm:%s3476_s9]   ;;  %v3423_v30 = vsel %vm14_vm2, %v6577_v28, %v3418_v26  ;;  %s3522_s9 = smov 3 }
 0x1c3   :  { %v6590_v29 = vld [vmem:[%s12308_s0 + $0x307] ss:$16 sm:%s3479_s22]   ;;  %3424 = vrot.lane.b32.xlu0 %v3423_v30, %s7121_s18  ;;  %s3525_s22 = smov 12 }
 0x1c4   :  { %v3482_v32 = vsel %vm6_vm0, %v6590_v29, %v6589_v27  ;;  %v6591_v33 = vld [vmem:[%s12308_s0 + $0x307] ss:$16 sm:%s3484_s15]   ;;  %s3530_s15 = smov 48  ;;  %v2508_v18 = vpop.permute.xlu0 %2507   ;;  %v2576_v23 = vpop.permute.xlu1 %2575  }
 0x1c5   :  { %v6592_v34 = vld [vmem:[%s12308_s0 + $0x307] ss:$16 sm:%s3489_s16]   ;;  %v3487_v60 = vsel %vm10_vm1, %v6591_v33, %v3482_v32  ;;  %s3535_s16 = smov 192  ;;  %6381 = vst.msk [vmem:[%s12309_s1 + $0x58] sm:$0xff] %vm2188_vm9, %v2508_v18  }
 0x1c6   :  { %v6584_v37 = vld [vmem:[%s12308_s0 + $0x107] ss:$16 sm:%s3453_s23]   ;;  %v3492_v38 = vsel %vm14_vm2, %v6592_v34, %v3487_v60  ;;  %s3499_s23 = smov 3  ;;  %6395 = vst.msk [vmem:[%s12309_s1 + $0x20] sm:$0xff] %vm2555_vm10, %v2576_v23  }
 0x1c7   :  { %v6585_v39 = vld [vmem:[%s12308_s0 + $0x107] ss:$16 sm:%s3456_s2]   ;;  %3493 = vrot.lane.b32.xlu1 %v3492_v38, %s7121_s18  ;;  %s3502_s2 = smov 12 }
 0x1c8   :  { %v6586_v31 = vld [vmem:[%s12308_s0 + $0x107] ss:$16 sm:%s3461_s17]   ;;  %v3459_v4 = vsel %vm6_vm0, %v6585_v39, %v6584_v37  ;;  %s3507_s17 = smov 48  ;;  %v2554_v35 = vpop.permute.xlu0 %2553   ;;  %v2622_v40 = vpop.permute.xlu1 %2621  }
 0x1c9   :  { %v6587_v41 = vld [vmem:[%s12308_s0 + $0x107] ss:$16 sm:%s3466_s19]   ;;  %v3464_v43 = vsel %vm10_vm1, %v6586_v31, %v3459_v4  ;;  %s3512_s19 = smov 192  ;;  %2556 = vst.msk [vmem:[%s12309_s1] sm:$0xff] %vm2555_vm10, %v2554_v35   ;;  %6405 = vst.msk [vmem:[%s12309_s1 + $0x60] sm:$0xff] %vm2555_vm10, %v2622_v40  }
 0x1ca   :  { %v6599_v45 = vld [vmem:[%s12308_s0 + $0x707] ss:$16 sm:%s3522_s9]   ;;  %v3469_v47 = vsel %vm14_vm2, %v6587_v41, %v3464_v43  ;;  %s3568_s9 = smov 3 }
 0x1cb   :  { %v6600_v46 = vld [vmem:[%s12308_s0 + $0x707] ss:$16 sm:%s3525_s22]   ;;  %3470 = vrot.lane.b32.xlu0 %v3469_v47, %s7121_s18  ;;  %s3571_s22 = smov 12 }
 0x1cc   :  { %v3528_v48 = vsel %vm6_vm0, %v6600_v46, %v6599_v45  ;;  %v6601_v50 = vld [vmem:[%s12308_s0 + $0x707] ss:$16 sm:%s3530_s15]   ;;  %s3576_s15 = smov 48  ;;  %v6638_v45 = vld [vmem:[%s12308_s0 + $0x606] ss:$16 sm:%s3705_s8]   ;;  %v2599_v51 = vpop.permute.xlu0 %2598   ;;  %s3751_s8 = smov 3  ;;  %v2668_v55 = vpop.permute.xlu1 %2667  }
 0x1cd   :  { %v6602_v36 = vld [vmem:[%s12308_s0 + $0x707] ss:$16 sm:%s3535_s16]   ;;  %v3533_v42 = vsel %vm10_vm1, %v6601_v50, %v3528_v48  ;;  %s3581_s16 = smov 192  ;;  %v6640_v50 = vld [vmem:[%s12308_s0 + $0x606] ss:$16 sm:%s3713_s14]   ;;  %s3759_s14 = smov 48 }
 0x1ce   :  { %v6594_v16 = vld [vmem:[%s12308_s0 + $0x507] ss:$16 sm:%s3499_s23]   ;;  %v3538_v52 = vsel %vm14_vm2, %v6602_v36, %v3533_v42  ;;  %s3545_s23 = smov 3  ;;  %6400 = vst.msk [vmem:[%s12309_s1 + $0x40] sm:$0xff] %vm2555_vm10, %v2599_v51   ;;  %6415 = vst.msk [vmem:[%s12309_s1 + $0x28] sm:$0xff] %vm2555_vm10, %v2668_v55  }
 0x1cf   :  { %v6595_v14 = vld [vmem:[%s12308_s0 + $0x507] ss:$16 sm:%s3502_s2]   ;;  %3539 = vrot.lane.b32.xlu1 %v3538_v52, %s7121_s18  ;;  %s3548_s2 = smov 12 }
 0x1d0   :  { %v6596_v53 = vld [vmem:[%s12308_s0 + $0x507] ss:$16 sm:%s3507_s17]   ;;  %v3505_v56 = vsel %vm6_vm0, %v6595_v14, %v6594_v16  ;;  %s3553_s17 = smov 48  ;;  %v2645_v22 = vpop.permute.xlu0 %2644   ;;  %v2714_v7 = vpop.permute.xlu1 %2713  }
 0x1d1   :  { %v6597_v57 = vld [vmem:[%s12308_s0 + $0x507] ss:$16 sm:%s3512_s19]   ;;  %v3510_v6 = vsel %vm10_vm1, %v6596_v53, %v3505_v56  ;;  %s3558_s19 = smov 192  ;;  %6410 = vst.msk [vmem:[%s12309_s1 + $0x8] sm:$0xff] %vm2555_vm10, %v2645_v22   ;;  %6425 = vst.msk [vmem:[%s12309_s1 + $0x68] sm:$0xff] %vm2555_vm10, %v2714_v7  }
 0x1d2   :  { %v6609_v58 = vld [vmem:[%s12308_s0 + $0x387] ss:$16 sm:%s3568_s9]   ;;  %v3515_v62 = vsel %vm14_vm2, %v6597_v57, %v3510_v6  ;;  %s3614_s9 = smov 3 }
 0x1d3   :  { %v6610_v59 = vld [vmem:[%s12308_s0 + $0x387] ss:$16 sm:%s3571_s22]   ;;  %3516 = vrot.lane.b32.xlu0 %v3515_v62, %s7121_s18  ;;  %s3617_s22 = smov 12 }
 0x1d4   :  { %v3574_v44 = vsel %vm6_vm0, %v6610_v59, %v6609_v58  ;;  %v6611_v63 = vld [vmem:[%s12308_s0 + $0x387] ss:$16 sm:%s3576_s15]   ;;  %s3622_s15 = smov 48  ;;  %v6648_v58 = vld [vmem:[%s12308_s0 + $0x286] ss:$16 sm:%s3751_s8]   ;;  %s3797_s8 = smov 3  ;;  %v2691_v18 = vpop.permute.xlu0 %2690  }
 0x1d5   :  { %v6612_v0 = vld [vmem:[%s12308_s0 + $0x387] ss:$16 sm:%s3581_s16]   ;;  %v3579_v1 = vsel %vm10_vm1, %v6611_v63, %v3574_v44  ;;  %s3627_s16 = smov 192  ;;  %v6650_v63 = vld [vmem:[%s12308_s0 + $0x286] ss:$16 sm:%s3759_s14]   ;;  %s3805_s14 = smov 48  ;;  %v2760_v23 = vpop.permute.xlu1 %2759  }
 0x1d6   :  { %v6604_v2 = vld [vmem:[%s12308_s0 + $0x187] ss:$16 sm:%s3545_s23]   ;;  %v3584_v3 = vsel %vm14_vm2, %v6612_v0, %v3579_v1  ;;  %s3591_s23 = smov 3  ;;  %6420 = vst.msk [vmem:[%s12309_s1 + $0x48] sm:$0xff] %vm2555_vm10, %v2691_v18   ;;  %6435 = vst.msk [vmem:[%s12309_s1 + $0x30] sm:$0xff] %vm2555_vm10, %v2760_v23  }
 0x1d7   :  { %v6605_v12 = vld [vmem:[%s12308_s0 + $0x187] ss:$16 sm:%s3548_s2]   ;;  %3585 = vrot.lane.b32.xlu1 %v3584_v3, %s7121_s18  ;;  %s3594_s2 = smov 12 }
 0x1d8   :  { %v6606_v5 = vld [vmem:[%s12308_s0 + $0x187] ss:$16 sm:%s3553_s17]   ;;  %v3551_v8 = vsel %vm6_vm0, %v6605_v12, %v6604_v2  ;;  %s3599_s17 = smov 48 }
 0x1d9   :  { %v6607_v49 = vld [vmem:[%s12308_s0 + $0x187] ss:$16 sm:%s3558_s19]   ;;  %v3556_v9 = vsel %vm10_vm1, %v6606_v5, %v3551_v8  ;;  %s3604_s19 = smov 192  ;;  %v2737_v35 = vpop.permute.xlu0 %2736  }
 0x1da   :  { %v6619_v54 = vld [vmem:[%s12308_s0 + $0x787] ss:$16 sm:%s3614_s9]   ;;  %v3561_v11 = vsel %vm14_vm2, %v6607_v49, %v3556_v9  ;;  %s3659_s9 = smov 3  ;;  %6430 = vst.msk [vmem:[%s12309_s1 + $0x10] sm:$0xff] %vm2555_vm10, %v2737_v35  }
 0x1db   :  { %v6620_v10 = vld [vmem:[%s12308_s0 + $0x787] ss:$16 sm:%s3617_s22]   ;;  %3562 = vrot.lane.b32.xlu0 %v3561_v11, %s7121_s18  ;;  %s3662_s22 = smov 12 }
 0x1dc   :  { %v3620_v13 = vsel %vm6_vm0, %v6620_v10, %v6619_v54  ;;  %v6621_v15 = vld [vmem:[%s12308_s0 + $0x787] ss:$16 sm:%s3622_s15]   ;;  %s3667_s15 = smov 48  ;;  %v6628_v27 = vld [vmem:[%s12308_s0 + $0x206] ss:$16 sm:%s3659_s9]   ;;  %s3708_s9 = smov 12 }
 0x1dd   :  { %v6622_v17 = vld [vmem:[%s12308_s0 + $0x787] ss:$16 sm:%s3627_s16]   ;;  %v3625_v24 = vsel %vm10_vm1, %v6621_v15, %v3620_v13  ;;  %s3672_s16 = smov 192  ;;  %v6629_v29 = vld [vmem:[%s12308_s0 + $0x206] ss:$16 sm:%s3662_s22]   ;;  %v2806_v40 = vpop.permute.xlu1 %2805  }
 0x1de   :  { %v6614_v19 = vld [vmem:[%s12308_s0 + $0x587] ss:$16 sm:%s3591_s23]   ;;  %v3630_v61 = vsel %vm14_vm2, %v6622_v17, %v3625_v24  ;;  %s3637_s23 = smov 3  ;;  %v3665_v32 = vsel %vm6_vm0, %v6629_v29, %v6628_v27  ;;  %v6630_v33 = vld [vmem:[%s12308_s0 + $0x206] ss:$16 sm:%s3667_s15]   ;;  %s3718_s15 = smov 192 }
 0x1df   :  { %v6615_v20 = vld [vmem:[%s12308_s0 + $0x587] ss:$16 sm:%s3594_s2]   ;;  %3631 = vrot.lane.b32.xlu1 %v3630_v61, %s7121_s18  ;;  %s3640_s2 = smov 12  ;;  %v3670_v60 = vsel %vm10_vm1, %v6630_v33, %v3665_v32  ;;  %6445 = vst.msk [vmem:[%s12309_s1 + $0x70] sm:$0xff] %vm2555_vm10, %v2806_v40  }
 0x1e0   :  { %v6616_v21 = vld [vmem:[%s12308_s0 + $0x587] ss:$16 sm:%s3599_s17]   ;;  %v3597_v25 = vsel %vm6_vm0, %v6615_v20, %v6614_v19  ;;  %s3645_s17 = smov 48  ;;  %v6631_v34 = vld [vmem:[%s12308_s0 + $0x206] ss:$16 sm:%s3672_s16]   ;;  %s7122_s16 = smov 48  }
 0x1e1   :  { %v6617_v28 = vld [vmem:[%s12308_s0 + $0x587] ss:$16 sm:%s3604_s19]   ;;  %v3602_v26 = vsel %vm10_vm1, %v6616_v21, %v3597_v25  ;;  %s3650_s19 = smov 192  ;;  %v6624_v37 = vld [vmem:[%s12308_s0 + $0x6] ss:$16 sm:%s3637_s23]   ;;  %v3675_v38 = vsel %vm14_vm2, %v6631_v34, %v3670_v60  ;;  %s3682_s23 = smov 3  ;;  %v2783_v51 = vpop.permute.xlu0 %2782  }
 0x1e2   :  { %v3607_v30 = vsel %vm14_vm2, %v6617_v28, %v3602_v26  ;;  %v6625_v39 = vld [vmem:[%s12308_s0 + $0x6] ss:$16 sm:%s3640_s2]   ;;  %s3685_s2 = smov 12  ;;  %6440 = vst.msk [vmem:[%s12309_s1 + $0x50] sm:$0xff] %vm2555_vm10, %v2783_v51  }
 0x1e3   :  { %3608 = vrot.lane.b32.xlu0 %v3607_v30, %s7121_s18  ;;  %v6626_v31 = vld [vmem:[%s12308_s0 + $0x6] ss:$16 sm:%s3645_s17]   ;;  %3676 = vrot.lane.b32.xlu1 %v3675_v38, %s7122_s16  ;;  %v3643_v4 = vsel %vm6_vm0, %v6625_v39, %v6624_v37  ;;  %s3690_s17 = smov 48  ;;  %s4439_s18 = smov 3 }
 0x1e4   :  { %v6627_v41 = vld [vmem:[%s12308_s0 + $0x6] ss:$16 sm:%s3650_s19]   ;;  %v3648_v43 = vsel %vm10_vm1, %v6626_v31, %v3643_v4  ;;  %s3695_s19 = smov 192 }
 0x1e5   :  { %v6639_v46 = vld [vmem:[%s12308_s0 + $0x606] ss:$16 sm:%s3708_s9]   ;;  %v3653_v47 = vsel %vm14_vm2, %v6627_v41, %v3648_v43  ;;  %s3754_s9 = smov 12  ;;  %v2852_v55 = vpop.permute.xlu1 %2851  }
 0x1e6   :  { %v3711_v48 = vsel %vm6_vm0, %v6639_v46, %v6638_v45  ;;  %v6641_v36 = vld [vmem:[%s12308_s0 + $0x606] ss:$16 sm:%s3718_s15]   ;;  %s3764_s15 = smov 192  ;;  %6455 = vst.msk [vmem:[%s12309_s1 + $0x38] sm:$0xff] %vm2555_vm10, %v2852_v55  }
 0x1e7   :  { %3654 = vrot.lane.b32.xlu0 %v3653_v47, %s7122_s16  ;;  %v3716_v42 = vsel %vm10_vm1, %v6640_v50, %v3711_v48  ;;  %v6633_v16 = vld [vmem:[%s12308_s0 + $0x406] ss:$16 sm:%s3682_s23]   ;;  %s3728_s23 = smov 3 }
 0x1e8   :  { %v3721_v52 = vsel %vm14_vm2, %v6641_v36, %v3716_v42  ;;  %v6634_v14 = vld [vmem:[%s12308_s0 + $0x406] ss:$16 sm:%s3685_s2]   ;;  %s3731_s2 = smov 12 }
 0x1e9   :  { %v6635_v53 = vld [vmem:[%s12308_s0 + $0x406] ss:$16 sm:%s3690_s17]   ;;  %3722 = vrot.lane.b32.xlu1 %v3721_v52, %s7122_s16  ;;  %v3688_v56 = vsel %vm6_vm0, %v6634_v14, %v6633_v16  ;;  %s3736_s17 = smov 48  ;;  %v2829_v22 = vpop.permute.xlu0 %2828  }
 0x1ea   :  { %v6636_v57 = vld [vmem:[%s12308_s0 + $0x406] ss:$16 sm:%s3695_s19]   ;;  %v3693_v6 = vsel %vm10_vm1, %v6635_v53, %v3688_v56  ;;  %s3741_s19 = smov 192  ;;  %6450 = vst.msk [vmem:[%s12309_s1 + $0x18] sm:$0xff] %vm2555_vm10, %v2829_v22  }
 0x1eb   :  { %v6649_v59 = vld [vmem:[%s12308_s0 + $0x286] ss:$16 sm:%s3754_s9]   ;;  %v3698_v62 = vsel %vm14_vm2, %v6636_v57, %v3693_v6  ;;  %s3800_s9 = smov 12 }
 0x1ec   :  { %v3757_v44 = vsel %vm6_vm0, %v6649_v59, %v6648_v58  ;;  %v6651_v0 = vld [vmem:[%s12308_s0 + $0x286] ss:$16 sm:%s3764_s15]   ;;  %3699 = vrot.lane.b32.xlu0 %v3698_v62, %s7122_s16  ;;  %s3810_s15 = smov 192 }
 0x1ed   :  { %v3762_v1 = vsel %vm10_vm1, %v6650_v63, %v3757_v44  ;;  %v6643_v2 = vld [vmem:[%s12308_s0 + $0x86] ss:$16 sm:%s3728_s23]   ;;  %s3774_s23 = smov 3  ;;  %v2898_v7 = vpop.permute.xlu1 %2897  }
 0x1ee   :  { %v3767_v3 = vsel %vm14_vm2, %v6651_v0, %v3762_v1  ;;  %v6644_v12 = vld [vmem:[%s12308_s0 + $0x86] ss:$16 sm:%s3731_s2]   ;;  %s3777_s2 = smov 12  ;;  %6465 = vst.msk [vmem:[%s12309_s1 + $0x78] sm:$0xff] %vm2555_vm10, %v2898_v7  }
 0x1ef   :  { %v6645_v5 = vld [vmem:[%s12308_s0 + $0x86] ss:$16 sm:%s3736_s17]   ;;  %3768 = vrot.lane.b32.xlu1 %v3767_v3, %s7122_s16  ;;  %v3734_v8 = vsel %vm6_vm0, %v6644_v12, %v6643_v2  ;;  %s3782_s17 = smov 48 }
 0x1f0   :  { %v6646_v49 = vld [vmem:[%s12308_s0 + $0x86] ss:$16 sm:%s3741_s19]   ;;  %v3739_v9 = vsel %vm10_vm1, %v6645_v5, %v3734_v8  ;;  %s3787_s19 = smov 192 }
 0x1f1   :  { %v6658_v54 = vld [vmem:[%s12308_s0 + $0x686] ss:$16 sm:%s3797_s8]   ;;  %v3744_v11 = vsel %vm14_vm2, %v6646_v49, %v3739_v9  ;;  %s3843_s8 = smov 3  ;;  %v2875_v18 = vpop.permute.xlu0 %2874   ;;  %v2943_v23 = vpop.permute.xlu1 %2942  }
 0x1f2   :  { %v6659_v10 = vld [vmem:[%s12308_s0 + $0x686] ss:$16 sm:%s3800_s9]   ;;  %3745 = vrot.lane.b32.xlu0 %v3744_v11, %s7122_s16  ;;  %s3846_s9 = smov 12  ;;  %6460 = vst.msk [vmem:[%s12309_s1 + $0x58] sm:$0xff] %vm2555_vm10, %v2875_v18  }
 0x1f3   :  { %v3803_v13 = vsel %vm6_vm0, %v6659_v10, %v6658_v54  ;;  %v6660_v15 = vld [vmem:[%s12308_s0 + $0x686] ss:$16 sm:%s3805_s14]   ;;  %s3851_s14 = smov 48  ;;  %6474 = vst.msk [vmem:[%s12309_s1 + $0x20] sm:$0xff] %vm2922_vm11, %v2943_v23  }
 0x1f4   :  { %v6661_v17 = vld [vmem:[%s12308_s0 + $0x686] ss:$16 sm:%s3810_s15]   ;;  %v3808_v24 = vsel %vm10_vm1, %v6660_v15, %v3803_v13  ;;  %s3856_s15 = smov 192 }
 0x1f5   :  { %v6653_v19 = vld [vmem:[%s12308_s0 + $0x486] ss:$16 sm:%s3774_s23]   ;;  %v3813_v61 = vsel %vm14_vm2, %v6661_v17, %v3808_v24  ;;  %s3820_s23 = smov 3  ;;  %v2921_v35 = vpop.permute.xlu0 %2920   ;;  %v2989_v40 = vpop.permute.xlu1 %2988  }
 0x1f6   :  { %v6654_v20 = vld [vmem:[%s12308_s0 + $0x486] ss:$16 sm:%s3777_s2]   ;;  %3814 = vrot.lane.b32.xlu1 %v3813_v61, %s7122_s16  ;;  %s3823_s2 = smov 12  ;;  %2923 = vst.msk [vmem:[%s12309_s1] sm:$0xff] %vm2922_vm11, %v2921_v35  }
 0x1f7   :  { %v6655_v21 = vld [vmem:[%s12308_s0 + $0x486] ss:$16 sm:%s3782_s17]   ;;  %v3780_v25 = vsel %vm6_vm0, %v6654_v20, %v6653_v19  ;;  %s3828_s17 = smov 48  ;;  %6484 = vst.msk [vmem:[%s12309_s1 + $0x60] sm:$0xff] %vm2922_vm11, %v2989_v40  }
 0x1f8   :  { %v6656_v28 = vld [vmem:[%s12308_s0 + $0x486] ss:$16 sm:%s3787_s19]   ;;  %v3785_v26 = vsel %vm10_vm1, %v6655_v21, %v3780_v25  ;;  %s3833_s19 = smov 192 }
 0x1f9   :  { %v6668_v27 = vld [vmem:[%s12308_s0 + $0x306] ss:$16 sm:%s3843_s8]   ;;  %v3790_v30 = vsel %vm14_vm2, %v6656_v28, %v3785_v26  ;;  %s3889_s8 = smov 3  ;;  %v2966_v51 = vpop.permute.xlu0 %2965   ;;  %v3035_v55 = vpop.permute.xlu1 %3034  }
 0x1fa   :  { %v6669_v29 = vld [vmem:[%s12308_s0 + $0x306] ss:$16 sm:%s3846_s9]   ;;  %3791 = vrot.lane.b32.xlu0 %v3790_v30, %s7122_s16  ;;  %s3892_s9 = smov 12  ;;  %6479 = vst.msk [vmem:[%s12309_s1 + $0x40] sm:$0xff] %vm2922_vm11, %v2966_v51  }
 0x1fb   :  { %v3849_v32 = vsel %vm6_vm0, %v6669_v29, %v6668_v27  ;;  %v6670_v33 = vld [vmem:[%s12308_s0 + $0x306] ss:$16 sm:%s3851_s14]   ;;  %s3897_s14 = smov 48  ;;  %6494 = vst.msk [vmem:[%s12309_s1 + $0x28] sm:$0xff] %vm2922_vm11, %v3035_v55  }
 0x1fc   :  { %v6671_v34 = vld [vmem:[%s12308_s0 + $0x306] ss:$16 sm:%s3856_s15]   ;;  %v3854_v60 = vsel %vm10_vm1, %v6670_v33, %v3849_v32  ;;  %s3902_s15 = smov 192 }
 0x1fd   :  { %v6663_v37 = vld [vmem:[%s12308_s0 + $0x106] ss:$16 sm:%s3820_s23]   ;;  %v3859_v38 = vsel %vm14_vm2, %v6671_v34, %v3854_v60  ;;  %s3866_s23 = smov 3  ;;  %v3012_v22 = vpop.permute.xlu0 %3011   ;;  %v3081_v7 = vpop.permute.xlu1 %3080  }
 0x1fe   :  { %v6664_v39 = vld [vmem:[%s12308_s0 + $0x106] ss:$16 sm:%s3823_s2]   ;;  %3860 = vrot.lane.b32.xlu1 %v3859_v38, %s7122_s16  ;;  %s3869_s2 = smov 12  ;;  %6489 = vst.msk [vmem:[%s12309_s1 + $0x8] sm:$0xff] %vm2922_vm11, %v3012_v22  }
 0x1ff   :  { %v6665_v31 = vld [vmem:[%s12308_s0 + $0x106] ss:$16 sm:%s3828_s17]   ;;  %v3826_v4 = vsel %vm6_vm0, %v6664_v39, %v6663_v37  ;;  %s3874_s17 = smov 48  ;;  %6504 = vst.msk [vmem:[%s12309_s1 + $0x68] sm:$0xff] %vm2922_vm11, %v3081_v7  }
 0x200   :  { %v6666_v41 = vld [vmem:[%s12308_s0 + $0x106] ss:$16 sm:%s3833_s19]   ;;  %v3831_v43 = vsel %vm10_vm1, %v6665_v31, %v3826_v4  ;;  %s3879_s19 = smov 192 }
 0x201   :  { %v6678_v45 = vld [vmem:[%s12308_s0 + $0x706] ss:$16 sm:%s3889_s8]   ;;  %v3836_v47 = vsel %vm14_vm2, %v6666_v41, %v3831_v43  ;;  %s3935_s8 = smov 3  ;;  %v3058_v18 = vpop.permute.xlu0 %3057  }
 0x202   :  { %v6679_v46 = vld [vmem:[%s12308_s0 + $0x706] ss:$16 sm:%s3892_s9]   ;;  %3837 = vrot.lane.b32.xlu0 %v3836_v47, %s7122_s16  ;;  %s3938_s9 = smov 12  ;;  %6499 = vst.msk [vmem:[%s12309_s1 + $0x48] sm:$0xff] %vm2922_vm11, %v3058_v18   ;;  %v3127_v23 = vpop.permute.xlu1 %3126  }
 0x203   :  { %v3895_v48 = vsel %vm6_vm0, %v6679_v46, %v6678_v45  ;;  %v6680_v50 = vld [vmem:[%s12308_s0 + $0x706] ss:$16 sm:%s3897_s14]   ;;  %s3943_s14 = smov 48  ;;  %v6717_v45 = vld [vmem:[%s12308_s0 + $0x605] ss:$16 sm:%s4072_s28]   ;;  %s4118_s28 = smov 3 }
 0x204   :  { %v6681_v36 = vld [vmem:[%s12308_s0 + $0x706] ss:$16 sm:%s3902_s15]   ;;  %v3900_v42 = vsel %vm10_vm1, %v6680_v50, %v3895_v48  ;;  %s3948_s15 = smov 192  ;;  %v6719_v50 = vld [vmem:[%s12308_s0 + $0x605] ss:$16 sm:%s4080_s27]   ;;  %s4126_s27 = smov 48 }
 0x205   :  { %v6673_v16 = vld [vmem:[%s12308_s0 + $0x506] ss:$16 sm:%s3866_s23]   ;;  %v3905_v52 = vsel %vm14_vm2, %v6681_v36, %v3900_v42  ;;  %s3912_s23 = smov 3  ;;  %6514 = vst.msk [vmem:[%s12309_s1 + $0x30] sm:$0xff] %vm2922_vm11, %v3127_v23  }
 0x206   :  { %v6674_v14 = vld [vmem:[%s12308_s0 + $0x506] ss:$16 sm:%s3869_s2]   ;;  %3906 = vrot.lane.b32.xlu1 %v3905_v52, %s7122_s16  ;;  %s3915_s2 = smov 12  ;;  %v3104_v35 = vpop.permute.xlu0 %3103  }
 0x207   :  { %v6675_v53 = vld [vmem:[%s12308_s0 + $0x506] ss:$16 sm:%s3874_s17]   ;;  %v3872_v56 = vsel %vm6_vm0, %v6674_v14, %v6673_v16  ;;  %s3920_s17 = smov 48  ;;  %6509 = vst.msk [vmem:[%s12309_s1 + $0x10] sm:$0xff] %vm2922_vm11, %v3104_v35  }
 0x208   :  { %v6676_v57 = vld [vmem:[%s12308_s0 + $0x506] ss:$16 sm:%s3879_s19]   ;;  %v3877_v6 = vsel %vm10_vm1, %v6675_v53, %v3872_v56  ;;  %s3925_s19 = smov 192 }
 0x209   :  { %v6688_v58 = vld [vmem:[%s12308_s0 + $0x386] ss:$16 sm:%s3935_s8]   ;;  %v3882_v62 = vsel %vm14_vm2, %v6676_v57, %v3877_v6  ;;  %s3981_s8 = smov 3 }
 0x20a   :  { %v6689_v59 = vld [vmem:[%s12308_s0 + $0x386] ss:$16 sm:%s3938_s9]   ;;  %3883 = vrot.lane.b32.xlu0 %v3882_v62, %s7122_s16  ;;  %s3984_s9 = smov 12  ;;  %v3173_v40 = vpop.permute.xlu1 %3172  }
 0x20b   :  { %v3941_v44 = vsel %vm6_vm0, %v6689_v59, %v6688_v58  ;;  %v6690_v63 = vld [vmem:[%s12308_s0 + $0x386] ss:$16 sm:%s3943_s14]   ;;  %s3989_s14 = smov 48  ;;  %v6727_v58 = vld [vmem:[%s12308_s0 + $0x285] ss:$16 sm:%s4118_s28]   ;;  %s4164_s28 = smov 3 }
 0x20c   :  { %v6691_v0 = vld [vmem:[%s12308_s0 + $0x386] ss:$16 sm:%s3948_s15]   ;;  %v3946_v1 = vsel %vm10_vm1, %v6690_v63, %v3941_v44  ;;  %s3994_s15 = smov 192  ;;  %v6729_v63 = vld [vmem:[%s12308_s0 + $0x285] ss:$16 sm:%s4126_s27]   ;;  %s4172_s27 = smov 48 }
 0x20d   :  { %v6683_v2 = vld [vmem:[%s12308_s0 + $0x186] ss:$16 sm:%s3912_s23]   ;;  %v3951_v3 = vsel %vm14_vm2, %v6691_v0, %v3946_v1  ;;  %s3958_s23 = smov 3  ;;  %6524 = vst.msk [vmem:[%s12309_s1 + $0x70] sm:$0xff] %vm2922_vm11, %v3173_v40  }
 0x20e   :  { %v6684_v12 = vld [vmem:[%s12308_s0 + $0x186] ss:$16 sm:%s3915_s2]   ;;  %3952 = vrot.lane.b32.xlu1 %v3951_v3, %s7122_s16  ;;  %s3961_s2 = smov 12  ;;  %v3150_v51 = vpop.permute.xlu0 %3149  }
 0x20f   :  { %v6685_v5 = vld [vmem:[%s12308_s0 + $0x186] ss:$16 sm:%s3920_s17]   ;;  %v3918_v8 = vsel %vm6_vm0, %v6684_v12, %v6683_v2  ;;  %s3966_s17 = smov 48  ;;  %6519 = vst.msk [vmem:[%s12309_s1 + $0x50] sm:$0xff] %vm2922_vm11, %v3150_v51  }
 0x210   :  { %v6686_v49 = vld [vmem:[%s12308_s0 + $0x186] ss:$16 sm:%s3925_s19]   ;;  %v3923_v9 = vsel %vm10_vm1, %v6685_v5, %v3918_v8  ;;  %s3971_s19 = smov 192 }
 0x211   :  { %v6698_v54 = vld [vmem:[%s12308_s0 + $0x786] ss:$16 sm:%s3981_s8]   ;;  %v3928_v11 = vsel %vm14_vm2, %v6686_v49, %v3923_v9  ;;  %s4026_s8 = smov 3 }
 0x212   :  { %v6699_v10 = vld [vmem:[%s12308_s0 + $0x786] ss:$16 sm:%s3984_s9]   ;;  %3929 = vrot.lane.b32.xlu0 %v3928_v11, %s7122_s16  ;;  %s4029_s9 = smov 12  ;;  %v3219_v55 = vpop.permute.xlu1 %3218  }
 0x213   :  { %v3987_v13 = vsel %vm6_vm0, %v6699_v10, %v6698_v54  ;;  %v6700_v15 = vld [vmem:[%s12308_s0 + $0x786] ss:$16 sm:%s3989_s14]   ;;  %s4034_s14 = smov 48  ;;  %v6707_v27 = vld [vmem:[%s12308_s0 + $0x205] ss:$16 sm:%s4026_s8]   ;;  %s4075_s8 = smov 12 }
 0x214   :  { %v6701_v17 = vld [vmem:[%s12308_s0 + $0x786] ss:$16 sm:%s3994_s15]   ;;  %v3992_v24 = vsel %vm10_vm1, %v6700_v15, %v3987_v13  ;;  %s4039_s15 = smov 192  ;;  %v6708_v29 = vld [vmem:[%s12308_s0 + $0x205] ss:$16 sm:%s4029_s9]  }
 0x215   :  { %v6693_v19 = vld [vmem:[%s12308_s0 + $0x586] ss:$16 sm:%s3958_s23]   ;;  %v3997_v61 = vsel %vm14_vm2, %v6701_v17, %v3992_v24  ;;  %s4004_s23 = smov 3  ;;  %v4032_v32 = vsel %vm6_vm0, %v6708_v29, %v6707_v27  ;;  %v6709_v33 = vld [vmem:[%s12308_s0 + $0x205] ss:$16 sm:%s4034_s14]   ;;  %s4085_s14 = smov 192 }
 0x216   :  { %v6694_v20 = vld [vmem:[%s12308_s0 + $0x586] ss:$16 sm:%s3961_s2]   ;;  %3998 = vrot.lane.b32.xlu1 %v3997_v61, %s7122_s16  ;;  %s4007_s2 = smov 12  ;;  %v4037_v60 = vsel %vm10_vm1, %v6709_v33, %v4032_v32  ;;  %6534 = vst.msk [vmem:[%s12309_s1 + $0x38] sm:$0xff] %vm2922_vm11, %v3219_v55   ;;  %v3196_v22 = vpop.permute.xlu0 %3195  }
 0x217   :  { %v6695_v21 = vld [vmem:[%s12308_s0 + $0x586] ss:$16 sm:%s3966_s17]   ;;  %v3964_v25 = vsel %vm6_vm0, %v6694_v20, %v6693_v19  ;;  %s4012_s17 = smov 48  ;;  %v6710_v34 = vld [vmem:[%s12308_s0 + $0x205] ss:$16 sm:%s4039_s15]   ;;  %s7123_s15 = smov 40  }
 0x218   :  { %v6696_v28 = vld [vmem:[%s12308_s0 + $0x586] ss:$16 sm:%s3971_s19]   ;;  %v3969_v26 = vsel %vm10_vm1, %v6695_v21, %v3964_v25  ;;  %s4017_s19 = smov 192  ;;  %v6703_v37 = vld [vmem:[%s12308_s0 + $0x5] ss:$16 sm:%s4004_s23]   ;;  %v4042_v38 = vsel %vm14_vm2, %v6710_v34, %v4037_v60  ;;  %s4049_s23 = smov 3 }
 0x219   :  { %v3974_v30 = vsel %vm14_vm2, %v6696_v28, %v3969_v26  ;;  %v6704_v39 = vld [vmem:[%s12308_s0 + $0x5] ss:$16 sm:%s4007_s2]   ;;  %s4052_s2 = smov 12  ;;  %6529 = vst.msk [vmem:[%s12309_s1 + $0x18] sm:$0xff] %vm2922_vm11, %v3196_v22  }
 0x21a   :  { %3975 = vrot.lane.b32.xlu0 %v3974_v30, %s7122_s16  ;;  %v6705_v31 = vld [vmem:[%s12308_s0 + $0x5] ss:$16 sm:%s4012_s17]   ;;  %4043 = vrot.lane.b32.xlu1 %v4042_v38, %s7123_s15  ;;  %v4010_v4 = vsel %vm6_vm0, %v6704_v39, %v6703_v37  ;;  %s4057_s17 = smov 48  ;;  %v3265_v7 = vpop.permute.xlu1 %3264   ;;  %s4806_s16 = smov 3 }
 0x21b   :  { %v6706_v41 = vld [vmem:[%s12308_s0 + $0x5] ss:$16 sm:%s4017_s19]   ;;  %v4015_v43 = vsel %vm10_vm1, %v6705_v31, %v4010_v4  ;;  %s4062_s19 = smov 192  ;;  %6544 = vst.msk [vmem:[%s12309_s1 + $0x78] sm:$0xff] %vm2922_vm11, %v3265_v7  }
 0x21c   :  { %v6718_v46 = vld [vmem:[%s12308_s0 + $0x605] ss:$16 sm:%s4075_s8]   ;;  %v4020_v47 = vsel %vm14_vm2, %v6706_v41, %v4015_v43  ;;  %s4121_s8 = smov 12 }
 0x21d   :  { %v4078_v48 = vsel %vm6_vm0, %v6718_v46, %v6717_v45  ;;  %v6720_v36 = vld [vmem:[%s12308_s0 + $0x605] ss:$16 sm:%s4085_s14]   ;;  %s4131_s14 = smov 192 }
 0x21e   :  { %4021 = vrot.lane.b32.xlu0 %v4020_v47, %s7123_s15  ;;  %v4083_v42 = vsel %vm10_vm1, %v6719_v50, %v4078_v48  ;;  %v6712_v16 = vld [vmem:[%s12308_s0 + $0x405] ss:$16 sm:%s4049_s23]   ;;  %s4095_s23 = smov 3  ;;  %v3242_v18 = vpop.permute.xlu0 %3241   ;;  %v3310_v23 = vpop.permute.xlu1 %3309  }
 0x21f   :  { %v4088_v52 = vsel %vm14_vm2, %v6720_v36, %v4083_v42  ;;  %v6713_v14 = vld [vmem:[%s12308_s0 + $0x405] ss:$16 sm:%s4052_s2]   ;;  %s4098_s2 = smov 12  ;;  %6539 = vst.msk [vmem:[%s12309_s1 + $0x58] sm:$0xff] %vm2922_vm11, %v3242_v18  }
 0x220   :  { %v6714_v53 = vld [vmem:[%s12308_s0 + $0x405] ss:$16 sm:%s4057_s17]   ;;  %4089 = vrot.lane.b32.xlu1 %v4088_v52, %s7123_s15  ;;  %v4055_v56 = vsel %vm6_vm0, %v6713_v14, %v6712_v16  ;;  %s4103_s17 = smov 48  ;;  %6553 = vst.msk [vmem:[%s12309_s1 + $0x20] sm:$0xff] %vm3289_vm12, %v3310_v23  }
 0x221   :  { %v6715_v57 = vld [vmem:[%s12308_s0 + $0x405] ss:$16 sm:%s4062_s19]   ;;  %v4060_v6 = vsel %vm10_vm1, %v6714_v53, %v4055_v56  ;;  %s4108_s19 = smov 192 }
 0x222   :  { %v6728_v59 = vld [vmem:[%s12308_s0 + $0x285] ss:$16 sm:%s4121_s8]   ;;  %v4065_v62 = vsel %vm14_vm2, %v6715_v57, %v4060_v6  ;;  %s4167_s8 = smov 12  ;;  %v3288_v35 = vpop.permute.xlu0 %3287  }
 0x223   :  { %v4124_v44 = vsel %vm6_vm0, %v6728_v59, %v6727_v58  ;;  %v6730_v0 = vld [vmem:[%s12308_s0 + $0x285] ss:$16 sm:%s4131_s14]   ;;  %4066 = vrot.lane.b32.xlu0 %v4065_v62, %s7123_s15  ;;  %s4177_s14 = smov 192  ;;  %3290 = vst.msk [vmem:[%s12309_s1] sm:$0xff] %vm3289_vm12, %v3288_v35  }
 0x224   :  { %v4129_v1 = vsel %vm10_vm1, %v6729_v63, %v4124_v44  ;;  %v6722_v2 = vld [vmem:[%s12308_s0 + $0x85] ss:$16 sm:%s4095_s23]   ;;  %s4141_s23 = smov 3  ;;  %v3356_v40 = vpop.permute.xlu1 %3355  }
 0x225   :  { %v4134_v3 = vsel %vm14_vm2, %v6730_v0, %v4129_v1  ;;  %v6723_v12 = vld [vmem:[%s12308_s0 + $0x85] ss:$16 sm:%s4098_s2]   ;;  %s4144_s2 = smov 12  ;;  %6563 = vst.msk [vmem:[%s12309_s1 + $0x60] sm:$0xff] %vm3289_vm12, %v3356_v40  }
 0x226   :  { %v6724_v5 = vld [vmem:[%s12308_s0 + $0x85] ss:$16 sm:%s4103_s17]   ;;  %4135 = vrot.lane.b32.xlu1 %v4134_v3, %s7123_s15  ;;  %v4101_v8 = vsel %vm6_vm0, %v6723_v12, %v6722_v2  ;;  %s4149_s17 = smov 48 }
 0x227   :  { %v6725_v49 = vld [vmem:[%s12308_s0 + $0x85] ss:$16 sm:%s4108_s19]   ;;  %v4106_v9 = vsel %vm10_vm1, %v6724_v5, %v4101_v8  ;;  %s4154_s19 = smov 192  ;;  %v3333_v51 = vpop.permute.xlu0 %3332  }
 0x228   :  { %v6737_v54 = vld [vmem:[%s12308_s0 + $0x685] ss:$16 sm:%s4164_s28]   ;;  %v4111_v11 = vsel %vm14_vm2, %v6725_v49, %v4106_v9  ;;  %s4210_s28 = smov 3  ;;  %6558 = vst.msk [vmem:[%s12309_s1 + $0x40] sm:$0xff] %vm3289_vm12, %v3333_v51  }
 0x229   :  { %v6738_v10 = vld [vmem:[%s12308_s0 + $0x685] ss:$16 sm:%s4167_s8]   ;;  %4112 = vrot.lane.b32.xlu0 %v4111_v11, %s7123_s15  ;;  %s4213_s8 = smov 12 }
 0x22a   :  { %v4170_v13 = vsel %vm6_vm0, %v6738_v10, %v6737_v54  ;;  %v6739_v15 = vld [vmem:[%s12308_s0 + $0x685] ss:$16 sm:%s4172_s27]   ;;  %s4218_s27 = smov 48  ;;  %v3402_v55 = vpop.permute.xlu1 %3401  }
 0x22b   :  { %v6740_v17 = vld [vmem:[%s12308_s0 + $0x685] ss:$16 sm:%s4177_s14]   ;;  %v4175_v24 = vsel %vm10_vm1, %v6739_v15, %v4170_v13  ;;  %s4223_s14 = smov 192  ;;  %6573 = vst.msk [vmem:[%s12309_s1 + $0x28] sm:$0xff] %vm3289_vm12, %v3402_v55  }
 0x22c   :  { %v6732_v19 = vld [vmem:[%s12308_s0 + $0x485] ss:$16 sm:%s4141_s23]   ;;  %v4180_v61 = vsel %vm14_vm2, %v6740_v17, %v4175_v24  ;;  %s4187_s23 = smov 3 }
 0x22d   :  { %v6733_v20 = vld [vmem:[%s12308_s0 + $0x485] ss:$16 sm:%s4144_s2]   ;;  %4181 = vrot.lane.b32.xlu1 %v4180_v61, %s7123_s15  ;;  %s4190_s2 = smov 12  ;;  %v3379_v22 = vpop.permute.xlu0 %3378  }
 0x22e   :  { %v6734_v21 = vld [vmem:[%s12308_s0 + $0x485] ss:$16 sm:%s4149_s17]   ;;  %v4147_v25 = vsel %vm6_vm0, %v6733_v20, %v6732_v19  ;;  %s4195_s17 = smov 48  ;;  %6568 = vst.msk [vmem:[%s12309_s1 + $0x8] sm:$0xff] %vm3289_vm12, %v3379_v22  }
 0x22f   :  { %v6735_v28 = vld [vmem:[%s12308_s0 + $0x485] ss:$16 sm:%s4154_s19]   ;;  %v4152_v26 = vsel %vm10_vm1, %v6734_v21, %v4147_v25  ;;  %s4200_s19 = smov 192 }
 0x230   :  { %v6747_v27 = vld [vmem:[%s12308_s0 + $0x305] ss:$16 sm:%s4210_s28]   ;;  %v4157_v30 = vsel %vm14_vm2, %v6735_v28, %v4152_v26  ;;  %s4256_s28 = smov 3 }
 0x231   :  { %v6748_v29 = vld [vmem:[%s12308_s0 + $0x305] ss:$16 sm:%s4213_s8]   ;;  %4158 = vrot.lane.b32.xlu0 %v4157_v30, %s7123_s15  ;;  %s4259_s8 = smov 12  ;;  %v3448_v7 = vpop.permute.xlu1 %3447  }
 0x232   :  { %v4216_v32 = vsel %vm6_vm0, %v6748_v29, %v6747_v27  ;;  %v6749_v33 = vld [vmem:[%s12308_s0 + $0x305] ss:$16 sm:%s4218_s27]   ;;  %s4264_s27 = smov 48  ;;  %6583 = vst.msk [vmem:[%s12309_s1 + $0x68] sm:$0xff] %vm3289_vm12, %v3448_v7  }
 0x233   :  { %v6750_v34 = vld [vmem:[%s12308_s0 + $0x305] ss:$16 sm:%s4223_s14]   ;;  %v4221_v60 = vsel %vm10_vm1, %v6749_v33, %v4216_v32  ;;  %s4269_s14 = smov 192 }
 0x234   :  { %v6742_v37 = vld [vmem:[%s12308_s0 + $0x105] ss:$16 sm:%s4187_s23]   ;;  %v4226_v38 = vsel %vm14_vm2, %v6750_v34, %v4221_v60  ;;  %s4233_s23 = smov 3 }
 0x235   :  { %v6743_v39 = vld [vmem:[%s12308_s0 + $0x105] ss:$16 sm:%s4190_s2]   ;;  %4227 = vrot.lane.b32.xlu1 %v4226_v38, %s7123_s15  ;;  %s4236_s2 = smov 12  ;;  %v3425_v18 = vpop.permute.xlu0 %3424  }
 0x236   :  { %v6744_v31 = vld [vmem:[%s12308_s0 + $0x105] ss:$16 sm:%s4195_s17]   ;;  %v4193_v4 = vsel %vm6_vm0, %v6743_v39, %v6742_v37  ;;  %s4241_s17 = smov 48  ;;  %6578 = vst.msk [vmem:[%s12309_s1 + $0x48] sm:$0xff] %vm3289_vm12, %v3425_v18  }
 0x237   :  { %v6745_v41 = vld [vmem:[%s12308_s0 + $0x105] ss:$16 sm:%s4200_s19]   ;;  %v4198_v43 = vsel %vm10_vm1, %v6744_v31, %v4193_v4  ;;  %s4246_s19 = smov 192 }
 0x238   :  { %v6757_v45 = vld [vmem:[%s12308_s0 + $0x705] ss:$16 sm:%s4256_s28]   ;;  %v4203_v47 = vsel %vm14_vm2, %v6745_v41, %v4198_v43  ;;  %s4302_s28 = smov 3 }
 0x239   :  { %v6758_v46 = vld [vmem:[%s12308_s0 + $0x705] ss:$16 sm:%s4259_s8]   ;;  %4204 = vrot.lane.b32.xlu0 %v4203_v47, %s7123_s15  ;;  %s4305_s8 = smov 12  ;;  %v3494_v23 = vpop.permute.xlu1 %3493  }
 0x23a   :  { %v4262_v48 = vsel %vm6_vm0, %v6758_v46, %v6757_v45  ;;  %v6759_v50 = vld [vmem:[%s12308_s0 + $0x705] ss:$16 sm:%s4264_s27]   ;;  %s4310_s27 = smov 48  ;;  %v6796_v45 = vld [vmem:[%s12308_s0 + $0x604] ss:$16 sm:%s4439_s18]   ;;  %s4485_s18 = smov 3 }
 0x23b   :  { %v6760_v36 = vld [vmem:[%s12308_s0 + $0x705] ss:$16 sm:%s4269_s14]   ;;  %v4267_v42 = vsel %vm10_vm1, %v6759_v50, %v4262_v48  ;;  %s4315_s14 = smov 192  ;;  %v6798_v50 = vld [vmem:[%s12308_s0 + $0x604] ss:$16 sm:%s4447_s11]   ;;  %s4493_s11 = smov 48 }
 0x23c   :  { %v6752_v16 = vld [vmem:[%s12308_s0 + $0x505] ss:$16 sm:%s4233_s23]   ;;  %v4272_v52 = vsel %vm14_vm2, %v6760_v36, %v4267_v42  ;;  %s4279_s23 = smov 3  ;;  %6593 = vst.msk [vmem:[%s12309_s1 + $0x30] sm:$0xff] %vm3289_vm12, %v3494_v23  }
 0x23d   :  { %v6753_v14 = vld [vmem:[%s12308_s0 + $0x505] ss:$16 sm:%s4236_s2]   ;;  %4273 = vrot.lane.b32.xlu1 %v4272_v52, %s7123_s15  ;;  %s4282_s2 = smov 12  ;;  %v3471_v35 = vpop.permute.xlu0 %3470  }
 0x23e   :  { %v6754_v53 = vld [vmem:[%s12308_s0 + $0x505] ss:$16 sm:%s4241_s17]   ;;  %v4239_v56 = vsel %vm6_vm0, %v6753_v14, %v6752_v16  ;;  %s4287_s17 = smov 48  ;;  %6588 = vst.msk [vmem:[%s12309_s1 + $0x10] sm:$0xff] %vm3289_vm12, %v3471_v35  }
 0x23f   :  { %v6755_v57 = vld [vmem:[%s12308_s0 + $0x505] ss:$16 sm:%s4246_s19]   ;;  %v4244_v6 = vsel %vm10_vm1, %v6754_v53, %v4239_v56  ;;  %s4292_s19 = smov 192 }
 0x240   :  { %v6767_v58 = vld [vmem:[%s12308_s0 + $0x385] ss:$16 sm:%s4302_s28]   ;;  %v4249_v62 = vsel %vm14_vm2, %v6755_v57, %v4244_v6  ;;  %s4348_s28 = smov 3 }
 0x241   :  { %v6768_v59 = vld [vmem:[%s12308_s0 + $0x385] ss:$16 sm:%s4305_s8]   ;;  %4250 = vrot.lane.b32.xlu0 %v4249_v62, %s7123_s15  ;;  %s4351_s8 = smov 12  ;;  %v3540_v40 = vpop.permute.xlu1 %3539  }
 0x242   :  { %v4308_v44 = vsel %vm6_vm0, %v6768_v59, %v6767_v58  ;;  %v6769_v63 = vld [vmem:[%s12308_s0 + $0x385] ss:$16 sm:%s4310_s27]   ;;  %s4356_s27 = smov 48  ;;  %v6806_v58 = vld [vmem:[%s12308_s0 + $0x284] ss:$16 sm:%s4485_s18]   ;;  %s4531_s18 = smov 3 }
 0x243   :  { %v6770_v0 = vld [vmem:[%s12308_s0 + $0x385] ss:$16 sm:%s4315_s14]   ;;  %v4313_v1 = vsel %vm10_vm1, %v6769_v63, %v4308_v44  ;;  %s4361_s14 = smov 192  ;;  %v6808_v63 = vld [vmem:[%s12308_s0 + $0x284] ss:$16 sm:%s4493_s11]   ;;  %s4539_s11 = smov 48 }
 0x244   :  { %v6762_v2 = vld [vmem:[%s12308_s0 + $0x185] ss:$16 sm:%s4279_s23]   ;;  %v4318_v3 = vsel %vm14_vm2, %v6770_v0, %v4313_v1  ;;  %s4325_s23 = smov 3  ;;  %6603 = vst.msk [vmem:[%s12309_s1 + $0x70] sm:$0xff] %vm3289_vm12, %v3540_v40  }
 0x245   :  { %v6763_v12 = vld [vmem:[%s12308_s0 + $0x185] ss:$16 sm:%s4282_s2]   ;;  %4319 = vrot.lane.b32.xlu1 %v4318_v3, %s7123_s15  ;;  %s4328_s2 = smov 12  ;;  %v3517_v51 = vpop.permute.xlu0 %3516  }
 0x246   :  { %v6764_v5 = vld [vmem:[%s12308_s0 + $0x185] ss:$16 sm:%s4287_s17]   ;;  %v4285_v8 = vsel %vm6_vm0, %v6763_v12, %v6762_v2  ;;  %s4333_s17 = smov 48  ;;  %6598 = vst.msk [vmem:[%s12309_s1 + $0x50] sm:$0xff] %vm3289_vm12, %v3517_v51  }
 0x247   :  { %v6765_v49 = vld [vmem:[%s12308_s0 + $0x185] ss:$16 sm:%s4292_s19]   ;;  %v4290_v9 = vsel %vm10_vm1, %v6764_v5, %v4285_v8  ;;  %s4338_s19 = smov 192 }
 0x248   :  { %v6777_v54 = vld [vmem:[%s12308_s0 + $0x785] ss:$16 sm:%s4348_s28]   ;;  %v4295_v11 = vsel %vm14_vm2, %v6765_v49, %v4290_v9  ;;  %s4393_s28 = smov 3 }
 0x249   :  { %v6778_v10 = vld [vmem:[%s12308_s0 + $0x785] ss:$16 sm:%s4351_s8]   ;;  %4296 = vrot.lane.b32.xlu0 %v4295_v11, %s7123_s15  ;;  %s4396_s8 = smov 12  ;;  %v3586_v55 = vpop.permute.xlu1 %3585  }
 0x24a   :  { %v4354_v13 = vsel %vm6_vm0, %v6778_v10, %v6777_v54  ;;  %v6779_v15 = vld [vmem:[%s12308_s0 + $0x785] ss:$16 sm:%s4356_s27]   ;;  %s4401_s27 = smov 48  ;;  %v6786_v27 = vld [vmem:[%s12308_s0 + $0x204] ss:$16 sm:%s4393_s28]   ;;  %s4442_s28 = smov 12 }
 0x24b   :  { %v6780_v17 = vld [vmem:[%s12308_s0 + $0x785] ss:$16 sm:%s4361_s14]   ;;  %v4359_v24 = vsel %vm10_vm1, %v6779_v15, %v4354_v13  ;;  %s4406_s14 = smov 192  ;;  %v6787_v29 = vld [vmem:[%s12308_s0 + $0x204] ss:$16 sm:%s4396_s8]  }
 0x24c   :  { %v6772_v19 = vld [vmem:[%s12308_s0 + $0x585] ss:$16 sm:%s4325_s23]   ;;  %v4364_v61 = vsel %vm14_vm2, %v6780_v17, %v4359_v24  ;;  %s4371_s23 = smov 3  ;;  %v4399_v32 = vsel %vm6_vm0, %v6787_v29, %v6786_v27  ;;  %v6788_v33 = vld [vmem:[%s12308_s0 + $0x204] ss:$16 sm:%s4401_s27]   ;;  %s4452_s27 = smov 192 }
 0x24d   :  { %v6773_v20 = vld [vmem:[%s12308_s0 + $0x585] ss:$16 sm:%s4328_s2]   ;;  %4365 = vrot.lane.b32.xlu1 %v4364_v61, %s7123_s15  ;;  %s4374_s2 = smov 12  ;;  %v4404_v60 = vsel %vm10_vm1, %v6788_v33, %v4399_v32  ;;  %6613 = vst.msk [vmem:[%s12309_s1 + $0x38] sm:$0xff] %vm3289_vm12, %v3586_v55   ;;  %v3563_v22 = vpop.permute.xlu0 %3562  }
 0x24e   :  { %v6774_v21 = vld [vmem:[%s12308_s0 + $0x585] ss:$16 sm:%s4333_s17]   ;;  %v4331_v25 = vsel %vm6_vm0, %v6773_v20, %v6772_v19  ;;  %s4379_s17 = smov 48  ;;  %v6789_v34 = vld [vmem:[%s12308_s0 + $0x204] ss:$16 sm:%s4406_s14]   ;;  %s7124_s14 = smov 32  }
 0x24f   :  { %v6775_v28 = vld [vmem:[%s12308_s0 + $0x585] ss:$16 sm:%s4338_s19]   ;;  %v4336_v26 = vsel %vm10_vm1, %v6774_v21, %v4331_v25  ;;  %s4384_s19 = smov 192  ;;  %v6782_v37 = vld [vmem:[%s12308_s0 + $0x4] ss:$16 sm:%s4371_s23]   ;;  %v4409_v38 = vsel %vm14_vm2, %v6789_v34, %v4404_v60  ;;  %s4416_s23 = smov 3 }
 0x250   :  { %v4341_v30 = vsel %vm14_vm2, %v6775_v28, %v4336_v26  ;;  %v6783_v39 = vld [vmem:[%s12308_s0 + $0x4] ss:$16 sm:%s4374_s2]   ;;  %s4419_s2 = smov 12  ;;  %6608 = vst.msk [vmem:[%s12309_s1 + $0x18] sm:$0xff] %vm3289_vm12, %v3563_v22  }
 0x251   :  { %4342 = vrot.lane.b32.xlu0 %v4341_v30, %s7123_s15  ;;  %v6784_v31 = vld [vmem:[%s12308_s0 + $0x4] ss:$16 sm:%s4379_s17]   ;;  %4410 = vrot.lane.b32.xlu1 %v4409_v38, %s7124_s14  ;;  %v4377_v4 = vsel %vm6_vm0, %v6783_v39, %v6782_v37  ;;  %s4424_s17 = smov 48  ;;  %v3632_v7 = vpop.permute.xlu1 %3631   ;;  %s5173_s15 = smov 3 }
 0x252   :  { %v6785_v41 = vld [vmem:[%s12308_s0 + $0x4] ss:$16 sm:%s4384_s19]   ;;  %v4382_v43 = vsel %vm10_vm1, %v6784_v31, %v4377_v4  ;;  %s4429_s19 = smov 192  ;;  %6623 = vst.msk [vmem:[%s12309_s1 + $0x78] sm:$0xff] %vm3289_vm12, %v3632_v7  }
 0x253   :  { %v6797_v46 = vld [vmem:[%s12308_s0 + $0x604] ss:$16 sm:%s4442_s28]   ;;  %v4387_v47 = vsel %vm14_vm2, %v6785_v41, %v4382_v43  ;;  %s4488_s28 = smov 12 }
 0x254   :  { %v4445_v48 = vsel %vm6_vm0, %v6797_v46, %v6796_v45  ;;  %v6799_v36 = vld [vmem:[%s12308_s0 + $0x604] ss:$16 sm:%s4452_s27]   ;;  %s4498_s27 = smov 192 }
 0x255   :  { %4388 = vrot.lane.b32.xlu0 %v4387_v47, %s7124_s14  ;;  %v4450_v42 = vsel %vm10_vm1, %v6798_v50, %v4445_v48  ;;  %v6791_v16 = vld [vmem:[%s12308_s0 + $0x404] ss:$16 sm:%s4416_s23]   ;;  %s4462_s23 = smov 3  ;;  %v3609_v18 = vpop.permute.xlu0 %3608   ;;  %v3677_v23 = vpop.permute.xlu1 %3676  }
 0x256   :  { %v4455_v52 = vsel %vm14_vm2, %v6799_v36, %v4450_v42  ;;  %v6792_v14 = vld [vmem:[%s12308_s0 + $0x404] ss:$16 sm:%s4419_s2]   ;;  %s4465_s2 = smov 12  ;;  %6618 = vst.msk [vmem:[%s12309_s1 + $0x58] sm:$0xff] %vm3289_vm12, %v3609_v18  }
 0x257   :  { %v6793_v53 = vld [vmem:[%s12308_s0 + $0x404] ss:$16 sm:%s4424_s17]   ;;  %4456 = vrot.lane.b32.xlu1 %v4455_v52, %s7124_s14  ;;  %v4422_v56 = vsel %vm6_vm0, %v6792_v14, %v6791_v16  ;;  %s4470_s17 = smov 48  ;;  %6632 = vst.msk [vmem:[%s12309_s1 + $0x20] sm:$0xff] %vm3656_vm13, %v3677_v23  }
 0x258   :  { %v6794_v57 = vld [vmem:[%s12308_s0 + $0x404] ss:$16 sm:%s4429_s19]   ;;  %v4427_v6 = vsel %vm10_vm1, %v6793_v53, %v4422_v56  ;;  %s4475_s19 = smov 192 }
 0x259   :  { %v6807_v59 = vld [vmem:[%s12308_s0 + $0x284] ss:$16 sm:%s4488_s28]   ;;  %v4432_v62 = vsel %vm14_vm2, %v6794_v57, %v4427_v6  ;;  %s4534_s28 = smov 12  ;;  %v3655_v35 = vpop.permute.xlu0 %3654  }
 0x25a   :  { %v4491_v44 = vsel %vm6_vm0, %v6807_v59, %v6806_v58  ;;  %v6809_v0 = vld [vmem:[%s12308_s0 + $0x284] ss:$16 sm:%s4498_s27]   ;;  %4433 = vrot.lane.b32.xlu0 %v4432_v62, %s7124_s14  ;;  %s4544_s27 = smov 192  ;;  %3657 = vst.msk [vmem:[%s12309_s1] sm:$0xff] %vm3656_vm13, %v3655_v35  }
 0x25b   :  { %v4496_v1 = vsel %vm10_vm1, %v6808_v63, %v4491_v44  ;;  %v6801_v2 = vld [vmem:[%s12308_s0 + $0x84] ss:$16 sm:%s4462_s23]   ;;  %s4508_s23 = smov 3  ;;  %v3723_v40 = vpop.permute.xlu1 %3722  }
 0x25c   :  { %v4501_v3 = vsel %vm14_vm2, %v6809_v0, %v4496_v1  ;;  %v6802_v12 = vld [vmem:[%s12308_s0 + $0x84] ss:$16 sm:%s4465_s2]   ;;  %s4511_s2 = smov 12  ;;  %6642 = vst.msk [vmem:[%s12309_s1 + $0x60] sm:$0xff] %vm3656_vm13, %v3723_v40  }
 0x25d   :  { %v6803_v5 = vld [vmem:[%s12308_s0 + $0x84] ss:$16 sm:%s4470_s17]   ;;  %4502 = vrot.lane.b32.xlu1 %v4501_v3, %s7124_s14  ;;  %v4468_v8 = vsel %vm6_vm0, %v6802_v12, %v6801_v2  ;;  %s4516_s17 = smov 48 }
 0x25e   :  { %v6804_v49 = vld [vmem:[%s12308_s0 + $0x84] ss:$16 sm:%s4475_s19]   ;;  %v4473_v9 = vsel %vm10_vm1, %v6803_v5, %v4468_v8  ;;  %s4521_s19 = smov 192  ;;  %v3700_v51 = vpop.permute.xlu0 %3699  }
 0x25f   :  { %v6816_v54 = vld [vmem:[%s12308_s0 + $0x684] ss:$16 sm:%s4531_s18]   ;;  %v4478_v11 = vsel %vm14_vm2, %v6804_v49, %v4473_v9  ;;  %s4577_s18 = smov 3  ;;  %6637 = vst.msk [vmem:[%s12309_s1 + $0x40] sm:$0xff] %vm3656_vm13, %v3700_v51  }
 0x260   :  { %v6817_v10 = vld [vmem:[%s12308_s0 + $0x684] ss:$16 sm:%s4534_s28]   ;;  %4479 = vrot.lane.b32.xlu0 %v4478_v11, %s7124_s14  ;;  %s4580_s28 = smov 12 }
 0x261   :  { %v4537_v13 = vsel %vm6_vm0, %v6817_v10, %v6816_v54  ;;  %v6818_v15 = vld [vmem:[%s12308_s0 + $0x684] ss:$16 sm:%s4539_s11]   ;;  %s4585_s11 = smov 48  ;;  %v3769_v55 = vpop.permute.xlu1 %3768  }
 0x262   :  { %v6819_v17 = vld [vmem:[%s12308_s0 + $0x684] ss:$16 sm:%s4544_s27]   ;;  %v4542_v24 = vsel %vm10_vm1, %v6818_v15, %v4537_v13  ;;  %s4590_s27 = smov 192  ;;  %6652 = vst.msk [vmem:[%s12309_s1 + $0x28] sm:$0xff] %vm3656_vm13, %v3769_v55  }
 0x263   :  { %v6811_v19 = vld [vmem:[%s12308_s0 + $0x484] ss:$16 sm:%s4508_s23]   ;;  %v4547_v61 = vsel %vm14_vm2, %v6819_v17, %v4542_v24  ;;  %s4554_s23 = smov 3 }
 0x264   :  { %v6812_v20 = vld [vmem:[%s12308_s0 + $0x484] ss:$16 sm:%s4511_s2]   ;;  %4548 = vrot.lane.b32.xlu1 %v4547_v61, %s7124_s14  ;;  %s4557_s2 = smov 12  ;;  %v3746_v22 = vpop.permute.xlu0 %3745  }
 0x265   :  { %v6813_v21 = vld [vmem:[%s12308_s0 + $0x484] ss:$16 sm:%s4516_s17]   ;;  %v4514_v25 = vsel %vm6_vm0, %v6812_v20, %v6811_v19  ;;  %s4562_s17 = smov 48  ;;  %6647 = vst.msk [vmem:[%s12309_s1 + $0x8] sm:$0xff] %vm3656_vm13, %v3746_v22  }
 0x266   :  { %v6814_v28 = vld [vmem:[%s12308_s0 + $0x484] ss:$16 sm:%s4521_s19]   ;;  %v4519_v26 = vsel %vm10_vm1, %v6813_v21, %v4514_v25  ;;  %s4567_s19 = smov 192 }
 0x267   :  { %v6826_v27 = vld [vmem:[%s12308_s0 + $0x304] ss:$16 sm:%s4577_s18]   ;;  %v4524_v30 = vsel %vm14_vm2, %v6814_v28, %v4519_v26  ;;  %s4623_s18 = smov 3 }
 0x268   :  { %v6827_v29 = vld [vmem:[%s12308_s0 + $0x304] ss:$16 sm:%s4580_s28]   ;;  %4525 = vrot.lane.b32.xlu0 %v4524_v30, %s7124_s14  ;;  %s4626_s28 = smov 12  ;;  %v3815_v7 = vpop.permute.xlu1 %3814  }
 0x269   :  { %v4583_v32 = vsel %vm6_vm0, %v6827_v29, %v6826_v27  ;;  %v6828_v33 = vld [vmem:[%s12308_s0 + $0x304] ss:$16 sm:%s4585_s11]   ;;  %s4631_s11 = smov 48  ;;  %6662 = vst.msk [vmem:[%s12309_s1 + $0x68] sm:$0xff] %vm3656_vm13, %v3815_v7  }
 0x26a   :  { %v6829_v34 = vld [vmem:[%s12308_s0 + $0x304] ss:$16 sm:%s4590_s27]   ;;  %v4588_v60 = vsel %vm10_vm1, %v6828_v33, %v4583_v32  ;;  %s4636_s27 = smov 192 }
 0x26b   :  { %v6821_v37 = vld [vmem:[%s12308_s0 + $0x104] ss:$16 sm:%s4554_s23]   ;;  %v4593_v38 = vsel %vm14_vm2, %v6829_v34, %v4588_v60  ;;  %s4600_s23 = smov 3 }
 0x26c   :  { %v6822_v39 = vld [vmem:[%s12308_s0 + $0x104] ss:$16 sm:%s4557_s2]   ;;  %4594 = vrot.lane.b32.xlu1 %v4593_v38, %s7124_s14  ;;  %s4603_s2 = smov 12  ;;  %v3792_v18 = vpop.permute.xlu0 %3791  }
 0x26d   :  { %v6823_v31 = vld [vmem:[%s12308_s0 + $0x104] ss:$16 sm:%s4562_s17]   ;;  %v4560_v4 = vsel %vm6_vm0, %v6822_v39, %v6821_v37  ;;  %s4608_s17 = smov 48  ;;  %6657 = vst.msk [vmem:[%s12309_s1 + $0x48] sm:$0xff] %vm3656_vm13, %v3792_v18  }
 0x26e   :  { %v6824_v41 = vld [vmem:[%s12308_s0 + $0x104] ss:$16 sm:%s4567_s19]   ;;  %v4565_v43 = vsel %vm10_vm1, %v6823_v31, %v4560_v4  ;;  %s4613_s19 = smov 192 }
 0x26f   :  { %v6836_v45 = vld [vmem:[%s12308_s0 + $0x704] ss:$16 sm:%s4623_s18]   ;;  %v4570_v47 = vsel %vm14_vm2, %v6824_v41, %v4565_v43  ;;  %s4669_s18 = smov 3 }
 0x270   :  { %v6837_v46 = vld [vmem:[%s12308_s0 + $0x704] ss:$16 sm:%s4626_s28]   ;;  %4571 = vrot.lane.b32.xlu0 %v4570_v47, %s7124_s14  ;;  %s4672_s28 = smov 12  ;;  %v3861_v23 = vpop.permute.xlu1 %3860  }
 0x271   :  { %v4629_v48 = vsel %vm6_vm0, %v6837_v46, %v6836_v45  ;;  %v6838_v50 = vld [vmem:[%s12308_s0 + $0x704] ss:$16 sm:%s4631_s11]   ;;  %s4677_s11 = smov 48  ;;  %v6875_v45 = vld [vmem:[%s12308_s0 + $0x603] ss:$16 sm:%s4806_s16]   ;;  %s4852_s16 = smov 3 }
 0x272   :  { %v6839_v36 = vld [vmem:[%s12308_s0 + $0x704] ss:$16 sm:%s4636_s27]   ;;  %v4634_v42 = vsel %vm10_vm1, %v6838_v50, %v4629_v48  ;;  %s4682_s27 = smov 192  ;;  %v6877_v50 = vld [vmem:[%s12308_s0 + $0x603] ss:$16 sm:%s4814_s13]   ;;  %s4860_s13 = smov 48 }
 0x273   :  { %v6831_v16 = vld [vmem:[%s12308_s0 + $0x504] ss:$16 sm:%s4600_s23]   ;;  %v4639_v52 = vsel %vm14_vm2, %v6839_v36, %v4634_v42  ;;  %s4646_s23 = smov 3  ;;  %6672 = vst.msk [vmem:[%s12309_s1 + $0x30] sm:$0xff] %vm3656_vm13, %v3861_v23  }
 0x274   :  { %v6832_v14 = vld [vmem:[%s12308_s0 + $0x504] ss:$16 sm:%s4603_s2]   ;;  %4640 = vrot.lane.b32.xlu1 %v4639_v52, %s7124_s14  ;;  %s4649_s2 = smov 12  ;;  %v3838_v35 = vpop.permute.xlu0 %3837  }
 0x275   :  { %v6833_v53 = vld [vmem:[%s12308_s0 + $0x504] ss:$16 sm:%s4608_s17]   ;;  %v4606_v56 = vsel %vm6_vm0, %v6832_v14, %v6831_v16  ;;  %s4654_s17 = smov 48  ;;  %6667 = vst.msk [vmem:[%s12309_s1 + $0x10] sm:$0xff] %vm3656_vm13, %v3838_v35  }
 0x276   :  { %v6834_v57 = vld [vmem:[%s12308_s0 + $0x504] ss:$16 sm:%s4613_s19]   ;;  %v4611_v6 = vsel %vm10_vm1, %v6833_v53, %v4606_v56  ;;  %s4659_s19 = smov 192 }
 0x277   :  { %v6846_v58 = vld [vmem:[%s12308_s0 + $0x384] ss:$16 sm:%s4669_s18]   ;;  %v4616_v62 = vsel %vm14_vm2, %v6834_v57, %v4611_v6  ;;  %s4715_s18 = smov 3 }
 0x278   :  { %v6847_v59 = vld [vmem:[%s12308_s0 + $0x384] ss:$16 sm:%s4672_s28]   ;;  %4617 = vrot.lane.b32.xlu0 %v4616_v62, %s7124_s14  ;;  %s4718_s28 = smov 12  ;;  %v3907_v40 = vpop.permute.xlu1 %3906  }
 0x279   :  { %v4675_v44 = vsel %vm6_vm0, %v6847_v59, %v6846_v58  ;;  %v6848_v63 = vld [vmem:[%s12308_s0 + $0x384] ss:$16 sm:%s4677_s11]   ;;  %s4723_s11 = smov 48  ;;  %v6885_v58 = vld [vmem:[%s12308_s0 + $0x283] ss:$16 sm:%s4852_s16]   ;;  %s4898_s16 = smov 3 }
 0x27a   :  { %v6849_v0 = vld [vmem:[%s12308_s0 + $0x384] ss:$16 sm:%s4682_s27]   ;;  %v4680_v1 = vsel %vm10_vm1, %v6848_v63, %v4675_v44  ;;  %s4728_s27 = smov 192  ;;  %v6887_v63 = vld [vmem:[%s12308_s0 + $0x283] ss:$16 sm:%s4860_s13]   ;;  %s4906_s13 = smov 48 }
 0x27b   :  { %v6841_v2 = vld [vmem:[%s12308_s0 + $0x184] ss:$16 sm:%s4646_s23]   ;;  %v4685_v3 = vsel %vm14_vm2, %v6849_v0, %v4680_v1  ;;  %s4692_s23 = smov 3  ;;  %6682 = vst.msk [vmem:[%s12309_s1 + $0x70] sm:$0xff] %vm3656_vm13, %v3907_v40  }
 0x27c   :  { %v6842_v12 = vld [vmem:[%s12308_s0 + $0x184] ss:$16 sm:%s4649_s2]   ;;  %4686 = vrot.lane.b32.xlu1 %v4685_v3, %s7124_s14  ;;  %s4695_s2 = smov 12  ;;  %v3884_v51 = vpop.permute.xlu0 %3883  }
 0x27d   :  { %v6843_v5 = vld [vmem:[%s12308_s0 + $0x184] ss:$16 sm:%s4654_s17]   ;;  %v4652_v8 = vsel %vm6_vm0, %v6842_v12, %v6841_v2  ;;  %s4700_s17 = smov 48  ;;  %6677 = vst.msk [vmem:[%s12309_s1 + $0x50] sm:$0xff] %vm3656_vm13, %v3884_v51  }
 0x27e   :  { %v6844_v49 = vld [vmem:[%s12308_s0 + $0x184] ss:$16 sm:%s4659_s19]   ;;  %v4657_v9 = vsel %vm10_vm1, %v6843_v5, %v4652_v8  ;;  %s4705_s19 = smov 192 }
 0x27f   :  { %v6856_v54 = vld [vmem:[%s12308_s0 + $0x784] ss:$16 sm:%s4715_s18]   ;;  %v4662_v11 = vsel %vm14_vm2, %v6844_v49, %v4657_v9  ;;  %s4760_s18 = smov 3 }
 0x280   :  { %v6857_v10 = vld [vmem:[%s12308_s0 + $0x784] ss:$16 sm:%s4718_s28]   ;;  %4663 = vrot.lane.b32.xlu0 %v4662_v11, %s7124_s14  ;;  %s4763_s28 = smov 12  ;;  %v3953_v55 = vpop.permute.xlu1 %3952  }
 0x281   :  { %v4721_v13 = vsel %vm6_vm0, %v6857_v10, %v6856_v54  ;;  %v6858_v15 = vld [vmem:[%s12308_s0 + $0x784] ss:$16 sm:%s4723_s11]   ;;  %s4768_s11 = smov 48  ;;  %v6865_v27 = vld [vmem:[%s12308_s0 + $0x203] ss:$16 sm:%s4760_s18]   ;;  %s4809_s18 = smov 12 }
 0x282   :  { %v6859_v17 = vld [vmem:[%s12308_s0 + $0x784] ss:$16 sm:%s4728_s27]   ;;  %v4726_v24 = vsel %vm10_vm1, %v6858_v15, %v4721_v13  ;;  %s4773_s27 = smov 192  ;;  %v6866_v29 = vld [vmem:[%s12308_s0 + $0x203] ss:$16 sm:%s4763_s28]  }
 0x283   :  { %v6851_v19 = vld [vmem:[%s12308_s0 + $0x584] ss:$16 sm:%s4692_s23]   ;;  %v4731_v61 = vsel %vm14_vm2, %v6859_v17, %v4726_v24  ;;  %s4738_s23 = smov 3  ;;  %v4766_v32 = vsel %vm6_vm0, %v6866_v29, %v6865_v27  ;;  %v6867_v33 = vld [vmem:[%s12308_s0 + $0x203] ss:$16 sm:%s4768_s11]   ;;  %s4819_s11 = smov 192 }
 0x284   :  { %v6852_v20 = vld [vmem:[%s12308_s0 + $0x584] ss:$16 sm:%s4695_s2]   ;;  %4732 = vrot.lane.b32.xlu1 %v4731_v61, %s7124_s14  ;;  %s4741_s2 = smov 12  ;;  %v4771_v60 = vsel %vm10_vm1, %v6867_v33, %v4766_v32  ;;  %6692 = vst.msk [vmem:[%s12309_s1 + $0x38] sm:$0xff] %vm3656_vm13, %v3953_v55   ;;  %v3930_v22 = vpop.permute.xlu0 %3929  }
 0x285   :  { %v6853_v21 = vld [vmem:[%s12308_s0 + $0x584] ss:$16 sm:%s4700_s17]   ;;  %v4698_v25 = vsel %vm6_vm0, %v6852_v20, %v6851_v19  ;;  %s4746_s17 = smov 48  ;;  %v6868_v34 = vld [vmem:[%s12308_s0 + $0x203] ss:$16 sm:%s4773_s27]   ;;  %s7125_s27 = smov 24  }
 0x286   :  { %v6854_v28 = vld [vmem:[%s12308_s0 + $0x584] ss:$16 sm:%s4705_s19]   ;;  %v4703_v26 = vsel %vm10_vm1, %v6853_v21, %v4698_v25  ;;  %s4751_s19 = smov 192  ;;  %v6861_v37 = vld [vmem:[%s12308_s0 + $0x3] ss:$16 sm:%s4738_s23]   ;;  %v4776_v38 = vsel %vm14_vm2, %v6868_v34, %v4771_v60  ;;  %s4783_s23 = smov 3 }
 0x287   :  { %v4708_v30 = vsel %vm14_vm2, %v6854_v28, %v4703_v26  ;;  %v6862_v39 = vld [vmem:[%s12308_s0 + $0x3] ss:$16 sm:%s4741_s2]   ;;  %s4786_s2 = smov 12  ;;  %6687 = vst.msk [vmem:[%s12309_s1 + $0x18] sm:$0xff] %vm3656_vm13, %v3930_v22  }
 0x288   :  { %4709 = vrot.lane.b32.xlu0 %v4708_v30, %s7124_s14  ;;  %v6863_v31 = vld [vmem:[%s12308_s0 + $0x3] ss:$16 sm:%s4746_s17]   ;;  %4777 = vrot.lane.b32.xlu1 %v4776_v38, %s7125_s27  ;;  %v4744_v4 = vsel %vm6_vm0, %v6862_v39, %v6861_v37  ;;  %s4791_s17 = smov 48  ;;  %v3999_v7 = vpop.permute.xlu1 %3998   ;;  %s5540_s14 = smov 3 }
 0x289   :  { %v6864_v41 = vld [vmem:[%s12308_s0 + $0x3] ss:$16 sm:%s4751_s19]   ;;  %v4749_v43 = vsel %vm10_vm1, %v6863_v31, %v4744_v4  ;;  %s4796_s19 = smov 192  ;;  %6702 = vst.msk [vmem:[%s12309_s1 + $0x78] sm:$0xff] %vm3656_vm13, %v3999_v7  }
 0x28a   :  { %v6876_v46 = vld [vmem:[%s12308_s0 + $0x603] ss:$16 sm:%s4809_s18]   ;;  %v4754_v47 = vsel %vm14_vm2, %v6864_v41, %v4749_v43  ;;  %s4855_s18 = smov 12 }
 0x28b   :  { %v4812_v48 = vsel %vm6_vm0, %v6876_v46, %v6875_v45  ;;  %v6878_v36 = vld [vmem:[%s12308_s0 + $0x603] ss:$16 sm:%s4819_s11]   ;;  %s4865_s11 = smov 192 }
 0x28c   :  { %4755 = vrot.lane.b32.xlu0 %v4754_v47, %s7125_s27  ;;  %v4817_v42 = vsel %vm10_vm1, %v6877_v50, %v4812_v48  ;;  %v6870_v16 = vld [vmem:[%s12308_s0 + $0x403] ss:$16 sm:%s4783_s23]   ;;  %s4829_s23 = smov 3  ;;  %v3976_v18 = vpop.permute.xlu0 %3975   ;;  %v4044_v23 = vpop.permute.xlu1 %4043  }
 0x28d   :  { %v4822_v52 = vsel %vm14_vm2, %v6878_v36, %v4817_v42  ;;  %v6871_v14 = vld [vmem:[%s12308_s0 + $0x403] ss:$16 sm:%s4786_s2]   ;;  %s4832_s2 = smov 12  ;;  %6697 = vst.msk [vmem:[%s12309_s1 + $0x58] sm:$0xff] %vm3656_vm13, %v3976_v18  }
 0x28e   :  { %v6872_v53 = vld [vmem:[%s12308_s0 + $0x403] ss:$16 sm:%s4791_s17]   ;;  %4823 = vrot.lane.b32.xlu1 %v4822_v52, %s7125_s27  ;;  %v4789_v56 = vsel %vm6_vm0, %v6871_v14, %v6870_v16  ;;  %s4837_s17 = smov 48  ;;  %6711 = vst.msk [vmem:[%s12309_s1 + $0x20] sm:$0xff] %vm4023_vm14, %v4044_v23  }
 0x28f   :  { %v6873_v57 = vld [vmem:[%s12308_s0 + $0x403] ss:$16 sm:%s4796_s19]   ;;  %v4794_v6 = vsel %vm10_vm1, %v6872_v53, %v4789_v56  ;;  %s4842_s19 = smov 192 }
 0x290   :  { %v6886_v59 = vld [vmem:[%s12308_s0 + $0x283] ss:$16 sm:%s4855_s18]   ;;  %v4799_v62 = vsel %vm14_vm2, %v6873_v57, %v4794_v6  ;;  %s4901_s18 = smov 12  ;;  %v4022_v35 = vpop.permute.xlu0 %4021  }
 0x291   :  { %v4858_v44 = vsel %vm6_vm0, %v6886_v59, %v6885_v58  ;;  %v6888_v0 = vld [vmem:[%s12308_s0 + $0x283] ss:$16 sm:%s4865_s11]   ;;  %4800 = vrot.lane.b32.xlu0 %v4799_v62, %s7125_s27  ;;  %s4911_s11 = smov 192  ;;  %4024 = vst.msk [vmem:[%s12309_s1] sm:$0xff] %vm4023_vm14, %v4022_v35  }
 0x292   :  { %v4863_v1 = vsel %vm10_vm1, %v6887_v63, %v4858_v44  ;;  %v6880_v2 = vld [vmem:[%s12308_s0 + $0x83] ss:$16 sm:%s4829_s23]   ;;  %s4875_s23 = smov 3  ;;  %v4090_v40 = vpop.permute.xlu1 %4089  }
 0x293   :  { %v4868_v3 = vsel %vm14_vm2, %v6888_v0, %v4863_v1  ;;  %v6881_v12 = vld [vmem:[%s12308_s0 + $0x83] ss:$16 sm:%s4832_s2]   ;;  %s4878_s2 = smov 12  ;;  %6721 = vst.msk [vmem:[%s12309_s1 + $0x60] sm:$0xff] %vm4023_vm14, %v4090_v40  }
 0x294   :  { %v6882_v5 = vld [vmem:[%s12308_s0 + $0x83] ss:$16 sm:%s4837_s17]   ;;  %4869 = vrot.lane.b32.xlu1 %v4868_v3, %s7125_s27  ;;  %v4835_v8 = vsel %vm6_vm0, %v6881_v12, %v6880_v2  ;;  %s4883_s17 = smov 48 }
 0x295   :  { %v6883_v49 = vld [vmem:[%s12308_s0 + $0x83] ss:$16 sm:%s4842_s19]   ;;  %v4840_v9 = vsel %vm10_vm1, %v6882_v5, %v4835_v8  ;;  %s4888_s19 = smov 192  ;;  %v4067_v51 = vpop.permute.xlu0 %4066  }
 0x296   :  { %v6895_v54 = vld [vmem:[%s12308_s0 + $0x683] ss:$16 sm:%s4898_s16]   ;;  %v4845_v11 = vsel %vm14_vm2, %v6883_v49, %v4840_v9  ;;  %s4944_s16 = smov 3  ;;  %6716 = vst.msk [vmem:[%s12309_s1 + $0x40] sm:$0xff] %vm4023_vm14, %v4067_v51  }
 0x297   :  { %v6896_v10 = vld [vmem:[%s12308_s0 + $0x683] ss:$16 sm:%s4901_s18]   ;;  %4846 = vrot.lane.b32.xlu0 %v4845_v11, %s7125_s27  ;;  %s4947_s18 = smov 12 }
 0x298   :  { %v4904_v13 = vsel %vm6_vm0, %v6896_v10, %v6895_v54  ;;  %v6897_v15 = vld [vmem:[%s12308_s0 + $0x683] ss:$16 sm:%s4906_s13]   ;;  %s4952_s13 = smov 48  ;;  %v4136_v55 = vpop.permute.xlu1 %4135  }
 0x299   :  { %v6898_v17 = vld [vmem:[%s12308_s0 + $0x683] ss:$16 sm:%s4911_s11]   ;;  %v4909_v24 = vsel %vm10_vm1, %v6897_v15, %v4904_v13  ;;  %s4957_s11 = smov 192  ;;  %6731 = vst.msk [vmem:[%s12309_s1 + $0x28] sm:$0xff] %vm4023_vm14, %v4136_v55  }
 0x29a   :  { %v6890_v19 = vld [vmem:[%s12308_s0 + $0x483] ss:$16 sm:%s4875_s23]   ;;  %v4914_v61 = vsel %vm14_vm2, %v6898_v17, %v4909_v24  ;;  %s4921_s23 = smov 3 }
 0x29b   :  { %v6891_v20 = vld [vmem:[%s12308_s0 + $0x483] ss:$16 sm:%s4878_s2]   ;;  %4915 = vrot.lane.b32.xlu1 %v4914_v61, %s7125_s27  ;;  %s4924_s2 = smov 12  ;;  %v4113_v22 = vpop.permute.xlu0 %4112  }
 0x29c   :  { %v6892_v21 = vld [vmem:[%s12308_s0 + $0x483] ss:$16 sm:%s4883_s17]   ;;  %v4881_v25 = vsel %vm6_vm0, %v6891_v20, %v6890_v19  ;;  %s4929_s17 = smov 48  ;;  %6726 = vst.msk [vmem:[%s12309_s1 + $0x8] sm:$0xff] %vm4023_vm14, %v4113_v22  }
 0x29d   :  { %v6893_v28 = vld [vmem:[%s12308_s0 + $0x483] ss:$16 sm:%s4888_s19]   ;;  %v4886_v26 = vsel %vm10_vm1, %v6892_v21, %v4881_v25  ;;  %s4934_s19 = smov 192 }
 0x29e   :  { %v6905_v27 = vld [vmem:[%s12308_s0 + $0x303] ss:$16 sm:%s4944_s16]   ;;  %v4891_v30 = vsel %vm14_vm2, %v6893_v28, %v4886_v26  ;;  %s4990_s16 = smov 3 }
 0x29f   :  { %v6906_v29 = vld [vmem:[%s12308_s0 + $0x303] ss:$16 sm:%s4947_s18]   ;;  %4892 = vrot.lane.b32.xlu0 %v4891_v30, %s7125_s27  ;;  %s4993_s18 = smov 12  ;;  %v4182_v7 = vpop.permute.xlu1 %4181  }
 0x2a0   :  { %v4950_v32 = vsel %vm6_vm0, %v6906_v29, %v6905_v27  ;;  %v6907_v33 = vld [vmem:[%s12308_s0 + $0x303] ss:$16 sm:%s4952_s13]   ;;  %s4998_s13 = smov 48  ;;  %6741 = vst.msk [vmem:[%s12309_s1 + $0x68] sm:$0xff] %vm4023_vm14, %v4182_v7  }
 0x2a1   :  { %v6908_v34 = vld [vmem:[%s12308_s0 + $0x303] ss:$16 sm:%s4957_s11]   ;;  %v4955_v60 = vsel %vm10_vm1, %v6907_v33, %v4950_v32  ;;  %s5003_s11 = smov 192 }
 0x2a2   :  { %v6900_v37 = vld [vmem:[%s12308_s0 + $0x103] ss:$16 sm:%s4921_s23]   ;;  %v4960_v38 = vsel %vm14_vm2, %v6908_v34, %v4955_v60  ;;  %s4967_s23 = smov 3 }
 0x2a3   :  { %v6901_v39 = vld [vmem:[%s12308_s0 + $0x103] ss:$16 sm:%s4924_s2]   ;;  %4961 = vrot.lane.b32.xlu1 %v4960_v38, %s7125_s27  ;;  %s4970_s2 = smov 12  ;;  %v4159_v18 = vpop.permute.xlu0 %4158  }
 0x2a4   :  { %v6902_v31 = vld [vmem:[%s12308_s0 + $0x103] ss:$16 sm:%s4929_s17]   ;;  %v4927_v4 = vsel %vm6_vm0, %v6901_v39, %v6900_v37  ;;  %s4975_s17 = smov 48  ;;  %6736 = vst.msk [vmem:[%s12309_s1 + $0x48] sm:$0xff] %vm4023_vm14, %v4159_v18  }
 0x2a5   :  { %v6903_v41 = vld [vmem:[%s12308_s0 + $0x103] ss:$16 sm:%s4934_s19]   ;;  %v4932_v43 = vsel %vm10_vm1, %v6902_v31, %v4927_v4  ;;  %s4980_s19 = smov 192 }
 0x2a6   :  { %v6915_v45 = vld [vmem:[%s12308_s0 + $0x703] ss:$16 sm:%s4990_s16]   ;;  %v4937_v47 = vsel %vm14_vm2, %v6903_v41, %v4932_v43  ;;  %s5036_s16 = smov 3 }
 0x2a7   :  { %v6916_v46 = vld [vmem:[%s12308_s0 + $0x703] ss:$16 sm:%s4993_s18]   ;;  %4938 = vrot.lane.b32.xlu0 %v4937_v47, %s7125_s27  ;;  %s5039_s18 = smov 12  ;;  %v4228_v23 = vpop.permute.xlu1 %4227  }
 0x2a8   :  { %v4996_v48 = vsel %vm6_vm0, %v6916_v46, %v6915_v45  ;;  %v6917_v50 = vld [vmem:[%s12308_s0 + $0x703] ss:$16 sm:%s4998_s13]   ;;  %s5044_s13 = smov 48  ;;  %v6954_v45 = vld [vmem:[%s12308_s0 + $0x602] ss:$16 sm:%s5173_s15]   ;;  %s5219_s15 = smov 3 }
 0x2a9   :  { %v6918_v36 = vld [vmem:[%s12308_s0 + $0x703] ss:$16 sm:%s5003_s11]   ;;  %v5001_v42 = vsel %vm10_vm1, %v6917_v50, %v4996_v48  ;;  %s5049_s11 = smov 192  ;;  %v6956_v50 = vld [vmem:[%s12308_s0 + $0x602] ss:$16 sm:%s5181_s12]   ;;  %s5227_s12 = smov 48 }
 0x2aa   :  { %v6910_v16 = vld [vmem:[%s12308_s0 + $0x503] ss:$16 sm:%s4967_s23]   ;;  %v5006_v52 = vsel %vm14_vm2, %v6918_v36, %v5001_v42  ;;  %s5013_s23 = smov 3  ;;  %6751 = vst.msk [vmem:[%s12309_s1 + $0x30] sm:$0xff] %vm4023_vm14, %v4228_v23  }
 0x2ab   :  { %v6911_v14 = vld [vmem:[%s12308_s0 + $0x503] ss:$16 sm:%s4970_s2]   ;;  %5007 = vrot.lane.b32.xlu1 %v5006_v52, %s7125_s27  ;;  %s5016_s2 = smov 12  ;;  %v4205_v35 = vpop.permute.xlu0 %4204  }
 0x2ac   :  { %v6912_v53 = vld [vmem:[%s12308_s0 + $0x503] ss:$16 sm:%s4975_s17]   ;;  %v4973_v56 = vsel %vm6_vm0, %v6911_v14, %v6910_v16  ;;  %s5021_s17 = smov 48  ;;  %6746 = vst.msk [vmem:[%s12309_s1 + $0x10] sm:$0xff] %vm4023_vm14, %v4205_v35  }
 0x2ad   :  { %v6913_v57 = vld [vmem:[%s12308_s0 + $0x503] ss:$16 sm:%s4980_s19]   ;;  %v4978_v6 = vsel %vm10_vm1, %v6912_v53, %v4973_v56  ;;  %s5026_s19 = smov 192 }
 0x2ae   :  { %v6925_v58 = vld [vmem:[%s12308_s0 + $0x383] ss:$16 sm:%s5036_s16]   ;;  %v4983_v62 = vsel %vm14_vm2, %v6913_v57, %v4978_v6  ;;  %s5082_s16 = smov 3 }
 0x2af   :  { %v6926_v59 = vld [vmem:[%s12308_s0 + $0x383] ss:$16 sm:%s5039_s18]   ;;  %4984 = vrot.lane.b32.xlu0 %v4983_v62, %s7125_s27  ;;  %s5085_s18 = smov 12  ;;  %v4274_v40 = vpop.permute.xlu1 %4273  }
 0x2b0   :  { %v5042_v44 = vsel %vm6_vm0, %v6926_v59, %v6925_v58  ;;  %v6927_v63 = vld [vmem:[%s12308_s0 + $0x383] ss:$16 sm:%s5044_s13]   ;;  %s5090_s13 = smov 48  ;;  %v6964_v58 = vld [vmem:[%s12308_s0 + $0x282] ss:$16 sm:%s5219_s15]   ;;  %s5265_s15 = smov 3 }
 0x2b1   :  { %v6928_v0 = vld [vmem:[%s12308_s0 + $0x383] ss:$16 sm:%s5049_s11]   ;;  %v5047_v1 = vsel %vm10_vm1, %v6927_v63, %v5042_v44  ;;  %s5095_s11 = smov 192  ;;  %v6966_v63 = vld [vmem:[%s12308_s0 + $0x282] ss:$16 sm:%s5227_s12]   ;;  %s5273_s12 = smov 48 }
 0x2b2   :  { %v6920_v2 = vld [vmem:[%s12308_s0 + $0x183] ss:$16 sm:%s5013_s23]   ;;  %v5052_v3 = vsel %vm14_vm2, %v6928_v0, %v5047_v1  ;;  %s5059_s23 = smov 3  ;;  %6761 = vst.msk [vmem:[%s12309_s1 + $0x70] sm:$0xff] %vm4023_vm14, %v4274_v40  }
 0x2b3   :  { %v6921_v12 = vld [vmem:[%s12308_s0 + $0x183] ss:$16 sm:%s5016_s2]   ;;  %5053 = vrot.lane.b32.xlu1 %v5052_v3, %s7125_s27  ;;  %s5062_s2 = smov 12  ;;  %v4251_v51 = vpop.permute.xlu0 %4250  }
 0x2b4   :  { %v6922_v5 = vld [vmem:[%s12308_s0 + $0x183] ss:$16 sm:%s5021_s17]   ;;  %v5019_v8 = vsel %vm6_vm0, %v6921_v12, %v6920_v2  ;;  %s5067_s17 = smov 48  ;;  %6756 = vst.msk [vmem:[%s12309_s1 + $0x50] sm:$0xff] %vm4023_vm14, %v4251_v51  }
 0x2b5   :  { %v6923_v49 = vld [vmem:[%s12308_s0 + $0x183] ss:$16 sm:%s5026_s19]   ;;  %v5024_v9 = vsel %vm10_vm1, %v6922_v5, %v5019_v8  ;;  %s5072_s19 = smov 192 }
 0x2b6   :  { %v6935_v54 = vld [vmem:[%s12308_s0 + $0x783] ss:$16 sm:%s5082_s16]   ;;  %v5029_v11 = vsel %vm14_vm2, %v6923_v49, %v5024_v9  ;;  %s5127_s16 = smov 3 }
 0x2b7   :  { %v6936_v10 = vld [vmem:[%s12308_s0 + $0x783] ss:$16 sm:%s5085_s18]   ;;  %5030 = vrot.lane.b32.xlu0 %v5029_v11, %s7125_s27  ;;  %s5130_s18 = smov 12  ;;  %v4320_v55 = vpop.permute.xlu1 %4319  }
 0x2b8   :  { %v5088_v13 = vsel %vm6_vm0, %v6936_v10, %v6935_v54  ;;  %v6937_v15 = vld [vmem:[%s12308_s0 + $0x783] ss:$16 sm:%s5090_s13]   ;;  %s5135_s13 = smov 48  ;;  %v6944_v27 = vld [vmem:[%s12308_s0 + $0x202] ss:$16 sm:%s5127_s16]   ;;  %s5176_s16 = smov 12 }
 0x2b9   :  { %v6938_v17 = vld [vmem:[%s12308_s0 + $0x783] ss:$16 sm:%s5095_s11]   ;;  %v5093_v24 = vsel %vm10_vm1, %v6937_v15, %v5088_v13  ;;  %s5140_s11 = smov 192  ;;  %v6945_v29 = vld [vmem:[%s12308_s0 + $0x202] ss:$16 sm:%s5130_s18]  }
 0x2ba   :  { %v6930_v19 = vld [vmem:[%s12308_s0 + $0x583] ss:$16 sm:%s5059_s23]   ;;  %v5098_v61 = vsel %vm14_vm2, %v6938_v17, %v5093_v24  ;;  %s5105_s23 = smov 3  ;;  %v5133_v32 = vsel %vm6_vm0, %v6945_v29, %v6944_v27  ;;  %v6946_v33 = vld [vmem:[%s12308_s0 + $0x202] ss:$16 sm:%s5135_s13]   ;;  %s5186_s13 = smov 192 }
 0x2bb   :  { %v6931_v20 = vld [vmem:[%s12308_s0 + $0x583] ss:$16 sm:%s5062_s2]   ;;  %5099 = vrot.lane.b32.xlu1 %v5098_v61, %s7125_s27  ;;  %s5108_s2 = smov 12  ;;  %v5138_v60 = vsel %vm10_vm1, %v6946_v33, %v5133_v32  ;;  %6771 = vst.msk [vmem:[%s12309_s1 + $0x38] sm:$0xff] %vm4023_vm14, %v4320_v55   ;;  %v4297_v22 = vpop.permute.xlu0 %4296  }
 0x2bc   :  { %v6932_v21 = vld [vmem:[%s12308_s0 + $0x583] ss:$16 sm:%s5067_s17]   ;;  %v5065_v25 = vsel %vm6_vm0, %v6931_v20, %v6930_v19  ;;  %s5113_s17 = smov 48  ;;  %v6947_v34 = vld [vmem:[%s12308_s0 + $0x202] ss:$16 sm:%s5140_s11]   ;;  %s7126_s11 = smov 16  }
 0x2bd   :  { %v6933_v28 = vld [vmem:[%s12308_s0 + $0x583] ss:$16 sm:%s5072_s19]   ;;  %v5070_v26 = vsel %vm10_vm1, %v6932_v21, %v5065_v25  ;;  %s5118_s19 = smov 192  ;;  %v6940_v37 = vld [vmem:[%s12308_s0 + $0x2] ss:$16 sm:%s5105_s23]   ;;  %v5143_v38 = vsel %vm14_vm2, %v6947_v34, %v5138_v60  ;;  %s5150_s23 = smov 3 }
 0x2be   :  { %v5075_v30 = vsel %vm14_vm2, %v6933_v28, %v5070_v26  ;;  %v6941_v39 = vld [vmem:[%s12308_s0 + $0x2] ss:$16 sm:%s5108_s2]   ;;  %s5153_s2 = smov 12  ;;  %6766 = vst.msk [vmem:[%s12309_s1 + $0x18] sm:$0xff] %vm4023_vm14, %v4297_v22  }
 0x2bf   :  { %5076 = vrot.lane.b32.xlu0 %v5075_v30, %s7125_s27  ;;  %v6942_v31 = vld [vmem:[%s12308_s0 + $0x2] ss:$16 sm:%s5113_s17]   ;;  %5144 = vrot.lane.b32.xlu1 %v5143_v38, %s7126_s11  ;;  %v5111_v4 = vsel %vm6_vm0, %v6941_v39, %v6940_v37  ;;  %s5158_s17 = smov 48  ;;  %v4366_v7 = vpop.permute.xlu1 %4365  }
 0x2c0   :  { %v6943_v41 = vld [vmem:[%s12308_s0 + $0x2] ss:$16 sm:%s5118_s19]   ;;  %v5116_v43 = vsel %vm10_vm1, %v6942_v31, %v5111_v4  ;;  %s5163_s19 = smov 192  ;;  %6781 = vst.msk [vmem:[%s12309_s1 + $0x78] sm:$0xff] %vm4023_vm14, %v4366_v7  }
 0x2c1   :  { %v6955_v46 = vld [vmem:[%s12308_s0 + $0x602] ss:$16 sm:%s5176_s16]   ;;  %v5121_v47 = vsel %vm14_vm2, %v6943_v41, %v5116_v43  ;;  %s5222_s16 = smov 12 }
 0x2c2   :  { %v5179_v48 = vsel %vm6_vm0, %v6955_v46, %v6954_v45  ;;  %v6957_v36 = vld [vmem:[%s12308_s0 + $0x602] ss:$16 sm:%s5186_s13]   ;;  %s5232_s13 = smov 192 }
 0x2c3   :  { %5122 = vrot.lane.b32.xlu0 %v5121_v47, %s7126_s11  ;;  %v5184_v42 = vsel %vm10_vm1, %v6956_v50, %v5179_v48  ;;  %v6949_v16 = vld [vmem:[%s12308_s0 + $0x402] ss:$16 sm:%s5150_s23]   ;;  %s5196_s23 = smov 3  ;;  %v4343_v18 = vpop.permute.xlu0 %4342   ;;  %v4411_v23 = vpop.permute.xlu1 %4410  }
 0x2c4   :  { %v5189_v52 = vsel %vm14_vm2, %v6957_v36, %v5184_v42  ;;  %v6950_v14 = vld [vmem:[%s12308_s0 + $0x402] ss:$16 sm:%s5153_s2]   ;;  %s5199_s2 = smov 12  ;;  %6776 = vst.msk [vmem:[%s12309_s1 + $0x58] sm:$0xff] %vm4023_vm14, %v4343_v18  }
 0x2c5   :  { %v6951_v53 = vld [vmem:[%s12308_s0 + $0x402] ss:$16 sm:%s5158_s17]   ;;  %5190 = vrot.lane.b32.xlu1 %v5189_v52, %s7126_s11  ;;  %v5156_v56 = vsel %vm6_vm0, %v6950_v14, %v6949_v16  ;;  %s5204_s17 = smov 48  ;;  %6790 = vst.msk [vmem:[%s12309_s1 + $0x20] sm:$0xff] %vm4390_vm15, %v4411_v23  }
 0x2c6   :  { %v6952_v57 = vld [vmem:[%s12308_s0 + $0x402] ss:$16 sm:%s5163_s19]   ;;  %v5161_v6 = vsel %vm10_vm1, %v6951_v53, %v5156_v56  ;;  %s5209_s19 = smov 192 }
 0x2c7   :  { %v6965_v59 = vld [vmem:[%s12308_s0 + $0x282] ss:$16 sm:%s5222_s16]   ;;  %v5166_v62 = vsel %vm14_vm2, %v6952_v57, %v5161_v6  ;;  %s5268_s16 = smov 12  ;;  %v4389_v35 = vpop.permute.xlu0 %4388  }
 0x2c8   :  { %v5225_v44 = vsel %vm6_vm0, %v6965_v59, %v6964_v58  ;;  %v6967_v0 = vld [vmem:[%s12308_s0 + $0x282] ss:$16 sm:%s5232_s13]   ;;  %5167 = vrot.lane.b32.xlu0 %v5166_v62, %s7126_s11  ;;  %s5278_s13 = smov 192  ;;  %4391 = vst.msk [vmem:[%s12309_s1] sm:$0xff] %vm4390_vm15, %v4389_v35  }
 0x2c9   :  { %v5230_v1 = vsel %vm10_vm1, %v6966_v63, %v5225_v44  ;;  %v6959_v2 = vld [vmem:[%s12308_s0 + $0x82] ss:$16 sm:%s5196_s23]   ;;  %s5242_s23 = smov 3  ;;  %v4457_v40 = vpop.permute.xlu1 %4456  }
 0x2ca   :  { %v5235_v3 = vsel %vm14_vm2, %v6967_v0, %v5230_v1  ;;  %v6960_v12 = vld [vmem:[%s12308_s0 + $0x82] ss:$16 sm:%s5199_s2]   ;;  %s5245_s2 = smov 12  ;;  %6800 = vst.msk [vmem:[%s12309_s1 + $0x60] sm:$0xff] %vm4390_vm15, %v4457_v40  }
 0x2cb   :  { %v6961_v5 = vld [vmem:[%s12308_s0 + $0x82] ss:$16 sm:%s5204_s17]   ;;  %5236 = vrot.lane.b32.xlu1 %v5235_v3, %s7126_s11  ;;  %v5202_v8 = vsel %vm6_vm0, %v6960_v12, %v6959_v2  ;;  %s5250_s17 = smov 48 }
 0x2cc   :  { %v6962_v49 = vld [vmem:[%s12308_s0 + $0x82] ss:$16 sm:%s5209_s19]   ;;  %v5207_v9 = vsel %vm10_vm1, %v6961_v5, %v5202_v8  ;;  %s5255_s19 = smov 192  ;;  %v4434_v51 = vpop.permute.xlu0 %4433  }
 0x2cd   :  { %v6974_v54 = vld [vmem:[%s12308_s0 + $0x682] ss:$16 sm:%s5265_s15]   ;;  %v5212_v11 = vsel %vm14_vm2, %v6962_v49, %v5207_v9  ;;  %s5311_s15 = smov 3  ;;  %6795 = vst.msk [vmem:[%s12309_s1 + $0x40] sm:$0xff] %vm4390_vm15, %v4434_v51  }
 0x2ce   :  { %v6975_v10 = vld [vmem:[%s12308_s0 + $0x682] ss:$16 sm:%s5268_s16]   ;;  %5213 = vrot.lane.b32.xlu0 %v5212_v11, %s7126_s11  ;;  %s5314_s16 = smov 12 }
 0x2cf   :  { %v5271_v13 = vsel %vm6_vm0, %v6975_v10, %v6974_v54  ;;  %v6976_v15 = vld [vmem:[%s12308_s0 + $0x682] ss:$16 sm:%s5273_s12]   ;;  %s5319_s12 = smov 48  ;;  %v4503_v55 = vpop.permute.xlu1 %4502  }
 0x2d0   :  { %v6977_v17 = vld [vmem:[%s12308_s0 + $0x682] ss:$16 sm:%s5278_s13]   ;;  %v5276_v24 = vsel %vm10_vm1, %v6976_v15, %v5271_v13  ;;  %s5324_s13 = smov 192  ;;  %6810 = vst.msk [vmem:[%s12309_s1 + $0x28] sm:$0xff] %vm4390_vm15, %v4503_v55  }
 0x2d1   :  { %v6969_v19 = vld [vmem:[%s12308_s0 + $0x482] ss:$16 sm:%s5242_s23]   ;;  %v5281_v61 = vsel %vm14_vm2, %v6977_v17, %v5276_v24  ;;  %s5288_s23 = smov 3 }
 0x2d2   :  { %v6970_v20 = vld [vmem:[%s12308_s0 + $0x482] ss:$16 sm:%s5245_s2]   ;;  %5282 = vrot.lane.b32.xlu1 %v5281_v61, %s7126_s11  ;;  %s5291_s2 = smov 12  ;;  %v4480_v22 = vpop.permute.xlu0 %4479  }
 0x2d3   :  { %v6971_v21 = vld [vmem:[%s12308_s0 + $0x482] ss:$16 sm:%s5250_s17]   ;;  %v5248_v25 = vsel %vm6_vm0, %v6970_v20, %v6969_v19  ;;  %s5296_s17 = smov 48  ;;  %6805 = vst.msk [vmem:[%s12309_s1 + $0x8] sm:$0xff] %vm4390_vm15, %v4480_v22  }
 0x2d4   :  { %v6972_v28 = vld [vmem:[%s12308_s0 + $0x482] ss:$16 sm:%s5255_s19]   ;;  %v5253_v26 = vsel %vm10_vm1, %v6971_v21, %v5248_v25  ;;  %s5301_s19 = smov 192 }
 0x2d5   :  { %v6984_v27 = vld [vmem:[%s12308_s0 + $0x302] ss:$16 sm:%s5311_s15]   ;;  %v5258_v30 = vsel %vm14_vm2, %v6972_v28, %v5253_v26  ;;  %s5357_s15 = smov 3 }
 0x2d6   :  { %v6985_v29 = vld [vmem:[%s12308_s0 + $0x302] ss:$16 sm:%s5314_s16]   ;;  %5259 = vrot.lane.b32.xlu0 %v5258_v30, %s7126_s11  ;;  %s5360_s16 = smov 12  ;;  %v4549_v7 = vpop.permute.xlu1 %4548  }
 0x2d7   :  { %v5317_v32 = vsel %vm6_vm0, %v6985_v29, %v6984_v27  ;;  %v6986_v33 = vld [vmem:[%s12308_s0 + $0x302] ss:$16 sm:%s5319_s12]   ;;  %s5365_s12 = smov 48  ;;  %6820 = vst.msk [vmem:[%s12309_s1 + $0x68] sm:$0xff] %vm4390_vm15, %v4549_v7  }
 0x2d8   :  { %v6987_v34 = vld [vmem:[%s12308_s0 + $0x302] ss:$16 sm:%s5324_s13]   ;;  %v5322_v60 = vsel %vm10_vm1, %v6986_v33, %v5317_v32  ;;  %s5370_s13 = smov 192 }
 0x2d9   :  { %v6979_v37 = vld [vmem:[%s12308_s0 + $0x102] ss:$16 sm:%s5288_s23]   ;;  %v5327_v38 = vsel %vm14_vm2, %v6987_v34, %v5322_v60  ;;  %s5334_s23 = smov 3 }
 0x2da   :  { %v6980_v39 = vld [vmem:[%s12308_s0 + $0x102] ss:$16 sm:%s5291_s2]   ;;  %5328 = vrot.lane.b32.xlu1 %v5327_v38, %s7126_s11  ;;  %s5337_s2 = smov 12  ;;  %v4526_v18 = vpop.permute.xlu0 %4525  }
 0x2db   :  { %v6981_v31 = vld [vmem:[%s12308_s0 + $0x102] ss:$16 sm:%s5296_s17]   ;;  %v5294_v4 = vsel %vm6_vm0, %v6980_v39, %v6979_v37  ;;  %s5342_s17 = smov 48  ;;  %6815 = vst.msk [vmem:[%s12309_s1 + $0x48] sm:$0xff] %vm4390_vm15, %v4526_v18  }
 0x2dc   :  { %v6982_v41 = vld [vmem:[%s12308_s0 + $0x102] ss:$16 sm:%s5301_s19]   ;;  %v5299_v43 = vsel %vm10_vm1, %v6981_v31, %v5294_v4  ;;  %s5347_s19 = smov 192 }
 0x2dd   :  { %v6994_v45 = vld [vmem:[%s12308_s0 + $0x702] ss:$16 sm:%s5357_s15]   ;;  %v5304_v47 = vsel %vm14_vm2, %v6982_v41, %v5299_v43  ;;  %s5403_s15 = smov 3 }
 0x2de   :  { %v6995_v46 = vld [vmem:[%s12308_s0 + $0x702] ss:$16 sm:%s5360_s16]   ;;  %5305 = vrot.lane.b32.xlu0 %v5304_v47, %s7126_s11  ;;  %s5406_s16 = smov 12  ;;  %v4595_v23 = vpop.permute.xlu1 %4594  }
 0x2df   :  { %v5363_v48 = vsel %vm6_vm0, %v6995_v46, %v6994_v45  ;;  %v6996_v50 = vld [vmem:[%s12308_s0 + $0x702] ss:$16 sm:%s5365_s12]   ;;  %s5411_s12 = smov 48  ;;  %v7033_v45 = vld [vmem:[%s12308_s0 + $0x601] ss:$16 sm:%s5540_s14]   ;;  %s5586_s14 = smov 3 }
 0x2e0   :  { %v6997_v36 = vld [vmem:[%s12308_s0 + $0x702] ss:$16 sm:%s5370_s13]   ;;  %v5368_v42 = vsel %vm10_vm1, %v6996_v50, %v5363_v48  ;;  %s5416_s13 = smov 192  ;;  %v7035_v50 = vld [vmem:[%s12308_s0 + $0x601] ss:$16 sm:%s5548_s10]   ;;  %s5594_s10 = smov 48 }
 0x2e1   :  { %v6989_v16 = vld [vmem:[%s12308_s0 + $0x502] ss:$16 sm:%s5334_s23]   ;;  %v5373_v52 = vsel %vm14_vm2, %v6997_v36, %v5368_v42  ;;  %s5380_s23 = smov 3  ;;  %6830 = vst.msk [vmem:[%s12309_s1 + $0x30] sm:$0xff] %vm4390_vm15, %v4595_v23  }
 0x2e2   :  { %v6990_v14 = vld [vmem:[%s12308_s0 + $0x502] ss:$16 sm:%s5337_s2]   ;;  %5374 = vrot.lane.b32.xlu1 %v5373_v52, %s7126_s11  ;;  %s5383_s2 = smov 12  ;;  %v4572_v35 = vpop.permute.xlu0 %4571  }
 0x2e3   :  { %v6991_v53 = vld [vmem:[%s12308_s0 + $0x502] ss:$16 sm:%s5342_s17]   ;;  %v5340_v56 = vsel %vm6_vm0, %v6990_v14, %v6989_v16  ;;  %s5388_s17 = smov 48  ;;  %6825 = vst.msk [vmem:[%s12309_s1 + $0x10] sm:$0xff] %vm4390_vm15, %v4572_v35  }
 0x2e4   :  { %v6992_v57 = vld [vmem:[%s12308_s0 + $0x502] ss:$16 sm:%s5347_s19]   ;;  %v5345_v6 = vsel %vm10_vm1, %v6991_v53, %v5340_v56  ;;  %s5393_s19 = smov 192 }
 0x2e5   :  { %v7004_v58 = vld [vmem:[%s12308_s0 + $0x382] ss:$16 sm:%s5403_s15]   ;;  %v5350_v62 = vsel %vm14_vm2, %v6992_v57, %v5345_v6  ;;  %s5449_s15 = smov 3 }
 0x2e6   :  { %v7005_v59 = vld [vmem:[%s12308_s0 + $0x382] ss:$16 sm:%s5406_s16]   ;;  %5351 = vrot.lane.b32.xlu0 %v5350_v62, %s7126_s11  ;;  %s5452_s16 = smov 12  ;;  %v4641_v40 = vpop.permute.xlu1 %4640  }
 0x2e7   :  { %v5409_v44 = vsel %vm6_vm0, %v7005_v59, %v7004_v58  ;;  %v7006_v63 = vld [vmem:[%s12308_s0 + $0x382] ss:$16 sm:%s5411_s12]   ;;  %s5457_s12 = smov 48  ;;  %v7043_v58 = vld [vmem:[%s12308_s0 + $0x281] ss:$16 sm:%s5586_s14]   ;;  %s5632_s14 = smov 3 }
 0x2e8   :  { %v7007_v0 = vld [vmem:[%s12308_s0 + $0x382] ss:$16 sm:%s5416_s13]   ;;  %v5414_v1 = vsel %vm10_vm1, %v7006_v63, %v5409_v44  ;;  %s5462_s13 = smov 192  ;;  %v7045_v63 = vld [vmem:[%s12308_s0 + $0x281] ss:$16 sm:%s5594_s10]   ;;  %s5640_s10 = smov 48 }
 0x2e9   :  { %v6999_v2 = vld [vmem:[%s12308_s0 + $0x182] ss:$16 sm:%s5380_s23]   ;;  %v5419_v3 = vsel %vm14_vm2, %v7007_v0, %v5414_v1  ;;  %s5426_s23 = smov 3  ;;  %6840 = vst.msk [vmem:[%s12309_s1 + $0x70] sm:$0xff] %vm4390_vm15, %v4641_v40  }
 0x2ea   :  { %v7000_v12 = vld [vmem:[%s12308_s0 + $0x182] ss:$16 sm:%s5383_s2]   ;;  %5420 = vrot.lane.b32.xlu1 %v5419_v3, %s7126_s11  ;;  %s5429_s2 = smov 12  ;;  %v4618_v51 = vpop.permute.xlu0 %4617  }
 0x2eb   :  { %v7001_v5 = vld [vmem:[%s12308_s0 + $0x182] ss:$16 sm:%s5388_s17]   ;;  %v5386_v8 = vsel %vm6_vm0, %v7000_v12, %v6999_v2  ;;  %s5434_s17 = smov 48  ;;  %6835 = vst.msk [vmem:[%s12309_s1 + $0x50] sm:$0xff] %vm4390_vm15, %v4618_v51  }
 0x2ec   :  { %v7002_v49 = vld [vmem:[%s12308_s0 + $0x182] ss:$16 sm:%s5393_s19]   ;;  %v5391_v9 = vsel %vm10_vm1, %v7001_v5, %v5386_v8  ;;  %s5439_s19 = smov 192 }
 0x2ed   :  { %v7014_v54 = vld [vmem:[%s12308_s0 + $0x782] ss:$16 sm:%s5449_s15]   ;;  %v5396_v11 = vsel %vm14_vm2, %v7002_v49, %v5391_v9  ;;  %s5494_s15 = smov 3 }
 0x2ee   :  { %v7015_v10 = vld [vmem:[%s12308_s0 + $0x782] ss:$16 sm:%s5452_s16]   ;;  %5397 = vrot.lane.b32.xlu0 %v5396_v11, %s7126_s11  ;;  %s5497_s16 = smov 12  ;;  %v4687_v55 = vpop.permute.xlu1 %4686  }
 0x2ef   :  { %v5455_v13 = vsel %vm6_vm0, %v7015_v10, %v7014_v54  ;;  %v7016_v15 = vld [vmem:[%s12308_s0 + $0x782] ss:$16 sm:%s5457_s12]   ;;  %s5502_s12 = smov 48  ;;  %v7023_v27 = vld [vmem:[%s12308_s0 + $0x201] ss:$16 sm:%s5494_s15]   ;;  %s5543_s15 = smov 12 }
 0x2f0   :  { %v7017_v17 = vld [vmem:[%s12308_s0 + $0x782] ss:$16 sm:%s5462_s13]   ;;  %v5460_v24 = vsel %vm10_vm1, %v7016_v15, %v5455_v13  ;;  %s5507_s13 = smov 192  ;;  %v7024_v29 = vld [vmem:[%s12308_s0 + $0x201] ss:$16 sm:%s5497_s16]  }
 0x2f1   :  { %v7009_v19 = vld [vmem:[%s12308_s0 + $0x582] ss:$16 sm:%s5426_s23]   ;;  %v5465_v61 = vsel %vm14_vm2, %v7017_v17, %v5460_v24  ;;  %s5472_s23 = smov 3  ;;  %v5500_v32 = vsel %vm6_vm0, %v7024_v29, %v7023_v27  ;;  %v7025_v33 = vld [vmem:[%s12308_s0 + $0x201] ss:$16 sm:%s5502_s12]   ;;  %s5553_s12 = smov 192 }
 0x2f2   :  { %v7010_v20 = vld [vmem:[%s12308_s0 + $0x582] ss:$16 sm:%s5429_s2]   ;;  %5466 = vrot.lane.b32.xlu1 %v5465_v61, %s7126_s11  ;;  %s5475_s2 = smov 12  ;;  %v5505_v60 = vsel %vm10_vm1, %v7025_v33, %v5500_v32  ;;  %6850 = vst.msk [vmem:[%s12309_s1 + $0x38] sm:$0xff] %vm4390_vm15, %v4687_v55   ;;  %v4664_v22 = vpop.permute.xlu0 %4663  }
 0x2f3   :  { %v7011_v21 = vld [vmem:[%s12308_s0 + $0x582] ss:$16 sm:%s5434_s17]   ;;  %v5432_v25 = vsel %vm6_vm0, %v7010_v20, %v7009_v19  ;;  %s5480_s17 = smov 48  ;;  %v7026_v34 = vld [vmem:[%s12308_s0 + $0x201] ss:$16 sm:%s5507_s13]   ;;  %s7127_s13 = smov 8  }
 0x2f4   :  { %v7012_v28 = vld [vmem:[%s12308_s0 + $0x582] ss:$16 sm:%s5439_s19]   ;;  %v5437_v26 = vsel %vm10_vm1, %v7011_v21, %v5432_v25  ;;  %s5485_s19 = smov 192  ;;  %v7019_v37 = vld [vmem:[%s12308_s0 + $0x1] ss:$16 sm:%s5472_s23]   ;;  %v5510_v38 = vsel %vm14_vm2, %v7026_v34, %v5505_v60  ;;  %s5517_s23 = smov 3 }
 0x2f5   :  { %v5442_v30 = vsel %vm14_vm2, %v7012_v28, %v5437_v26  ;;  %v7020_v39 = vld [vmem:[%s12308_s0 + $0x1] ss:$16 sm:%s5475_s2]   ;;  %s5520_s2 = smov 12  ;;  %6845 = vst.msk [vmem:[%s12309_s1 + $0x18] sm:$0xff] %vm4390_vm15, %v4664_v22  }
 0x2f6   :  { %5443 = vrot.lane.b32.xlu0 %v5442_v30, %s7126_s11  ;;  %v7021_v31 = vld [vmem:[%s12308_s0 + $0x1] ss:$16 sm:%s5480_s17]   ;;  %5511 = vrot.lane.b32.xlu1 %v5510_v38, %s7127_s13  ;;  %v5478_v4 = vsel %vm6_vm0, %v7020_v39, %v7019_v37  ;;  %s5525_s17 = smov 48  ;;  %v4733_v7 = vpop.permute.xlu1 %4732  }
 0x2f7   :  { %v7022_v41 = vld [vmem:[%s12308_s0 + $0x1] ss:$16 sm:%s5485_s19]   ;;  %v5483_v43 = vsel %vm10_vm1, %v7021_v31, %v5478_v4  ;;  %s5530_s19 = smov 192  ;;  %6860 = vst.msk [vmem:[%s12309_s1 + $0x78] sm:$0xff] %vm4390_vm15, %v4733_v7  }
 0x2f8   :  { %v7034_v46 = vld [vmem:[%s12308_s0 + $0x601] ss:$16 sm:%s5543_s15]   ;;  %v5488_v47 = vsel %vm14_vm2, %v7022_v41, %v5483_v43  ;;  %s5589_s15 = smov 12 }
 0x2f9   :  { %v5546_v48 = vsel %vm6_vm0, %v7034_v46, %v7033_v45  ;;  %v7036_v36 = vld [vmem:[%s12308_s0 + $0x601] ss:$16 sm:%s5553_s12]   ;;  %s5599_s12 = smov 192 }
 0x2fa   :  { %5489 = vrot.lane.b32.xlu0 %v5488_v47, %s7127_s13  ;;  %v5551_v42 = vsel %vm10_vm1, %v7035_v50, %v5546_v48  ;;  %v7028_v16 = vld [vmem:[%s12308_s0 + $0x401] ss:$16 sm:%s5517_s23]   ;;  %s5563_s23 = smov 3  ;;  %v4710_v18 = vpop.permute.xlu0 %4709   ;;  %v4778_v23 = vpop.permute.xlu1 %4777  }
 0x2fb   :  { %v5556_v52 = vsel %vm14_vm2, %v7036_v36, %v5551_v42  ;;  %v7029_v14 = vld [vmem:[%s12308_s0 + $0x401] ss:$16 sm:%s5520_s2]   ;;  %s5566_s2 = smov 12  ;;  %6855 = vst.msk [vmem:[%s12309_s1 + $0x58] sm:$0xff] %vm4390_vm15, %v4710_v18  }
 0x2fc   :  { %v7030_v53 = vld [vmem:[%s12308_s0 + $0x401] ss:$16 sm:%s5525_s17]   ;;  %5557 = vrot.lane.b32.xlu1 %v5556_v52, %s7127_s13  ;;  %v5523_v56 = vsel %vm6_vm0, %v7029_v14, %v7028_v16  ;;  %s5571_s17 = smov 48  ;;  %6869 = vst.msk [vmem:[%s12309_s1 + $0x20] sm:$0xff] %vm4757_vm3, %v4778_v23  }
 0x2fd   :  { %v7031_v57 = vld [vmem:[%s12308_s0 + $0x401] ss:$16 sm:%s5530_s19]   ;;  %v5528_v6 = vsel %vm10_vm1, %v7030_v53, %v5523_v56  ;;  %s5576_s19 = smov 192 }
 0x2fe   :  { %v7044_v59 = vld [vmem:[%s12308_s0 + $0x281] ss:$16 sm:%s5589_s15]   ;;  %v5533_v62 = vsel %vm14_vm2, %v7031_v57, %v5528_v6  ;;  %s5635_s15 = smov 12 }
 0x2ff   :  { %v5592_v44 = vsel %vm6_vm0, %v7044_v59, %v7043_v58  ;;  %v7046_v0 = vld [vmem:[%s12308_s0 + $0x281] ss:$16 sm:%s5599_s12]   ;;  %5534 = vrot.lane.b32.xlu0 %v5533_v62, %s7127_s13  ;;  %s5645_s12 = smov 192 }
 0x300   :  { %v5597_v1 = vsel %vm10_vm1, %v7045_v63, %v5592_v44  ;;  %v7038_v2 = vld [vmem:[%s12308_s0 + $0x81] ss:$16 sm:%s5563_s23]   ;;  %s5609_s23 = smov 3 }
 0x301   :  { %v5602_v3 = vsel %vm14_vm2, %v7046_v0, %v5597_v1  ;;  %v7039_v12 = vld [vmem:[%s12308_s0 + $0x81] ss:$16 sm:%s5566_s2]   ;;  %s5612_s2 = smov 12 }
 0x302   :  { %v7040_v5 = vld [vmem:[%s12308_s0 + $0x81] ss:$16 sm:%s5571_s17]   ;;  %5603 = vrot.lane.b32.xlu1 %v5602_v3, %s7127_s13  ;;  %v5569_v8 = vsel %vm6_vm0, %v7039_v12, %v7038_v2  ;;  %s5617_s17 = smov 48 }
 0x303   :  { %v7041_v49 = vld [vmem:[%s12308_s0 + $0x81] ss:$16 sm:%s5576_s19]   ;;  %v5574_v9 = vsel %vm10_vm1, %v7040_v5, %v5569_v8  ;;  %s5622_s19 = smov 192 }
 0x304   :  { %v7053_v54 = vld [vmem:[%s12308_s0 + $0x681] ss:$16 sm:%s5632_s14]   ;;  %v5579_v11 = vsel %vm14_vm2, %v7041_v49, %v5574_v9  ;;  %s5678_s14 = smov 3 }
 0x305   :  { %v7054_v10 = vld [vmem:[%s12308_s0 + $0x681] ss:$16 sm:%s5635_s15]   ;;  %5580 = vrot.lane.b32.xlu0 %v5579_v11, %s7127_s13  ;;  %s5681_s15 = smov 12 }
 0x306   :  { %v5638_v13 = vsel %vm6_vm0, %v7054_v10, %v7053_v54  ;;  %v7055_v15 = vld [vmem:[%s12308_s0 + $0x681] ss:$16 sm:%s5640_s10]   ;;  %s5686_s10 = smov 48 }
 0x307   :  { %v7056_v17 = vld [vmem:[%s12308_s0 + $0x681] ss:$16 sm:%s5645_s12]   ;;  %v5643_v24 = vsel %vm10_vm1, %v7055_v15, %v5638_v13  ;;  %s5691_s12 = smov 192 }
 0x308   :  { %v7048_v19 = vld [vmem:[%s12308_s0 + $0x481] ss:$16 sm:%s5609_s23]   ;;  %v5648_v61 = vsel %vm14_vm2, %v7056_v17, %v5643_v24  ;;  %s5655_s23 = smov 3 }
 0x309   :  { %v7049_v20 = vld [vmem:[%s12308_s0 + $0x481] ss:$16 sm:%s5612_s2]   ;;  %5649 = vrot.lane.b32.xlu1 %v5648_v61, %s7127_s13  ;;  %s5658_s2 = smov 12 }
 0x30a   :  { %v7050_v21 = vld [vmem:[%s12308_s0 + $0x481] ss:$16 sm:%s5617_s17]   ;;  %v5615_v25 = vsel %vm6_vm0, %v7049_v20, %v7048_v19  ;;  %s5663_s17 = smov 48 }
 0x30b   :  { %v7051_v28 = vld [vmem:[%s12308_s0 + $0x481] ss:$16 sm:%s5622_s19]   ;;  %v5620_v26 = vsel %vm10_vm1, %v7050_v21, %v5615_v25  ;;  %s5668_s19 = smov 192 }
 0x30c   :  { %v7063_v27 = vld [vmem:[%s12308_s0 + $0x301] ss:$16 sm:%s5678_s14]   ;;  %v5625_v30 = vsel %vm14_vm2, %v7051_v28, %v5620_v26  ;;  %s5724_s14 = smov 3 }
 0x30d   :  { %v7064_v29 = vld [vmem:[%s12308_s0 + $0x301] ss:$16 sm:%s5681_s15]   ;;  %5626 = vrot.lane.b32.xlu0 %v5625_v30, %s7127_s13  ;;  %s5727_s15 = smov 12  ;;  %v4824_v30 = vpop.permute.xlu1 %4823  }
 0x30e   :  { %v5684_v32 = vsel %vm6_vm0, %v7064_v29, %v7063_v27  ;;  %v7065_v33 = vld [vmem:[%s12308_s0 + $0x301] ss:$16 sm:%s5686_s10]   ;;  %s5732_s10 = smov 48  ;;  %v4756_v29 = vpop.permute.xlu0 %4755   ;;  %6879 = vst.msk [vmem:[%s12309_s1 + $0x60] sm:$0xff] %vm4757_vm3, %v4824_v30  }
 0x30f   :  { %v7066_v34 = vld [vmem:[%s12308_s0 + $0x301] ss:$16 sm:%s5691_s12]   ;;  %v5689_v60 = vsel %vm10_vm1, %v7065_v33, %v5684_v32  ;;  %s5737_s12 = smov 192  ;;  %4758 = vst.msk [vmem:[%s12309_s1] sm:$0xff] %vm4757_vm3, %v4756_v29  }
 0x310   :  { %v7058_v37 = vld [vmem:[%s12308_s0 + $0x101] ss:$16 sm:%s5655_s23]   ;;  %v5694_v38 = vsel %vm14_vm2, %v7066_v34, %v5689_v60  ;;  %s5701_s23 = smov 3 }
 0x311   :  { %v7059_v39 = vld [vmem:[%s12308_s0 + $0x101] ss:$16 sm:%s5658_s2]   ;;  %5695 = vrot.lane.b32.xlu1 %v5694_v38, %s7127_s13  ;;  %s5704_s2 = smov 12  ;;  %v4870_v33 = vpop.permute.xlu1 %4869  }
 0x312   :  { %v7060_v31 = vld [vmem:[%s12308_s0 + $0x101] ss:$16 sm:%s5663_s17]   ;;  %v5661_v4 = vsel %vm6_vm0, %v7059_v39, %v7058_v37  ;;  %s5709_s17 = smov 48  ;;  %v4801_v32 = vpop.permute.xlu0 %4800   ;;  %6889 = vst.msk [vmem:[%s12309_s1 + $0x28] sm:$0xff] %vm4757_vm3, %v4870_v33  }
 0x313   :  { %v7061_v41 = vld [vmem:[%s12308_s0 + $0x101] ss:$16 sm:%s5668_s19]   ;;  %v5666_v43 = vsel %vm10_vm1, %v7060_v31, %v5661_v4  ;;  %s5714_s19 = smov 192  ;;  %6874 = vst.msk [vmem:[%s12309_s1 + $0x40] sm:$0xff] %vm4757_vm3, %v4801_v32  }
 0x314   :  { %v7073_v45 = vld [vmem:[%s12308_s0 + $0x701] ss:$16 sm:%s5724_s14]   ;;  %v5671_v47 = vsel %vm14_vm2, %v7061_v41, %v5666_v43  ;;  %s5770_s14 = smov 3 }
 0x315   :  { %v7074_v46 = vld [vmem:[%s12308_s0 + $0x701] ss:$16 sm:%s5727_s15]   ;;  %5672 = vrot.lane.b32.xlu0 %v5671_v47, %s7127_s13  ;;  %s5773_s15 = smov 12  ;;  %v4916_v35 = vpop.permute.xlu1 %4915  }
 0x316   :  { %v5730_v48 = vsel %vm6_vm0, %v7074_v46, %v7073_v45  ;;  %v7075_v50 = vld [vmem:[%s12308_s0 + $0x701] ss:$16 sm:%s5732_s10]   ;;  %s5778_s10 = smov 48  ;;  %v4847_v34 = vpop.permute.xlu0 %4846   ;;  %6899 = vst.msk [vmem:[%s12309_s1 + $0x68] sm:$0xff] %vm4757_vm3, %v4916_v35  }
 0x317   :  { %v7076_v36 = vld [vmem:[%s12308_s0 + $0x701] ss:$16 sm:%s5737_s12]   ;;  %v5735_v42 = vsel %vm10_vm1, %v7075_v50, %v5730_v48  ;;  %s5783_s12 = smov 192  ;;  %6884 = vst.msk [vmem:[%s12309_s1 + $0x8] sm:$0xff] %vm4757_vm3, %v4847_v34  }
 0x318   :  { %v7068_v16 = vld [vmem:[%s12308_s0 + $0x501] ss:$16 sm:%s5701_s23]   ;;  %v5740_v52 = vsel %vm14_vm2, %v7076_v36, %v5735_v42  ;;  %s5747_s23 = smov 3 }
 0x319   :  { %v7069_v14 = vld [vmem:[%s12308_s0 + $0x501] ss:$16 sm:%s5704_s2]   ;;  %5741 = vrot.lane.b32.xlu1 %v5740_v52, %s7127_s13  ;;  %s5750_s2 = smov 12  ;;  %v4962_v37 = vpop.permute.xlu1 %4961  }
 0x31a   :  { %v7070_v53 = vld [vmem:[%s12308_s0 + $0x501] ss:$16 sm:%s5709_s17]   ;;  %v5707_v56 = vsel %vm6_vm0, %v7069_v14, %v7068_v16  ;;  %s5755_s17 = smov 48  ;;  %v4893_v60 = vpop.permute.xlu0 %4892   ;;  %6909 = vst.msk [vmem:[%s12309_s1 + $0x30] sm:$0xff] %vm4757_vm3, %v4962_v37  }
 0x31b   :  { %v7071_v57 = vld [vmem:[%s12308_s0 + $0x501] ss:$16 sm:%s5714_s19]   ;;  %v5712_v6 = vsel %vm10_vm1, %v7070_v53, %v5707_v56  ;;  %s5760_s19 = smov 192  ;;  %6894 = vst.msk [vmem:[%s12309_s1 + $0x48] sm:$0xff] %vm4757_vm3, %v4893_v60  }
 0x31c   :  { %v7083_v58 = vld [vmem:[%s12308_s0 + $0x381] ss:$16 sm:%s5770_s14]   ;;  %v5717_v62 = vsel %vm14_vm2, %v7071_v57, %v5712_v6  ;;  %s5816_s14 = smov 3 }
 0x31d   :  { %v7084_v59 = vld [vmem:[%s12308_s0 + $0x381] ss:$16 sm:%s5773_s15]   ;;  %5718 = vrot.lane.b32.xlu0 %v5717_v62, %s7127_s13  ;;  %s5819_s15 = smov 12  ;;  %v5008_v39 = vpop.permute.xlu1 %5007  }
 0x31e   :  { %v5776_v44 = vsel %vm6_vm0, %v7084_v59, %v7083_v58  ;;  %v7085_v63 = vld [vmem:[%s12308_s0 + $0x381] ss:$16 sm:%s5778_s10]   ;;  %s5824_s10 = smov 48  ;;  %v4939_v38 = vpop.permute.xlu0 %4938   ;;  %6919 = vst.msk [vmem:[%s12309_s1 + $0x70] sm:$0xff] %vm4757_vm3, %v5008_v39  }
 0x31f   :  { %v7086_v0 = vld [vmem:[%s12308_s0 + $0x381] ss:$16 sm:%s5783_s12]   ;;  %v5781_v1 = vsel %vm10_vm1, %v7085_v63, %v5776_v44  ;;  %s5829_s12 = smov 192  ;;  %6904 = vst.msk [vmem:[%s12309_s1 + $0x10] sm:$0xff] %vm4757_vm3, %v4939_v38  }
 0x320   :  { %v7078_v2 = vld [vmem:[%s12308_s0 + $0x181] ss:$16 sm:%s5747_s23]   ;;  %v5786_v3 = vsel %vm14_vm2, %v7086_v0, %v5781_v1  ;;  %s5793_s23 = smov 3 }
 0x321   :  { %v7079_v12 = vld [vmem:[%s12308_s0 + $0x181] ss:$16 sm:%s5750_s2]   ;;  %5787 = vrot.lane.b32.xlu1 %v5786_v3, %s7127_s13  ;;  %s5796_s2 = smov 12 }
 0x322   :  { %v7080_v5 = vld [vmem:[%s12308_s0 + $0x181] ss:$16 sm:%s5755_s17]   ;;  %v5753_v8 = vsel %vm6_vm0, %v7079_v12, %v7078_v2  ;;  %s5801_s17 = smov 48  ;;  %v4985_v31 = vpop.permute.xlu0 %4984  }
 0x323   :  { %v7081_v49 = vld [vmem:[%s12308_s0 + $0x181] ss:$16 sm:%s5760_s19]   ;;  %v5758_v9 = vsel %vm10_vm1, %v7080_v5, %v5753_v8  ;;  %s5806_s19 = smov 192  ;;  %6914 = vst.msk [vmem:[%s12309_s1 + $0x50] sm:$0xff] %vm4757_vm3, %v4985_v31  }
 0x324   :  { %v7093_v54 = vld [vmem:[%s12308_s0 + $0x781] ss:$16 sm:%s5816_s14]   ;;  %v5763_v11 = vsel %vm14_vm2, %v7081_v49, %v5758_v9 }
 0x325   :  { %v7094_v10 = vld [vmem:[%s12308_s0 + $0x781] ss:$16 sm:%s5819_s15]   ;;  %5764 = vrot.lane.b32.xlu0 %v5763_v11, %s7127_s13  ;;  %v5054_v40 = vpop.permute.xlu1 %5053  }
 0x326   :  { %v5822_v13 = vsel %vm6_vm0, %v7094_v10, %v7093_v54  ;;  %v7095_v15 = vld [vmem:[%s12308_s0 + $0x781] ss:$16 sm:%s5824_s10]   ;;  %6929 = vst.msk [vmem:[%s12309_s1 + $0x38] sm:$0xff] %vm4757_vm3, %v5054_v40  }
 0x327   :  { %v7096_v17 = vld [vmem:[%s12308_s0 + $0x781] ss:$16 sm:%s5829_s12]   ;;  %v5827_v24 = vsel %vm10_vm1, %v7095_v15, %v5822_v13 }
 0x328   :  { %v7088_v19 = vld [vmem:[%s12308_s0 + $0x581] ss:$16 sm:%s5793_s23]   ;;  %v5832_v61 = vsel %vm14_vm2, %v7096_v17, %v5827_v24 }
 0x329   :  { %v7089_v20 = vld [vmem:[%s12308_s0 + $0x581] ss:$16 sm:%s5796_s2]   ;;  %5833 = vrot.lane.b32.xlu1 %v5832_v61, %s7127_s13  ;;  %v5031_v4 = vpop.permute.xlu0 %5030  }
 0x32a   :  { %v7090_v21 = vld [vmem:[%s12308_s0 + $0x581] ss:$16 sm:%s5801_s17]   ;;  %v5799_v25 = vsel %vm6_vm0, %v7089_v20, %v7088_v19  ;;  %6924 = vst.msk [vmem:[%s12309_s1 + $0x18] sm:$0xff] %vm4757_vm3, %v5031_v4   ;;  %vm5124_vm0 = vcmask 195712  }
 0x32b   :  { %v7091_v28 = vld [vmem:[%s12308_s0 + $0x581] ss:$16 sm:%s5806_s19]   ;;  %v5804_v26 = vsel %vm10_vm1, %v7090_v21, %v5799_v25  ;;  %vm5491_vm1 = vcmask 130112  }
 0x32c   :  { %v5809_v27 = vsel %vm14_vm2, %v7091_v28, %v5804_v26 }
 0x32d   :  { %5810 = vrot.lane.b32.xlu0 %v5809_v27, %s7127_s13  ;;  %v5100_v41 = vpop.permute.xlu1 %5099  }
 0x32e   :  { %6939 = vst.msk [vmem:[%s12309_s1 + $0x78] sm:$0xff] %vm4757_vm3, %v5100_v41  }
 0x331   :  { %v5077_v43 = vpop.permute.xlu0 %5076   ;;  %v5145_v45 = vpop.permute.xlu1 %5144  }
 0x332   :  { %6934 = vst.msk [vmem:[%s12309_s1 + $0x58] sm:$0xff] %vm4757_vm3, %v5077_v43  }
 0x333   :  { %6948 = vst.msk [vmem:[%s12309_s1 + $0x20] sm:$0xff] %vm5124_vm0, %v5145_v45  }
 0x335   :  { %v5123_v46 = vpop.permute.xlu0 %5122  }
 0x336   :  { %5125 = vst.msk [vmem:[%s12309_s1] sm:$0xff] %vm5124_vm0, %v5123_v46  }
 0x337   :  { %v5191_v47 = vpop.permute.xlu1 %5190  }
 0x338   :  { %6958 = vst.msk [vmem:[%s12309_s1 + $0x60] sm:$0xff] %vm5124_vm0, %v5191_v47  }
 0x33a   :  { %v5168_v48 = vpop.permute.xlu0 %5167  }
 0x33b   :  { %6953 = vst.msk [vmem:[%s12309_s1 + $0x40] sm:$0xff] %vm5124_vm0, %v5168_v48  }
 0x33d   :  { %v5237_v50 = vpop.permute.xlu1 %5236  }
 0x33e   :  { %6968 = vst.msk [vmem:[%s12309_s1 + $0x28] sm:$0xff] %vm5124_vm0, %v5237_v50  }
 0x340   :  { %v5214_v36 = vpop.permute.xlu0 %5213  }
 0x341   :  { %6963 = vst.msk [vmem:[%s12309_s1 + $0x8] sm:$0xff] %vm5124_vm0, %v5214_v36  }
 0x344   :  { %v5283_v51 = vpop.permute.xlu1 %5282  }
 0x345   :  { %6978 = vst.msk [vmem:[%s12309_s1 + $0x68] sm:$0xff] %vm5124_vm0, %v5283_v51  }
 0x348   :  { %v5260_v42 = vpop.permute.xlu0 %5259  }
 0x349   :  { %6973 = vst.msk [vmem:[%s12309_s1 + $0x48] sm:$0xff] %vm5124_vm0, %v5260_v42  }
 0x34c   :  { %v5329_v16 = vpop.permute.xlu1 %5328  }
 0x34d   :  { %6988 = vst.msk [vmem:[%s12309_s1 + $0x30] sm:$0xff] %vm5124_vm0, %v5329_v16  }
 0x350   :  { %v5306_v52 = vpop.permute.xlu0 %5305  }
 0x351   :  { %6983 = vst.msk [vmem:[%s12309_s1 + $0x10] sm:$0xff] %vm5124_vm0, %v5306_v52  }
 0x354   :  { %v5375_v14 = vpop.permute.xlu1 %5374  }
 0x355   :  { %6998 = vst.msk [vmem:[%s12309_s1 + $0x70] sm:$0xff] %vm5124_vm0, %v5375_v14  }
 0x358   :  { %v5352_v53 = vpop.permute.xlu0 %5351  }
 0x359   :  { %6993 = vst.msk [vmem:[%s12309_s1 + $0x50] sm:$0xff] %vm5124_vm0, %v5352_v53  }
 0x35c   :  { %v5421_v55 = vpop.permute.xlu1 %5420  }
 0x35d   :  { %7008 = vst.msk [vmem:[%s12309_s1 + $0x38] sm:$0xff] %vm5124_vm0, %v5421_v55  }
 0x360   :  { %v5398_v56 = vpop.permute.xlu0 %5397  }
 0x361   :  { %7003 = vst.msk [vmem:[%s12309_s1 + $0x18] sm:$0xff] %vm5124_vm0, %v5398_v56  }
 0x364   :  { %v5467_v57 = vpop.permute.xlu1 %5466  }
 0x365   :  { %7018 = vst.msk [vmem:[%s12309_s1 + $0x78] sm:$0xff] %vm5124_vm0, %v5467_v57  }
 0x368   :  { %v5444_v6 = vpop.permute.xlu0 %5443   ;;  %v5512_v58 = vpop.permute.xlu1 %5511  }
 0x369   :  { %7013 = vst.msk [vmem:[%s12309_s1 + $0x58] sm:$0xff] %vm5124_vm0, %v5444_v6  }
 0x36a   :  { %7027 = vst.msk [vmem:[%s12309_s1 + $0x20] sm:$0xff] %vm5491_vm1, %v5512_v58  }
 0x36c   :  { %v5490_v59 = vpop.permute.xlu0 %5489  }
 0x36d   :  { %5492 = vst.msk [vmem:[%s12309_s1] sm:$0xff] %vm5491_vm1, %v5490_v59  }
 0x36e   :  { %v5558_v62 = vpop.permute.xlu1 %5557  }
 0x36f   :  { %7037 = vst.msk [vmem:[%s12309_s1 + $0x60] sm:$0xff] %vm5491_vm1, %v5558_v62  }
 0x371   :  { %v5535_v44 = vpop.permute.xlu0 %5534  }
 0x372   :  { %7032 = vst.msk [vmem:[%s12309_s1 + $0x40] sm:$0xff] %vm5491_vm1, %v5535_v44  }
 0x374   :  { %v5604_v63 = vpop.permute.xlu1 %5603  }
 0x375   :  { %7047 = vst.msk [vmem:[%s12309_s1 + $0x28] sm:$0xff] %vm5491_vm1, %v5604_v63  }
 0x377   :  { %v5581_v0 = vpop.permute.xlu0 %5580  }
 0x378   :  { %7042 = vst.msk [vmem:[%s12309_s1 + $0x8] sm:$0xff] %vm5491_vm1, %v5581_v0  }
 0x37b   :  { %v5650_v22 = vpop.permute.xlu1 %5649  }
 0x37c   :  { %7057 = vst.msk [vmem:[%s12309_s1 + $0x68] sm:$0xff] %vm5491_vm1, %v5650_v22  }
 0x37f   :  { %v5627_v1 = vpop.permute.xlu0 %5626  }
 0x380   :  { %7052 = vst.msk [vmem:[%s12309_s1 + $0x48] sm:$0xff] %vm5491_vm1, %v5627_v1  }
 0x383   :  { %v5696_v2 = vpop.permute.xlu1 %5695  }
 0x384   :  { %7067 = vst.msk [vmem:[%s12309_s1 + $0x30] sm:$0xff] %vm5491_vm1, %v5696_v2  }
 0x387   :  { %v5673_v3 = vpop.permute.xlu0 %5672  }
 0x388   :  { %7062 = vst.msk [vmem:[%s12309_s1 + $0x10] sm:$0xff] %vm5491_vm1, %v5673_v3  }
 0x38b   :  { %v5742_v12 = vpop.permute.xlu1 %5741  }
 0x38c   :  { %7077 = vst.msk [vmem:[%s12309_s1 + $0x70] sm:$0xff] %vm5491_vm1, %v5742_v12  }
 0x38f   :  { %v5719_v5 = vpop.permute.xlu0 %5718  }
 0x390   :  { %7072 = vst.msk [vmem:[%s12309_s1 + $0x50] sm:$0xff] %vm5491_vm1, %v5719_v5  }
 0x393   :  { %v5788_v7 = vpop.permute.xlu1 %5787  }
 0x394   :  { %7087 = vst.msk [vmem:[%s12309_s1 + $0x38] sm:$0xff] %vm5491_vm1, %v5788_v7  }
 0x397   :  { %v5765_v8 = vpop.permute.xlu0 %5764  }
 0x398   :  { %7082 = vst.msk [vmem:[%s12309_s1 + $0x18] sm:$0xff] %vm5491_vm1, %v5765_v8  }
 0x39b   :  { %v5834_v49 = vpop.permute.xlu1 %5833  }
 0x39c   :  { %7097 = vst.msk [vmem:[%s12309_s1 + $0x78] sm:$0xff] %vm5491_vm1, %v5834_v49  }
 0x39f   :  { %v5811_v9 = vpop.permute.xlu0 %5810  }
 0x3a0   :  { %7092 = vst.msk [vmem:[%s12309_s1 + $0x58] sm:$0xff] %vm5491_vm1, %v5811_v9  }

// kernel: tile.43
= control target key start
LH: loop header
LB: loop body
LE: loop exit
PB: predicated region body
PF: predicated region fallthrough
CT: control target
= control target key end

     0   :  { %s28_s0 = inlined_call_operand.vmem [shape: f32[8], index: 0, kind: input, shape index: {}]   ;;  %s29_s1 = inlined_call_operand.vmem [shape: f32[16,8], index: 1, kind: output, shape index: {}]  }
   0x1   :  { %v4_v0 = vld [vmem:[%s28_s0] ss:$0 sm:$0xff] }
   0x2   :  { %5 = vst [vmem:[%s29_s1] sm:$0xff] %v4_v0  ;;  %8 = vst [vmem:[%s29_s1 + $0x8] sm:$0xff] %v4_v0 }

// kernel: tile.44
= control target key start
LH: loop header
LB: loop body
LE: loop exit
PB: predicated region body
PF: predicated region fallthrough
CT: control target
= control target key end

     0   :  { %s131_s10 = smov 120   ;;  %s132_s11 = smov 104   ;;  %vm3_vm0 = vcmask 64512   ;;  %vm9_vm1 = vcmask 1048512   ;;  %vm15_vm2 = vcmask 982912   ;;  %vm21_vm3 = vcmask 917312   ;;  %s207_s0 = inlined_call_operand.vmem [shape: f32[16,8], index: 0, kind: input, shape index: {}]   ;;  %s208_s1 = inlined_call_operand.vmem [shape: f32[1,128], index: 1, kind: output, shape index: {}]  }
   0x1   :  { %v101_v0 = vld [vmem:[%s207_s0 + $0xf] sm:$0x1]   ;;  %v103_v1 = vld [vmem:[%s207_s0 + $0xd] sm:$0x1]   ;;  %v102_v2 = vld [vmem:[%s207_s0 + $0xe] sm:$0x1]  }
   0x2   :  { %7 = vrot.lane.b32.xlu0 %v101_v0, %s131_s10  ;;  %19 = vrot.lane.b32.xlu1 %v103_v1, %s132_s11  ;;  %v104_v3 = vld [vmem:[%s207_s0 + $0xc] sm:$0x1]   ;;  %s133_s16 = smov 112   ;;  %s134_s17 = smov 96   ;;  %v105_v4 = vld [vmem:[%s207_s0 + $0xb] sm:$0x1]  }
   0x3   :  { %v106_v5 = vld [vmem:[%s207_s0 + $0xa] sm:$0x1]   ;;  %v2_v6 = vld [vmem:[%s207_s0] sm:$0x1]   ;;  %s135_s24 = smov 88   ;;  %s136_s25 = smov 80  }
   0x4   :  { %4 = vst.msk [vmem:[#allocation0] sm:$0x1] %vm3_vm0, %v2_v6   ;;  %v107_v7 = vld [vmem:[%s207_s0 + $0x9] sm:$0x1]   ;;  %v108_v8 = vld [vmem:[%s207_s0 + $0x8] sm:$0x1]  }
   0x5   :  { %s137_s30 = smov 72   ;;  %s138_s2 = smov 64   ;;  %v109_v9 = vld [vmem:[%s207_s0 + $0x7] sm:$0x1]   ;;  %v110_v10 = vld [vmem:[%s207_s0 + $0x6] sm:$0x1]  }
   0x6   :  { %13 = vrot.lane.b32.xlu0 %v102_v2, %s133_s16  ;;  %25 = vrot.lane.b32.xlu1 %v104_v3, %s134_s17  ;;  %s139_s7 = smov 56   ;;  %s140_s8 = smov 48   ;;  %v111_v11 = vld [vmem:[%s207_s0 + $0x5] sm:$0x1]   ;;  %v112_v12 = vld [vmem:[%s207_s0 + $0x4] sm:$0x1]  }
   0x7   :  { %s141_s13 = smov 40   ;;  %s142_s14 = smov 32   ;;  %v113_v13 = vld [vmem:[%s207_s0 + $0x3] sm:$0x1]   ;;  %v114_v14 = vld [vmem:[%s207_s0 + $0x2] sm:$0x1]  }
   0x8   :  { %s143_s19 = smov 24   ;;  %s144_s20 = smov 16   ;;  %v115_v15 = vld [vmem:[%s207_s0 + $0x1] sm:$0x1]   ;;  %vm27_vm4 = vcmask 851712   ;;  %vm33_vm5 = vcmask 786112  }
   0x9   :  { %s145_s0 = smov 8   ;;  %vm39_vm6 = vcmask 720512   ;;  %vm45_vm7 = vcmask 654912   ;;  %vm51_vm8 = vcmask 589312   ;;  %vm57_vm9 = vcmask 523712  }
   0xa   :  { %31 = vrot.lane.b32.xlu0 %v105_v4, %s135_s24  ;;  %37 = vrot.lane.b32.xlu1 %v106_v5, %s136_s25  ;;  %vm63_vm10 = vcmask 458112   ;;  %vm69_vm11 = vcmask 392512   ;;  %vm75_vm12 = vcmask 326912   ;;  %vm81_vm13 = vcmask 261312  }
   0xb   :  { %vm87_vm14 = vcmask 195712   ;;  %vm93_vm15 = vcmask 130112  }
   0xe   :  { %43 = vrot.lane.b32.xlu0 %v107_v7, %s137_s30  ;;  %49 = vrot.lane.b32.xlu1 %v108_v8, %s138_s2 }
  0x12   :  { %55 = vrot.lane.b32.xlu0 %v109_v9, %s139_s7  ;;  %61 = vrot.lane.b32.xlu1 %v110_v10, %s140_s8 }
  0x16   :  { %67 = vrot.lane.b32.xlu0 %v111_v11, %s141_s13  ;;  %73 = vrot.lane.b32.xlu1 %v112_v12, %s142_s14 }
  0x1a   :  { %79 = vrot.lane.b32.xlu0 %v113_v13, %s143_s19  ;;  %85 = vrot.lane.b32.xlu1 %v114_v14, %s144_s20 }
  0x1e   :  { %91 = vrot.lane.b32.xlu0 %v115_v15, %s145_s0 }
  0x74   :  { %v8_v16 = vpop.permute.xlu0 %7   ;;  %v20_v17 = vpop.permute.xlu1 %19  }
  0x75   :  { %10 = vst.msk [vmem:[#allocation0] sm:$0x1] %vm9_vm1, %v8_v16  }
  0x78   :  { %v14_v18 = vpop.permute.xlu0 %13   ;;  %v26_v19 = vpop.permute.xlu1 %25  }
  0x79   :  { %16 = vst.msk [vmem:[#allocation0] sm:$0x1] %vm15_vm2, %v14_v18  }
  0x7a   :  { %22 = vst.msk [vmem:[#allocation0] sm:$0x1] %vm21_vm3, %v20_v17  }
  0x7b   :  { %28 = vst.msk [vmem:[#allocation0] sm:$0x1] %vm27_vm4, %v26_v19  }
  0x7c   :  { %v32_v20 = vpop.permute.xlu0 %31   ;;  %v38_v21 = vpop.permute.xlu1 %37  }
  0x7d   :  { %34 = vst.msk [vmem:[#allocation0] sm:$0x1] %vm33_vm5, %v32_v20  }
  0x7e   :  { %40 = vst.msk [vmem:[#allocation0] sm:$0x1] %vm39_vm6, %v38_v21  }
  0x80   :  { %v44_v22 = vpop.permute.xlu0 %43   ;;  %v50_v23 = vpop.permute.xlu1 %49  }
  0x81   :  { %46 = vst.msk [vmem:[#allocation0] sm:$0x1] %vm45_vm7, %v44_v22  }
  0x82   :  { %52 = vst.msk [vmem:[#allocation0] sm:$0x1] %vm51_vm8, %v50_v23  }
  0x84   :  { %v56_v24 = vpop.permute.xlu0 %55   ;;  %v62_v25 = vpop.permute.xlu1 %61  }
  0x85   :  { %58 = vst.msk [vmem:[#allocation0] sm:$0x1] %vm57_vm9, %v56_v24  }
  0x86   :  { %64 = vst.msk [vmem:[#allocation0] sm:$0x1] %vm63_vm10, %v62_v25  }
  0x88   :  { %v68_v26 = vpop.permute.xlu0 %67   ;;  %v74_v27 = vpop.permute.xlu1 %73  }
  0x89   :  { %70 = vst.msk [vmem:[#allocation0] sm:$0x1] %vm69_vm11, %v68_v26  }
  0x8a   :  { %76 = vst.msk [vmem:[#allocation0] sm:$0x1] %vm75_vm12, %v74_v27  }
  0x8c   :  { %v80_v28 = vpop.permute.xlu0 %79   ;;  %v86_v29 = vpop.permute.xlu1 %85  }
  0x8d   :  { %82 = vst.msk [vmem:[#allocation0] sm:$0x1] %vm81_vm13, %v80_v28  }
  0x8e   :  { %88 = vst.msk [vmem:[#allocation0] sm:$0x1] %vm87_vm14, %v86_v29  }
  0x90   :  { %v92_v30 = vpop.permute.xlu0 %91  }
  0x91   :  { %94 = vst.msk [vmem:[#allocation0] sm:$0x1] %vm93_vm15, %v92_v30  }
  0x98   :  { %v98_v31 = vld [vmem:[#allocation0] sm:$0x1] }
  0x99   :  { %100 = vst [vmem:[%s208_s1] sm:$0x1] %v98_v31 }

// kernel: conv_block_forward.1
= control target key start
LH: loop header
LB: loop body
LE: loop exit
PB: predicated region body
PF: predicated region fallthrough
CT: control target
= control target key end

     0   :  { %vm58_vm0 = vcmask 516096   ;;  %vm63_vm1 = vcmask 523264   ;;  %v2078_v3 = vmov 0.0   ;;  %s2589_s1 = inlined_call_operand.vmem [shape: f32[3,64,128], index: 1, kind: input, shape index: {}]   ;;  %s2590_s0 = inlined_call_operand.vmem [shape: f32[2,16,64], index: 0, kind: input, shape index: {}]   ;;  %s2591_s3 = inlined_call_operand.vmem [shape: f32[128,128], index: 3, kind: input, shape index: {}]   ;;  %s2592_s4 = inlined_call_operand.vmem [shape: f32[1,128], index: 4, kind: input, shape index: {}]   ;;  %s2593_s2 = inlined_call_operand.vmem [shape: f32[3,128,128], index: 2, kind: input, shape index: {}]   ;;  %s2594_s5 = inlined_call_operand.vmem [shape: f32[1,128], index: 5, kind: input, shape index: {}]   ;;  %s2595_s6 = inlined_call_operand.vmem [shape: f32[1,128], index: 6, kind: input, shape index: {}]   ;;  %s2596_s7 = inlined_call_operand.vmem [shape: f32[1,128], index: 7, kind: input, shape index: {}]   ;;  %s2597_s8 = inlined_call_operand.vmem [shape: f32[1,128], index: 8, kind: input, shape index: {}]   ;;  %s2598_s9 = inlined_call_operand.vmem [shape: f32[1,128], index: 9, kind: input, shape index: {}]   ;;  %s2599_s10 = inlined_call_operand.vmem [shape: f32[2,16,128], index: 10, kind: output, shape index: {}]  }
   0x1   :  { %v1215_v0 = vld [vmem:[%s2589_s1 + $0x40] sm:$0xff]  ;;  %v1216_v1 = vld [vmem:[%s2589_s1 + $0x48] sm:$0xff]  ;;  %v1217_v2 = vld [vmem:[%s2589_s1 + $0x50] sm:$0xff]  ;;  %59 = vst.msk [vmem:[#allocation2] sm:$0x1] %vm58_vm0, %v2078_v3 }
   0x2   :  { %60 = vst.msk [vmem:[#allocation2 + $0x18] sm:$0x1] %vm58_vm0, %v2078_v3  ;;  %61 = vst.msk [vmem:[#allocation2 + $0x11] sm:$0x1] %vm58_vm0, %v2078_v3  ;;  %v1785_v4 = vpack.c.bf16 %v1216_v1, %v1215_v0  ;;  %v1218_v5 = vld [vmem:[%s2589_s1 + $0x58] sm:$0xff]  ;;  %v1219_v7 = vld [vmem:[%s2589_s1 + $0x60] sm:$0xff] }
   0x3   :  { %62 = vst.msk [vmem:[#allocation2 + $0x29] sm:$0x1] %vm58_vm0, %v2078_v3  ;;  %641 = vst [vmem:[#allocation3] sm:$0x1] %v2078_v3  ;;  %v1789_v6 = vpack.c.bf16 %v1218_v5, %v1217_v2  ;;  %v1220_v8 = vld [vmem:[%s2589_s1 + $0x68] sm:$0xff]  ;;  %v51_v9 = vld [vmem:[%s2590_s0] sm:$0xff] }
   0x4   :  { %642 = vst [vmem:[#allocation3 + $0x18] sm:$0x1] %v2078_v3  ;;  %643 = vst [vmem:[#allocation3 + $0x11] sm:$0x1] %v2078_v3  ;;  %1786 = vmatprep.subr.bf16.mxu0 %v1785_v4  ;;  %v52_v10 = vld [vmem:[%s2590_s0 + $0x8] sm:$0xff]  ;;  %v1793_v11 = vpack.c.bf16 %v1220_v8, %v1219_v7  ;;  %v53_v12 = vld [vmem:[%s2590_s0 + $0x10] sm:$0xff] }
   0x5   :  { %644 = vst [vmem:[#allocation3 + $0x29] sm:$0x1] %v2078_v3  ;;  %64 = vst.msk [vmem:[#allocation2 + $0x1] sm:$0xff] %vm63_vm1, %v51_v9  ;;  %1788 = vmatpush3.bf16.msra.mxu0 %v1785_v4  ;;  %v1221_v13 = vld [vmem:[%s2589_s1 + $0x70] sm:$0xff]  ;;  %v1222_v14 = vld [vmem:[%s2589_s1 + $0x78] sm:$0xff] }
   0x6   :  { %65 = vst.msk [vmem:[#allocation2 + $0x9] sm:$0xff] %vm63_vm1, %v52_v10  ;;  %1790 = vmatprep.subr.bf16.mxu0 %v1789_v6  ;;  %66 = vst.msk [vmem:[#allocation2 + $0x19] sm:$0xff] %vm63_vm1, %v53_v12  ;;  %v54_v15 = vld [vmem:[%s2590_s0 + $0x18] sm:$0xff]  ;;  %v1797_v16 = vpack.c.bf16 %v1222_v14, %v1221_v13  ;;  %v72_v17 = vld [vmem:[%s2589_s1] sm:$0xff] }
   0x7   :  { %67 = vst.msk [vmem:[#allocation2 + $0x21] sm:$0xff] %vm63_vm1, %v54_v15  ;;  %v35_v18 = vld [vmem:[%s2591_s3] sm:$0xff]  ;;  %v36_v19 = vld [vmem:[%s2591_s3 + $0x8] sm:$0xff]  ;;  %v37_v23 = vld [vmem:[%s2591_s3 + $0x10] sm:$0xff] }
   0x8   :  { %v73_v21 = vld [vmem:[%s2589_s1 + $0x8] sm:$0xff]  ;;  %v2186_v22 = vpack.c.bf16 %v36_v19, %v35_v18  ;;  %v38_v24 = vld [vmem:[%s2591_s3 + $0x18] sm:$0xff]  ;;  %v39_v25 = vld [vmem:[%s2591_s3 + $0x20] sm:$0xff] }
   0x9   :  { %1792 = vmatpush3.bf16.msra.mxu0 %v1789_v6  ;;  %v1801_v26 = vpack.c.bf16 %v73_v21, %v72_v17  ;;  %v2200_v27 = vpack.c.bf16 %v38_v24, %v37_v23  ;;  %v40_v28 = vld [vmem:[%s2591_s3 + $0x28] sm:$0xff]  ;;  %v74_v29 = vld [vmem:[%s2589_s1 + $0x10] sm:$0xff]  ;;  %v75_v30 = vld [vmem:[%s2589_s1 + $0x18] sm:$0xff] }
   0xa   :  { %1794 = vmatprep.subr.bf16.mxu0 %v1793_v11  ;;  %1834 = vmatprep.subr.bf16.mxu1 %v2186_v22  ;;  %v2211_v31 = vpack.c.bf16 %v40_v28, %v39_v25  ;;  %v41_v32 = vld [vmem:[%s2591_s3 + $0x30] sm:$0xff]  ;;  %v42_v33 = vld [vmem:[%s2591_s3 + $0x38] sm:$0xff]  ;;  %v1805_v35 = vpack.c.bf16 %v75_v30, %v74_v29  ;;  %v76_v37 = vld [vmem:[%s2589_s1 + $0x20] sm:$0xff] }
   0xb   :  { %1836 = vmatpush3.bf16.msra.mxu1 %v2186_v22  ;;  %v77_v38 = vld [vmem:[%s2589_s1 + $0x28] sm:$0xff]  ;;  %v2228_v39 = vpack.c.bf16 %v42_v33, %v41_v32  ;;  %v43_v40 = vld [vmem:[%s2591_s3 + $0x40] sm:$0xff]  ;;  %v78_v45 = vld [vmem:[%s2589_s1 + $0x30] sm:$0xff] }
   0xc   :  { %v80_v20 = vld [vmem:[#allocation2 + $0x1] sm:$0xff]  ;;  %1838 = vmatprep.subr.bf16.mxu1 %v2200_v27  ;;  %v1809_v43 = vpack.c.bf16 %v77_v38, %v76_v37  ;;  %v79_v46 = vld [vmem:[%s2589_s1 + $0x38] sm:$0xff]  ;;  %v45_v48 = vld [vmem:[%s2591_s3 + $0x50] sm:$0xff] }
   0xd   :  { %1469 = vmatprep.mubr.msk.f32.mxu0 %vm63_vm1, %v80_v20  ;;  %1796 = vmatpush3.bf16.msra.mxu0 %v1793_v11  ;;  %v81_v34 = vld [vmem:[#allocation2 + $0x9] sm:$0xff]  ;;  %v82_v36 = vld [vmem:[#allocation2 + $0x19] sm:$0xff]  ;;  %v1813_v50 = vpack.c.bf16 %v79_v46, %v78_v45 }
   0xe   :  { %1798 = vmatprep.subr.bf16.mxu0 %v1797_v16  ;;  %v44_v41 = vld [vmem:[%s2591_s3 + $0x48] sm:$0xff]  ;;  %v68_v44 = vld [vmem:[#allocation2] sm:$0xff]  ;;  %v46_v49 = vld [vmem:[%s2591_s3 + $0x58] sm:$0xff] }
   0xf   :  { %1840 = vmatpush3.bf16.msra.mxu1 %v2200_v27  ;;  %v83_v42 = vld [vmem:[#allocation2 + $0x21] sm:$0xff]  ;;  %v2246_v47 = vpack.c.bf16 %v44_v41, %v43_v40  ;;  %v2264_v53 = vpack.c.bf16 %v46_v49, %v45_v48  ;;  %v1233_v57 = vld [vmem:[%s2589_s1 + $0x90] sm:$0xff]  ;;  %v1234_v58 = vld [vmem:[%s2589_s1 + $0x98] sm:$0xff] }
  0x10   :  { %1842 = vmatprep.subr.bf16.mxu1 %v2211_v31  ;;  %v1231_v51 = vld [vmem:[%s2589_s1 + $0x80] sm:$0xff]  ;;  %v1232_v52 = vld [vmem:[%s2589_s1 + $0x88] sm:$0xff]  ;;  %v1821_v61 = vpack.c.bf16 %v1234_v58, %v1233_v57  ;;  %v70_v62 = vld [vmem:[#allocation2 + $0x18] sm:$0xff] }
  0x11   :  { %1800 = vmatpush3.bf16.msra.mxu0 %v1797_v16  ;;  %v47_v54 = vld [vmem:[%s2591_s3 + $0x60] sm:$0xff]  ;;  %v48_v55 = vld [vmem:[%s2591_s3 + $0x68] sm:$0xff]  ;;  %v1817_v56 = vpack.c.bf16 %v1232_v52, %v1231_v51  ;;  %v1237_v4 = vld [vmem:[%s2589_s1 + $0xb0] sm:$0xff] }
  0x12   :  { %1802 = vmatprep.subr.bf16.mxu0 %v1801_v26  ;;  %v2280_v59 = vpack.c.bf16 %v48_v55, %v47_v54  ;;  %v69_v60 = vld [vmem:[#allocation2 + $0x8] sm:$0xff]  ;;  %v1235_v63 = vld [vmem:[%s2589_s1 + $0xa0] sm:$0xff]  ;;  %v1238_v5 = vld [vmem:[%s2589_s1 + $0xb8] sm:$0xff] }
  0x13   :  { %1844 = vmatpush3.bf16.msra.mxu1 %v2211_v31  ;;  %v1236_v0 = vld [vmem:[%s2589_s1 + $0xa8] sm:$0xff]  ;;  %v71_v1 = vld [vmem:[#allocation2 + $0x20] sm:$0xff]  ;;  %v1829_v6 = vpack.c.bf16 %v1238_v5, %v1237_v4  ;;  %v49_v10 = vld [vmem:[%s2591_s3 + $0x70] sm:$0xff] }
  0x14   :  { %1470 = vmatmul.mubr.msk.f32.vlgmr.msra.gmra.mrb[0].mxu0 %vm63_vm1, %v81_v34  ;;  %1846 = vmatprep.subr.bf16.mxu1 %v2228_v39  ;;  %v1825_v2 = vpack.c.bf16 %v1236_v0, %v1235_v63  ;;  %v287_v3 = vld [vmem:[#allocation2 + $0x2] sm:$0xff]  ;;  %v288_v7 = vld [vmem:[#allocation2 + $0xa] sm:$0xff]  ;;  %v289_v8 = vld [vmem:[#allocation2 + $0x1a] sm:$0xff] }
  0x15   :  { %1804 = vmatpush3.bf16.msra.mxu0 %v1801_v26  ;;  %1472 = vmatprep.mubr.msk.f32.mxu0 %vm63_vm1, %v82_v36  ;;  %v290_v9 = vld [vmem:[#allocation2 + $0x22] sm:$0xff]  ;;  %v50_v11 = vld [vmem:[%s2591_s3 + $0x78] sm:$0xff]  ;;  %v1243_v13 = vld [vmem:[%s2592_s4] ss:$0 sm:$0xff] }
  0x16   :  { %1806 = vmatprep.subr.bf16.mxu0 %v1805_v35  ;;  %v2310_v12 = vpack.c.bf16 %v50_v11, %v49_v10  ;;  %v1244_v49 = vld [vmem:[%s2593_s2 + $0x80] sm:$0xff]  ;;  %v1246_v52 = vld [vmem:[%s2593_s2 + $0x90] sm:$0xff]  ;;  %v1247_v54 = vld [vmem:[%s2593_s2 + $0x98] sm:$0xff] }
  0x17   :  { %1848 = vmatpush3.bf16.msra.mxu1 %v2228_v39  ;;  %v1901_v55 = vpack.c.bf16 %v1247_v54, %v1246_v52  ;;  %v1249_v57 = vld [vmem:[%s2593_s2 + $0xa8] sm:$0xff]  ;;  %v1252_v63 = vld [vmem:[%s2593_s2 + $0xc0] sm:$0xff] }
  0x18   :  { %1473 = vmatmul.mubr.msk.f32.gmra.mrb[2].mxu0 %vm63_vm1, %v83_v42  ;;  %1850 = vmatprep.subr.bf16.mxu1 %v2246_v47  ;;  %v1253_v0 = vld [vmem:[%s2593_s2 + $0xc8] sm:$0xff]  ;;  %v1256_v5 = vld [vmem:[%s2593_s2 + $0xe0] sm:$0xff] }
  0x19   :  { %1808 = vmatpush3.bf16.msra.mxu0 %v1805_v35  ;;  %1491 = vmatprep.mubr.msk.f32.mxu0 %vm63_vm1, %v68_v44  ;;  %v653_v11 = vld [vmem:[%s2593_s2] sm:$0xff] }
  0x1a   :  { %1810 = vmatprep.subr.bf16.mxu0 %v1809_v43 }
  0x1b   :  { %1852 = vmatpush3.bf16.msra.mxu1 %v2246_v47 }
  0x1c   :  { %1854 = vmatprep.subr.bf16.mxu1 %v2264_v53 }
  0x1d   :  { %1812 = vmatpush3.bf16.msra.mxu0 %v1809_v43 }
  0x1e   :  { %1814 = vmatprep.subr.bf16.mxu0 %v1813_v50 }
  0x1f   :  { %1856 = vmatpush3.bf16.msra.mxu1 %v2264_v53 }
  0x20   :  { %1858 = vmatprep.subr.bf16.mxu1 %v2280_v59 }
  0x21   :  { %1816 = vmatpush3.bf16.msra.mxu0 %v1813_v50  ;;  %v1245_v50 = vld [vmem:[%s2593_s2 + $0x88] sm:$0xff] }
  0x22   :  { %1818 = vmatprep.subr.bf16.mxu0 %v1817_v56  ;;  %v1897_v51 = vpack.c.bf16 %v1245_v50, %v1244_v49 }
  0x23   :  { %1860 = vmatpush3.bf16.msra.mxu1 %v2280_v59 }
  0x24   :  { %1492 = vmatmul.mubr.msk.f32.vlgmr.msra.gmra.mrb[0].mxu0 %vm63_vm1, %v69_v60  ;;  %1862 = vmatprep.subr.bf16.mxu1 %v2310_v12  ;;  %v1250_v60 = vld [vmem:[%s2593_s2 + $0xb0] sm:$0xff] }
  0x25   :  { %1820 = vmatpush3.bf16.msra.mxu0 %v1817_v56  ;;  %1494 = vmatprep.mubr.msk.f32.mxu0 %vm63_vm1, %v70_v62  ;;  %v1248_v56 = vld [vmem:[%s2593_s2 + $0xa0] sm:$0xff] }
  0x26   :  { %1822 = vmatprep.subr.bf16.mxu0 %v1821_v61  ;;  %v1905_v58 = vpack.c.bf16 %v1249_v57, %v1248_v56 }
  0x27   :  { %1864 = vmatpush3.bf16.msra.mxu1 %v2310_v12 }
  0x28   :  { %1495 = vmatmul.mubr.msk.f32.gmra.mrb[2].mxu0 %vm63_vm1, %v71_v1  ;;  %1866 = vmatprep.subr.bf16.mxu1 %v2186_v22  ;;  %v1913_v1 = vpack.c.bf16 %v1253_v0, %v1252_v63  ;;  %v658_v0 = vld [vmem:[%s2593_s2 + $0x28] sm:$0xff] }
  0x29   :  { %1824 = vmatpush3.bf16.msra.mxu0 %v1821_v61  ;;  %1513 = vmatprep.mubr.msk.f32.mxu0 %vm63_vm1, %v287_v3  ;;  %v1251_v61 = vld [vmem:[%s2593_s2 + $0xb8] sm:$0xff] }
  0x2a   :  { %1826 = vmatprep.subr.bf16.mxu0 %v1825_v2  ;;  %v1909_v62 = vpack.c.bf16 %v1251_v61, %v1250_v60  ;;  %v1255_v3 = vld [vmem:[%s2593_s2 + $0xd8] sm:$0xff] }
  0x2d   :  { %1828 = vmatpush3.bf16.msra.mxu0 %v1825_v2  ;;  %v1254_v2 = vld [vmem:[%s2593_s2 + $0xd0] sm:$0xff] }
  0x2e   :  { %1830 = vmatprep.subr.bf16.mxu0 %v1829_v6  ;;  %v1917_v4 = vpack.c.bf16 %v1255_v3, %v1254_v2  ;;  %v659_v2 = vld [vmem:[%s2593_s2 + $0x30] sm:$0xff]  ;;  %v660_v3 = vld [vmem:[%s2593_s2 + $0x38] sm:$0xff] }
  0x31   :  { %1832 = vmatpush3.bf16.msra.mxu0 %v1829_v6  ;;  %v1257_v6 = vld [vmem:[%s2593_s2 + $0xe8] sm:$0xff] }
  0x32   :  { %1898 = vmatprep.subr.bf16.mxu0 %v1897_v51 }
  0x34   :  { %1514 = vmatmul.mubr.msk.f32.vlgmr.msra.gmra.mrb[0].mxu0 %vm63_vm1, %v288_v7  ;;  %v1921_v7 = vpack.c.bf16 %v1257_v6, %v1256_v5  ;;  %v1941_v5 = vpack.c.bf16 %v660_v3, %v659_v2  ;;  %v661_v6 = vld [vmem:[%s2593_s2 + $0x40] sm:$0xff] }
  0x35   :  { %1516 = vmatprep.mubr.msk.f32.mxu0 %vm63_vm1, %v289_v8  ;;  %1900 = vmatpush3.bf16.msra.mxu0 %v1897_v51  ;;  %v1258_v8 = vld [vmem:[%s2593_s2 + $0xf0] sm:$0xff] }
  0x36   :  { %1902 = vmatprep.subr.bf16.mxu0 %v1901_v55 }
  0x38   :  { %1517 = vmatmul.mubr.msk.f32.gmra.mrb[2].mxu0 %vm63_vm1, %v290_v9  ;;  %v1259_v9 = vld [vmem:[%s2593_s2 + $0xf8] sm:$0xff] }
  0x39   :  { %1904 = vmatpush3.bf16.msra.mxu0 %v1901_v55  ;;  %v1925_v10 = vpack.c.bf16 %v1259_v9, %v1258_v8  ;;  %v663_v9 = vld [vmem:[%s2593_s2 + $0x50] sm:$0xff] }
  0x3a   :  { %1906 = vmatprep.subr.bf16.mxu0 %v1905_v58 }
  0x3d   :  { %1908 = vmatpush3.bf16.msra.mxu0 %v1905_v58 }
  0x3e   :  { %1910 = vmatprep.subr.bf16.mxu0 %v1909_v62 }
  0x41   :  { %1912 = vmatpush3.bf16.msra.mxu0 %v1909_v62 }
  0x42   :  { %1914 = vmatprep.subr.bf16.mxu0 %v1913_v1 }
  0x45   :  { %1916 = vmatpush3.bf16.msra.mxu0 %v1913_v1 }
  0x46   :  { %1918 = vmatprep.subr.bf16.mxu0 %v1917_v4 }
  0x49   :  { %1920 = vmatpush3.bf16.msra.mxu0 %v1917_v4 }
  0x4a   :  { %1922 = vmatprep.subr.bf16.mxu0 %v1921_v7 }
  0x4d   :  { %1924 = vmatpush3.bf16.msra.mxu0 %v1921_v7  ;;  %v662_v7 = vld [vmem:[%s2593_s2 + $0x48] sm:$0xff] }
  0x4e   :  { %1926 = vmatprep.subr.bf16.mxu0 %v1925_v10  ;;  %v1945_v8 = vpack.c.bf16 %v662_v7, %v661_v6 }
  0x51   :  { %1928 = vmatpush3.bf16.msra.mxu0 %v1925_v10  ;;  %v664_v10 = vld [vmem:[%s2593_s2 + $0x58] sm:$0xff] }
 0x107   :  { %v1515_v14 = vpop.f32.mrb[0].mxu0 }
 0x108   :  { %v378_v15 = vpop.f32.mrb[1].mxu0  ;;  %v2320_v17 = vadd.f32 %v1515_v14, %v1243_v13 }
 0x109   :  { %v2318_v16 = vadd.f32 %v1243_v13, %v378_v15 }
 0x10b   :  { %v1518_v18 = vpop.f32.mrb[2].mxu0  ;;  %1551 = vmatprep.mubr.f32.mxu1 %v2318_v16 }
 0x10c   :  { %v388_v19 = vpop.f32.mrb[3].mxu0  ;;  %1552 = vmatmul.mubr.f32.vlgmr.msra.gmra.mrb[0].mxu1 %v2320_v17  ;;  %v2327_v21 = vadd.f32 %v1518_v18, %v1243_v13 }
 0x10d   :  { %v2324_v20 = vadd.f32 %v1243_v13, %v388_v19  ;;  %1868 = vmatpush3.bf16.msra.mxu1 %v2186_v22  ;;  %v654_v13 = vld [vmem:[%s2593_s2 + $0x8] sm:$0xff] }
 0x10e   :  { %1870 = vmatprep.subr.bf16.mxu1 %v2200_v27  ;;  %v1929_v14 = vpack.c.bf16 %v654_v13, %v653_v11  ;;  %v1949_v11 = vpack.c.bf16 %v664_v10, %v663_v9  ;;  %v665_v13 = vld [vmem:[%s2593_s2 + $0x60] sm:$0xff] }
 0x10f   :  { %1554 = vmatprep.mubr.f32.mxu1 %v2324_v20 }
 0x110   :  { %1555 = vmatmul.mubr.f32.gmra.mrb[2].mxu1 %v2327_v21  ;;  %1930 = vmatprep.subr.bf16.mxu0 %v1929_v14 }
 0x111   :  { %1872 = vmatpush3.bf16.msra.mxu1 %v2200_v27 }
 0x112   :  { %1874 = vmatprep.subr.bf16.mxu1 %v2211_v31 }
 0x115   :  { %1876 = vmatpush3.bf16.msra.mxu1 %v2211_v31 }
 0x116   :  { %1878 = vmatprep.subr.bf16.mxu1 %v2228_v39 }
 0x119   :  { %1880 = vmatpush3.bf16.msra.mxu1 %v2228_v39 }
 0x11a   :  { %1882 = vmatprep.subr.bf16.mxu1 %v2246_v47 }
 0x11d   :  { %1884 = vmatpush3.bf16.msra.mxu1 %v2246_v47 }
 0x11e   :  { %1886 = vmatprep.subr.bf16.mxu1 %v2264_v53 }
 0x121   :  { %1888 = vmatpush3.bf16.msra.mxu1 %v2264_v53 }
 0x122   :  { %1890 = vmatprep.subr.bf16.mxu1 %v2280_v59 }
 0x125   :  { %1892 = vmatpush3.bf16.msra.mxu1 %v2280_v59 }
 0x126   :  { %1894 = vmatprep.subr.bf16.mxu1 %v2310_v12 }
 0x129   :  { %1896 = vmatpush3.bf16.msra.mxu1 %v2310_v12 }
 0x12a   :  { %1994 = vmatprep.subr.bf16.mxu1 %v2186_v22 }
 0x1df   :  { %v1553_v23 = vpop.f32.mrb[0].mxu1 }
 0x1e0   :  { %v477_v24 = vpop.f32.mrb[1].mxu1 }
 0x1e1   :  { %v496_v25 = vadd.f32 %v1553_v23, %v477_v24 }
 0x1e3   :  { %v1556_v26 = vpop.f32.mrb[2].mxu1 }
 0x1e4   :  { %v487_v28 = vpop.f32.mrb[3].mxu1 }
 0x1e5   :  { %v497_v29 = vadd.f32 %v496_v25, %v487_v28 }
 0x1e7   :  { %v498_v30 = vadd.f32 %v1556_v26, %v497_v29 }
 0x1e9   :  { %v499_v32 = vrot.slane %v498_v30, 4 }
 0x1eb   :  { %v500_v33 = vadd.f32 %v499_v32, %v498_v30 }
 0x1ed   :  { %v501_v34 = vrot.slane %v500_v33, 2 }
 0x1ef   :  { %v502_v35 = vadd.f32 %v501_v34, %v500_v33 }
 0x1f1   :  { %v503_v36 = vrot.slane %v502_v35, 1 }
 0x1f3   :  { %v504_v37 = vadd.f32 %v503_v36, %v502_v35 }
 0x1f5   :  { %v2346_v38 = vmul.f32 0.001953125, %v504_v37  ;;  %v615_v37 = vlaneseq }
 0x1f7   :  { %v506_v40 = vsub.f32 %v2318_v16, %v2346_v38  ;;  %v507_v41 = vsub.f32 %v2320_v17, %v2346_v38  ;;  %v508_v42 = vsub.f32 %v2324_v20, %v2346_v38  ;;  %v509_v45 = vsub.f32 %v2327_v21, %v2346_v38 }
 0x1f9   :  { %v510_v43 = vmul.f32 %v506_v40, %v506_v40  ;;  %v511_v44 = vmul.f32 %v507_v41, %v507_v41  ;;  %v512_v46 = vmul.f32 %v508_v42, %v508_v42  ;;  %v513_v48 = vmul.f32 %v509_v45, %v509_v45  ;;  %v56_v41 = vld [vmem:[%s2594_s5] sm:$0x1] }
 0x1fa   :  { %v616_v40 = vshrl.u32 %v615_v37, 7  ;;  %v57_v45 = vld [vmem:[%s2595_s6] sm:$0x1] }
 0x1fb   :  { %1589 = vmatprep.mubr.f32.mxu1 %v510_v43 }
 0x1fc   :  { %1590 = vmatmul.mubr.f32.vlgmr.msra.gmra.mrb[4].mxu1 %v511_v44  ;;  %v2429_v42 = vsub.s32 0, %v616_v40  ;;  %v1266_v40 = vld [vmem:[%s2593_s2 + $0x130] sm:$0xff] }
 0x1fd   :  { %1592 = vmatprep.mubr.f32.mxu1 %v512_v46  ;;  %1996 = vmatpush3.bf16.msra.mxu1 %v2186_v22 }
 0x1fe   :  { %1998 = vmatprep.subr.bf16.mxu1 %v2200_v27 }
 0x200   :  { %1593 = vmatmul.mubr.f32.gmra.mrb[6].mxu1 %v513_v48 }
 0x201   :  { %2000 = vmatpush3.bf16.msra.mxu1 %v2200_v27 }
 0x202   :  { %2002 = vmatprep.subr.bf16.mxu1 %v2211_v31 }
 0x205   :  { %2004 = vmatpush3.bf16.msra.mxu1 %v2211_v31 }
 0x206   :  { %2006 = vmatprep.subr.bf16.mxu1 %v2228_v39 }
 0x209   :  { %2008 = vmatpush3.bf16.msra.mxu1 %v2228_v39 }
 0x20a   :  { %2010 = vmatprep.subr.bf16.mxu1 %v2246_v47 }
 0x20d   :  { %2012 = vmatpush3.bf16.msra.mxu1 %v2246_v47 }
 0x20e   :  { %2014 = vmatprep.subr.bf16.mxu1 %v2264_v53 }
 0x211   :  { %2016 = vmatpush3.bf16.msra.mxu1 %v2264_v53 }
 0x212   :  { %2018 = vmatprep.subr.bf16.mxu1 %v2280_v59 }
 0x215   :  { %2020 = vmatpush3.bf16.msra.mxu1 %v2280_v59 }
 0x216   :  { %2022 = vmatprep.subr.bf16.mxu1 %v2310_v12 }
 0x219   :  { %2024 = vmatpush3.bf16.msra.mxu1 %v2310_v12 }
 0x21a   :  { %2026 = vmatprep.subr.bf16.mxu1 %v2186_v22 }
 0x2cf   :  { %v1591_v15 = vpop.f32.mrb[4].mxu1 }
 0x2d0   :  { %v580_v18 = vpop.f32.mrb[5].mxu1 }
 0x2d1   :  { %v599_v19 = vadd.f32 %v1591_v15, %v580_v18  ;;  %v667_v18 = vld [vmem:[%s2593_s2 + $0x70] sm:$0xff] }
 0x2d3   :  { %v1594_v23 = vpop.f32.mrb[6].mxu1 }
 0x2d4   :  { %v590_v24 = vpop.f32.mrb[7].mxu1 }
 0x2d5   :  { %v600_v25 = vadd.f32 %v599_v19, %v590_v24  ;;  %v668_v19 = vld [vmem:[%s2593_s2 + $0x78] sm:$0xff]  ;;  %v1260_v24 = vld [vmem:[%s2593_s2 + $0x100] sm:$0xff] }
 0x2d7   :  { %v601_v26 = vadd.f32 %v1594_v23, %v600_v25  ;;  %v1957_v23 = vpack.c.bf16 %v668_v19, %v667_v18  ;;  %v1261_v25 = vld [vmem:[%s2593_s2 + $0x108] sm:$0xff] }
 0x2d9   :  { %v602_v28 = vrot.slane %v601_v26, 4 }
 0x2db   :  { %v603_v29 = vadd.f32 %v602_v28, %v601_v26  ;;  %v1961_v26 = vpack.c.bf16 %v1261_v25, %v1260_v24  ;;  %v1262_v28 = vld [vmem:[%s2593_s2 + $0x110] sm:$0xff] }
 0x2dd   :  { %v604_v30 = vrot.slane %v603_v29, 2 }
 0x2df   :  { %v605_v32 = vadd.f32 %v604_v30, %v603_v29  ;;  %v1263_v29 = vld [vmem:[%s2593_s2 + $0x118] sm:$0xff] }
 0x2e0   :  { %v1965_v30 = vpack.c.bf16 %v1263_v29, %v1262_v28 }
 0x2e1   :  { %v606_v33 = vrot.slane %v605_v32, 1 }
 0x2e3   :  { %v607_v34 = vadd.f32 %v606_v33, %v605_v32  ;;  %v1264_v33 = vld [vmem:[%s2593_s2 + $0x120] sm:$0xff] }
 0x2e5   :  { %v608_v35 = vmul.f32 0.001953125, %v607_v34  ;;  %v1265_v34 = vld [vmem:[%s2593_s2 + $0x128] sm:$0xff] }
 0x2e7   :  { %v609_v36 = vadd.f32 1e-05, %v608_v35 }
 0x2e9   :  { %2074 = vrsqrt.f32 %v609_v36  ;;  %v1969_v36 = vpack.c.bf16 %v1265_v34, %v1264_v33 }
 0x2f3   :  { %v2075_v43 = vpop.eup %2074 }
 0x2f4   :  { %v611_v44 = vmul.f32 %v2075_v43, %v56_v41  ;;  %v1267_v41 = vld [vmem:[%s2593_s2 + $0x138] sm:$0xff] }
 0x2f6   :  { %v612_v46 = vmul.f32 %v611_v44, %v2346_v38  ;;  %v618_v48 = vrot.slane %v611_v44, %v2429_v42  ;;  %v655_v38 = vld [vmem:[%s2593_s2 + $0x10] sm:$0xff]  ;;  %v1973_v44 = vpack.c.bf16 %v1267_v41, %v1266_v40 }
 0x2f8   :  { %v613_v49 = vsub.f32 %v57_v45, %v612_v46  ;;  %v620_v50 = vmul.f32 %v618_v48, %v2318_v16  ;;  %v621_v51 = vmul.f32 %v618_v48, %v2320_v17  ;;  %v622_v52 = vmul.f32 %v618_v48, %v2324_v20  ;;  %v656_v16 = vld [vmem:[%s2593_s2 + $0x18] sm:$0xff]  ;;  %v1268_v45 = vld [vmem:[%s2593_s2 + $0x140] sm:$0xff]  ;;  %v1269_v46 = vld [vmem:[%s2593_s2 + $0x148] sm:$0xff] }
 0x2f9   :  { %v623_v54 = vmul.f32 %v618_v48, %v2327_v21  ;;  %v1933_v63 = vpack.c.bf16 %v656_v16, %v655_v38  ;;  %v657_v21 = vld [vmem:[%s2593_s2 + $0x20] sm:$0xff]  ;;  %v1977_v48 = vpack.c.bf16 %v1269_v46, %v1268_v45 }
 0x2fa   :  { %v628_v55 = vrot.slane %v613_v49, %v2429_v42  ;;  %v1937_v1 = vpack.c.bf16 %v658_v0, %v657_v21  ;;  %v1270_v49 = vld [vmem:[%s2593_s2 + $0x150] sm:$0xff]  ;;  %v640_v46 = vld [vmem:[%s2598_s9] sm:$0x1] }
 0x2fc   :  { %v630_v56 = vadd.f32 %v628_v55, %v620_v50  ;;  %v631_v57 = vadd.f32 %v628_v55, %v621_v51  ;;  %v632_v58 = vadd.f32 %v628_v55, %v622_v52  ;;  %v633_v60 = vadd.f32 %v628_v55, %v623_v54  ;;  %v1271_v50 = vld [vmem:[%s2593_s2 + $0x158] sm:$0xff]  ;;  %v1272_v52 = vld [vmem:[%s2593_s2 + $0x160] sm:$0xff]  ;;  %v1273_v54 = vld [vmem:[%s2593_s2 + $0x168] sm:$0xff] }
 0x2fd   :  { %v1981_v51 = vpack.c.bf16 %v1271_v50, %v1270_v49  ;;  %v1985_v55 = vpack.c.bf16 %v1273_v54, %v1272_v52 }
 0x2fe   :  { %v634_v61 = vmax.f32 %v630_v56, 0.0  ;;  %v635_v17 = vmax.f32 %v631_v57, 0.0  ;;  %v636_v62 = vmax.f32 %v632_v58, 0.0  ;;  %v637_v20 = vmax.f32 %v633_v60, 0.0  ;;  %v1274_v56 = vld [vmem:[%s2593_s2 + $0x170] sm:$0xff]  ;;  %v1275_v57 = vld [vmem:[%s2593_s2 + $0x178] sm:$0xff] }
 0x2ff   :  { %v1989_v58 = vpack.c.bf16 %v1275_v57, %v1274_v56 }
 0x300   :  { %646 = vst [vmem:[#allocation3 + $0x9] sm:$0xff] %v635_v17  ;;  %645 = vst [vmem:[#allocation3 + $0x1] sm:$0xff] %v634_v61  ;;  %1627 = vmatprep.mubr.f32.mxu0 %v634_v61  ;;  %v1276_v61 = vld [vmem:[%s2596_s7] ss:$0 sm:$0xff] }
 0x301   :  { %647 = vst [vmem:[#allocation3 + $0x19] sm:$0xff] %v636_v62  ;;  %648 = vst [vmem:[#allocation3 + $0x21] sm:$0xff] %v637_v20  ;;  %1628 = vmatmul.mubr.f32.vlgmr.msra.gmra.mrb[4].mxu0 %v635_v17 }
 0x302   :  { %1932 = vmatpush3.bf16.msra.mxu0 %v1929_v14  ;;  %1630 = vmatprep.mubr.f32.mxu0 %v636_v62  ;;  %v666_v14 = vld [vmem:[%s2593_s2 + $0x68] sm:$0xff] }
 0x303   :  { %1934 = vmatprep.subr.bf16.mxu0 %v1933_v63  ;;  %v1953_v15 = vpack.c.bf16 %v666_v14, %v665_v13 }
 0x305   :  { %1631 = vmatmul.mubr.f32.gmra.mrb[6].mxu0 %v637_v20 }
 0x306   :  { %1936 = vmatpush3.bf16.msra.mxu0 %v1933_v63 }
 0x307   :  { %v649_v4 = vld [vmem:[#allocation3] sm:$0xff]  ;;  %1938 = vmatprep.subr.bf16.mxu0 %v1937_v1  ;;  %v650_v32 = vld [vmem:[#allocation3 + $0x8] sm:$0xff] }
 0x308   :  { %1665 = vmatprep.mubr.f32.mxu0 %v649_v4  ;;  %v651_v35 = vld [vmem:[#allocation3 + $0x18] sm:$0xff]  ;;  %v652_v37 = vld [vmem:[#allocation3 + $0x20] sm:$0xff]  ;;  %v861_v60 = vld [vmem:[#allocation3 + $0xa] sm:$0xff] }
 0x309   :  { %v860_v43 = vld [vmem:[#allocation3 + $0x2] sm:$0xff]  ;;  %v862_v38 = vld [vmem:[#allocation3 + $0x1a] sm:$0xff] }
 0x30a   :  { %1940 = vmatpush3.bf16.msra.mxu0 %v1937_v1  ;;  %v863_v16 = vld [vmem:[#allocation3 + $0x22] sm:$0xff] }
 0x30b   :  { %1942 = vmatprep.subr.bf16.mxu0 %v1941_v5 }
 0x30e   :  { %1944 = vmatpush3.bf16.msra.mxu0 %v1941_v5 }
 0x30f   :  { %1946 = vmatprep.subr.bf16.mxu0 %v1945_v8 }
 0x312   :  { %1948 = vmatpush3.bf16.msra.mxu0 %v1945_v8 }
 0x313   :  { %1950 = vmatprep.subr.bf16.mxu0 %v1949_v11 }
 0x316   :  { %1952 = vmatpush3.bf16.msra.mxu0 %v1949_v11 }
 0x317   :  { %1954 = vmatprep.subr.bf16.mxu0 %v1953_v15 }
 0x31a   :  { %1956 = vmatpush3.bf16.msra.mxu0 %v1953_v15 }
 0x31b   :  { %1958 = vmatprep.subr.bf16.mxu0 %v1957_v23 }
 0x31e   :  { %1960 = vmatpush3.bf16.msra.mxu0 %v1957_v23 }
 0x31f   :  { %1962 = vmatprep.subr.bf16.mxu0 %v1961_v26 }
 0x321   :  { %1666 = vmatmul.mubr.f32.vlgmr.msra.gmra.mrb[4].mxu0 %v650_v32 }
 0x322   :  { %1668 = vmatprep.mubr.f32.mxu0 %v651_v35  ;;  %1964 = vmatpush3.bf16.msra.mxu0 %v1961_v26 }
 0x323   :  { %1966 = vmatprep.subr.bf16.mxu0 %v1965_v30 }
 0x325   :  { %1669 = vmatmul.mubr.f32.gmra.mrb[6].mxu0 %v652_v37 }
 0x326   :  { %1968 = vmatpush3.bf16.msra.mxu0 %v1965_v30  ;;  %1703 = vmatprep.mubr.f32.mxu0 %v860_v43  ;;  %v639_v43 = vld [vmem:[%s2597_s8] sm:$0x1] }
 0x327   :  { %1970 = vmatprep.subr.bf16.mxu0 %v1969_v36 }
 0x32a   :  { %1972 = vmatpush3.bf16.msra.mxu0 %v1969_v36 }
 0x32b   :  { %1974 = vmatprep.subr.bf16.mxu0 %v1973_v44 }
 0x32e   :  { %1976 = vmatpush3.bf16.msra.mxu0 %v1973_v44 }
 0x32f   :  { %1978 = vmatprep.subr.bf16.mxu0 %v1977_v48 }
 0x332   :  { %1980 = vmatpush3.bf16.msra.mxu0 %v1977_v48 }
 0x333   :  { %1982 = vmatprep.subr.bf16.mxu0 %v1981_v51 }
 0x336   :  { %1984 = vmatpush3.bf16.msra.mxu0 %v1981_v51 }
 0x337   :  { %1986 = vmatprep.subr.bf16.mxu0 %v1985_v55 }
 0x33a   :  { %1988 = vmatpush3.bf16.msra.mxu0 %v1985_v55 }
 0x33b   :  { %1990 = vmatprep.subr.bf16.mxu0 %v1989_v58 }
 0x33e   :  { %1992 = vmatpush3.bf16.msra.mxu0 %v1989_v58 }
 0x341   :  { %1704 = vmatmul.mubr.f32.vlgmr.msra.gmra.mrb[4].mxu0 %v861_v60 }
 0x342   :  { %1706 = vmatprep.mubr.f32.mxu0 %v862_v38 }
 0x345   :  { %1707 = vmatmul.mubr.f32.gmra.mrb[6].mxu0 %v863_v16 }
 0x414   :  { %v1705_v17 = vpop.f32.mrb[4].mxu0 }
 0x415   :  { %v947_v62 = vpop.f32.mrb[5].mxu0  ;;  %v2536_v63 = vadd.f32 %v1705_v17, %v1276_v61 }
 0x416   :  { %v2534_v20 = vadd.f32 %v1276_v61, %v947_v62 }
 0x418   :  { %v1708_v21 = vpop.f32.mrb[6].mxu0  ;;  %1741 = vmatprep.mubr.f32.mxu1 %v2534_v20 }
 0x419   :  { %v957_v0 = vpop.f32.mrb[7].mxu0  ;;  %1742 = vmatmul.mubr.f32.vlgmr.msra.gmra.mrb[8].mxu1 %v2536_v63  ;;  %v2543_v2 = vadd.f32 %v1708_v21, %v1276_v61 }
 0x41a   :  { %v2540_v1 = vadd.f32 %v1276_v61, %v957_v0  ;;  %2028 = vmatpush3.bf16.msra.mxu1 %v2186_v22 }
 0x41b   :  { %2030 = vmatprep.subr.bf16.mxu1 %v2200_v27 }
 0x41c   :  { %1744 = vmatprep.mubr.f32.mxu1 %v2540_v1 }
 0x41d   :  { %1745 = vmatmul.mubr.f32.gmra.mrb[10].mxu1 %v2543_v2 }
 0x41e   :  { %2032 = vmatpush3.bf16.msra.mxu1 %v2200_v27 }
 0x41f   :  { %2034 = vmatprep.subr.bf16.mxu1 %v2211_v31 }
 0x422   :  { %2036 = vmatpush3.bf16.msra.mxu1 %v2211_v31 }
 0x423   :  { %2038 = vmatprep.subr.bf16.mxu1 %v2228_v39 }
 0x426   :  { %2040 = vmatpush3.bf16.msra.mxu1 %v2228_v39 }
 0x427   :  { %2042 = vmatprep.subr.bf16.mxu1 %v2246_v47 }
 0x42a   :  { %2044 = vmatpush3.bf16.msra.mxu1 %v2246_v47 }
 0x42b   :  { %2046 = vmatprep.subr.bf16.mxu1 %v2264_v53 }
 0x42e   :  { %2048 = vmatpush3.bf16.msra.mxu1 %v2264_v53 }
 0x42f   :  { %2050 = vmatprep.subr.bf16.mxu1 %v2280_v59 }
 0x432   :  { %2052 = vmatpush3.bf16.msra.mxu1 %v2280_v59 }
 0x433   :  { %2054 = vmatprep.subr.bf16.mxu1 %v2310_v12 }
 0x436   :  { %2056 = vmatpush3.bf16.msra.mxu1 %v2310_v12 }
 0x4ec   :  { %v1743_v22 = vpop.f32.mrb[8].mxu1 }
 0x4ed   :  { %v1046_v27 = vpop.f32.mrb[9].mxu1 }
 0x4ee   :  { %v1065_v31 = vadd.f32 %v1743_v22, %v1046_v27 }
 0x4f0   :  { %v1746_v39 = vpop.f32.mrb[10].mxu1 }
 0x4f1   :  { %v1056_v3 = vpop.f32.mrb[11].mxu1 }
 0x4f2   :  { %v1066_v4 = vadd.f32 %v1065_v31, %v1056_v3 }
 0x4f4   :  { %v1067_v5 = vadd.f32 %v1746_v39, %v1066_v4 }
 0x4f6   :  { %v1068_v47 = vrot.slane %v1067_v5, 4 }
 0x4f8   :  { %v1069_v6 = vadd.f32 %v1068_v47, %v1067_v5 }
 0x4fa   :  { %v1070_v7 = vrot.slane %v1069_v6, 2 }
 0x4fc   :  { %v1071_v8 = vadd.f32 %v1070_v7, %v1069_v6 }
 0x4fe   :  { %v1072_v53 = vrot.slane %v1071_v8, 1 }
 0x500   :  { %v1073_v9 = vadd.f32 %v1072_v53, %v1071_v8 }
 0x502   :  { %v1074_v10 = vmul.f32 0.001953125, %v1073_v9 }
 0x504   :  { %v1075_v59 = vsub.f32 %v2534_v20, %v1074_v10  ;;  %v1076_v11 = vsub.f32 %v2536_v63, %v1074_v10  ;;  %v1077_v12 = vsub.f32 %v2540_v1, %v1074_v10  ;;  %v1078_v15 = vsub.f32 %v2543_v2, %v1074_v10 }
 0x506   :  { %v1079_v13 = vmul.f32 %v1075_v59, %v1075_v59  ;;  %v1080_v14 = vmul.f32 %v1076_v11, %v1076_v11  ;;  %v1081_v18 = vmul.f32 %v1077_v12, %v1077_v12  ;;  %v1082_v19 = vmul.f32 %v1078_v15, %v1078_v15 }
 0x508   :  { %1779 = vmatprep.mubr.f32.mxu1 %v1079_v13 }
 0x509   :  { %1780 = vmatmul.mubr.f32.vlgmr.msra.gmra.mrb[12].mxu1 %v1080_v14 }
 0x50a   :  { %1782 = vmatprep.mubr.f32.mxu1 %v1081_v18 }
 0x50d   :  { %1783 = vmatmul.mubr.f32.gmra.mrb[14].mxu1 %v1082_v19 }
 0x5dc   :  { %v1781_v23 = vpop.f32.mrb[12].mxu1 }
 0x5dd   :  { %v1149_v24 = vpop.f32.mrb[13].mxu1 }
 0x5de   :  { %v1168_v25 = vadd.f32 %v1781_v23, %v1149_v24 }
 0x5e0   :  { %v1784_v26 = vpop.f32.mrb[14].mxu1 }
 0x5e1   :  { %v1159_v28 = vpop.f32.mrb[15].mxu1 }
 0x5e2   :  { %v1169_v29 = vadd.f32 %v1168_v25, %v1159_v28 }
 0x5e4   :  { %v1170_v30 = vadd.f32 %v1784_v26, %v1169_v29 }
 0x5e6   :  { %v1171_v32 = vrot.slane %v1170_v30, 4 }
 0x5e8   :  { %v1172_v33 = vadd.f32 %v1171_v32, %v1170_v30 }
 0x5ea   :  { %v1173_v34 = vrot.slane %v1172_v33, 2 }
 0x5ec   :  { %v1174_v35 = vadd.f32 %v1173_v34, %v1172_v33 }
 0x5ee   :  { %v1175_v36 = vrot.slane %v1174_v35, 1 }
 0x5f0   :  { %v1176_v37 = vadd.f32 %v1175_v36, %v1174_v35 }
 0x5f2   :  { %v1177_v40 = vmul.f32 0.001953125, %v1176_v37 }
 0x5f4   :  { %v1178_v41 = vadd.f32 1e-05, %v1177_v40 }
 0x5f6   :  { %2076 = vrsqrt.f32 %v1178_v41 }
 0x600   :  { %v2077_v44 = vpop.eup %2076 }
 0x601   :  { %v1180_v45 = vmul.f32 %v2077_v44, %v639_v43 }
 0x603   :  { %v1181_v48 = vmul.f32 %v1180_v45, %v1074_v10  ;;  %v1187_v49 = vrot.slane %v1180_v45, %v2429_v42 }
 0x605   :  { %v1182_v50 = vsub.f32 %v640_v46, %v1181_v48  ;;  %v1189_v51 = vmul.f32 %v1187_v49, %v2534_v20  ;;  %v1190_v52 = vmul.f32 %v1187_v49, %v2536_v63  ;;  %v1191_v54 = vmul.f32 %v1187_v49, %v2540_v1 }
 0x606   :  { %v1192_v55 = vmul.f32 %v1187_v49, %v2543_v2 }
 0x607   :  { %v1197_v56 = vrot.slane %v1182_v50, %v2429_v42 }
 0x609   :  { %v1199_v57 = vadd.f32 %v1197_v56, %v1189_v51  ;;  %v1200_v58 = vadd.f32 %v1197_v56, %v1190_v52  ;;  %v1201_v60 = vadd.f32 %v1197_v56, %v1191_v54  ;;  %v1202_v38 = vadd.f32 %v1197_v56, %v1192_v55 }
 0x60b   :  { %v1203_v16 = vmax.f32 %v1199_v57, 0.0  ;;  %v1204_v61 = vmax.f32 %v1200_v58, 0.0  ;;  %v1205_v17 = vmax.f32 %v1201_v60, 0.0  ;;  %v1206_v62 = vmax.f32 %v1202_v38, 0.0 }
 0x60d   :  { %1207 = vst [vmem:[%s2599_s10] sm:$0xff] %v1203_v16  ;;  %1208 = vst [vmem:[%s2599_s10 + $0x8] sm:$0xff] %v1204_v61 }
 0x60e   :  { %1209 = vst [vmem:[%s2599_s10 + $0x10] sm:$0xff] %v1205_v17  ;;  %1210 = vst [vmem:[%s2599_s10 + $0x18] sm:$0xff] %v1206_v62 }

</bundles_post_ra>
